<compile_context>
chip_gen: v7x
topology: tpu7x:2x2x1
jax: 0.10.0
libtpu: 0.0.40
codegen_flags: <defaults>
</compile_context>

<pallas_src>
import functools

import jax
import jax.numpy as jnp
from jax.experimental import pallas as pl
from jax.experimental.pallas import tpu as pltpu

_BN_EPS = 1e-5
_BN_SCALE = 1.0 / (1.0 + _BN_EPS) ** 0.5  # eval-mode BN with default params
_TM_MAX = 2048                            # lane tile for the big conv layers


def _round_up(x, m):
    return (x + m - 1) // m * m


# ---------------------------------------------------------------------------
# Pallas kernels
# ---------------------------------------------------------------------------
def _conv_pool_kernel(scale, w_ref, a_ref, b_ref, o_ref):
    """Fused layer: out = maxpool2x2(relu(conv(x) + b)) * bn_scale.

    grid = (m_tiles, 4).  Axis 1 runs over the four 2x2 pool offsets; the
    (Cout, tm) output block stays resident across it and accumulates a max.
    Bias / ReLU / BN scale are applied once in the last step (they commute
    with the max since bias is per-channel, ReLU is monotone, scale > 0).
    """
    d = pl.program_id(1)
    prod = jnp.dot(w_ref[...], a_ref[...], preferred_element_type=jnp.float32)

    @pl.when(d == 0)
    def _():
        o_ref[...] = prod.astype(o_ref.dtype)

    @pl.when(d > 0)
    def _():
        o_ref[...] = jnp.maximum(o_ref[...], prod.astype(o_ref.dtype))

    @pl.when(d == pl.num_programs(1) - 1)
    def _():
        acc = o_ref[...].astype(jnp.float32)
        o_ref[...] = (jnp.maximum(acc + b_ref[...], 0.0) * scale).astype(o_ref.dtype)


def _fc_kernel(x_ref, w1_ref, b1_ref, w2_ref, b2_ref, o_ref):
    """Fused fc1 -> (dropout_fc: identity) -> fc2, whole arrays in VMEM."""
    h = jnp.dot(x_ref[...], w1_ref[...], preferred_element_type=jnp.float32)
    h = h + b1_ref[...]
    # TODO(synk): dropout_fc (p=0.2) is identity in inference mode.
    o = jnp.dot(h.astype(jnp.bfloat16), w2_ref[...],
                preferred_element_type=jnp.float32)
    o_ref[...] = o + b2_ref[...]


# ---------------------------------------------------------------------------
# XLA glue: pool-grouped transposed im2col
# ---------------------------------------------------------------------------
def _im2col_pool_T(x, k):
    """x: (C, N, H, W) -> A^T grouped by 2x2 pool offset.

    Returns (a_t, (N, Hp, Wp)) where a_t has shape (4, C*k*k, N*Hp*Wp) and
    a_t[2*dh+dw, (c, di, dj), (n, hp, wp)] = x[c, n, 2*hp+dh+di, 2*wp+dw+dj].
    """
    C, N, H, W = x.shape
    Ho, Wo = H - k + 1, W - k + 1
    Hp, Wp = Ho // 2, Wo // 2
    groups = []
    for dh in range(2):
        for dw in range(2):
            pats = []
            for di in range(k):
                for dj in range(k):
                    r0, c0 = dh + di, dw + dj
                    pats.append(x[:, :,
                                  r0:r0 + 2 * (Hp - 1) + 1:2,
                                  c0:c0 + 2 * (Wp - 1) + 1:2])
            p = jnp.stack(pats, axis=1)                    # (C, k*k, N, Hp, Wp)
            groups.append(p.reshape(C * k * k, N * Hp * Wp))
    return jnp.stack(groups, axis=0), (N, Hp, Wp)          # (4, K, Mp)


# ---------------------------------------------------------------------------
# Layer wrappers
# ---------------------------------------------------------------------------
def conv_relu_bn_pool(x, w_t, b, k):
    """dropout(pool(bnorm(relu(conv(x))))) -- dropout is identity.

    x: (C_in, N, H, W) bf16.  Returns (C_out, N, Hp, Wp) bf16.
    """
    a_t, (N, Hp, Wp) = _im2col_pool_T(x, k)        # (4, K, Mp) bf16
    cout, K = w_t.shape
    Mp = N * Hp * Wp
    if Mp <= _TM_MAX:                               # one full-M block, no pad
        tm = Mp
        m_pad = Mp
    else:                                           # tile M, pad to multiple
        tm = _TM_MAX
        m_pad = _round_up(Mp, tm)
        a_t = jnp.pad(a_t, ((0, 0), (0, 0), (0, m_pad - Mp)))
    grid_m = m_pad // tm

    out = pl.pallas_call(
        functools.partial(_conv_pool_kernel, _BN_SCALE),
        out_shape=jax.ShapeDtypeStruct((cout, m_pad), jnp.bfloat16),
        grid_spec=pltpu.PrefetchScalarGridSpec(
            num_scalar_prefetch=0,
            grid=(grid_m, 4),
            in_specs=[
                pl.BlockSpec((cout, K), lambda i, d: (0, 0)),        # W^T
                pl.BlockSpec((None, K, tm), lambda i, d: (d, 0, i)),  # A^T slab
                pl.BlockSpec((cout, 1), lambda i, d: (0, 0)),        # bias
            ],
            out_specs=pl.BlockSpec((cout, tm), lambda i, d: (0, i)),
        ),
        compiler_params=pltpu.CompilerParams(
            dimension_semantics=("parallel", "arbitrary")),
    )(w_t.astype(jnp.bfloat16), a_t, b)

    if m_pad != Mp:
        out = out[:, :Mp]
    return out.reshape(cout, N, Hp, Wp)


def fc_forward(params, x):
    n = x.shape[0]
    dout = params["fc2_b"].shape[-1]
    return pl.pallas_call(
        _fc_kernel,
        out_shape=jax.ShapeDtypeStruct((n, dout), jnp.float32),
    )(x.astype(jnp.bfloat16),
      params["fc1_w"].astype(jnp.bfloat16), params["fc1_b"],
      params["fc2_w"].astype(jnp.bfloat16), params["fc2_b"])


# ---------------------------------------------------------------------------
# Model
# ---------------------------------------------------------------------------
def init_params(key):
    ch = [5, 10, 20, 40, 80]
    ks = [5, 5, 4, 4, 2]
    cin = [1] + ch[:-1]
    keys = iter(jax.random.split(key, 14))
    params = {}
    for idx in range(5):
        k, ci, co = ks[idx], cin[idx], ch[idx]
        # Stored pre-transposed as (Cout, Cin*k*k); a real PyTorch
        # (Cout, Cin, kh, kw) weight maps via .reshape(Cout, -1).
        # torch.nn.init.uniform_(weight, -0.1, 0.1)
        w_t = jax.random.uniform(next(keys), (co, ci * k * k),
                                 jnp.float32, -0.1, 0.1)
        fan_in = ci * k * k
        bound = 1.0 / fan_in ** 0.5
        b = jax.random.uniform(next(keys), (co, 1), jnp.float32, -bound, bound)
        params[f"conv{idx + 1}_wT"] = w_t
        params[f"conv{idx + 1}_b"] = b
    for name, (din, dout) in [("fc1", (80 * 5 * 5, 68 * 8)),
                              ("fc2", (68 * 8, 68 * 2))]:
        w = jax.random.uniform(next(keys), (din, dout), jnp.float32, -0.1, 0.1)
        bound = 1.0 / din ** 0.5
        b = jax.random.uniform(next(keys), (1, dout), jnp.float32, -bound, bound)
        params[f"{name}_w"] = w
        params[f"{name}_b"] = b
    return params


def net_forward(params, x_nchw):
    # NCHW (PyTorch) -> channel-major (C, N, H, W) kernel layout, bf16 operands.
    x = jnp.transpose(x_nchw, (1, 0, 2, 3)).astype(jnp.bfloat16)
    ks = [5, 5, 4, 4, 2]
    for i in range(5):
        x = conv_relu_bn_pool(x, params[f"conv{i + 1}_wT"],
                              params[f"conv{i + 1}_b"], ks[i])
    # PyTorch x.view(N, -1) flattens (C, H, W) per sample.
    C, N, Hp, Wp = x.shape
    flat = jnp.transpose(x, (1, 0, 2, 3)).reshape(N, C * Hp * Wp)
    return fc_forward(params, flat)


if __name__ == "__main__":
    key = jax.random.PRNGKey(0)
    k_params, k_x = jax.random.split(key)
    params = init_params(k_params)
    # The module's fc1 (80*5*5 inputs) forces a 224x224 single-channel input.
    x = jax.random.normal(k_x, (2, 1, 224, 224), jnp.float32)

    out = jax.jit(net_forward)(params, x)
    out = jax.block_until_ready(out)
    assert out.shape == (2, 68 * 2), out.shape
    assert out.dtype == jnp.float32
    print("KERNEL_OK")
</pallas_src>

<mosaic_0001>
module attributes {stable_mosaic.version = 11 : i64} {
  func.func @_conv_pool_kernel(%arg0: i32, %arg1: i32, %arg2: memref<5x25xbf16, #tpu.memory_space<vmem>>, %arg3: memref<1x25x2048xbf16, #tpu.memory_space<vmem>>, %arg4: memref<5x1xf32, #tpu.memory_space<vmem>>, %arg5: memref<5x2048xbf16, #tpu.memory_space<vmem>>) attributes {dimension_semantics = [#tpu.dimension_semantics<parallel>, #tpu.dimension_semantics<arbitrary>], iteration_bounds = array<i64: 12, 4>, scalar_prefetch = 0 : i64, scratch_operands = 0 : i64, tpu.core_type = #tpu.core_type<tc>, window_params = [{pipeline_mode = #tpu.pipeline_mode<synchronous>, transform_indices = @transform_0, window_bounds = array<i64: 5, 25>}, {transform_indices = @transform_1, window_bounds = array<i64: 1, 25, 2048>}, {pipeline_mode = #tpu.pipeline_mode<synchronous>, transform_indices = @transform_2, window_bounds = array<i64: 5, 1>}, {transform_indices = @transform_3, window_bounds = array<i64: 5, 2048>}]} {
    %c0 = arith.constant 0 : index
    %c0_0 = arith.constant 0 : index
    %0 = vector.load %arg2[%c0, %c0_0] : memref<5x25xbf16, #tpu.memory_space<vmem>>, vector<5x25xbf16>
    %c0_1 = arith.constant 0 : index
    %c0_2 = arith.constant 0 : index
    %c0_3 = arith.constant 0 : index
    %1 = vector.load %arg3[%c0_1, %c0_2, %c0_3] : memref<1x25x2048xbf16, #tpu.memory_space<vmem>>, vector<1x25x2048xbf16>
    %2 = vector.shape_cast %1 : vector<1x25x2048xbf16> to vector<25x2048xbf16>
    %cst = arith.constant dense<0.000000e+00> : vector<5x2048xf32>
    %3 = tpu.matmul %0, %2, %cst {dimension_numbers = #tpu.dot_dimension_numbers<[1], [0], [0], [1], [0, 0, 1, 1], [], []>} : vector<5x25xbf16>, vector<25x2048xbf16>, vector<5x2048xf32> -> vector<5x2048xf32>
    %c0_i32 = arith.constant 0 : i32
    %4 = arith.cmpi eq, %arg1, %c0_i32 : i32
    %5 = arith.extui %4 : i1 to i32
    %c0_i32_4 = arith.constant 0 : i32
    %6 = arith.cmpi ne, %5, %c0_i32_4 : i32
    scf.if %6 {
      %13 = arith.truncf %3 : vector<5x2048xf32> to vector<5x2048xbf16>
      %c0_8 = arith.constant 0 : index
      %c0_9 = arith.constant 0 : index
      %14 = vector.load %arg5[%c0_8, %c0_9] : memref<5x2048xbf16, #tpu.memory_space<vmem>>, vector<5x2048xbf16>
      tpu.vector_store %arg5[%c0_8, %c0_9], %13 {strides = array<i32>} : memref<5x2048xbf16, #tpu.memory_space<vmem>>, vector<5x2048xbf16>,
    } else {
    }
    %c0_i32_5 = arith.constant 0 : i32
    %7 = arith.cmpi sgt, %arg1, %c0_i32_5 : i32
    %8 = arith.extui %7 : i1 to i32
    %c0_i32_6 = arith.constant 0 : i32
    %9 = arith.cmpi ne, %8, %c0_i32_6 : i32
    scf.if %9 {
      %c0_8 = arith.constant 0 : index
      %c0_9 = arith.constant 0 : index
      %13 = vector.load %arg5[%c0_8, %c0_9] : memref<5x2048xbf16, #tpu.memory_space<vmem>>, vector<5x2048xbf16>
      %14 = arith.truncf %3 : vector<5x2048xf32> to vector<5x2048xbf16>
      %15 = arith.maximumf %13, %14 : vector<5x2048xbf16>
      %c0_10 = arith.constant 0 : index
      %c0_11 = arith.constant 0 : index
      %16 = vector.load %arg5[%c0_10, %c0_11] : memref<5x2048xbf16, #tpu.memory_space<vmem>>, vector<5x2048xbf16>
      tpu.vector_store %arg5[%c0_10, %c0_11], %15 {strides = array<i32>} : memref<5x2048xbf16, #tpu.memory_space<vmem>>, vector<5x2048xbf16>,
    } else {
    }
    %c3_i32 = arith.constant 3 : i32
    %10 = arith.cmpi eq, %arg1, %c3_i32 : i32
    %11 = arith.extui %10 : i1 to i32
    %c0_i32_7 = arith.constant 0 : i32
    %12 = arith.cmpi ne, %11, %c0_i32_7 : i32
    scf.if %12 {
      %c0_8 = arith.constant 0 : index
      %c0_9 = arith.constant 0 : index
      %13 = vector.load %arg5[%c0_8, %c0_9] : memref<5x2048xbf16, #tpu.memory_space<vmem>>, vector<5x2048xbf16>
      %14 = arith.extf %13 : vector<5x2048xbf16> to vector<5x2048xf32>
      %c0_10 = arith.constant 0 : index
      %c0_11 = arith.constant 0 : index
      %15 = vector.load %arg4[%c0_10, %c0_11] : memref<5x1xf32, #tpu.memory_space<vmem>>, vector<5x1xf32>
      %16 = vector.broadcast %15 : vector<5x1xf32> to vector<5x2048xf32>
      %17 = arith.addf %14, %16 : vector<5x2048xf32>
      %cst_12 = arith.constant 0.000000e+00 : f32
      %18 = vector.broadcast %cst_12 : f32 to vector<5x2048xf32>
      %19 = arith.maximumf %17, %18 : vector<5x2048xf32>
      %cst_13 = arith.constant 0.999994993 : f32
      %20 = vector.broadcast %cst_13 : f32 to vector<5x2048xf32>
      %21 = arith.mulf %19, %20 : vector<5x2048xf32>
      %22 = arith.truncf %21 : vector<5x2048xf32> to vector<5x2048xbf16>
      %c0_14 = arith.constant 0 : index
      %c0_15 = arith.constant 0 : index
      %23 = vector.load %arg5[%c0_14, %c0_15] : memref<5x2048xbf16, #tpu.memory_space<vmem>>, vector<5x2048xbf16>
      tpu.vector_store %arg5[%c0_14, %c0_15], %22 {strides = array<i32>} : memref<5x2048xbf16, #tpu.memory_space<vmem>>, vector<5x2048xbf16>,
    } else {
    }
    return
  }
  func.func @transform_0(%arg0: i32, %arg1: i32) -> (i32, i32) {
    %c0_i32 = arith.constant 0 : i32
    %c0_i32_0 = arith.constant 0 : i32
    %c0_i32_1 = arith.constant 0 : i32
    return %c0_i32, %c0_i32_0 : i32, i32
  }
  func.func @transform_1(%arg0: i32, %arg1: i32) -> (i32, i32, i32) {
    %c0_i32 = arith.constant 0 : i32
    %c0_i32_0 = arith.constant 0 : i32
    return %arg1, %c0_i32, %arg0 : i32, i32, i32
  }
  func.func @transform_2(%arg0: i32, %arg1: i32) -> (i32, i32) {
    %c0_i32 = arith.constant 0 : i32
    %c0_i32_0 = arith.constant 0 : i32
    %c0_i32_1 = arith.constant 0 : i32
    return %c0_i32, %c0_i32_0 : i32, i32
  }
  func.func @transform_3(%arg0: i32, %arg1: i32) -> (i32, i32) {
    %c0_i32 = arith.constant 0 : i32
    %c0_i32_0 = arith.constant 0 : i32
    return %c0_i32, %arg0 : i32, i32
  }
}

module attributes {stable_mosaic.version = 11 : i64} {
  func.func @_conv_pool_kernel(%arg0: i32, %arg1: i32, %arg2: memref<10x125xbf16, #tpu.memory_space<vmem>>, %arg3: memref<1x125x2048xbf16, #tpu.memory_space<vmem>>, %arg4: memref<10x1xf32, #tpu.memory_space<vmem>>, %arg5: memref<10x2048xbf16, #tpu.memory_space<vmem>>) attributes {dimension_semantics = [#tpu.dimension_semantics<parallel>, #tpu.dimension_semantics<arbitrary>], iteration_bounds = array<i64: 3, 4>, scalar_prefetch = 0 : i64, scratch_operands = 0 : i64, tpu.core_type = #tpu.core_type<tc>, window_params = [{pipeline_mode = #tpu.pipeline_mode<synchronous>, transform_indices = @transform_0, window_bounds = array<i64: 10, 125>}, {transform_indices = @transform_1, window_bounds = array<i64: 1, 125, 2048>}, {pipeline_mode = #tpu.pipeline_mode<synchronous>, transform_indices = @transform_2, window_bounds = array<i64: 10, 1>}, {transform_indices = @transform_3, window_bounds = array<i64: 10, 2048>}]} {
    %c0 = arith.constant 0 : index
    %c0_0 = arith.constant 0 : index
    %0 = vector.load %arg2[%c0, %c0_0] : memref<10x125xbf16, #tpu.memory_space<vmem>>, vector<10x125xbf16>
    %c0_1 = arith.constant 0 : index
    %c0_2 = arith.constant 0 : index
    %c0_3 = arith.constant 0 : index
    %1 = vector.load %arg3[%c0_1, %c0_2, %c0_3] : memref<1x125x2048xbf16, #tpu.memory_space<vmem>>, vector<1x125x2048xbf16>
    %2 = vector.shape_cast %1 : vector<1x125x2048xbf16> to vector<125x2048xbf16>
    %cst = arith.constant dense<0.000000e+00> : vector<10x2048xf32>
    %3 = tpu.matmul %0, %2, %cst {dimension_numbers = #tpu.dot_dimension_numbers<[1], [0], [0], [1], [0, 0, 1, 1], [], []>} : vector<10x125xbf16>, vector<125x2048xbf16>, vector<10x2048xf32> -> vector<10x2048xf32>
    %c0_i32 = arith.constant 0 : i32
    %4 = arith.cmpi eq, %arg1, %c0_i32 : i32
    %5 = arith.extui %4 : i1 to i32
    %c0_i32_4 = arith.constant 0 : i32
    %6 = arith.cmpi ne, %5, %c0_i32_4 : i32
    scf.if %6 {
      %13 = arith.truncf %3 : vector<10x2048xf32> to vector<10x2048xbf16>
      %c0_8 = arith.constant 0 : index
      %c0_9 = arith.constant 0 : index
      %14 = vector.load %arg5[%c0_8, %c0_9] : memref<10x2048xbf16, #tpu.memory_space<vmem>>, vector<10x2048xbf16>
      tpu.vector_store %arg5[%c0_8, %c0_9], %13 {strides = array<i32>} : memref<10x2048xbf16, #tpu.memory_space<vmem>>, vector<10x2048xbf16>,
    } else {
    }
    %c0_i32_5 = arith.constant 0 : i32
    %7 = arith.cmpi sgt, %arg1, %c0_i32_5 : i32
    %8 = arith.extui %7 : i1 to i32
    %c0_i32_6 = arith.constant 0 : i32
    %9 = arith.cmpi ne, %8, %c0_i32_6 : i32
    scf.if %9 {
      %c0_8 = arith.constant 0 : index
      %c0_9 = arith.constant 0 : index
      %13 = vector.load %arg5[%c0_8, %c0_9] : memref<10x2048xbf16, #tpu.memory_space<vmem>>, vector<10x2048xbf16>
      %14 = arith.truncf %3 : vector<10x2048xf32> to vector<10x2048xbf16>
      %15 = arith.maximumf %13, %14 : vector<10x2048xbf16>
      %c0_10 = arith.constant 0 : index
      %c0_11 = arith.constant 0 : index
      %16 = vector.load %arg5[%c0_10, %c0_11] : memref<10x2048xbf16, #tpu.memory_space<vmem>>, vector<10x2048xbf16>
      tpu.vector_store %arg5[%c0_10, %c0_11], %15 {strides = array<i32>} : memref<10x2048xbf16, #tpu.memory_space<vmem>>, vector<10x2048xbf16>,
    } else {
    }
    %c3_i32 = arith.constant 3 : i32
    %10 = arith.cmpi eq, %arg1, %c3_i32 : i32
    %11 = arith.extui %10 : i1 to i32
    %c0_i32_7 = arith.constant 0 : i32
    %12 = arith.cmpi ne, %11, %c0_i32_7 : i32
    scf.if %12 {
      %c0_8 = arith.constant 0 : index
      %c0_9 = arith.constant 0 : index
      %13 = vector.load %arg5[%c0_8, %c0_9] : memref<10x2048xbf16, #tpu.memory_space<vmem>>, vector<10x2048xbf16>
      %14 = arith.extf %13 : vector<10x2048xbf16> to vector<10x2048xf32>
      %c0_10 = arith.constant 0 : index
      %c0_11 = arith.constant 0 : index
      %15 = vector.load %arg4[%c0_10, %c0_11] : memref<10x1xf32, #tpu.memory_space<vmem>>, vector<10x1xf32>
      %16 = vector.broadcast %15 : vector<10x1xf32> to vector<10x2048xf32>
      %17 = arith.addf %14, %16 : vector<10x2048xf32>
      %cst_12 = arith.constant 0.000000e+00 : f32
      %18 = vector.broadcast %cst_12 : f32 to vector<10x2048xf32>
      %19 = arith.maximumf %17, %18 : vector<10x2048xf32>
      %cst_13 = arith.constant 0.999994993 : f32
      %20 = vector.broadcast %cst_13 : f32 to vector<10x2048xf32>
      %21 = arith.mulf %19, %20 : vector<10x2048xf32>
      %22 = arith.truncf %21 : vector<10x2048xf32> to vector<10x2048xbf16>
      %c0_14 = arith.constant 0 : index
      %c0_15 = arith.constant 0 : index
      %23 = vector.load %arg5[%c0_14, %c0_15] : memref<10x2048xbf16, #tpu.memory_space<vmem>>, vector<10x2048xbf16>
      tpu.vector_store %arg5[%c0_14, %c0_15], %22 {strides = array<i32>} : memref<10x2048xbf16, #tpu.memory_space<vmem>>, vector<10x2048xbf16>,
    } else {
    }
    return
  }
  func.func @transform_0(%arg0: i32, %arg1: i32) -> (i32, i32) {
    %c0_i32 = arith.constant 0 : i32
    %c0_i32_0 = arith.constant 0 : i32
    %c0_i32_1 = arith.constant 0 : i32
    return %c0_i32, %c0_i32_0 : i32, i32
  }
  func.func @transform_1(%arg0: i32, %arg1: i32) -> (i32, i32, i32) {
    %c0_i32 = arith.constant 0 : i32
    %c0_i32_0 = arith.constant 0 : i32
    return %arg1, %c0_i32, %arg0 : i32, i32, i32
  }
  func.func @transform_2(%arg0: i32, %arg1: i32) -> (i32, i32) {
    %c0_i32 = arith.constant 0 : i32
    %c0_i32_0 = arith.constant 0 : i32
    %c0_i32_1 = arith.constant 0 : i32
    return %c0_i32, %c0_i32_0 : i32, i32
  }
  func.func @transform_3(%arg0: i32, %arg1: i32) -> (i32, i32) {
    %c0_i32 = arith.constant 0 : i32
    %c0_i32_0 = arith.constant 0 : i32
    return %c0_i32, %arg0 : i32, i32
  }
}

module attributes {stable_mosaic.version = 11 : i64} {
  func.func @_conv_pool_kernel(%arg0: i32, %arg1: i32, %arg2: memref<20x160xbf16, #tpu.memory_space<vmem>>, %arg3: memref<1x160x1250xbf16, #tpu.memory_space<vmem>>, %arg4: memref<20x1xf32, #tpu.memory_space<vmem>>, %arg5: memref<20x1250xbf16, #tpu.memory_space<vmem>>) attributes {dimension_semantics = [#tpu.dimension_semantics<parallel>, #tpu.dimension_semantics<arbitrary>], iteration_bounds = array<i64: 1, 4>, scalar_prefetch = 0 : i64, scratch_operands = 0 : i64, tpu.core_type = #tpu.core_type<tc>, window_params = [{pipeline_mode = #tpu.pipeline_mode<synchronous>, transform_indices = @transform_0, window_bounds = array<i64: 20, 160>}, {transform_indices = @transform_1, window_bounds = array<i64: 1, 160, 1250>}, {pipeline_mode = #tpu.pipeline_mode<synchronous>, transform_indices = @transform_2, window_bounds = array<i64: 20, 1>}, {transform_indices = @transform_3, window_bounds = array<i64: 20, 1250>}]} {
    %c0 = arith.constant 0 : index
    %c0_0 = arith.constant 0 : index
    %0 = vector.load %arg2[%c0, %c0_0] : memref<20x160xbf16, #tpu.memory_space<vmem>>, vector<20x160xbf16>
    %c0_1 = arith.constant 0 : index
    %c0_2 = arith.constant 0 : index
    %c0_3 = arith.constant 0 : index
    %1 = vector.load %arg3[%c0_1, %c0_2, %c0_3] : memref<1x160x1250xbf16, #tpu.memory_space<vmem>>, vector<1x160x1250xbf16>
    %2 = vector.shape_cast %1 : vector<1x160x1250xbf16> to vector<160x1250xbf16>
    %cst = arith.constant dense<0.000000e+00> : vector<20x1250xf32>
    %3 = tpu.matmul %0, %2, %cst {dimension_numbers = #tpu.dot_dimension_numbers<[1], [0], [0], [1], [0, 0, 1, 1], [], []>} : vector<20x160xbf16>, vector<160x1250xbf16>, vector<20x1250xf32> -> vector<20x1250xf32>
    %c0_i32 = arith.constant 0 : i32
    %4 = arith.cmpi eq, %arg1, %c0_i32 : i32
    %5 = arith.extui %4 : i1 to i32
    %c0_i32_4 = arith.constant 0 : i32
    %6 = arith.cmpi ne, %5, %c0_i32_4 : i32
    scf.if %6 {
      %13 = arith.truncf %3 : vector<20x1250xf32> to vector<20x1250xbf16>
      %c0_8 = arith.constant 0 : index
      %c0_9 = arith.constant 0 : index
      %14 = vector.load %arg5[%c0_8, %c0_9] : memref<20x1250xbf16, #tpu.memory_space<vmem>>, vector<20x1250xbf16>
      tpu.vector_store %arg5[%c0_8, %c0_9], %13 {strides = array<i32>} : memref<20x1250xbf16, #tpu.memory_space<vmem>>, vector<20x1250xbf16>,
    } else {
    }
    %c0_i32_5 = arith.constant 0 : i32
    %7 = arith.cmpi sgt, %arg1, %c0_i32_5 : i32
    %8 = arith.extui %7 : i1 to i32
    %c0_i32_6 = arith.constant 0 : i32
    %9 = arith.cmpi ne, %8, %c0_i32_6 : i32
    scf.if %9 {
      %c0_8 = arith.constant 0 : index
      %c0_9 = arith.constant 0 : index
      %13 = vector.load %arg5[%c0_8, %c0_9] : memref<20x1250xbf16, #tpu.memory_space<vmem>>, vector<20x1250xbf16>
      %14 = arith.truncf %3 : vector<20x1250xf32> to vector<20x1250xbf16>
      %15 = arith.maximumf %13, %14 : vector<20x1250xbf16>
      %c0_10 = arith.constant 0 : index
      %c0_11 = arith.constant 0 : index
      %16 = vector.load %arg5[%c0_10, %c0_11] : memref<20x1250xbf16, #tpu.memory_space<vmem>>, vector<20x1250xbf16>
      tpu.vector_store %arg5[%c0_10, %c0_11], %15 {strides = array<i32>} : memref<20x1250xbf16, #tpu.memory_space<vmem>>, vector<20x1250xbf16>,
    } else {
    }
    %c3_i32 = arith.constant 3 : i32
    %10 = arith.cmpi eq, %arg1, %c3_i32 : i32
    %11 = arith.extui %10 : i1 to i32
    %c0_i32_7 = arith.constant 0 : i32
    %12 = arith.cmpi ne, %11, %c0_i32_7 : i32
    scf.if %12 {
      %c0_8 = arith.constant 0 : index
      %c0_9 = arith.constant 0 : index
      %13 = vector.load %arg5[%c0_8, %c0_9] : memref<20x1250xbf16, #tpu.memory_space<vmem>>, vector<20x1250xbf16>
      %14 = arith.extf %13 : vector<20x1250xbf16> to vector<20x1250xf32>
      %c0_10 = arith.constant 0 : index
      %c0_11 = arith.constant 0 : index
      %15 = vector.load %arg4[%c0_10, %c0_11] : memref<20x1xf32, #tpu.memory_space<vmem>>, vector<20x1xf32>
      %16 = vector.broadcast %15 : vector<20x1xf32> to vector<20x1250xf32>
      %17 = arith.addf %14, %16 : vector<20x1250xf32>
      %cst_12 = arith.constant 0.000000e+00 : f32
      %18 = vector.broadcast %cst_12 : f32 to vector<20x1250xf32>
      %19 = arith.maximumf %17, %18 : vector<20x1250xf32>
      %cst_13 = arith.constant 0.999994993 : f32
      %20 = vector.broadcast %cst_13 : f32 to vector<20x1250xf32>
      %21 = arith.mulf %19, %20 : vector<20x1250xf32>
      %22 = arith.truncf %21 : vector<20x1250xf32> to vector<20x1250xbf16>
      %c0_14 = arith.constant 0 : index
      %c0_15 = arith.constant 0 : index
      %23 = vector.load %arg5[%c0_14, %c0_15] : memref<20x1250xbf16, #tpu.memory_space<vmem>>, vector<20x1250xbf16>
      tpu.vector_store %arg5[%c0_14, %c0_15], %22 {strides = array<i32>} : memref<20x1250xbf16, #tpu.memory_space<vmem>>, vector<20x1250xbf16>,
    } else {
    }
    return
  }
  func.func @transform_0(%arg0: i32, %arg1: i32) -> (i32, i32) {
    %c0_i32 = arith.constant 0 : i32
    %c0_i32_0 = arith.constant 0 : i32
    %c0_i32_1 = arith.constant 0 : i32
    return %c0_i32, %c0_i32_0 : i32, i32
  }
  func.func @transform_1(%arg0: i32, %arg1: i32) -> (i32, i32, i32) {
    %c0_i32 = arith.constant 0 : i32
    %c0_i32_0 = arith.constant 0 : i32
    return %arg1, %c0_i32, %arg0 : i32, i32, i32
  }
  func.func @transform_2(%arg0: i32, %arg1: i32) -> (i32, i32) {
    %c0_i32 = arith.constant 0 : i32
    %c0_i32_0 = arith.constant 0 : i32
    %c0_i32_1 = arith.constant 0 : i32
    return %c0_i32, %c0_i32_0 : i32, i32
  }
  func.func @transform_3(%arg0: i32, %arg1: i32) -> (i32, i32) {
    %c0_i32 = arith.constant 0 : i32
    %c0_i32_0 = arith.constant 0 : i32
    return %c0_i32, %arg0 : i32, i32
  }
}

module attributes {stable_mosaic.version = 11 : i64} {
  func.func @_conv_pool_kernel(%arg0: i32, %arg1: i32, %arg2: memref<40x320xbf16, #tpu.memory_space<vmem>>, %arg3: memref<1x320x242xbf16, #tpu.memory_space<vmem>>, %arg4: memref<40x1xf32, #tpu.memory_space<vmem>>, %arg5: memref<40x242xbf16, #tpu.memory_space<vmem>>) attributes {dimension_semantics = [#tpu.dimension_semantics<parallel>, #tpu.dimension_semantics<arbitrary>], iteration_bounds = array<i64: 1, 4>, scalar_prefetch = 0 : i64, scratch_operands = 0 : i64, tpu.core_type = #tpu.core_type<tc>, window_params = [{pipeline_mode = #tpu.pipeline_mode<synchronous>, transform_indices = @transform_0, window_bounds = array<i64: 40, 320>}, {transform_indices = @transform_1, window_bounds = array<i64: 1, 320, 242>}, {pipeline_mode = #tpu.pipeline_mode<synchronous>, transform_indices = @transform_2, window_bounds = array<i64: 40, 1>}, {transform_indices = @transform_3, window_bounds = array<i64: 40, 242>}]} {
    %c0 = arith.constant 0 : index
    %c0_0 = arith.constant 0 : index
    %0 = vector.load %arg2[%c0, %c0_0] : memref<40x320xbf16, #tpu.memory_space<vmem>>, vector<40x320xbf16>
    %c0_1 = arith.constant 0 : index
    %c0_2 = arith.constant 0 : index
    %c0_3 = arith.constant 0 : index
    %1 = vector.load %arg3[%c0_1, %c0_2, %c0_3] : memref<1x320x242xbf16, #tpu.memory_space<vmem>>, vector<1x320x242xbf16>
    %2 = vector.shape_cast %1 : vector<1x320x242xbf16> to vector<320x242xbf16>
    %cst = arith.constant dense<0.000000e+00> : vector<40x242xf32>
    %3 = tpu.matmul %0, %2, %cst {dimension_numbers = #tpu.dot_dimension_numbers<[1], [0], [0], [1], [0, 0, 1, 1], [], []>} : vector<40x320xbf16>, vector<320x242xbf16>, vector<40x242xf32> -> vector<40x242xf32>
    %c0_i32 = arith.constant 0 : i32
    %4 = arith.cmpi eq, %arg1, %c0_i32 : i32
    %5 = arith.extui %4 : i1 to i32
    %c0_i32_4 = arith.constant 0 : i32
    %6 = arith.cmpi ne, %5, %c0_i32_4 : i32
    scf.if %6 {
      %13 = arith.truncf %3 : vector<40x242xf32> to vector<40x242xbf16>
      %c0_8 = arith.constant 0 : index
      %c0_9 = arith.constant 0 : index
      %14 = vector.load %arg5[%c0_8, %c0_9] : memref<40x242xbf16, #tpu.memory_space<vmem>>, vector<40x242xbf16>
      tpu.vector_store %arg5[%c0_8, %c0_9], %13 {strides = array<i32>} : memref<40x242xbf16, #tpu.memory_space<vmem>>, vector<40x242xbf16>,
    } else {
    }
    %c0_i32_5 = arith.constant 0 : i32
    %7 = arith.cmpi sgt, %arg1, %c0_i32_5 : i32
    %8 = arith.extui %7 : i1 to i32
    %c0_i32_6 = arith.constant 0 : i32
    %9 = arith.cmpi ne, %8, %c0_i32_6 : i32
    scf.if %9 {
      %c0_8 = arith.constant 0 : index
      %c0_9 = arith.constant 0 : index
      %13 = vector.load %arg5[%c0_8, %c0_9] : memref<40x242xbf16, #tpu.memory_space<vmem>>, vector<40x242xbf16>
      %14 = arith.truncf %3 : vector<40x242xf32> to vector<40x242xbf16>
      %15 = arith.maximumf %13, %14 : vector<40x242xbf16>
      %c0_10 = arith.constant 0 : index
      %c0_11 = arith.constant 0 : index
      %16 = vector.load %arg5[%c0_10, %c0_11] : memref<40x242xbf16, #tpu.memory_space<vmem>>, vector<40x242xbf16>
      tpu.vector_store %arg5[%c0_10, %c0_11], %15 {strides = array<i32>} : memref<40x242xbf16, #tpu.memory_space<vmem>>, vector<40x242xbf16>,
    } else {
    }
    %c3_i32 = arith.constant 3 : i32
    %10 = arith.cmpi eq, %arg1, %c3_i32 : i32
    %11 = arith.extui %10 : i1 to i32
    %c0_i32_7 = arith.constant 0 : i32
    %12 = arith.cmpi ne, %11, %c0_i32_7 : i32
    scf.if %12 {
      %c0_8 = arith.constant 0 : index
      %c0_9 = arith.constant 0 : index
      %13 = vector.load %arg5[%c0_8, %c0_9] : memref<40x242xbf16, #tpu.memory_space<vmem>>, vector<40x242xbf16>
      %14 = arith.extf %13 : vector<40x242xbf16> to vector<40x242xf32>
      %c0_10 = arith.constant 0 : index
      %c0_11 = arith.constant 0 : index
      %15 = vector.load %arg4[%c0_10, %c0_11] : memref<40x1xf32, #tpu.memory_space<vmem>>, vector<40x1xf32>
      %16 = vector.broadcast %15 : vector<40x1xf32> to vector<40x242xf32>
      %17 = arith.addf %14, %16 : vector<40x242xf32>
      %cst_12 = arith.constant 0.000000e+00 : f32
      %18 = vector.broadcast %cst_12 : f32 to vector<40x242xf32>
      %19 = arith.maximumf %17, %18 : vector<40x242xf32>
      %cst_13 = arith.constant 0.999994993 : f32
      %20 = vector.broadcast %cst_13 : f32 to vector<40x242xf32>
      %21 = arith.mulf %19, %20 : vector<40x242xf32>
      %22 = arith.truncf %21 : vector<40x242xf32> to vector<40x242xbf16>
      %c0_14 = arith.constant 0 : index
      %c0_15 = arith.constant 0 : index
      %23 = vector.load %arg5[%c0_14, %c0_15] : memref<40x242xbf16, #tpu.memory_space<vmem>>, vector<40x242xbf16>
      tpu.vector_store %arg5[%c0_14, %c0_15], %22 {strides = array<i32>} : memref<40x242xbf16, #tpu.memory_space<vmem>>, vector<40x242xbf16>,
    } else {
    }
    return
  }
  func.func @transform_0(%arg0: i32, %arg1: i32) -> (i32, i32) {
    %c0_i32 = arith.constant 0 : i32
    %c0_i32_0 = arith.constant 0 : i32
    %c0_i32_1 = arith.constant 0 : i32
    return %c0_i32, %c0_i32_0 : i32, i32
  }
  func.func @transform_1(%arg0: i32, %arg1: i32) -> (i32, i32, i32) {
    %c0_i32 = arith.constant 0 : i32
    %c0_i32_0 = arith.constant 0 : i32
    return %arg1, %c0_i32, %arg0 : i32, i32, i32
  }
  func.func @transform_2(%arg0: i32, %arg1: i32) -> (i32, i32) {
    %c0_i32 = arith.constant 0 : i32
    %c0_i32_0 = arith.constant 0 : i32
    %c0_i32_1 = arith.constant 0 : i32
    return %c0_i32, %c0_i32_0 : i32, i32
  }
  func.func @transform_3(%arg0: i32, %arg1: i32) -> (i32, i32) {
    %c0_i32 = arith.constant 0 : i32
    %c0_i32_0 = arith.constant 0 : i32
    return %c0_i32, %arg0 : i32, i32
  }
}

module attributes {stable_mosaic.version = 11 : i64} {
  func.func @_conv_pool_kernel(%arg0: i32, %arg1: i32, %arg2: memref<80x160xbf16, #tpu.memory_space<vmem>>, %arg3: memref<1x160x50xbf16, #tpu.memory_space<vmem>>, %arg4: memref<80x1xf32, #tpu.memory_space<vmem>>, %arg5: memref<80x50xbf16, #tpu.memory_space<vmem>>) attributes {dimension_semantics = [#tpu.dimension_semantics<parallel>, #tpu.dimension_semantics<arbitrary>], iteration_bounds = array<i64: 1, 4>, scalar_prefetch = 0 : i64, scratch_operands = 0 : i64, tpu.core_type = #tpu.core_type<tc>, window_params = [{pipeline_mode = #tpu.pipeline_mode<synchronous>, transform_indices = @transform_0, window_bounds = array<i64: 80, 160>}, {transform_indices = @transform_1, window_bounds = array<i64: 1, 160, 50>}, {pipeline_mode = #tpu.pipeline_mode<synchronous>, transform_indices = @transform_2, window_bounds = array<i64: 80, 1>}, {transform_indices = @transform_3, window_bounds = array<i64: 80, 50>}]} {
    %c0 = arith.constant 0 : index
    %c0_0 = arith.constant 0 : index
    %0 = vector.load %arg2[%c0, %c0_0] : memref<80x160xbf16, #tpu.memory_space<vmem>>, vector<80x160xbf16>
    %c0_1 = arith.constant 0 : index
    %c0_2 = arith.constant 0 : index
    %c0_3 = arith.constant 0 : index
    %1 = vector.load %arg3[%c0_1, %c0_2, %c0_3] : memref<1x160x50xbf16, #tpu.memory_space<vmem>>, vector<1x160x50xbf16>
    %2 = vector.shape_cast %1 : vector<1x160x50xbf16> to vector<160x50xbf16>
    %cst = arith.constant dense<0.000000e+00> : vector<80x50xf32>
    %3 = tpu.matmul %0, %2, %cst {dimension_numbers = #tpu.dot_dimension_numbers<[1], [0], [0], [1], [0, 0, 1, 1], [], []>} : vector<80x160xbf16>, vector<160x50xbf16>, vector<80x50xf32> -> vector<80x50xf32>
    %c0_i32 = arith.constant 0 : i32
    %4 = arith.cmpi eq, %arg1, %c0_i32 : i32
    %5 = arith.extui %4 : i1 to i32
    %c0_i32_4 = arith.constant 0 : i32
    %6 = arith.cmpi ne, %5, %c0_i32_4 : i32
    scf.if %6 {
      %13 = arith.truncf %3 : vector<80x50xf32> to vector<80x50xbf16>
      %c0_8 = arith.constant 0 : index
      %c0_9 = arith.constant 0 : index
      %14 = vector.load %arg5[%c0_8, %c0_9] : memref<80x50xbf16, #tpu.memory_space<vmem>>, vector<80x50xbf16>
      tpu.vector_store %arg5[%c0_8, %c0_9], %13 {strides = array<i32>} : memref<80x50xbf16, #tpu.memory_space<vmem>>, vector<80x50xbf16>,
    } else {
    }
    %c0_i32_5 = arith.constant 0 : i32
    %7 = arith.cmpi sgt, %arg1, %c0_i32_5 : i32
    %8 = arith.extui %7 : i1 to i32
    %c0_i32_6 = arith.constant 0 : i32
    %9 = arith.cmpi ne, %8, %c0_i32_6 : i32
    scf.if %9 {
      %c0_8 = arith.constant 0 : index
      %c0_9 = arith.constant 0 : index
      %13 = vector.load %arg5[%c0_8, %c0_9] : memref<80x50xbf16, #tpu.memory_space<vmem>>, vector<80x50xbf16>
      %14 = arith.truncf %3 : vector<80x50xf32> to vector<80x50xbf16>
      %15 = arith.maximumf %13, %14 : vector<80x50xbf16>
      %c0_10 = arith.constant 0 : index
      %c0_11 = arith.constant 0 : index
      %16 = vector.load %arg5[%c0_10, %c0_11] : memref<80x50xbf16, #tpu.memory_space<vmem>>, vector<80x50xbf16>
      tpu.vector_store %arg5[%c0_10, %c0_11], %15 {strides = array<i32>} : memref<80x50xbf16, #tpu.memory_space<vmem>>, vector<80x50xbf16>,
    } else {
    }
    %c3_i32 = arith.constant 3 : i32
    %10 = arith.cmpi eq, %arg1, %c3_i32 : i32
    %11 = arith.extui %10 : i1 to i32
    %c0_i32_7 = arith.constant 0 : i32
    %12 = arith.cmpi ne, %11, %c0_i32_7 : i32
    scf.if %12 {
      %c0_8 = arith.constant 0 : index
      %c0_9 = arith.constant 0 : index
      %13 = vector.load %arg5[%c0_8, %c0_9] : memref<80x50xbf16, #tpu.memory_space<vmem>>, vector<80x50xbf16>
      %14 = arith.extf %13 : vector<80x50xbf16> to vector<80x50xf32>
      %c0_10 = arith.constant 0 : index
      %c0_11 = arith.constant 0 : index
      %15 = vector.load %arg4[%c0_10, %c0_11] : memref<80x1xf32, #tpu.memory_space<vmem>>, vector<80x1xf32>
      %16 = vector.broadcast %15 : vector<80x1xf32> to vector<80x50xf32>
      %17 = arith.addf %14, %16 : vector<80x50xf32>
      %cst_12 = arith.constant 0.000000e+00 : f32
      %18 = vector.broadcast %cst_12 : f32 to vector<80x50xf32>
      %19 = arith.maximumf %17, %18 : vector<80x50xf32>
      %cst_13 = arith.constant 0.999994993 : f32
      %20 = vector.broadcast %cst_13 : f32 to vector<80x50xf32>
      %21 = arith.mulf %19, %20 : vector<80x50xf32>
      %22 = arith.truncf %21 : vector<80x50xf32> to vector<80x50xbf16>
      %c0_14 = arith.constant 0 : index
      %c0_15 = arith.constant 0 : index
      %23 = vector.load %arg5[%c0_14, %c0_15] : memref<80x50xbf16, #tpu.memory_space<vmem>>, vector<80x50xbf16>
      tpu.vector_store %arg5[%c0_14, %c0_15], %22 {strides = array<i32>} : memref<80x50xbf16, #tpu.memory_space<vmem>>, vector<80x50xbf16>,
    } else {
    }
    return
  }
  func.func @transform_0(%arg0: i32, %arg1: i32) -> (i32, i32) {
    %c0_i32 = arith.constant 0 : i32
    %c0_i32_0 = arith.constant 0 : i32
    %c0_i32_1 = arith.constant 0 : i32
    return %c0_i32, %c0_i32_0 : i32, i32
  }
  func.func @transform_1(%arg0: i32, %arg1: i32) -> (i32, i32, i32) {
    %c0_i32 = arith.constant 0 : i32
    %c0_i32_0 = arith.constant 0 : i32
    return %arg1, %c0_i32, %arg0 : i32, i32, i32
  }
  func.func @transform_2(%arg0: i32, %arg1: i32) -> (i32, i32) {
    %c0_i32 = arith.constant 0 : i32
    %c0_i32_0 = arith.constant 0 : i32
    %c0_i32_1 = arith.constant 0 : i32
    return %c0_i32, %c0_i32_0 : i32, i32
  }
  func.func @transform_3(%arg0: i32, %arg1: i32) -> (i32, i32) {
    %c0_i32 = arith.constant 0 : i32
    %c0_i32_0 = arith.constant 0 : i32
    return %c0_i32, %arg0 : i32, i32
  }
}

module attributes {stable_mosaic.version = 11 : i64} {
  func.func @_fc_kernel(%arg0: memref<2x2000xbf16, #tpu.memory_space<vmem>>, %arg1: memref<2000x544xbf16, #tpu.memory_space<vmem>>, %arg2: memref<1x544xf32, #tpu.memory_space<vmem>>, %arg3: memref<544x136xbf16, #tpu.memory_space<vmem>>, %arg4: memref<1x136xf32, #tpu.memory_space<vmem>>, %arg5: memref<2x136xf32, #tpu.memory_space<vmem>>) attributes {dimension_semantics = [], scalar_prefetch = 0 : i64, scratch_operands = 0 : i64, tpu.core_type = #tpu.core_type<tc>} {
    %c0 = arith.constant 0 : index
    %c0_0 = arith.constant 0 : index
    %0 = vector.load %arg0[%c0, %c0_0] : memref<2x2000xbf16, #tpu.memory_space<vmem>>, vector<2x2000xbf16>
    %c0_1 = arith.constant 0 : index
    %c0_2 = arith.constant 0 : index
    %1 = vector.load %arg1[%c0_1, %c0_2] : memref<2000x544xbf16, #tpu.memory_space<vmem>>, vector<2000x544xbf16>
    %cst = arith.constant dense<0.000000e+00> : vector<2x544xf32>
    %2 = tpu.matmul %0, %1, %cst {dimension_numbers = #tpu.dot_dimension_numbers<[1], [0], [0], [1], [0, 0, 1, 1], [], []>} : vector<2x2000xbf16>, vector<2000x544xbf16>, vector<2x544xf32> -> vector<2x544xf32>
    %c0_3 = arith.constant 0 : index
    %c0_4 = arith.constant 0 : index
    %3 = vector.load %arg2[%c0_3, %c0_4] : memref<1x544xf32, #tpu.memory_space<vmem>>, vector<1x544xf32>
    %4 = vector.broadcast %3 : vector<1x544xf32> to vector<2x544xf32>
    %5 = arith.addf %2, %4 : vector<2x544xf32>
    %6 = arith.truncf %5 : vector<2x544xf32> to vector<2x544xbf16>
    %c0_5 = arith.constant 0 : index
    %c0_6 = arith.constant 0 : index
    %7 = vector.load %arg3[%c0_5, %c0_6] : memref<544x136xbf16, #tpu.memory_space<vmem>>, vector<544x136xbf16>
    %cst_7 = arith.constant dense<0.000000e+00> : vector<2x136xf32>
    %8 = tpu.matmul %6, %7, %cst_7 {dimension_numbers = #tpu.dot_dimension_numbers<[1], [0], [0], [1], [0, 0, 1, 1], [], []>} : vector<2x544xbf16>, vector<544x136xbf16>, vector<2x136xf32> -> vector<2x136xf32>
    %c0_8 = arith.constant 0 : index
    %c0_9 = arith.constant 0 : index
    %9 = vector.load %arg4[%c0_8, %c0_9] : memref<1x136xf32, #tpu.memory_space<vmem>>, vector<1x136xf32>
    %10 = vector.broadcast %9 : vector<1x136xf32> to vector<2x136xf32>
    %11 = arith.addf %8, %10 : vector<2x136xf32>
    %c0_10 = arith.constant 0 : index
    %c0_11 = arith.constant 0 : index
    %12 = vector.load %arg5[%c0_10, %c0_11] : memref<2x136xf32, #tpu.memory_space<vmem>>, vector<2x136xf32>
    tpu.vector_store %arg5[%c0_10, %c0_11], %11 {strides = array<i32>} : memref<2x136xf32, #tpu.memory_space<vmem>>, vector<2x136xf32>,
    return
  }
}

</mosaic_0001>

<bundles_post_ra>
// kernel: net_forward.6
= control target key start
LH: loop header
LB: loop body
LE: loop exit
PB: predicated region body
PF: predicated region fallthrough
CT: control target
= control target key end

     0   :  { %s1543_s12 = smov 0   ;;  %s1545_s13 = smov 0   ;;  %s1976_s0 = inlined_call_operand.vmem [shape: bf16[5,25], index: 0, kind: input, shape index: {}]   ;;  %s1977_s1 = inlined_call_operand.vmem [shape: bf16[4,25,24576], index: 1, kind: input, shape index: {}]   ;;  %s1978_s2 = inlined_call_operand.vmem [shape: f32[5,1], index: 2, kind: input, shape index: {}]   ;;  %s1979_s3 = inlined_call_operand.vmem [shape: bf16[5,24576], index: 3, kind: output, shape index: {}]  }
   0x1   :  { %s1547_s14 = smov 0   ;;  %s1549_s15 = smov 0  }
   0x2   :  { %s1551_s16 = smov 0   ;;  %s1553_s17 = smov 0  }
   0x3   :  { %s1555_s18 = smov 0  }
   0x4 LB: > { %s22_s19 = sadd.s32 1, %s1510_s16  ;;  %s25_s20 = sadd.s32 1, %s1514_s17  ;;  %s1518_s18 = sphi %s1555_s18, %s13_s18   ;;  %s1514_s17 = sphi %s1553_s17, %s1993_s17   ;;  %s1510_s16 = sphi %s1551_s16, %s1992_s16   ;;  %s1506_s15 = sphi %s1549_s15, %s1991_s15   ;;  %s1502_s14 = sphi %s1547_s14, %s1990_s14   ;;  %s1498_s13 = sphi %s1545_s13, %s1989_s13   ;;  %s1494_s12 = sphi %s1543_s12, %s1988_s12  }
   0x5   : > { %p23_p0 = scmp.ge.s32.totalorder %s22_s19, 4  ;;  %p62_p1 = scmp.ne.s32.totalorder %s1498_s13, %s1494_s12 }
   0x6   : > { %p63_p2 = scmp.eq.s32.totalorder %s1518_s18, 0  ;;  %s55_s24 = sadd.s32 1, %s1498_s13 }
   0x7   : > { %s1995_s19 = smov (%p23_p0, %s22_s19), 0  ;;  %s1997_s20 = smov (!%p23_p0, %s25_s20), %s1514_s17 }
   0x8   : > { %p64_p3 = por %p63_p2, %p62_p1  ;;  %p27_p4 = scmp.ge.s32.totalorder %s1997_s20, 12 }
   0x9   : > { %s50_s21 = ssub.s32 %s1510_s16, %s1995_s19  ;;  %p1302_p6 = scmp.ge.s32.totalorder %s1518_s18, 48 }
   0xa   : > { %s1999_s20 = smov (%p27_p4, %s1997_s20), 0 }
   0xb   : > { %s51_s22 = ssub.s32 %s1514_s17, %s1999_s20  ;;  %141 = sbr.rel (%p1302_p6) target bundleno = 42 (0x2a), region = 24 }
   0xc   : > { %s52_s23 = sor.u32 %s51_s22, %s50_s21 }
   0xd   : > { %p53_p5 = scmp.eq.s32.totalorder %s52_s23, 0 }
   0xf   : > { %s1594_s25 = scalar_select %p53_p5, %s1498_s13, %s55_s24  }
  0x12   : > { %144 = sbr.rel (!%p64_p3) target bundleno = 42 (0x2a), region = 28  ;;  %s146_s26 = sand.u32 (%p64_p3), 1, %s1498_s13  }
  0x13   : > { %s1304_s27 = sshll.u32 (%p64_p3), %s1514_s17, 4  ;;  %s1303_s28 = sshll.u32 (%p64_p3), %s146_s26, 8 }
  0x14   : > { %s1403_s29 = smul.u32 (%p64_p3), 768, %s1510_s16  ;;  %s1608_s8 = scalar_lea.vmem (%p64_p3), [#allocation2], %s1303_s28 }
  0x16   : > { %s151_s30 = sadd.s32 (%p64_p3), %s1403_s29, %s1304_s27 }
  0x17   : > { %s1305_s4 = sshll.u32 (%p64_p3), %s151_s30, 2 }
  0x18   : > { %s1603_s7 = scalar_lea.vmem (%p64_p3), %s1977_s1, %s1305_s4 }
  0x19   : > { %v166_v0 = vld [vmem:[%s1603_s7] sm:$0xff]  ;;  %v168_v1 = vld [vmem:[%s1603_s7 + $0x8] sm:$0xff]  ;;  %v170_v2 = vld [vmem:[%s1603_s7 + $0x10] sm:$0xff] }
  0x1a   : > { %167 = vst [vmem:[%s1608_s8] sm:$0xff] %v166_v0  ;;  %169 = vst [vmem:[%s1608_s8 + $0x8] sm:$0xff] %v168_v1  ;;  %v172_v3 = vld [vmem:[%s1603_s7 + $0x18] sm:$0xff]  ;;  %v174_v4 = vld [vmem:[%s1603_s7 + $0x20] sm:$0xff] }
  0x1b   : > { %171 = vst [vmem:[%s1608_s8 + $0x10] sm:$0xff] %v170_v2  ;;  %v176_v5 = vld [vmem:[%s1603_s7 + $0x28] sm:$0xff]  ;;  %173 = vst [vmem:[%s1608_s8 + $0x18] sm:$0xff] %v172_v3  ;;  %v178_v6 = vld [vmem:[%s1603_s7 + $0x30] sm:$0xff] }
  0x1c   : > { %175 = vst [vmem:[%s1608_s8 + $0x20] sm:$0xff] %v174_v4  ;;  %177 = vst [vmem:[%s1608_s8 + $0x28] sm:$0xff] %v176_v5  ;;  %v180_v7 = vld [vmem:[%s1603_s7 + $0x38] sm:$0xff]  ;;  %v182_v8 = vld [vmem:[%s1603_s7 + $0x300] sm:$0xff] }
  0x1d   : > { %179 = vst [vmem:[%s1608_s8 + $0x30] sm:$0xff] %v178_v6  ;;  %181 = vst [vmem:[%s1608_s8 + $0x38] sm:$0xff] %v180_v7  ;;  %v184_v9 = vld [vmem:[%s1603_s7 + $0x308] sm:$0xff]  ;;  %v186_v10 = vld [vmem:[%s1603_s7 + $0x310] sm:$0xff] }
  0x1e   : > { %183 = vst [vmem:[%s1608_s8 + $0x40] sm:$0xff] %v182_v8  ;;  %v188_v11 = vld [vmem:[%s1603_s7 + $0x318] sm:$0xff]  ;;  %185 = vst [vmem:[%s1608_s8 + $0x48] sm:$0xff] %v184_v9  ;;  %v190_v12 = vld [vmem:[%s1603_s7 + $0x320] sm:$0xff] }
  0x1f   : > { %187 = vst [vmem:[%s1608_s8 + $0x50] sm:$0xff] %v186_v10  ;;  %189 = vst [vmem:[%s1608_s8 + $0x58] sm:$0xff] %v188_v11  ;;  %v192_v13 = vld [vmem:[%s1603_s7 + $0x328] sm:$0xff]  ;;  %v194_v14 = vld [vmem:[%s1603_s7 + $0x330] sm:$0xff] }
  0x20   : > { %191 = vst [vmem:[%s1608_s8 + $0x60] sm:$0xff] %v190_v12  ;;  %193 = vst [vmem:[%s1608_s8 + $0x68] sm:$0xff] %v192_v13  ;;  %v196_v15 = vld [vmem:[%s1603_s7 + $0x338] sm:$0xff]  ;;  %v198_v16 = vld [vmem:[%s1603_s7 + $0x600] sm:$0xff] }
  0x21   : > { %195 = vst [vmem:[%s1608_s8 + $0x70] sm:$0xff] %v194_v14  ;;  %v200_v17 = vld [vmem:[%s1603_s7 + $0x608] sm:$0xff]  ;;  %197 = vst [vmem:[%s1608_s8 + $0x78] sm:$0xff] %v196_v15  ;;  %v202_v18 = vld [vmem:[%s1603_s7 + $0x610] sm:$0xff] }
  0x22   : > { %199 = vst [vmem:[%s1608_s8 + $0x80] sm:$0xff] %v198_v16  ;;  %201 = vst [vmem:[%s1608_s8 + $0x88] sm:$0xff] %v200_v17  ;;  %v204_v19 = vld [vmem:[%s1603_s7 + $0x618] sm:$0xff]  ;;  %v206_v20 = vld [vmem:[%s1603_s7 + $0x620] sm:$0xff] }
  0x23   : > { %203 = vst [vmem:[%s1608_s8 + $0x90] sm:$0xff] %v202_v18  ;;  %205 = vst [vmem:[%s1608_s8 + $0x98] sm:$0xff] %v204_v19  ;;  %v208_v21 = vld [vmem:[%s1603_s7 + $0x628] sm:$0xff]  ;;  %v210_v22 = vld [vmem:[%s1603_s7 + $0x630] sm:$0xff] }
  0x24   : > { %207 = vst [vmem:[%s1608_s8 + $0xa0] sm:$0xff] %v206_v20  ;;  %v212_v23 = vld [vmem:[%s1603_s7 + $0x638] sm:$0xff]  ;;  %209 = vst [vmem:[%s1608_s8 + $0xa8] sm:$0xff] %v208_v21  ;;  %v214_v24 = vld [vmem:[%s1603_s7 + $0x900] sm:$0xff] }
  0x25   : > { %211 = vst [vmem:[%s1608_s8 + $0xb0] sm:$0xff] %v210_v22  ;;  %213 = vst [vmem:[%s1608_s8 + $0xb8] sm:$0xff] %v212_v23  ;;  %v216_v25 = vld [vmem:[%s1603_s7 + $0x908] sm:$0xff]  ;;  %v218_v26 = vld [vmem:[%s1603_s7 + $0x910] sm:$0xff] }
  0x26   : > { %215 = vst [vmem:[%s1608_s8 + $0xc0] sm:$0xff] %v214_v24  ;;  %217 = vst [vmem:[%s1608_s8 + $0xc8] sm:$0xff] %v216_v25  ;;  %v220_v27 = vld [vmem:[%s1603_s7 + $0x918] sm:$0xff]  ;;  %v222_v28 = vld [vmem:[%s1603_s7 + $0x920] sm:$0xff] }
  0x27   : > { %219 = vst [vmem:[%s1608_s8 + $0xd0] sm:$0xff] %v218_v26  ;;  %v224_v29 = vld [vmem:[%s1603_s7 + $0x928] sm:$0xff]  ;;  %221 = vst [vmem:[%s1608_s8 + $0xd8] sm:$0xff] %v220_v27  ;;  %v226_v30 = vld [vmem:[%s1603_s7 + $0x930] sm:$0xff] }
  0x28   : > { %223 = vst [vmem:[%s1608_s8 + $0xe0] sm:$0xff] %v222_v28  ;;  %225 = vst [vmem:[%s1608_s8 + $0xe8] sm:$0xff] %v224_v29  ;;  %v228_v31 = vld [vmem:[%s1603_s7 + $0x938] sm:$0xff] }
  0x29   : > { %227 = vst [vmem:[%s1608_s8 + $0xf0] sm:$0xff] %v226_v30  ;;  %229 = vst [vmem:[%s1608_s8 + $0xf8] sm:$0xff] %v228_v31 }
  0x2a PF: > { %p1306_p7 = scmp.ge.s32.totalorder %s1518_s18, 1  ;;  %p234_p8 = scmp.lt.s32.totalorder %s1518_s18, 49 }
  0x2c   : > { %p235_p9 = pnand %p1306_p7, %p234_p8 }
  0x2d   : > { %s241_s9 = sand.u32 (!%p235_p9), 1, %s1494_s12   ;;  %s1308_s10 = sshll.u32 (!%p235_p9), %s1506_s15, 4  ;;  %vm453_vm0 = vcmask (!%p235_p9), 1043456   ;;  %vm454_vm1 = vcmask (!%p235_p9), 1044480   ;;  %v1520_v32 = vmov (!%p235_p9), 65535   ;;  %v1521_v34 = vmov (!%p235_p9), 0  }
  0x2e   : > { %238 = sbr.rel (%p235_p9) target bundleno = 465 (0x1d1), region = 51  ;;  %s1307_s11 = sshll.u32 (!%p235_p9), %s241_s9, 8  ;;  %v455_v33 = vsel (!%p235_p9), %vm453_vm0, 4294967295, %v1520_v32  ;;  %537 = vmatprep.mubr.bf16.mxu0 (!%p235_p9), %v1521_v34  ;;  %578 = vmatprep.mubr.bf16.mxu1 (!%p235_p9), %v1521_v34  ;;  %v1710_v4 = vld [vmem:[%s1976_s0] sm:$0x7] (!%p235_p9)  ;;  %vm449_vm2 = vcmask (!%p235_p9), 203776  }
  0x2f   : > { %p266_p10 = scmp.lt.s32.totalorder (!%p235_p9), %s1308_s10, 191  ;;  %s1677_s21 = scalar_lea.vmem (!%p235_p9), [#allocation2], %s1307_s11  ;;  %v1686_v43 = vsel (!%p235_p9), %vm454_vm1, %v455_v33, 0 }
  0x30   : > { %v273_v35 = vld [vmem:[%s1677_s21] sm:$0xff] (!%p235_p9)  ;;  %v274_v37 = vld [vmem:[%s1677_s21 + $0x8] sm:$0xff] (!%p235_p9)  ;;  %v275_v50 = vld [vmem:[%s1677_s21 + $0x10] sm:$0xff] (!%p235_p9)  ;;  %p1350_p11 = scmp.ne.s32.totalorder (!%p235_p9), %s1502_s14, 0 }
  0x31   : > { %v281_v36 = vld [vmem:[%s1677_s21 + $0x40] sm:$0xff] (!%p235_p9)  ;;  %v282_v39 = vld [vmem:[%s1677_s21 + $0x48] sm:$0xff] (!%p235_p9)  ;;  %v283_v53 = vld [vmem:[%s1677_s21 + $0x50] sm:$0xff] (!%p235_p9) }
  0x32   : > { %v1311_v38 = vcombine.high (!%p235_p9), %v273_v35, %v281_v36  ;;  %v1310_v40 = vcombine.low (!%p235_p9), %v273_v35, %v281_v36  ;;  %v289_v41 = vld [vmem:[%s1677_s21 + $0x80] sm:$0xff] (!%p235_p9)  ;;  %v1313_v44 = vcombine.high (!%p235_p9), %v274_v37, %v282_v39  ;;  %v1312_v45 = vcombine.low (!%p235_p9), %v274_v37, %v282_v39  ;;  %v290_v47 = vld [vmem:[%s1677_s21 + $0x88] sm:$0xff] (!%p235_p9)  ;;  %v276_v54 = vld [vmem:[%s1677_s21 + $0x18] sm:$0xff] (!%p235_p9) }
  0x33   : > { %v297_v42 = vld [vmem:[%s1677_s21 + $0xc0] sm:$0x11] (!%p235_p9)  ;;  %v298_v48 = vld [vmem:[%s1677_s21 + $0xc8] sm:$0x11] (!%p235_p9)  ;;  %v284_v55 = vld [vmem:[%s1677_s21 + $0x58] sm:$0xff] (!%p235_p9)  ;;  %v1315_v63 = vcombine.high (!%p235_p9), %v275_v50, %v283_v53  ;;  %v1314_v5 = vcombine.low (!%p235_p9), %v275_v50, %v283_v53 }
  0x34   : > { %v1327_v46 = vcombine.high (!%p235_p9), %v289_v41, %v297_v42  ;;  %v1326_v49 = vcombine.low (!%p235_p9), %v289_v41, %v297_v42  ;;  %505 = vmatprep.subr.bf16.mxu0 (!%p235_p9), %v1311_v38  ;;  %v1329_v51 = vcombine.high (!%p235_p9), %v290_v47, %v298_v48  ;;  %v1328_v52 = vcombine.low (!%p235_p9), %v290_v47, %v298_v48  ;;  %v291_v58 = vld [vmem:[%s1677_s21 + $0x90] sm:$0xff] (!%p235_p9)  ;;  %v292_v60 = vld [vmem:[%s1677_s21 + $0x98] sm:$0xff] (!%p235_p9)  ;;  %v277_v10 = vld [vmem:[%s1677_s21 + $0x20] sm:$0xff] (!%p235_p9) }
  0x35   : > { %s2001_s10 = smov (!%p266_p10, %s1308_s10), 191  ;;  %546 = vmatprep.subr.bf16.mxu1 %v1313_v44  ;;  %506 = vmatpush1.bf16.msra.mxu0 %v1310_v40  ;;  %v299_v59 = vld [vmem:[%s1677_s21 + $0xd0] sm:$0x11]  ;;  %v300_v0 = vld [vmem:[%s1677_s21 + $0xd8] sm:$0x11]  ;;  %v1317_v1 = vcombine.high %v276_v54, %v284_v55  ;;  %v1316_v7 = vcombine.low %v276_v54, %v284_v55  ;;  %v285_v11 = vld [vmem:[%s1677_s21 + $0x60] sm:$0xff] }
  0x36   : > { %s1309_s12 = sshll.u32 %s2001_s10, 2  ;;  %v461_v56 = vand.u32 %v1327_v46, %v1686_v43  ;;  %v458_v57 = vand.u32 %v1326_v49, %v1686_v43  ;;  %547 = vmatpush1.bf16.msra.mxu1 %v1312_v45  ;;  %v467_v61 = vand.u32 %v1329_v51, %v1686_v43  ;;  %v464_v62 = vand.u32 %v1328_v52, %v1686_v43  ;;  %v278_v13 = vld [vmem:[%s1677_s21 + $0x28] sm:$0xff]  ;;  %v293_v14 = vld [vmem:[%s1677_s21 + $0xa0] sm:$0xff]  ;;  %v279_v30 = vld [vmem:[%s1677_s21 + $0x30] sm:$0xff] }
  0x37   : > { %s1694_s23 = scalar_lea.vmem %s1979_s3, %s1309_s12  ;;  %v1331_v2 = vcombine.high %v291_v58, %v299_v59  ;;  %v1333_v3 = vcombine.high %v292_v60, %v300_v0  ;;  %v1330_v6 = vcombine.low %v291_v58, %v299_v59  ;;  %v1332_v9 = vcombine.low %v292_v60, %v300_v0  ;;  %v301_v15 = vld [vmem:[%s1677_s21 + $0xe0] sm:$0x11]  ;;  %v286_v16 = vld [vmem:[%s1677_s21 + $0x68] sm:$0xff]  ;;  %v287_v31 = vld [vmem:[%s1677_s21 + $0x70] sm:$0xff] }
  0x38   : > { %507 = vmatprep.subr.bf16.mxu0 %v461_v56  ;;  %548 = vmatprep.subr.bf16.mxu1 %v467_v61  ;;  %v294_v17 = vld [vmem:[%s1677_s21 + $0xa8] sm:$0xff]  ;;  %v1319_v21 = vcombine.high %v277_v10, %v285_v11  ;;  %v1335_v22 = vcombine.high %v293_v14, %v301_v15  ;;  %v1321_v23 = vcombine.high %v278_v13, %v286_v16  ;;  %v280_v33 = vld [vmem:[%s1677_s21 + $0x38] sm:$0xff]  ;;  %v295_v35 = vld [vmem:[%s1677_s21 + $0xb0] sm:$0xff]  ;;  %vm901_vm3 = vcmask (!%p1350_p11), 1042432  }
  0x39   : > { %508 = vmatpush1.bf16.msra.mxu0 %v458_v57  ;;  %v473_v8 = vand.u32 %v1331_v2, %v1686_v43  ;;  %v479_v12 = vand.u32 %v1333_v3, %v1686_v43  ;;  %v302_v18 = vld [vmem:[%s1677_s21 + $0xe8] sm:$0x11]  ;;  %v470_v19 = vand.u32 %v1330_v6, %v1686_v43  ;;  %v476_v20 = vand.u32 %v1332_v9, %v1686_v43  ;;  %v303_v36 = vld [vmem:[%s1677_s21 + $0xf0] sm:$0x11]  ;;  %v288_v37 = vld [vmem:[%s1677_s21 + $0x78] sm:$0xff] }
  0x3a   : > { %549 = vmatpush1.bf16.msra.mxu1 %v464_v62  ;;  %587 = vmatprep.subr.bf16.mxu0 %v1315_v63  ;;  %v1337_v24 = vcombine.high %v294_v17, %v302_v18  ;;  %v1318_v25 = vcombine.low %v277_v10, %v285_v11  ;;  %v1334_v26 = vcombine.low %v293_v14, %v301_v15  ;;  %v296_v38 = vld [vmem:[%s1677_s21 + $0xb8] sm:$0xff]  ;;  %vm902_vm4 = vsmask.f32 (!%p1350_p11), 2304 }
  0x3b   : > { %628 = vmatprep.subr.bf16.mxu1 %v1317_v1  ;;  %v1320_v27 = vcombine.low %v278_v13, %v286_v16  ;;  %v485_v28 = vand.u32 %v1335_v22, %v1686_v43  ;;  %v1336_v29 = vcombine.low %v294_v17, %v302_v18  ;;  %v304_v39 = vld [vmem:[%s1677_s21 + $0xf8] sm:$0x11]  ;;  %v1323_v42 = vcombine.high %v279_v30, %v287_v31  ;;  %v908_v22 = vld [vmem:[%s1694_s23] sm:$0x77] (!%p1350_p11)  ;;  %vm903_vm6 = vmand (!%p1350_p11), %vm901_vm3, %vm902_vm4 }
  0x3c   : > { %1342 = vmatmul.mubr.msk.bf16.vlgmr.msra.gmra.mrb[0].mxu0 %vm449_vm2, %v1710_v4  ;;  %v491_v32 = vand.u32 %v1337_v24, %v1686_v43  ;;  %v482_v40 = vand.u32 %v1334_v26, %v1686_v43  ;;  %v1339_v44 = vcombine.high %v295_v35, %v303_v36  ;;  %v1325_v45 = vcombine.high %v280_v33, %v288_v37  ;;  %v911_v24 = vld [vmem:[%s1694_s23 + $0x8] sm:$0x77] (!%p1350_p11)  ;;  %v914_v26 = vld [vmem:[%s1694_s23 + $0x10] sm:$0x77] (!%p1350_p11) }
  0x3d   : > { %1343 = vmatmul.mubr.msk.bf16.vlgmr.msra.gmra.mrb[0].mxu1 %vm449_vm2, %v1710_v4  ;;  %588 = vmatpush1.bf16.msra.mxu0 %v1314_v5  ;;  %v488_v41 = vand.u32 %v1336_v29, %v1686_v43  ;;  %v1341_v46 = vcombine.high %v296_v38, %v304_v39  ;;  %v1322_v47 = vcombine.low %v279_v30, %v287_v31  ;;  %vm904_vm5 = vcmask (!%p1350_p11), 1046532   ;;  %v920_v30 = vld [vmem:[%s1694_s23 + $0x20] sm:$0x77] (!%p1350_p11) }
  0x3e   : > { %629 = vmatpush1.bf16.msra.mxu1 %v1316_v7  ;;  %589 = vmatprep.subr.bf16.mxu0 %v473_v8  ;;  %v1338_v48 = vcombine.low %v295_v35, %v303_v36  ;;  %v1324_v49 = vcombine.low %v280_v33, %v288_v37  ;;  %v497_v50 = vand.u32 %v1339_v44, %v1686_v43  ;;  %vm905_vm7 = vsmask.f32 (!%p1350_p11), 6400  ;;  %v923_v35 = vld [vmem:[%s1694_s23 + $0x28] sm:$0x77] (!%p1350_p11)  ;;  %v926_v36 = vld [vmem:[%s1694_s23 + $0x30] sm:$0x77] (!%p1350_p11) }
  0x3f   : > { %630 = vmatprep.subr.bf16.mxu1 %v479_v12  ;;  %619 = vmatprep.mubr.bf16.mxu0 %v1521_v34  ;;  %v1340_v51 = vcombine.low %v296_v38, %v304_v39  ;;  %v503_v52 = vand.u32 %v1341_v46, %v1686_v43  ;;  %vm906_vm8 = vmand (!%p1350_p11), %vm904_vm5, %vm905_vm7 }
  0x40   : > { %660 = vmatprep.mubr.bf16.mxu1 %v1521_v34  ;;  %v494_v53 = vand.u32 %v1338_v48, %v1686_v43  ;;  %vm907_vm9 = vmor (!%p1350_p11), %vm906_vm8, %vm903_vm6 }
  0x41   : > { %590 = vmatpush1.bf16.msra.mxu0 %v470_v19  ;;  %v500_v54 = vand.u32 %v1340_v51, %v1686_v43 }
  0x42   : > { %631 = vmatpush1.bf16.msra.mxu1 %v476_v20  ;;  %669 = vmatprep.subr.bf16.mxu0 %v1319_v21 }
  0x43   : > { %710 = vmatprep.subr.bf16.mxu1 %v1321_v23 }
  0x44   : > { %1344 = vmatmul.mubr.msk.bf16.vlgmr.msra.gmra.mrb[4].mxu0 %vm449_vm2, %v1710_v4 }
  0x45   : > { %1345 = vmatmul.mubr.msk.bf16.vlgmr.msra.gmra.mrb[4].mxu1 %vm449_vm2, %v1710_v4  ;;  %670 = vmatpush1.bf16.msra.mxu0 %v1318_v25 }
  0x46   : > { %711 = vmatpush1.bf16.msra.mxu1 %v1320_v27  ;;  %671 = vmatprep.subr.bf16.mxu0 %v485_v28  ;;  %v917_v28 = vld [vmem:[%s1694_s23 + $0x18] sm:$0x77] (!%p1350_p11) }
  0x47   : > { %712 = vmatprep.subr.bf16.mxu1 %v491_v32  ;;  %701 = vmatprep.mubr.bf16.mxu0 %v1521_v34 }
  0x48   : > { %742 = vmatprep.mubr.bf16.mxu1 %v1521_v34 }
  0x49   : > { %672 = vmatpush1.bf16.msra.mxu0 %v482_v40 }
  0x4a   : > { %713 = vmatpush1.bf16.msra.mxu1 %v488_v41  ;;  %751 = vmatprep.subr.bf16.mxu0 %v1323_v42  ;;  %v929_v41 = vld [vmem:[%s1694_s23 + $0x38] sm:$0x77] (!%p1350_p11) }
  0x4b   : > { %792 = vmatprep.subr.bf16.mxu1 %v1325_v45 }
  0x4c   : > { %1346 = vmatmul.mubr.msk.bf16.vlgmr.msra.gmra.mrb[8].mxu0 %vm449_vm2, %v1710_v4 }
  0x4d   : > { %1347 = vmatmul.mubr.msk.bf16.vlgmr.msra.gmra.mrb[8].mxu1 %vm449_vm2, %v1710_v4  ;;  %752 = vmatpush1.bf16.msra.mxu0 %v1322_v47 }
  0x4e   : > { %793 = vmatpush1.bf16.msra.mxu1 %v1324_v49  ;;  %753 = vmatprep.subr.bf16.mxu0 %v497_v50 }
  0x4f   : > { %794 = vmatprep.subr.bf16.mxu1 %v503_v52  ;;  %783 = vmatprep.mubr.bf16.mxu0 %v1521_v34 }
  0x50   : > { %824 = vmatprep.mubr.bf16.mxu1 %v1521_v34 }
  0x51   : > { %754 = vmatpush1.bf16.msra.mxu0 %v494_v53 }
  0x52   : > { %795 = vmatpush1.bf16.msra.mxu1 %v500_v54 }
  0x54   : > { %1348 = vmatmul.mubr.msk.bf16.vlgmr.msra.gmra.mrb[12].mxu0 %vm449_vm2, %v1710_v4 }
  0x55   : > { %1349 = vmatmul.mubr.msk.bf16.vlgmr.msra.gmra.mrb[12].mxu1 %vm449_vm2, %v1710_v4 }
 0x10f   : > { %v1762_v55 = vpop.f32.mrb[0].mxu0 }
 0x110   : > { %v1764_v56 = vpop.f32.mrb[0].mxu1  ;;  %v1766_v57 = vpop.f32.mrb[1].mxu0 }
 0x111   : > { %v1768_v43 = vpop.f32.mrb[1].mxu1  ;;  %v543_v58 = vpop.f32.mrb[2].mxu0  ;;  %v1379_v21 = vpack.c.bf16 (!%p1350_p11), %v1766_v57, %v1762_v55 }
 0x112   : > { %v584_v59 = vpop.f32.mrb[2].mxu1  ;;  %v544_v60 = vpop.f32.mrb[3].mxu0  ;;  %v1380_v23 = vpack.c.bf16 (!%p1350_p11), %v1768_v43, %v1764_v56 }
 0x113   : > { %v585_v34 = vpop.f32.mrb[3].mxu1  ;;  %v909_v37 = vsel (!%p1350_p11), %vm907_vm9, %v1379_v21, %v908_v22 }
 0x114   : > { %v912_v38 = vsel (!%p1350_p11), %vm907_vm9, %v1380_v23, %v911_v24  ;;  %910 = vst [vmem:[%s1694_s23] sm:$0x77] (!%p1350_p11), %v909_v37 }
 0x115   : > { %913 = vst [vmem:[%s1694_s23 + $0x8] sm:$0x77] (!%p1350_p11), %v912_v38 }
 0x117   : > { %v1770_v61 = vpop.f32.mrb[4].mxu0 }
 0x118   : > { %v1772_v62 = vpop.f32.mrb[4].mxu1  ;;  %v1774_v63 = vpop.f32.mrb[5].mxu0 }
 0x119   : > { %v1776_v0 = vpop.f32.mrb[5].mxu1  ;;  %v625_v1 = vpop.f32.mrb[6].mxu0  ;;  %v1381_v25 = vpack.c.bf16 (!%p1350_p11), %v1774_v63, %v1770_v61 }
 0x11a   : > { %v666_v2 = vpop.f32.mrb[6].mxu1  ;;  %v626_v3 = vpop.f32.mrb[7].mxu0  ;;  %v1382_v27 = vpack.c.bf16 (!%p1350_p11), %v1776_v0, %v1772_v62 }
 0x11b   : > { %v667_v4 = vpop.f32.mrb[7].mxu1  ;;  %v915_v39 = vsel (!%p1350_p11), %vm907_vm9, %v1381_v25, %v914_v26 }
 0x11c   : > { %v918_v40 = vsel (!%p1350_p11), %vm907_vm9, %v1382_v27, %v917_v28  ;;  %916 = vst [vmem:[%s1694_s23 + $0x10] sm:$0x77] (!%p1350_p11), %v915_v39 }
 0x11d   : > { %919 = vst [vmem:[%s1694_s23 + $0x18] sm:$0x77] (!%p1350_p11), %v918_v40 }
 0x11f   : > { %v1778_v5 = vpop.f32.mrb[8].mxu0 }
 0x120   : > { %v1780_v6 = vpop.f32.mrb[8].mxu1  ;;  %v1782_v7 = vpop.f32.mrb[9].mxu0 }
 0x121   : > { %v1784_v8 = vpop.f32.mrb[9].mxu1  ;;  %v707_v9 = vpop.f32.mrb[10].mxu0  ;;  %v1383_v29 = vpack.c.bf16 (!%p1350_p11), %v1782_v7, %v1778_v5 }
 0x122   : > { %v748_v10 = vpop.f32.mrb[10].mxu1  ;;  %v708_v11 = vpop.f32.mrb[11].mxu0  ;;  %v1384_v31 = vpack.c.bf16 (!%p1350_p11), %v1784_v8, %v1780_v6 }
 0x123   : > { %v749_v12 = vpop.f32.mrb[11].mxu1  ;;  %v921_v42 = vsel (!%p1350_p11), %vm907_vm9, %v1383_v29, %v920_v30 }
 0x124   : > { %v924_v44 = vsel (!%p1350_p11), %vm907_vm9, %v1384_v31, %v923_v35  ;;  %922 = vst [vmem:[%s1694_s23 + $0x20] sm:$0x77] (!%p1350_p11), %v921_v42 }
 0x125   : > { %836 = sbr.rel (%p1350_p11) target bundleno = 302 (0x12e), region = 59  ;;  %925 = vst [vmem:[%s1694_s23 + $0x28] sm:$0x77] (!%p1350_p11), %v924_v44 }
 0x127   : > { %v1786_v13 = vpop.f32.mrb[12].mxu0 }
 0x128   : > { %v1788_v14 = vpop.f32.mrb[12].mxu1  ;;  %v1790_v15 = vpop.f32.mrb[13].mxu0 }
 0x129   : > { %v1792_v16 = vpop.f32.mrb[13].mxu1  ;;  %v789_v17 = vpop.f32.mrb[14].mxu0  ;;  %v1385_v32 = vpack.c.bf16 (!%p1350_p11), %v1790_v15, %v1786_v13 }
 0x12a   : > { %v830_v18 = vpop.f32.mrb[14].mxu1  ;;  %v790_v19 = vpop.f32.mrb[15].mxu0  ;;  %v1386_v33 = vpack.c.bf16 (!%p1350_p11), %v1792_v16, %v1788_v14 }
 0x12b   : > { %v831_v20 = vpop.f32.mrb[15].mxu1  ;;  %v927_v45 = vsel (!%p1350_p11), %vm907_vm9, %v1385_v32, %v926_v36 }
 0x12c   : > { %v930_v46 = vsel %vm907_vm9, %v1386_v33, %v929_v41  ;;  %928 = vst [vmem:[%s1694_s23 + $0x30] sm:$0x77] %v927_v45 }
 0x12d   : > { %931 = vst [vmem:[%s1694_s23 + $0x38] sm:$0x77] %v930_v46 }
 0x12e PF: > { %p1359_p12 = scmp.le.s32.totalorder %s1502_s14, 0 }
 0x12f   : > { %v936_v47 = vld [vmem:[%s1694_s23] sm:$0x77] (!%p1359_p12)  ;;  %v1387_v48 = vpack.c.bf16 (!%p1359_p12), %v1766_v57, %v1762_v55  ;;  %vm1016_vm10 = vcmask (!%p1359_p12), 1042432   ;;  %vm1017_vm11 = vsmask.f32 (!%p1359_p12), 2304  ;;  %vm1019_vm12 = vcmask (!%p1359_p12), 1046532  }
 0x130   : > { %935 = sbr.rel (%p1359_p12) target bundleno = 315 (0x13b), region = 63  ;;  %vm1018_vm13 = vmand (!%p1359_p12), %vm1016_vm10, %vm1017_vm11  ;;  %vm1020_vm14 = vsmask.f32 (!%p1359_p12), 6400  ;;  %v937_v49 = vld [vmem:[%s1694_s23 + $0x8] sm:$0x77] (!%p1359_p12)  ;;  %v1388_v50 = vpack.c.bf16 (!%p1359_p12), %v1768_v43, %v1764_v56  ;;  %v1389_v52 = vpack.c.bf16 (!%p1359_p12), %v1774_v63, %v1770_v61  ;;  %v1390_v53 = vpack.c.bf16 (!%p1359_p12), %v1776_v0, %v1772_v62 }
 0x131   : > { %v1025_v51 = vld [vmem:[%s1694_s23 + $0x8] sm:$0x77] (!%p1359_p12)  ;;  %v1008_v54 = vmax.bf16 (!%p1359_p12), %v1387_v48, %v936_v47  ;;  %vm1021_vm15 = vmand (!%p1359_p12), %vm1019_vm12, %vm1020_vm14  ;;  %v938_v55 = vld [vmem:[%s1694_s23 + $0x10] sm:$0x77] (!%p1359_p12)  ;;  %v1391_v58 = vpack.c.bf16 (!%p1359_p12), %v1782_v7, %v1778_v5  ;;  %v1392_v56 = vpack.c.bf16 (!%p1359_p12), %v1784_v8, %v1780_v6  ;;  %v1393_v43 = vpack.c.bf16 (!%p1359_p12), %v1790_v15, %v1786_v13 }
 0x132   : > { %v1028_v57 = vld [vmem:[%s1694_s23 + $0x10] sm:$0x77] (!%p1359_p12)  ;;  %vm1847_vm0 = vmor (!%p1359_p12), %vm1021_vm15, %vm1018_vm13  ;;  %v1009_v60 = vmax.bf16 (!%p1359_p12), %v1388_v50, %v937_v49  ;;  %v1010_v34 = vmax.bf16 (!%p1359_p12), %v1389_v52, %v938_v55  ;;  %v939_v61 = vld [vmem:[%s1694_s23 + $0x18] sm:$0x77] (!%p1359_p12)  ;;  %v1394_v63 = vpack.c.bf16 (!%p1359_p12), %v1792_v16, %v1788_v14 }
 0x133   : > { %v1031_v62 = vld [vmem:[%s1694_s23 + $0x18] sm:$0x77] (!%p1359_p12)  ;;  %v1023_v0 = vsel (!%p1359_p12), %vm1847_vm0, %v1008_v54, %v936_v47  ;;  %v1011_v1 = vmax.bf16 (!%p1359_p12), %v1390_v53, %v939_v61  ;;  %v940_v2 = vld [vmem:[%s1694_s23 + $0x20] sm:$0x77] (!%p1359_p12)  ;;  %v941_v4 = vld [vmem:[%s1694_s23 + $0x28] sm:$0x77] (!%p1359_p12) }
 0x134   : > { %v1034_v3 = vld [vmem:[%s1694_s23 + $0x20] sm:$0x77] (!%p1359_p12)  ;;  %1024 = vst [vmem:[%s1694_s23] sm:$0x77] (!%p1359_p12), %v1023_v0  ;;  %v1026_v5 = vsel (!%p1359_p12), %vm1847_vm0, %v1009_v60, %v1025_v51  ;;  %v1029_v6 = vsel (!%p1359_p12), %vm1847_vm0, %v1010_v34, %v1028_v57  ;;  %v1012_v7 = vmax.bf16 (!%p1359_p12), %v1391_v58, %v940_v2  ;;  %v1013_v8 = vmax.bf16 (!%p1359_p12), %v1392_v56, %v941_v4  ;;  %v1037_v9 = vld [vmem:[%s1694_s23 + $0x28] sm:$0x77] (!%p1359_p12) }
 0x135   : > { %v942_v10 = vld [vmem:[%s1694_s23 + $0x30] sm:$0x77] (!%p1359_p12)  ;;  %1027 = vst [vmem:[%s1694_s23 + $0x8] sm:$0x77] (!%p1359_p12), %v1026_v5  ;;  %1030 = vst [vmem:[%s1694_s23 + $0x10] sm:$0x77] (!%p1359_p12), %v1029_v6  ;;  %v1032_v12 = vsel (!%p1359_p12), %vm1847_vm0, %v1011_v1, %v1031_v62 }
 0x136   : > { %v1040_v11 = vld [vmem:[%s1694_s23 + $0x30] sm:$0x77] (!%p1359_p12)  ;;  %v1014_v13 = vmax.bf16 (!%p1359_p12), %v1393_v43, %v942_v10  ;;  %v943_v14 = vld [vmem:[%s1694_s23 + $0x38] sm:$0x77] (!%p1359_p12)  ;;  %1033 = vst [vmem:[%s1694_s23 + $0x18] sm:$0x77] (!%p1359_p12), %v1032_v12  ;;  %v1035_v16 = vsel (!%p1359_p12), %vm1847_vm0, %v1012_v7, %v1034_v3  ;;  %v1038_v17 = vsel (!%p1359_p12), %vm1847_vm0, %v1013_v8, %v1037_v9 }
 0x137   : > { %v1043_v15 = vld [vmem:[%s1694_s23 + $0x38] sm:$0x77]  ;;  %v1015_v18 = vmax.bf16 %v1394_v63, %v943_v14  ;;  %1036 = vst [vmem:[%s1694_s23 + $0x20] sm:$0x77] %v1035_v16  ;;  %1039 = vst [vmem:[%s1694_s23 + $0x28] sm:$0x77] %v1038_v17 }
 0x138   : > { %v1041_v19 = vsel %vm1847_vm0, %v1014_v13, %v1040_v11 }
 0x139   : > { %1042 = vst [vmem:[%s1694_s23 + $0x30] sm:$0x77] %v1041_v19  ;;  %v1044_v20 = vsel %vm1847_vm0, %v1015_v18, %v1043_v15 }
 0x13a   : > { %1045 = vst [vmem:[%s1694_s23 + $0x38] sm:$0x77] %v1044_v20 }
 0x13b PF: > { %p1368_p13 = scmp.ne.s32.totalorder %s1502_s14, 3 }
 0x13c   : > { %v1074_v21 = vld [vmem:[%s1978_s2] sm:$0x1f] (!%p1368_p13)  ;;  %v1522_v22 = vmov (!%p1368_p13), 0   ;;  %vm1192_vm1 = vcmask (!%p1368_p13), 1042432   ;;  %vm1193_vm2 = vsmask.f32 (!%p1368_p13), 2304 }
 0x13d   : > { %1049 = sbr.rel (%p1368_p13) target bundleno = 465 (0x1d1), region = 67  ;;  %1463 = vset.pattern.permute.xlu0 (!%p1368_p13), %v1522_v22  ;;  %vm1195_vm3 = vcmask (!%p1368_p13), 1046532   ;;  %vm1196_vm4 = vsmask.f32 (!%p1368_p13), 6400  ;;  %vm1905_vm5 = vmand (!%p1368_p13), %vm1192_vm1, %vm1193_vm2 }
 0x13e   : > { %1077 = vperm.xlu0 (!%p1368_p13), %1463, %v1074_v21   ;;  %vm1911_vm6 = vmand (!%p1368_p13), %vm1195_vm3, %vm1196_vm4 }
 0x13f   : > { %v1892_v23 = vld [vmem:[%s1694_s23] sm:$0x77] (!%p1368_p13)  ;;  %vm1924_vm7 = vmor (!%p1368_p13), %vm1911_vm6, %vm1905_vm5 }
 0x140   : > { %v1051_v24 = vld [vmem:[%s1694_s23 + $0x8] sm:$0x77] (!%p1368_p13)  ;;  %v1052_v25 = vld [vmem:[%s1694_s23 + $0x10] sm:$0x77] (!%p1368_p13)  ;;  %v1058_v31 = vunpack.c.l.bf16 (!%p1368_p13), %v1892_v23  ;;  %v1059_v32 = vunpack.c.h.bf16 (!%p1368_p13), %v1892_v23 }
 0x141   : > { %v1053_v26 = vld [vmem:[%s1694_s23 + $0x18] sm:$0x77] (!%p1368_p13)  ;;  %v1056_v29 = vld [vmem:[%s1694_s23 + $0x30] sm:$0x77] (!%p1368_p13)  ;;  %v1060_v33 = vunpack.c.l.bf16 (!%p1368_p13), %v1051_v24  ;;  %v1061_v35 = vunpack.c.h.bf16 (!%p1368_p13), %v1051_v24  ;;  %v1062_v36 = vunpack.c.l.bf16 (!%p1368_p13), %v1052_v25  ;;  %v1063_v37 = vunpack.c.h.bf16 (!%p1368_p13), %v1052_v25  ;;  %v1201_v21 = vld [vmem:[%s1694_s23 + $0x8] sm:$0x77] (!%p1368_p13) }
 0x142   : > { %v1054_v27 = vld [vmem:[%s1694_s23 + $0x20] sm:$0x77] (!%p1368_p13)  ;;  %v1055_v28 = vld [vmem:[%s1694_s23 + $0x28] sm:$0x77] (!%p1368_p13)  ;;  %v1057_v30 = vld [vmem:[%s1694_s23 + $0x38] sm:$0x77] (!%p1368_p13)  ;;  %v1064_v38 = vunpack.c.l.bf16 (!%p1368_p13), %v1053_v26  ;;  %v1065_v39 = vunpack.c.h.bf16 (!%p1368_p13), %v1053_v26  ;;  %v1070_v46 = vunpack.c.l.bf16 (!%p1368_p13), %v1056_v29  ;;  %v1071_v47 = vunpack.c.h.bf16 (!%p1368_p13), %v1056_v29 }
 0x143   : > { %v1066_v40 = vunpack.c.l.bf16 (!%p1368_p13), %v1054_v27  ;;  %v1067_v41 = vunpack.c.h.bf16 (!%p1368_p13), %v1054_v27  ;;  %v1068_v42 = vunpack.c.l.bf16 (!%p1368_p13), %v1055_v28  ;;  %v1069_v44 = vunpack.c.h.bf16 (!%p1368_p13), %v1055_v28  ;;  %v1204_v22 = vld [vmem:[%s1694_s23 + $0x10] sm:$0x77] (!%p1368_p13)  ;;  %v1207_v27 = vld [vmem:[%s1694_s23 + $0x18] sm:$0x77] (!%p1368_p13)  ;;  %v1210_v28 = vld [vmem:[%s1694_s23 + $0x20] sm:$0x77] (!%p1368_p13) }
 0x144   : > { %v1072_v48 = vunpack.c.l.bf16 %v1057_v30  ;;  %v1073_v49 = vunpack.c.h.bf16 %v1057_v30  ;;  %v1213_v29 = vld [vmem:[%s1694_s23 + $0x28] sm:$0x77] }
 0x1bd   : > { %v1078_v45 = vpop.permute.xlu0 %1077 }
 0x1be   : > { %v1080_v50 = vadd.f32 %v1078_v45, %v1058_v31  ;;  %v1081_v51 = vadd.f32 %v1078_v45, %v1059_v32  ;;  %v1082_v52 = vadd.f32 %v1078_v45, %v1060_v33  ;;  %v1083_v53 = vadd.f32 %v1078_v45, %v1061_v35 }
 0x1bf   : > { %v1084_v54 = vadd.f32 %v1078_v45, %v1062_v36  ;;  %v1085_v55 = vadd.f32 %v1078_v45, %v1063_v37  ;;  %v1086_v57 = vadd.f32 %v1078_v45, %v1064_v38  ;;  %v1087_v58 = vadd.f32 %v1078_v45, %v1065_v39 }
 0x1c0   : > { %v1088_v56 = vadd.f32 %v1078_v45, %v1066_v40  ;;  %v1089_v43 = vadd.f32 %v1078_v45, %v1067_v41  ;;  %v1090_v59 = vadd.f32 %v1078_v45, %v1068_v42  ;;  %v1091_v60 = vadd.f32 %v1078_v45, %v1069_v44 }
 0x1c1   : > { %v1092_v34 = vadd.f32 %v1078_v45, %v1070_v46  ;;  %v1093_v61 = vadd.f32 %v1078_v45, %v1071_v47  ;;  %v1094_v62 = vadd.f32 %v1078_v45, %v1072_v48  ;;  %v1095_v63 = vadd.f32 %v1078_v45, %v1073_v49  ;;  %v1216_v45 = vld [vmem:[%s1694_s23 + $0x30] sm:$0x77] }
 0x1c2   : > { %v1096_v0 = vmax.f32 %v1080_v50, 0.0  ;;  %v1097_v1 = vmax.f32 %v1081_v51, 0.0  ;;  %v1098_v2 = vmax.f32 %v1082_v52, 0.0  ;;  %v1099_v3 = vmax.f32 %v1083_v53, 0.0  ;;  %v1219_v50 = vld [vmem:[%s1694_s23 + $0x38] sm:$0x77] }
 0x1c3   : > { %v1100_v4 = vmax.f32 %v1084_v54, 0.0  ;;  %v1101_v5 = vmax.f32 %v1085_v55, 0.0  ;;  %v1102_v6 = vmax.f32 %v1086_v57, 0.0  ;;  %v1103_v7 = vmax.f32 %v1087_v58, 0.0 }
 0x1c4   : > { %v1104_v8 = vmax.f32 %v1088_v56, 0.0  ;;  %v1105_v9 = vmax.f32 %v1089_v43, 0.0  ;;  %v1106_v10 = vmax.f32 %v1090_v59, 0.0  ;;  %v1107_v11 = vmax.f32 %v1091_v60, 0.0 }
 0x1c5   : > { %v1108_v13 = vmax.f32 %v1092_v34, 0.0  ;;  %v1109_v14 = vmax.f32 %v1093_v61, 0.0  ;;  %v1110_v15 = vmax.f32 %v1094_v62, 0.0  ;;  %v1111_v16 = vmax.f32 %v1095_v63, 0.0 }
 0x1c6   : > { %v1112_v18 = vmul.f32 0.999995, %v1096_v0  ;;  %v1113_v19 = vmul.f32 0.999995, %v1097_v1  ;;  %v1114_v20 = vmul.f32 0.999995, %v1098_v2 }
 0x1c7   : > { %v1115_v24 = vmul.f32 0.999995, %v1099_v3  ;;  %v1116_v25 = vmul.f32 0.999995, %v1100_v4  ;;  %v1117_v26 = vmul.f32 0.999995, %v1101_v5 }
 0x1c8   : > { %v1118_v30 = vmul.f32 0.999995, %v1102_v6  ;;  %v1119_v31 = vmul.f32 0.999995, %v1103_v7  ;;  %v1120_v32 = vmul.f32 0.999995, %v1104_v8  ;;  %v1395_v33 = vpack.c.bf16 %v1113_v19, %v1112_v18 }
 0x1c9   : > { %v1121_v36 = vmul.f32 0.999995, %v1105_v9  ;;  %v1122_v37 = vmul.f32 0.999995, %v1106_v10  ;;  %v1123_v38 = vmul.f32 0.999995, %v1107_v11  ;;  %v1396_v39 = vpack.c.bf16 %v1115_v24, %v1114_v20 }
 0x1ca   : > { %v1124_v40 = vmul.f32 0.999995, %v1108_v13  ;;  %v1125_v41 = vmul.f32 0.999995, %v1109_v14  ;;  %v1126_v42 = vmul.f32 0.999995, %v1110_v15  ;;  %v1397_v44 = vpack.c.bf16 %v1117_v26, %v1116_v25 }
 0x1cb   : > { %v1127_v46 = vmul.f32 0.999995, %v1111_v16  ;;  %v1398_v47 = vpack.c.bf16 %v1119_v31, %v1118_v30  ;;  %v1399_v48 = vpack.c.bf16 %v1121_v36, %v1120_v32  ;;  %v1400_v49 = vpack.c.bf16 %v1123_v38, %v1122_v37 }
 0x1cc   : > { %v1401_v51 = vpack.c.bf16 %v1125_v41, %v1124_v40  ;;  %v1199_v52 = vsel %vm1924_vm7, %v1395_v33, %v1892_v23  ;;  %v1202_v53 = vsel %vm1924_vm7, %v1396_v39, %v1201_v21  ;;  %v1205_v54 = vsel %vm1924_vm7, %v1397_v44, %v1204_v22 }
 0x1cd   : > { %v1402_v55 = vpack.c.bf16 %v1127_v46, %v1126_v42  ;;  %1200 = vst [vmem:[%s1694_s23] sm:$0x77] %v1199_v52  ;;  %1203 = vst [vmem:[%s1694_s23 + $0x8] sm:$0x77] %v1202_v53  ;;  %v1208_v57 = vsel %vm1924_vm7, %v1398_v47, %v1207_v27  ;;  %v1211_v58 = vsel %vm1924_vm7, %v1399_v48, %v1210_v28 }
 0x1ce   : > { %1206 = vst [vmem:[%s1694_s23 + $0x10] sm:$0x77] %v1205_v54  ;;  %v1214_v23 = vsel %vm1924_vm7, %v1400_v49, %v1213_v29  ;;  %1209 = vst [vmem:[%s1694_s23 + $0x18] sm:$0x77] %v1208_v57  ;;  %v1217_v56 = vsel %vm1924_vm7, %v1401_v51, %v1216_v45 }
 0x1cf   : > { %1212 = vst [vmem:[%s1694_s23 + $0x20] sm:$0x77] %v1211_v58  ;;  %1215 = vst [vmem:[%s1694_s23 + $0x28] sm:$0x77] %v1214_v23  ;;  %v1220_v43 = vsel %vm1924_vm7, %v1402_v55, %v1219_v50 }
 0x1d0   : > { %1218 = vst [vmem:[%s1694_s23 + $0x30] sm:$0x77] %v1217_v56  ;;  %1221 = vst [vmem:[%s1694_s23 + $0x38] sm:$0x77] %v1220_v43 }
 0x1d1 PF: > { %s13_s18 = sadd.s32 1, %s1518_s18   ;;  %s1988_s12 = smov %s1498_s13 }
 0x1d2   : > { %p10_p0 = scmp.ge.s32.totalorder %s13_s18, 50   ;;  %s1989_s13 = smov %s1594_s25 }
 0x1d3   : > { %s1990_s14 = smov %s1510_s16  ;;  %s1991_s15 = smov %s1514_s17 }
 0x1d4   : > { %s1992_s16 = smov %s1995_s19  ;;  %s1993_s17 = smov %s1999_s20 }
 0x1d5   :  { %12 = sbr.rel (!%p10_p0) target bundleno = 4 (0x4), region = 102 }

// kernel: net_forward.7
= control target key start
LH: loop header
LB: loop body
LE: loop exit
PB: predicated region body
PF: predicated region fallthrough
CT: control target
= control target key end

     0   :  { %s2706_s12 = smov 0   ;;  %s2708_s13 = smov 0   ;;  %s3589_s0 = inlined_call_operand.vmem [shape: bf16[10,125], index: 0, kind: input, shape index: {}]   ;;  %s3590_s1 = inlined_call_operand.vmem [shape: bf16[4,125,6144], index: 1, kind: input, shape index: {}]   ;;  %s3591_s2 = inlined_call_operand.vmem [shape: f32[10,1], index: 2, kind: input, shape index: {}]   ;;  %s3592_s3 = inlined_call_operand.vmem [shape: bf16[10,6144], index: 3, kind: output, shape index: {}]  }
   0x1   :  { %s2710_s14 = smov 0   ;;  %s2712_s15 = smov 0  }
   0x2   :  { %s2714_s16 = smov 0   ;;  %s2716_s17 = smov 0  }
   0x3   :  { %s2718_s18 = smov 0   ;;  %s2720_s19 = smov 0  }
   0x4   :  { %s2722_s20 = smov 0  }
   0x5 LB: > { %s22_s21 = sadd.s32 1, %s2673_s18  ;;  %s25_s22 = sadd.s32 1, %s2677_s19  ;;  %s2681_s20 = sphi %s2722_s20, %s13_s20   ;;  %s2677_s19 = sphi %s2720_s19, %s3602_s19   ;;  %s2673_s18 = sphi %s2718_s18, %s3601_s18   ;;  %s2669_s17 = sphi %s2716_s17, %s3600_s17   ;;  %s2665_s16 = sphi %s2714_s16, %s3599_s16   ;;  %s2661_s15 = sphi %s2712_s15, %s3598_s15   ;;  %s2657_s14 = sphi %s2710_s14, %s3597_s14   ;;  %s2653_s13 = sphi %s2708_s13, %s3596_s13   ;;  %s2649_s12 = sphi %s2706_s12, %s3595_s12  }
   0x6   : > { %p23_p0 = scmp.ge.s32.totalorder %s22_s21, 4  ;;  %p62_p1 = scmp.ne.s32.totalorder %s2661_s15, %s2657_s14 }
   0x7   : > { %s2281_s23 = sadd.s32 4294967295, %s2681_s20   ;;  %p63_p2 = scmp.eq.s32.totalorder %s2681_s20, 0 }
   0x8   : > { %s3604_s21 = smov (%p23_p0, %s22_s21), 0  ;;  %s3606_s22 = smov (!%p23_p0, %s25_s22), %s2677_s19 }
   0x9   : > { %p27_p3 = scmp.ge.s32.totalorder %s3606_s22, 3  ;;  %s50_s24 = ssub.s32 %s2673_s18, %s3604_s21 }
   0xa   : > { %p2762_p4 = por %p63_p2, %p62_p1  ;;  %p112_p5 = scmp.ne.s32.totalorder %s2653_s13, %s2649_s12 }
   0xb   : > { %s3608_s22 = smov (%p27_p3, %s3606_s22), 0  ;;  %s55_s26 = sadd.s32 1, %s2661_s15 }
   0xc   : > { %p113_p6 = scmp.eq.s32.totalorder %s2281_s23, 11  ;;  %s51_s27 = ssub.s32 %s2677_s19, %s3608_s22 }
   0xd   : > { %s102_s28 = sadd.s32 1, %s2653_s13  ;;  %s52_s29 = sor.u32 %s51_s27, %s50_s24 }
   0xe   : > { %p100_p7 = scmp.eq.s32.totalorder %s51_s27, 0  ;;  %p53_p8 = scmp.eq.s32.totalorder %s52_s29, 0 }
   0xf   : > { %p2774_p9 = por %p113_p6, %p112_p5  ;;  %p2284_p10 = scmp.ge.s32.totalorder %s2681_s20, 12 }
  0x10   : > { %s2779_s4 = scalar_select %p100_p7, %s2653_s13, %s102_s28  }
  0x11   : > { %s2782_s5 = scalar_select %p53_p8, %s2661_s15, %s55_s26  }
  0x12   : > { %141 = sbr.rel (%p2284_p10) target bundleno = 97 (0x61), region = 24 }
  0x19   : > { %144 = sbr.rel (!%p2762_p4) target bundleno = 97 (0x61), region = 28  ;;  %s146_s6 = sand.u32 (%p2762_p4), 1, %s2661_s15  }
  0x1a   : > { %s2286_s7 = sshll.u32 (%p2762_p4), %s2677_s19, 4  ;;  %s2285_s8 = sshll.u32 (%p2762_p4), %s146_s6, 10 }
  0x1b   : > { %s2533_s9 = smul.u32 (%p2762_p4), 768, %s2673_s18  ;;  %s2798_s25 = scalar_lea.vmem (%p2762_p4), [#allocation2], %s2285_s8 }
  0x1d   : > { %s151_s10 = sadd.s32 (%p2762_p4), %s2533_s9, %s2286_s7 }
  0x1e   : > { %s2287_s11 = sshll.u32 (%p2762_p4), %s151_s10, 2 }
  0x1f   : > { %s2793_s26 = scalar_lea.vmem (%p2762_p4), %s3590_s1, %s2287_s11 }
  0x20   : > { %v166_v0 = vld [vmem:[%s2793_s26] sm:$0xff]  ;;  %v168_v1 = vld [vmem:[%s2793_s26 + $0x8] sm:$0xff]  ;;  %v170_v2 = vld [vmem:[%s2793_s26 + $0x10] sm:$0xff] }
  0x21   : > { %167 = vst [vmem:[%s2798_s25] sm:$0xff] %v166_v0  ;;  %169 = vst [vmem:[%s2798_s25 + $0x8] sm:$0xff] %v168_v1  ;;  %v172_v3 = vld [vmem:[%s2793_s26 + $0x18] sm:$0xff]  ;;  %v174_v4 = vld [vmem:[%s2793_s26 + $0x20] sm:$0xff] }
  0x22   : > { %171 = vst [vmem:[%s2798_s25 + $0x10] sm:$0xff] %v170_v2  ;;  %v176_v5 = vld [vmem:[%s2793_s26 + $0x28] sm:$0xff]  ;;  %173 = vst [vmem:[%s2798_s25 + $0x18] sm:$0xff] %v172_v3  ;;  %v178_v6 = vld [vmem:[%s2793_s26 + $0x30] sm:$0xff] }
  0x23   : > { %175 = vst [vmem:[%s2798_s25 + $0x20] sm:$0xff] %v174_v4  ;;  %177 = vst [vmem:[%s2798_s25 + $0x28] sm:$0xff] %v176_v5  ;;  %v180_v7 = vld [vmem:[%s2793_s26 + $0x38] sm:$0xff]  ;;  %v182_v8 = vld [vmem:[%s2793_s26 + $0xc0] sm:$0xff] }
  0x24   : > { %179 = vst [vmem:[%s2798_s25 + $0x30] sm:$0xff] %v178_v6  ;;  %181 = vst [vmem:[%s2798_s25 + $0x38] sm:$0xff] %v180_v7  ;;  %v184_v9 = vld [vmem:[%s2793_s26 + $0xc8] sm:$0xff]  ;;  %v186_v10 = vld [vmem:[%s2793_s26 + $0xd0] sm:$0xff] }
  0x25   : > { %183 = vst [vmem:[%s2798_s25 + $0x40] sm:$0xff] %v182_v8  ;;  %v188_v11 = vld [vmem:[%s2793_s26 + $0xd8] sm:$0xff]  ;;  %185 = vst [vmem:[%s2798_s25 + $0x48] sm:$0xff] %v184_v9  ;;  %v190_v12 = vld [vmem:[%s2793_s26 + $0xe0] sm:$0xff] }
  0x26   : > { %187 = vst [vmem:[%s2798_s25 + $0x50] sm:$0xff] %v186_v10  ;;  %189 = vst [vmem:[%s2798_s25 + $0x58] sm:$0xff] %v188_v11  ;;  %v192_v13 = vld [vmem:[%s2793_s26 + $0xe8] sm:$0xff]  ;;  %v194_v14 = vld [vmem:[%s2793_s26 + $0xf0] sm:$0xff] }
  0x27   : > { %191 = vst [vmem:[%s2798_s25 + $0x60] sm:$0xff] %v190_v12  ;;  %193 = vst [vmem:[%s2798_s25 + $0x68] sm:$0xff] %v192_v13  ;;  %v196_v15 = vld [vmem:[%s2793_s26 + $0xf8] sm:$0xff]  ;;  %v198_v16 = vld [vmem:[%s2793_s26 + $0x180] sm:$0xff] }
  0x28   : > { %195 = vst [vmem:[%s2798_s25 + $0x70] sm:$0xff] %v194_v14  ;;  %v200_v17 = vld [vmem:[%s2793_s26 + $0x188] sm:$0xff]  ;;  %197 = vst [vmem:[%s2798_s25 + $0x78] sm:$0xff] %v196_v15  ;;  %v202_v18 = vld [vmem:[%s2793_s26 + $0x190] sm:$0xff] }
  0x29   : > { %199 = vst [vmem:[%s2798_s25 + $0x80] sm:$0xff] %v198_v16  ;;  %201 = vst [vmem:[%s2798_s25 + $0x88] sm:$0xff] %v200_v17  ;;  %v204_v19 = vld [vmem:[%s2793_s26 + $0x198] sm:$0xff]  ;;  %v206_v20 = vld [vmem:[%s2793_s26 + $0x1a0] sm:$0xff] }
  0x2a   : > { %203 = vst [vmem:[%s2798_s25 + $0x90] sm:$0xff] %v202_v18  ;;  %205 = vst [vmem:[%s2798_s25 + $0x98] sm:$0xff] %v204_v19  ;;  %v208_v21 = vld [vmem:[%s2793_s26 + $0x1a8] sm:$0xff]  ;;  %v210_v22 = vld [vmem:[%s2793_s26 + $0x1b0] sm:$0xff] }
  0x2b   : > { %207 = vst [vmem:[%s2798_s25 + $0xa0] sm:$0xff] %v206_v20  ;;  %v212_v23 = vld [vmem:[%s2793_s26 + $0x1b8] sm:$0xff]  ;;  %209 = vst [vmem:[%s2798_s25 + $0xa8] sm:$0xff] %v208_v21  ;;  %v214_v24 = vld [vmem:[%s2793_s26 + $0x240] sm:$0xff] }
  0x2c   : > { %211 = vst [vmem:[%s2798_s25 + $0xb0] sm:$0xff] %v210_v22  ;;  %213 = vst [vmem:[%s2798_s25 + $0xb8] sm:$0xff] %v212_v23  ;;  %v216_v25 = vld [vmem:[%s2793_s26 + $0x248] sm:$0xff]  ;;  %v218_v26 = vld [vmem:[%s2793_s26 + $0x250] sm:$0xff] }
  0x2d   : > { %215 = vst [vmem:[%s2798_s25 + $0xc0] sm:$0xff] %v214_v24  ;;  %217 = vst [vmem:[%s2798_s25 + $0xc8] sm:$0xff] %v216_v25  ;;  %v220_v27 = vld [vmem:[%s2793_s26 + $0x258] sm:$0xff]  ;;  %v222_v28 = vld [vmem:[%s2793_s26 + $0x260] sm:$0xff] }
  0x2e   : > { %219 = vst [vmem:[%s2798_s25 + $0xd0] sm:$0xff] %v218_v26  ;;  %v224_v29 = vld [vmem:[%s2793_s26 + $0x268] sm:$0xff]  ;;  %221 = vst [vmem:[%s2798_s25 + $0xd8] sm:$0xff] %v220_v27  ;;  %v226_v30 = vld [vmem:[%s2793_s26 + $0x270] sm:$0xff] }
  0x2f   : > { %223 = vst [vmem:[%s2798_s25 + $0xe0] sm:$0xff] %v222_v28  ;;  %225 = vst [vmem:[%s2798_s25 + $0xe8] sm:$0xff] %v224_v29  ;;  %v228_v31 = vld [vmem:[%s2793_s26 + $0x278] sm:$0xff]  ;;  %v230_v32 = vld [vmem:[%s2793_s26 + $0x300] sm:$0xff] }
  0x30   : > { %227 = vst [vmem:[%s2798_s25 + $0xf0] sm:$0xff] %v226_v30  ;;  %229 = vst [vmem:[%s2798_s25 + $0xf8] sm:$0xff] %v228_v31  ;;  %v232_v33 = vld [vmem:[%s2793_s26 + $0x308] sm:$0xff]  ;;  %v234_v34 = vld [vmem:[%s2793_s26 + $0x310] sm:$0xff] }
  0x31   : > { %231 = vst [vmem:[%s2798_s25 + $0x100] sm:$0xff] %v230_v32  ;;  %v236_v35 = vld [vmem:[%s2793_s26 + $0x318] sm:$0xff]  ;;  %233 = vst [vmem:[%s2798_s25 + $0x108] sm:$0xff] %v232_v33  ;;  %v238_v36 = vld [vmem:[%s2793_s26 + $0x320] sm:$0xff] }
  0x32   : > { %235 = vst [vmem:[%s2798_s25 + $0x110] sm:$0xff] %v234_v34  ;;  %237 = vst [vmem:[%s2798_s25 + $0x118] sm:$0xff] %v236_v35  ;;  %v240_v37 = vld [vmem:[%s2793_s26 + $0x328] sm:$0xff]  ;;  %v242_v38 = vld [vmem:[%s2793_s26 + $0x330] sm:$0xff] }
  0x33   : > { %239 = vst [vmem:[%s2798_s25 + $0x120] sm:$0xff] %v238_v36  ;;  %241 = vst [vmem:[%s2798_s25 + $0x128] sm:$0xff] %v240_v37  ;;  %v244_v39 = vld [vmem:[%s2793_s26 + $0x338] sm:$0xff]  ;;  %v246_v40 = vld [vmem:[%s2793_s26 + $0x3c0] sm:$0xff] }
  0x34   : > { %243 = vst [vmem:[%s2798_s25 + $0x130] sm:$0xff] %v242_v38  ;;  %v248_v41 = vld [vmem:[%s2793_s26 + $0x3c8] sm:$0xff]  ;;  %245 = vst [vmem:[%s2798_s25 + $0x138] sm:$0xff] %v244_v39  ;;  %v250_v42 = vld [vmem:[%s2793_s26 + $0x3d0] sm:$0xff] }
  0x35   : > { %247 = vst [vmem:[%s2798_s25 + $0x140] sm:$0xff] %v246_v40  ;;  %249 = vst [vmem:[%s2798_s25 + $0x148] sm:$0xff] %v248_v41  ;;  %v252_v43 = vld [vmem:[%s2793_s26 + $0x3d8] sm:$0xff]  ;;  %v254_v44 = vld [vmem:[%s2793_s26 + $0x3e0] sm:$0xff] }
  0x36   : > { %251 = vst [vmem:[%s2798_s25 + $0x150] sm:$0xff] %v250_v42  ;;  %253 = vst [vmem:[%s2798_s25 + $0x158] sm:$0xff] %v252_v43  ;;  %v256_v45 = vld [vmem:[%s2793_s26 + $0x3e8] sm:$0xff]  ;;  %v258_v46 = vld [vmem:[%s2793_s26 + $0x3f0] sm:$0xff] }
  0x37   : > { %255 = vst [vmem:[%s2798_s25 + $0x160] sm:$0xff] %v254_v44  ;;  %v260_v47 = vld [vmem:[%s2793_s26 + $0x3f8] sm:$0xff]  ;;  %257 = vst [vmem:[%s2798_s25 + $0x168] sm:$0xff] %v256_v45  ;;  %v262_v48 = vld [vmem:[%s2793_s26 + $0x480] sm:$0xff] }
  0x38   : > { %259 = vst [vmem:[%s2798_s25 + $0x170] sm:$0xff] %v258_v46  ;;  %261 = vst [vmem:[%s2798_s25 + $0x178] sm:$0xff] %v260_v47  ;;  %v264_v49 = vld [vmem:[%s2793_s26 + $0x488] sm:$0xff]  ;;  %v266_v50 = vld [vmem:[%s2793_s26 + $0x490] sm:$0xff] }
  0x39   : > { %263 = vst [vmem:[%s2798_s25 + $0x180] sm:$0xff] %v262_v48  ;;  %265 = vst [vmem:[%s2798_s25 + $0x188] sm:$0xff] %v264_v49  ;;  %v268_v51 = vld [vmem:[%s2793_s26 + $0x498] sm:$0xff]  ;;  %v270_v52 = vld [vmem:[%s2793_s26 + $0x4a0] sm:$0xff] }
  0x3a   : > { %267 = vst [vmem:[%s2798_s25 + $0x190] sm:$0xff] %v266_v50  ;;  %v272_v53 = vld [vmem:[%s2793_s26 + $0x4a8] sm:$0xff]  ;;  %269 = vst [vmem:[%s2798_s25 + $0x198] sm:$0xff] %v268_v51  ;;  %v274_v54 = vld [vmem:[%s2793_s26 + $0x4b0] sm:$0xff] }
  0x3b   : > { %271 = vst [vmem:[%s2798_s25 + $0x1a0] sm:$0xff] %v270_v52  ;;  %273 = vst [vmem:[%s2798_s25 + $0x1a8] sm:$0xff] %v272_v53  ;;  %v276_v55 = vld [vmem:[%s2793_s26 + $0x4b8] sm:$0xff]  ;;  %v278_v56 = vld [vmem:[%s2793_s26 + $0x540] sm:$0xff] }
  0x3c   : > { %275 = vst [vmem:[%s2798_s25 + $0x1b0] sm:$0xff] %v274_v54  ;;  %277 = vst [vmem:[%s2798_s25 + $0x1b8] sm:$0xff] %v276_v55  ;;  %v280_v57 = vld [vmem:[%s2793_s26 + $0x548] sm:$0xff]  ;;  %v282_v58 = vld [vmem:[%s2793_s26 + $0x550] sm:$0xff] }
  0x3d   : > { %279 = vst [vmem:[%s2798_s25 + $0x1c0] sm:$0xff] %v278_v56  ;;  %v284_v59 = vld [vmem:[%s2793_s26 + $0x558] sm:$0xff]  ;;  %281 = vst [vmem:[%s2798_s25 + $0x1c8] sm:$0xff] %v280_v57  ;;  %v286_v60 = vld [vmem:[%s2793_s26 + $0x560] sm:$0xff] }
  0x3e   : > { %283 = vst [vmem:[%s2798_s25 + $0x1d0] sm:$0xff] %v282_v58  ;;  %285 = vst [vmem:[%s2798_s25 + $0x1d8] sm:$0xff] %v284_v59  ;;  %v288_v61 = vld [vmem:[%s2793_s26 + $0x568] sm:$0xff]  ;;  %v290_v62 = vld [vmem:[%s2793_s26 + $0x570] sm:$0xff] }
  0x3f   : > { %287 = vst [vmem:[%s2798_s25 + $0x1e0] sm:$0xff] %v286_v60  ;;  %289 = vst [vmem:[%s2798_s25 + $0x1e8] sm:$0xff] %v288_v61  ;;  %v292_v63 = vld [vmem:[%s2793_s26 + $0x578] sm:$0xff]  ;;  %v294_v0 = vld [vmem:[%s2793_s26 + $0x600] sm:$0xff] }
  0x40   : > { %291 = vst [vmem:[%s2798_s25 + $0x1f0] sm:$0xff] %v290_v62  ;;  %v296_v1 = vld [vmem:[%s2793_s26 + $0x608] sm:$0xff]  ;;  %293 = vst [vmem:[%s2798_s25 + $0x1f8] sm:$0xff] %v292_v63  ;;  %v298_v2 = vld [vmem:[%s2793_s26 + $0x610] sm:$0xff] }
  0x41   : > { %295 = vst [vmem:[%s2798_s25 + $0x200] sm:$0xff] %v294_v0  ;;  %297 = vst [vmem:[%s2798_s25 + $0x208] sm:$0xff] %v296_v1  ;;  %v300_v3 = vld [vmem:[%s2793_s26 + $0x618] sm:$0xff]  ;;  %v302_v4 = vld [vmem:[%s2793_s26 + $0x620] sm:$0xff] }
  0x42   : > { %299 = vst [vmem:[%s2798_s25 + $0x210] sm:$0xff] %v298_v2  ;;  %301 = vst [vmem:[%s2798_s25 + $0x218] sm:$0xff] %v300_v3  ;;  %v304_v5 = vld [vmem:[%s2793_s26 + $0x628] sm:$0xff]  ;;  %v306_v6 = vld [vmem:[%s2793_s26 + $0x630] sm:$0xff] }
  0x43   : > { %303 = vst [vmem:[%s2798_s25 + $0x220] sm:$0xff] %v302_v4  ;;  %v308_v7 = vld [vmem:[%s2793_s26 + $0x638] sm:$0xff]  ;;  %305 = vst [vmem:[%s2798_s25 + $0x228] sm:$0xff] %v304_v5  ;;  %v310_v8 = vld [vmem:[%s2793_s26 + $0x6c0] sm:$0xff] }
  0x44   : > { %307 = vst [vmem:[%s2798_s25 + $0x230] sm:$0xff] %v306_v6  ;;  %309 = vst [vmem:[%s2798_s25 + $0x238] sm:$0xff] %v308_v7  ;;  %v312_v9 = vld [vmem:[%s2793_s26 + $0x6c8] sm:$0xff]  ;;  %v314_v10 = vld [vmem:[%s2793_s26 + $0x6d0] sm:$0xff] }
  0x45   : > { %311 = vst [vmem:[%s2798_s25 + $0x240] sm:$0xff] %v310_v8  ;;  %313 = vst [vmem:[%s2798_s25 + $0x248] sm:$0xff] %v312_v9  ;;  %v316_v11 = vld [vmem:[%s2793_s26 + $0x6d8] sm:$0xff]  ;;  %v318_v12 = vld [vmem:[%s2793_s26 + $0x6e0] sm:$0xff] }
  0x46   : > { %315 = vst [vmem:[%s2798_s25 + $0x250] sm:$0xff] %v314_v10  ;;  %v320_v13 = vld [vmem:[%s2793_s26 + $0x6e8] sm:$0xff]  ;;  %317 = vst [vmem:[%s2798_s25 + $0x258] sm:$0xff] %v316_v11  ;;  %v322_v14 = vld [vmem:[%s2793_s26 + $0x6f0] sm:$0xff] }
  0x47   : > { %319 = vst [vmem:[%s2798_s25 + $0x260] sm:$0xff] %v318_v12  ;;  %321 = vst [vmem:[%s2798_s25 + $0x268] sm:$0xff] %v320_v13  ;;  %v324_v15 = vld [vmem:[%s2793_s26 + $0x6f8] sm:$0xff]  ;;  %v326_v16 = vld [vmem:[%s2793_s26 + $0x780] sm:$0xff] }
  0x48   : > { %323 = vst [vmem:[%s2798_s25 + $0x270] sm:$0xff] %v322_v14  ;;  %325 = vst [vmem:[%s2798_s25 + $0x278] sm:$0xff] %v324_v15  ;;  %v328_v17 = vld [vmem:[%s2793_s26 + $0x788] sm:$0xff]  ;;  %v330_v18 = vld [vmem:[%s2793_s26 + $0x790] sm:$0xff] }
  0x49   : > { %327 = vst [vmem:[%s2798_s25 + $0x280] sm:$0xff] %v326_v16  ;;  %v332_v19 = vld [vmem:[%s2793_s26 + $0x798] sm:$0xff]  ;;  %329 = vst [vmem:[%s2798_s25 + $0x288] sm:$0xff] %v328_v17  ;;  %v334_v20 = vld [vmem:[%s2793_s26 + $0x7a0] sm:$0xff] }
  0x4a   : > { %331 = vst [vmem:[%s2798_s25 + $0x290] sm:$0xff] %v330_v18  ;;  %333 = vst [vmem:[%s2798_s25 + $0x298] sm:$0xff] %v332_v19  ;;  %v336_v21 = vld [vmem:[%s2793_s26 + $0x7a8] sm:$0xff]  ;;  %v338_v22 = vld [vmem:[%s2793_s26 + $0x7b0] sm:$0xff] }
  0x4b   : > { %335 = vst [vmem:[%s2798_s25 + $0x2a0] sm:$0xff] %v334_v20  ;;  %337 = vst [vmem:[%s2798_s25 + $0x2a8] sm:$0xff] %v336_v21  ;;  %v340_v23 = vld [vmem:[%s2793_s26 + $0x7b8] sm:$0xff]  ;;  %v342_v24 = vld [vmem:[%s2793_s26 + $0x840] sm:$0xff] }
  0x4c   : > { %339 = vst [vmem:[%s2798_s25 + $0x2b0] sm:$0xff] %v338_v22  ;;  %v344_v25 = vld [vmem:[%s2793_s26 + $0x848] sm:$0xff]  ;;  %341 = vst [vmem:[%s2798_s25 + $0x2b8] sm:$0xff] %v340_v23  ;;  %v346_v26 = vld [vmem:[%s2793_s26 + $0x850] sm:$0xff] }
  0x4d   : > { %343 = vst [vmem:[%s2798_s25 + $0x2c0] sm:$0xff] %v342_v24  ;;  %345 = vst [vmem:[%s2798_s25 + $0x2c8] sm:$0xff] %v344_v25  ;;  %v348_v27 = vld [vmem:[%s2793_s26 + $0x858] sm:$0xff]  ;;  %v350_v28 = vld [vmem:[%s2793_s26 + $0x860] sm:$0xff] }
  0x4e   : > { %347 = vst [vmem:[%s2798_s25 + $0x2d0] sm:$0xff] %v346_v26  ;;  %349 = vst [vmem:[%s2798_s25 + $0x2d8] sm:$0xff] %v348_v27  ;;  %v352_v29 = vld [vmem:[%s2793_s26 + $0x868] sm:$0xff]  ;;  %v354_v30 = vld [vmem:[%s2793_s26 + $0x870] sm:$0xff] }
  0x4f   : > { %351 = vst [vmem:[%s2798_s25 + $0x2e0] sm:$0xff] %v350_v28  ;;  %v356_v31 = vld [vmem:[%s2793_s26 + $0x878] sm:$0xff]  ;;  %353 = vst [vmem:[%s2798_s25 + $0x2e8] sm:$0xff] %v352_v29  ;;  %v358_v32 = vld [vmem:[%s2793_s26 + $0x900] sm:$0xff] }
  0x50   : > { %355 = vst [vmem:[%s2798_s25 + $0x2f0] sm:$0xff] %v354_v30  ;;  %357 = vst [vmem:[%s2798_s25 + $0x2f8] sm:$0xff] %v356_v31  ;;  %v360_v33 = vld [vmem:[%s2793_s26 + $0x908] sm:$0xff]  ;;  %v362_v34 = vld [vmem:[%s2793_s26 + $0x910] sm:$0xff] }
  0x51   : > { %359 = vst [vmem:[%s2798_s25 + $0x300] sm:$0xff] %v358_v32  ;;  %361 = vst [vmem:[%s2798_s25 + $0x308] sm:$0xff] %v360_v33  ;;  %v364_v35 = vld [vmem:[%s2793_s26 + $0x918] sm:$0xff]  ;;  %v366_v36 = vld [vmem:[%s2793_s26 + $0x920] sm:$0xff] }
  0x52   : > { %363 = vst [vmem:[%s2798_s25 + $0x310] sm:$0xff] %v362_v34  ;;  %v368_v37 = vld [vmem:[%s2793_s26 + $0x928] sm:$0xff]  ;;  %365 = vst [vmem:[%s2798_s25 + $0x318] sm:$0xff] %v364_v35  ;;  %v370_v38 = vld [vmem:[%s2793_s26 + $0x930] sm:$0xff] }
  0x53   : > { %367 = vst [vmem:[%s2798_s25 + $0x320] sm:$0xff] %v366_v36  ;;  %369 = vst [vmem:[%s2798_s25 + $0x328] sm:$0xff] %v368_v37  ;;  %v372_v39 = vld [vmem:[%s2793_s26 + $0x938] sm:$0xff]  ;;  %v374_v40 = vld [vmem:[%s2793_s26 + $0x9c0] sm:$0xff] }
  0x54   : > { %371 = vst [vmem:[%s2798_s25 + $0x330] sm:$0xff] %v370_v38  ;;  %373 = vst [vmem:[%s2798_s25 + $0x338] sm:$0xff] %v372_v39  ;;  %v376_v41 = vld [vmem:[%s2793_s26 + $0x9c8] sm:$0xff]  ;;  %v378_v42 = vld [vmem:[%s2793_s26 + $0x9d0] sm:$0xff] }
  0x55   : > { %375 = vst [vmem:[%s2798_s25 + $0x340] sm:$0xff] %v374_v40  ;;  %v380_v43 = vld [vmem:[%s2793_s26 + $0x9d8] sm:$0xff]  ;;  %377 = vst [vmem:[%s2798_s25 + $0x348] sm:$0xff] %v376_v41  ;;  %v382_v44 = vld [vmem:[%s2793_s26 + $0x9e0] sm:$0xff] }
  0x56   : > { %379 = vst [vmem:[%s2798_s25 + $0x350] sm:$0xff] %v378_v42  ;;  %381 = vst [vmem:[%s2798_s25 + $0x358] sm:$0xff] %v380_v43  ;;  %v384_v45 = vld [vmem:[%s2793_s26 + $0x9e8] sm:$0xff]  ;;  %v386_v46 = vld [vmem:[%s2793_s26 + $0x9f0] sm:$0xff] }
  0x57   : > { %383 = vst [vmem:[%s2798_s25 + $0x360] sm:$0xff] %v382_v44  ;;  %385 = vst [vmem:[%s2798_s25 + $0x368] sm:$0xff] %v384_v45  ;;  %v388_v47 = vld [vmem:[%s2793_s26 + $0x9f8] sm:$0xff]  ;;  %v390_v48 = vld [vmem:[%s2793_s26 + $0xa80] sm:$0xff] }
  0x58   : > { %387 = vst [vmem:[%s2798_s25 + $0x370] sm:$0xff] %v386_v46  ;;  %v392_v49 = vld [vmem:[%s2793_s26 + $0xa88] sm:$0xff]  ;;  %389 = vst [vmem:[%s2798_s25 + $0x378] sm:$0xff] %v388_v47  ;;  %v394_v50 = vld [vmem:[%s2793_s26 + $0xa90] sm:$0xff] }
  0x59   : > { %391 = vst [vmem:[%s2798_s25 + $0x380] sm:$0xff] %v390_v48  ;;  %393 = vst [vmem:[%s2798_s25 + $0x388] sm:$0xff] %v392_v49  ;;  %v396_v51 = vld [vmem:[%s2793_s26 + $0xa98] sm:$0xff]  ;;  %v398_v52 = vld [vmem:[%s2793_s26 + $0xaa0] sm:$0xff] }
  0x5a   : > { %395 = vst [vmem:[%s2798_s25 + $0x390] sm:$0xff] %v394_v50  ;;  %397 = vst [vmem:[%s2798_s25 + $0x398] sm:$0xff] %v396_v51  ;;  %v400_v53 = vld [vmem:[%s2793_s26 + $0xaa8] sm:$0xff]  ;;  %v402_v54 = vld [vmem:[%s2793_s26 + $0xab0] sm:$0xff] }
  0x5b   : > { %399 = vst [vmem:[%s2798_s25 + $0x3a0] sm:$0xff] %v398_v52  ;;  %v404_v55 = vld [vmem:[%s2793_s26 + $0xab8] sm:$0xff]  ;;  %401 = vst [vmem:[%s2798_s25 + $0x3a8] sm:$0xff] %v400_v53  ;;  %v406_v56 = vld [vmem:[%s2793_s26 + $0xb40] sm:$0xff] }
  0x5c   : > { %403 = vst [vmem:[%s2798_s25 + $0x3b0] sm:$0xff] %v402_v54  ;;  %405 = vst [vmem:[%s2798_s25 + $0x3b8] sm:$0xff] %v404_v55  ;;  %v408_v57 = vld [vmem:[%s2793_s26 + $0xb48] sm:$0xff]  ;;  %v410_v58 = vld [vmem:[%s2793_s26 + $0xb50] sm:$0xff] }
  0x5d   : > { %407 = vst [vmem:[%s2798_s25 + $0x3c0] sm:$0xff] %v406_v56  ;;  %409 = vst [vmem:[%s2798_s25 + $0x3c8] sm:$0xff] %v408_v57  ;;  %v412_v59 = vld [vmem:[%s2793_s26 + $0xb58] sm:$0xff]  ;;  %v414_v60 = vld [vmem:[%s2793_s26 + $0xb60] sm:$0xff] }
  0x5e   : > { %411 = vst [vmem:[%s2798_s25 + $0x3d0] sm:$0xff] %v410_v58  ;;  %v416_v61 = vld [vmem:[%s2793_s26 + $0xb68] sm:$0xff]  ;;  %413 = vst [vmem:[%s2798_s25 + $0x3d8] sm:$0xff] %v412_v59  ;;  %v418_v62 = vld [vmem:[%s2793_s26 + $0xb70] sm:$0xff] }
  0x5f   : > { %415 = vst [vmem:[%s2798_s25 + $0x3e0] sm:$0xff] %v414_v60  ;;  %417 = vst [vmem:[%s2798_s25 + $0x3e8] sm:$0xff] %v416_v61  ;;  %v420_v63 = vld [vmem:[%s2793_s26 + $0xb78] sm:$0xff] }
  0x60   : > { %419 = vst [vmem:[%s2798_s25 + $0x3f0] sm:$0xff] %v418_v62  ;;  %421 = vst [vmem:[%s2798_s25 + $0x3f8] sm:$0xff] %v420_v63 }
  0x61 PF: > { %p2288_p11 = scmp.ge.s32.totalorder %s2681_s20, 1  ;;  %p426_p12 = scmp.lt.s32.totalorder %s2681_s20, 13 }
  0x63   : > { %p427_p13 = pnand %p2288_p11, %p426_p12 }
  0x64   : > { %s433_s27 = sand.u32 (!%p427_p13), 1, %s2657_s14   ;;  %s452_s28 = sand.u32 (!%p427_p13), 1, %s2649_s12   ;;  %v2683_v0 = vmov (!%p427_p13), 0   ;;  %vm1221_vm0 = vcmask (!%p427_p13), 1045504   ;;  %vm1222_vm1 = vcmask (!%p427_p13), 1046528   ;;  %v2684_v53 = vmov (!%p427_p13), 65535  }
  0x65   : > { %430 = sbr.rel (%p427_p13) target bundleno = 640 (0x280), region = 51  ;;  %s2289_s29 = sshll.u32 (!%p427_p13), %s433_s27, 10  ;;  %1305 = vmatprep.mubr.bf16.mxu0 (!%p427_p13), %v2683_v0  ;;  %1348 = vmatprep.mubr.bf16.mxu1 (!%p427_p13), %v2683_v0  ;;  %v1223_v54 = vsel (!%p427_p13), %vm1221_vm0, 4294967295, %v2684_v53  ;;  %vm1217_vm2 = vcmask (!%p427_p13), 1022976  }
  0x66   : > { %s3057_s6 = sshll.u32 (!%p427_p13), %s452_s28, 7  ;;  %s3061_s7 = scalar_lea.vmem (!%p427_p13), [#allocation2], %s2289_s29  ;;  %v3095_v62 = vsel (!%p427_p13), %vm1222_vm1, %v1223_v54, 0 }
  0x67   : > { %v460_v1 = vld [vmem:[%s3061_s7] sm:$0xff] (!%p427_p13)  ;;  %v461_v3 = vld [vmem:[%s3061_s7 + $0x8] sm:$0xff] (!%p427_p13)  ;;  %v578_v53 = vld [vmem:[%s3061_s7 + $0x3b0] sm:$0xff] (!%p427_p13)  ;;  %s3325_s8 = scalar_lea.vmem (!%p427_p13), [#allocation3], %s3057_s6  ;;  %p2428_p0 = scmp.ne.s32.totalorder (!%p427_p13), %s2665_s16, 0 }
  0x68   : > { %v468_v2 = vld [vmem:[%s3061_s7 + $0x40] sm:$0xff] (!%p427_p13)  ;;  %v469_v5 = vld [vmem:[%s3061_s7 + $0x48] sm:$0xff] (!%p427_p13) }
  0x69   : > { %v2293_v4 = vcombine.high (!%p427_p13), %v460_v1, %v468_v2  ;;  %v2292_v6 = vcombine.low (!%p427_p13), %v460_v1, %v468_v2  ;;  %v476_v7 = vld [vmem:[%s3061_s7 + $0x80] sm:$0xff] (!%p427_p13)  ;;  %v2295_v9 = vcombine.high (!%p427_p13), %v461_v3, %v469_v5  ;;  %v2294_v10 = vcombine.low (!%p427_p13), %v461_v3, %v469_v5  ;;  %v477_v12 = vld [vmem:[%s3061_s7 + $0x88] sm:$0xff] (!%p427_p13) }
  0x6a   : > { %v484_v8 = vld [vmem:[%s3061_s7 + $0xc0] sm:$0xff] (!%p427_p13)  ;;  %v485_v13 = vld [vmem:[%s3061_s7 + $0xc8] sm:$0xff] (!%p427_p13) }
  0x6b   : > { %v2309_v11 = vcombine.high (!%p427_p13), %v476_v7, %v484_v8  ;;  %v492_v14 = vld [vmem:[%s3061_s7 + $0x100] sm:$0xff] (!%p427_p13)  ;;  %1273 = vmatprep.subr.bf16.mxu0 (!%p427_p13), %v2293_v4  ;;  %v2311_v15 = vcombine.high (!%p427_p13), %v477_v12, %v485_v13  ;;  %v493_v17 = vld [vmem:[%s3061_s7 + $0x108] sm:$0xff] (!%p427_p13)  ;;  %1316 = vmatprep.subr.bf16.mxu1 (!%p427_p13), %v2295_v9  ;;  %v2308_v19 = vcombine.low (!%p427_p13), %v476_v7, %v484_v8  ;;  %v462_v7 = vld [vmem:[%s3061_s7 + $0x10] sm:$0xff] (!%p427_p13) }
  0x6c   : > { %v500_v16 = vld [vmem:[%s3061_s7 + $0x140] sm:$0xff]  ;;  %v501_v18 = vld [vmem:[%s3061_s7 + $0x148] sm:$0xff]  ;;  %1274 = vmatpush1.bf16.msra.mxu0 %v2292_v6  ;;  %1317 = vmatpush1.bf16.msra.mxu1 %v2294_v10  ;;  %v2310_v20 = vcombine.low %v477_v12, %v485_v13  ;;  %v470_v8 = vld [vmem:[%s3061_s7 + $0x50] sm:$0xff] }
  0x6d   : > { %1275 = vmatprep.subr.bf16.mxu0 %v2309_v11  ;;  %v2325_v21 = vcombine.high %v492_v14, %v500_v16  ;;  %1318 = vmatprep.subr.bf16.mxu1 %v2311_v15  ;;  %v2327_v22 = vcombine.high %v493_v17, %v501_v18  ;;  %v508_v23 = vld [vmem:[%s3061_s7 + $0x180] sm:$0xff]  ;;  %v509_v25 = vld [vmem:[%s3061_s7 + $0x188] sm:$0xff]  ;;  %v2324_v27 = vcombine.low %v492_v14, %v500_v16  ;;  %v463_v9 = vld [vmem:[%s3061_s7 + $0x18] sm:$0xff] }
  0x6e   : > { %v516_v24 = vld [vmem:[%s3061_s7 + $0x1c0] sm:$0xff]  ;;  %v517_v26 = vld [vmem:[%s3061_s7 + $0x1c8] sm:$0xff]  ;;  %v2326_v28 = vcombine.low %v493_v17, %v501_v18  ;;  %v471_v10 = vld [vmem:[%s3061_s7 + $0x58] sm:$0xff]  ;;  %v2297_v14 = vcombine.high %v462_v7, %v470_v8 }
  0x6f   : > { %v2341_v29 = vcombine.high %v508_v23, %v516_v24  ;;  %v2343_v30 = vcombine.high %v509_v25, %v517_v26  ;;  %v524_v31 = vld [vmem:[%s3061_s7 + $0x200] sm:$0xff]  ;;  %v525_v33 = vld [vmem:[%s3061_s7 + $0x208] sm:$0xff]  ;;  %v2340_v35 = vcombine.low %v508_v23, %v516_v24  ;;  %v2342_v36 = vcombine.low %v509_v25, %v517_v26  ;;  %v478_v15 = vld [vmem:[%s3061_s7 + $0x90] sm:$0xff] }
  0x70   : > { %1276 = vmatpush1.bf16.msra.mxu0 %v2308_v19  ;;  %1319 = vmatpush1.bf16.msra.mxu1 %v2310_v20  ;;  %v532_v32 = vld [vmem:[%s3061_s7 + $0x240] sm:$0xff]  ;;  %v533_v34 = vld [vmem:[%s3061_s7 + $0x248] sm:$0xff]  ;;  %v2299_v16 = vcombine.high %v463_v9, %v471_v10  ;;  %v486_v17 = vld [vmem:[%s3061_s7 + $0xd0] sm:$0xff]  ;;  %v2296_v23 = vcombine.low %v462_v7, %v470_v8  ;;  %v2298_v24 = vcombine.low %v463_v9, %v471_v10 }
  0x71   : > { %1277 = vmatprep.subr.bf16.mxu0 %v2325_v21  ;;  %1320 = vmatprep.subr.bf16.mxu1 %v2327_v22  ;;  %v2357_v37 = vcombine.high %v524_v31, %v532_v32  ;;  %v2359_v38 = vcombine.high %v525_v33, %v533_v34  ;;  %v540_v39 = vld [vmem:[%s3061_s7 + $0x280] sm:$0xff]  ;;  %v541_v41 = vld [vmem:[%s3061_s7 + $0x288] sm:$0xff]  ;;  %v2356_v43 = vcombine.low %v524_v31, %v532_v32  ;;  %v479_v18 = vld [vmem:[%s3061_s7 + $0x98] sm:$0xff] }
  0x72   : > { %v548_v40 = vld [vmem:[%s3061_s7 + $0x2c0] sm:$0xff]  ;;  %v549_v42 = vld [vmem:[%s3061_s7 + $0x2c8] sm:$0xff]  ;;  %v2358_v44 = vcombine.low %v525_v33, %v533_v34  ;;  %v487_v19 = vld [vmem:[%s3061_s7 + $0xd8] sm:$0xff] }
  0x73   : > { %v2373_v45 = vcombine.high %v540_v39, %v548_v40  ;;  %v556_v46 = vld [vmem:[%s3061_s7 + $0x300] sm:$0xff]  ;;  %v2375_v48 = vcombine.high %v541_v41, %v549_v42  ;;  %v557_v49 = vld [vmem:[%s3061_s7 + $0x308] sm:$0xff]  ;;  %v2372_v57 = vcombine.low %v540_v39, %v548_v40  ;;  %v2374_v58 = vcombine.low %v541_v41, %v549_v42  ;;  %v494_v32 = vld [vmem:[%s3061_s7 + $0x110] sm:$0xff] }
  0x74   : > { %1278 = vmatpush1.bf16.msra.mxu0 %v2324_v27  ;;  %1321 = vmatpush1.bf16.msra.mxu1 %v2326_v28  ;;  %v564_v47 = vld [vmem:[%s3061_s7 + $0x340] sm:$0xff]  ;;  %v565_v52 = vld [vmem:[%s3061_s7 + $0x348] sm:$0xff]  ;;  %v2313_v28 = vcombine.high %v478_v15, %v486_v17  ;;  %v2315_v31 = vcombine.high %v479_v18, %v487_v19  ;;  %v502_v33 = vld [vmem:[%s3061_s7 + $0x150] sm:$0xff]  ;;  %v2312_v40 = vcombine.low %v478_v15, %v486_v17 }
  0x75   : > { %1279 = vmatprep.subr.bf16.mxu0 %v2341_v29  ;;  %1322 = vmatprep.subr.bf16.mxu1 %v2343_v30  ;;  %v572_v50 = vld [vmem:[%s3061_s7 + $0x380] sm:$0xff]  ;;  %v573_v55 = vld [vmem:[%s3061_s7 + $0x388] sm:$0xff]  ;;  %v2389_v59 = vcombine.high %v556_v46, %v564_v47  ;;  %v2391_v61 = vcombine.high %v557_v49, %v565_v52  ;;  %v2388_v1 = vcombine.low %v556_v46, %v564_v47  ;;  %v511_v46 = vld [vmem:[%s3061_s7 + $0x198] sm:$0xff] }
  0x76   : > { %v580_v51 = vld [vmem:[%s3061_s7 + $0x3c0] sm:$0x77]  ;;  %v581_v56 = vld [vmem:[%s3061_s7 + $0x3c8] sm:$0x77]  ;;  %v2390_v3 = vcombine.low %v557_v49, %v565_v52  ;;  %v2314_v41 = vcombine.low %v479_v18, %v487_v19  ;;  %v2329_v42 = vcombine.high %v494_v32, %v502_v33  ;;  %v519_v47 = vld [vmem:[%s3061_s7 + $0x1d8] sm:$0xff] }
  0x77   : > { %v2405_v60 = vcombine.high %v572_v50, %v580_v51  ;;  %v2407_v63 = vcombine.high %v573_v55, %v581_v56  ;;  %v2404_v2 = vcombine.low %v572_v50, %v580_v51  ;;  %v2406_v5 = vcombine.low %v573_v55, %v581_v56  ;;  %v3108_v13 = vld [vmem:[%s3589_s0] sm:$0x1f]   ;;  %v577_v22 = vld [vmem:[%s3061_s7 + $0x3a8] sm:$0xff]  ;;  %v526_v51 = vld [vmem:[%s3061_s7 + $0x210] sm:$0xff] }
  0x78   : > { %1280 = vmatpush1.bf16.msra.mxu0 %v2340_v35  ;;  %1323 = vmatpush1.bf16.msra.mxu1 %v2342_v36  ;;  %v576_v20 = vld [vmem:[%s3061_s7 + $0x3a0] sm:$0xff]  ;;  %v585_v27 = vld [vmem:[%s3061_s7 + $0x3e8] sm:$0x77]  ;;  %v495_v36 = vld [vmem:[%s3061_s7 + $0x118] sm:$0xff]  ;;  %v2347_v54 = vcombine.high %v511_v46, %v519_v47 }
  0x79   : > { %1281 = vmatprep.subr.bf16.mxu0 %v2357_v37  ;;  %1324 = vmatprep.subr.bf16.mxu1 %v2359_v38  ;;  %v1229_v4 = vand.u32 %v2405_v60, %v3095_v62  ;;  %v1235_v6 = vand.u32 %v2407_v63, %v3095_v62  ;;  %v1226_v11 = vand.u32 %v2404_v2, %v3095_v62  ;;  %v584_v21 = vld [vmem:[%s3061_s7 + $0x3e0] sm:$0x77]  ;;  %v503_v37 = vld [vmem:[%s3061_s7 + $0x158] sm:$0xff]  ;;  %v534_v52 = vld [vmem:[%s3061_s7 + $0x250] sm:$0xff] }
  0x7a   : > { %v1232_v12 = vand.u32 %v2406_v5, %v3095_v62  ;;  %v2412_v25 = vcombine.low %v576_v20, %v584_v21  ;;  %v2413_v26 = vcombine.high %v576_v20, %v584_v21  ;;  %v2414_v29 = vcombine.low %v577_v22, %v585_v27  ;;  %v586_v55 = vld [vmem:[%s3061_s7 + $0x3f0] sm:$0x77]  ;;  %v579_v56 = vld [vmem:[%s3061_s7 + $0x3b8] sm:$0xff] }
  0x7b   : > { %v2415_v30 = vcombine.high %v577_v22, %v585_v27  ;;  %v2330_v49 = vcombine.low %v495_v36, %v503_v37  ;;  %v2416_v60 = vcombine.low %v578_v53, %v586_v55  ;;  %v542_v9 = vld [vmem:[%s3061_s7 + $0x290] sm:$0xff]  ;;  %v2360_v15 = vcombine.low %v526_v51, %v534_v52  ;;  %v559_v21 = vld [vmem:[%s3061_s7 + $0x318] sm:$0xff] }
  0x7c   : > { %1282 = vmatpush1.bf16.msra.mxu0 %v2356_v43  ;;  %1325 = vmatpush1.bf16.msra.mxu1 %v2358_v44  ;;  %v3121_v34 = vand.u32 %v2413_v26, %v3095_v62  ;;  %v3124_v35 = vand.u32 %v2412_v25, %v3095_v62  ;;  %v3134_v39 = vand.u32 %v2414_v29, %v3095_v62  ;;  %v510_v44 = vld [vmem:[%s3061_s7 + $0x190] sm:$0xff]  ;;  %v575_v25 = vld [vmem:[%s3061_s7 + $0x398] sm:$0xff] }
  0x7d   : > { %1283 = vmatprep.subr.bf16.mxu0 %v2373_v45  ;;  %1326 = vmatprep.subr.bf16.mxu1 %v2375_v48  ;;  %v3131_v38 = vand.u32 %v2415_v30, %v3095_v62  ;;  %v2331_v43 = vcombine.high %v495_v36, %v503_v37  ;;  %v518_v45 = vld [vmem:[%s3061_s7 + $0x1d0] sm:$0xff]  ;;  %v2328_v48 = vcombine.low %v494_v32, %v502_v33  ;;  %v583_v26 = vld [vmem:[%s3061_s7 + $0x3d8] sm:$0x77] }
  0x7e   : > { %v2345_v50 = vcombine.high %v510_v44, %v518_v45  ;;  %v2344_v2 = vcombine.low %v510_v44, %v518_v45  ;;  %v3159_v7 = vand.u32 %v2416_v60, %v3095_v62  ;;  %v550_v10 = vld [vmem:[%s3061_s7 + $0x2d0] sm:$0xff]  ;;  %v2411_v32 = vcombine.high %v575_v25, %v583_v26  ;;  %v472_v44 = vld [vmem:[%s3061_s7 + $0x60] sm:$0xff]  ;;  %v465_v45 = vld [vmem:[%s3061_s7 + $0x28] sm:$0xff] }
  0x7f   : > { %v2377_v17 = vcombine.high %v542_v9, %v550_v10  ;;  %v558_v18 = vld [vmem:[%s3061_s7 + $0x310] sm:$0xff]  ;;  %v2376_v27 = vcombine.low %v542_v9, %v550_v10  ;;  %v497_v60 = vld [vmem:[%s3061_s7 + $0x128] sm:$0xff] }
  0x80   : > { %1284 = vmatpush1.bf16.msra.mxu0 %v2372_v57  ;;  %1327 = vmatpush1.bf16.msra.mxu1 %v2374_v58  ;;  %v587_v57 = vld [vmem:[%s3061_s7 + $0x3f8] sm:$0x77]  ;;  %v566_v19 = vld [vmem:[%s3061_s7 + $0x350] sm:$0xff]  ;;  %v513_v9 = vld [vmem:[%s3061_s7 + $0x1a8] sm:$0xff] }
  0x81   : > { %1285 = vmatprep.subr.bf16.mxu0 %v2389_v59  ;;  %1328 = vmatprep.subr.bf16.mxu1 %v2391_v61  ;;  %v527_v58 = vld [vmem:[%s3061_s7 + $0x218] sm:$0xff]  ;;  %v2417_v61 = vcombine.high %v578_v53, %v586_v55  ;;  %v2418_v63 = vcombine.low %v579_v56, %v587_v57  ;;  %v574_v22 = vld [vmem:[%s3061_s7 + $0x390] sm:$0xff]  ;;  %v2393_v29 = vcombine.high %v558_v18, %v566_v19  ;;  %v481_v53 = vld [vmem:[%s3061_s7 + $0xa8] sm:$0xff] }
  0x82   : > { %v535_v59 = vld [vmem:[%s3061_s7 + $0x258] sm:$0xff]  ;;  %v2392_v33 = vcombine.low %v558_v18, %v566_v19  ;;  %v521_v10 = vld [vmem:[%s3061_s7 + $0x1e8] sm:$0xff]  ;;  %v536_v18 = vld [vmem:[%s3061_s7 + $0x260] sm:$0xff] }
  0x83   : > { %v3153_v5 = vand.u32 %v2417_v61, %v3095_v62  ;;  %v2363_v8 = vcombine.high %v527_v58, %v535_v59  ;;  %v505_v61 = vld [vmem:[%s3061_s7 + $0x168] sm:$0xff] }
  0x84   : > { %1286 = vmatpush1.bf16.msra.mxu0 %v2388_v1  ;;  %1329 = vmatpush1.bf16.msra.mxu1 %v2390_v3  ;;  %v2419_v1 = vcombine.high %v579_v56, %v587_v57  ;;  %v2346_v3 = vcombine.low %v511_v46, %v519_v47  ;;  %v473_v46 = vld [vmem:[%s3061_s7 + $0x68] sm:$0xff] }
  0x85   : > { %1287 = vmatprep.subr.bf16.mxu0 %v1229_v4  ;;  %1330 = vmatprep.subr.bf16.mxu1 %v1235_v6  ;;  %v2361_v4 = vcombine.high %v526_v51, %v534_v52  ;;  %v480_v51 = vld [vmem:[%s3061_s7 + $0xa0] sm:$0xff]  ;;  %v2302_v56 = vcombine.low %v465_v45, %v473_v46  ;;  %v529_v19 = vld [vmem:[%s3061_s7 + $0x228] sm:$0xff] }
  0x86   : > { %v3156_v6 = vand.u32 %v2419_v1, %v3095_v62  ;;  %v488_v52 = vld [vmem:[%s3061_s7 + $0xe0] sm:$0xff] }
  0x87   : > { %v2317_v57 = vcombine.high %v480_v51, %v488_v52 }
  0x88   : > { %1288 = vmatpush1.bf16.msra.mxu0 %v1226_v11  ;;  %1331 = vmatpush1.bf16.msra.mxu1 %v1232_v12  ;;  %v3164_v11 = vand.u32 %v2418_v63, %v3095_v62  ;;  %v543_v12 = vld [vmem:[%s3061_s7 + $0x298] sm:$0xff]  ;;  %v2316_v63 = vcombine.low %v480_v51, %v488_v52 }
  0x89   : > { %1359 = vmatprep.subr.bf16.mxu0 %v2297_v14  ;;  %1402 = vmatprep.subr.bf16.mxu1 %v2299_v16  ;;  %v551_v14 = vld [vmem:[%s3061_s7 + $0x2d8] sm:$0xff]  ;;  %v2362_v16 = vcombine.low %v527_v58, %v535_v59  ;;  %v496_v58 = vld [vmem:[%s3061_s7 + $0x120] sm:$0xff] }
  0x8a   : > { %v2379_v20 = vcombine.high %v543_v12, %v551_v14  ;;  %v504_v59 = vld [vmem:[%s3061_s7 + $0x160] sm:$0xff] }
  0x8b   : > { %2420 = vmatmul.mubr.msk.bf16.vlgmr.msra.gmra.mrb[0].mxu0 %vm1217_vm2, %v3108_v13  ;;  %2421 = vmatmul.mubr.msk.bf16.vlgmr.msra.gmra.mrb[0].mxu1 %vm1217_vm2, %v3108_v13 }
  0x8c   : > { %1360 = vmatpush1.bf16.msra.mxu0 %v2296_v23  ;;  %1403 = vmatpush1.bf16.msra.mxu1 %v2298_v24  ;;  %v582_v23 = vld [vmem:[%s3061_s7 + $0x3d0] sm:$0x77]  ;;  %v567_v24 = vld [vmem:[%s3061_s7 + $0x358] sm:$0xff] }
  0x8d   : > { %1361 = vmatprep.subr.bf16.mxu0 %v2313_v28  ;;  %1404 = vmatprep.subr.bf16.mxu1 %v2315_v31  ;;  %v2378_v28 = vcombine.low %v543_v12, %v551_v14  ;;  %v2409_v30 = vcombine.high %v574_v22, %v582_v23  ;;  %v2395_v31 = vcombine.high %v559_v21, %v567_v24 }
  0x8e   : > { %1391 = vmatprep.mubr.bf16.mxu0 %v2683_v0  ;;  %1434 = vmatprep.mubr.bf16.mxu1 %v2683_v0  ;;  %v2408_v36 = vcombine.low %v574_v22, %v582_v23  ;;  %v2394_v37 = vcombine.low %v559_v21, %v567_v24  ;;  %v2332_v12 = vcombine.low %v496_v58, %v504_v59 }
  0x8f   : > { %v2334_v14 = vcombine.low %v497_v60, %v505_v61  ;;  %v2350_v22 = vcombine.low %v513_v9, %v521_v10 }
  0x90   : > { %1362 = vmatpush1.bf16.msra.mxu0 %v2312_v40  ;;  %1405 = vmatpush1.bf16.msra.mxu1 %v2314_v41  ;;  %v1241_v40 = vand.u32 %v2409_v30, %v3095_v62  ;;  %v2410_v41 = vcombine.low %v575_v25, %v583_v26  ;;  %v1238_v47 = vand.u32 %v2408_v36, %v3095_v62  ;;  %v544_v25 = vld [vmem:[%s3061_s7 + $0x2a0] sm:$0xff] }
  0x91   : > { %1363 = vmatprep.subr.bf16.mxu0 %v2329_v42  ;;  %1406 = vmatprep.subr.bf16.mxu1 %v2331_v43  ;;  %v1247_v42 = vand.u32 %v2411_v32, %v3095_v62  ;;  %v464_v43 = vld [vmem:[%s3061_s7 + $0x20] sm:$0xff] }
  0x92   : > { %v2300_v55 = vcombine.low %v464_v43, %v472_v44  ;;  %v552_v26 = vld [vmem:[%s3061_s7 + $0x2e0] sm:$0xff] }
  0x93   : > { %v568_v36 = vld [vmem:[%s3061_s7 + $0x360] sm:$0xff] }
  0x94   : > { %1364 = vmatpush1.bf16.msra.mxu0 %v2328_v48  ;;  %1407 = vmatpush1.bf16.msra.mxu1 %v2330_v49  ;;  %v1244_v48 = vand.u32 %v2410_v41, %v3095_v62  ;;  %v2301_v49 = vcombine.high %v464_v43, %v472_v44  ;;  %v2380_v41 = vcombine.low %v544_v25, %v552_v26 }
  0x95   : > { %1365 = vmatprep.subr.bf16.mxu0 %v2345_v50  ;;  %1408 = vmatprep.subr.bf16.mxu1 %v2347_v54  ;;  %v2303_v50 = vcombine.high %v465_v45, %v473_v46  ;;  %v489_v54 = vld [vmem:[%s3061_s7 + $0xe8] sm:$0xff] }
  0x96   : > { %v2319_v62 = vcombine.high %v481_v53, %v489_v54  ;;  %v2318_v1 = vcombine.low %v481_v53, %v489_v54  ;;  %v482_v53 = vld [vmem:[%s3061_s7 + $0xb0] sm:$0xff] }
  0x97   : > { %v490_v54 = vld [vmem:[%s3061_s7 + $0xf0] sm:$0xff] }
  0x98   : > { %1366 = vmatpush1.bf16.msra.mxu0 %v2344_v2  ;;  %1409 = vmatpush1.bf16.msra.mxu1 %v2346_v3  ;;  %v2333_v2 = vcombine.high %v496_v58, %v504_v59  ;;  %v2335_v3 = vcombine.high %v497_v60, %v505_v61  ;;  %v506_v59 = vld [vmem:[%s3061_s7 + $0x170] sm:$0xff]  ;;  %v499_v60 = vld [vmem:[%s3061_s7 + $0x138] sm:$0xff] }
  0x99   : > { %1367 = vmatprep.subr.bf16.mxu0 %v2361_v4  ;;  %1410 = vmatprep.subr.bf16.mxu1 %v2363_v8  ;;  %v512_v4 = vld [vmem:[%s3061_s7 + $0x1a0] sm:$0xff]  ;;  %v507_v61 = vld [vmem:[%s3061_s7 + $0x178] sm:$0xff] }
  0x9a   : > { %v520_v8 = vld [vmem:[%s3061_s7 + $0x1e0] sm:$0xff] }
  0x9b   : > { %v2348_v21 = vcombine.low %v512_v4, %v520_v8 }
  0x9c   : > { %1368 = vmatpush1.bf16.msra.mxu0 %v2360_v15  ;;  %1411 = vmatpush1.bf16.msra.mxu1 %v2362_v16  ;;  %v2349_v15 = vcombine.high %v512_v4, %v520_v8  ;;  %v2351_v16 = vcombine.high %v513_v9, %v521_v10  ;;  %v515_v4 = vld [vmem:[%s3061_s7 + $0x1b8] sm:$0xff]  ;;  %v2338_v10 = vcombine.low %v499_v60, %v507_v61 }
  0x9d   : > { %1369 = vmatprep.subr.bf16.mxu0 %v2377_v17  ;;  %1412 = vmatprep.subr.bf16.mxu1 %v2379_v20  ;;  %v528_v17 = vld [vmem:[%s3061_s7 + $0x220] sm:$0xff]  ;;  %v537_v20 = vld [vmem:[%s3061_s7 + $0x268] sm:$0xff]  ;;  %v523_v8 = vld [vmem:[%s3061_s7 + $0x1f8] sm:$0xff] }
  0x9e   : > { %v2365_v23 = vcombine.high %v528_v17, %v536_v18  ;;  %v2367_v24 = vcombine.high %v529_v19, %v537_v20  ;;  %v2366_v30 = vcombine.low %v529_v19, %v537_v20 }
  0xa0   : > { %1370 = vmatpush1.bf16.msra.mxu0 %v2376_v27  ;;  %1413 = vmatpush1.bf16.msra.mxu1 %v2378_v28  ;;  %v545_v27 = vld [vmem:[%s3061_s7 + $0x2a8] sm:$0xff] }
  0xa1   : > { %1371 = vmatprep.subr.bf16.mxu0 %v2393_v29  ;;  %1414 = vmatprep.subr.bf16.mxu1 %v2395_v31  ;;  %v553_v28 = vld [vmem:[%s3061_s7 + $0x2e8] sm:$0xff]  ;;  %v2364_v29 = vcombine.low %v528_v17, %v536_v18  ;;  %v2381_v31 = vcombine.high %v544_v25, %v552_v26  ;;  %v531_v17 = vld [vmem:[%s3061_s7 + $0x238] sm:$0xff] }
  0xa2   : > { %v2383_v32 = vcombine.high %v545_v27, %v553_v28  ;;  %v539_v18 = vld [vmem:[%s3061_s7 + $0x278] sm:$0xff] }
  0xa3   : > { %v555_v25 = vld [vmem:[%s3061_s7 + $0x2f8] sm:$0xff] }
  0xa4   : > { %1372 = vmatpush1.bf16.msra.mxu0 %v2392_v33  ;;  %1415 = vmatpush1.bf16.msra.mxu1 %v2394_v37  ;;  %v560_v33 = vld [vmem:[%s3061_s7 + $0x320] sm:$0xff]  ;;  %v561_v37 = vld [vmem:[%s3061_s7 + $0x328] sm:$0xff] }
  0xa5   : > { %1373 = vmatprep.subr.bf16.mxu0 %v1241_v40  ;;  %1416 = vmatprep.subr.bf16.mxu1 %v1247_v42  ;;  %v569_v40 = vld [vmem:[%s3061_s7 + $0x368] sm:$0xff]  ;;  %v2382_v42 = vcombine.low %v545_v27, %v553_v28  ;;  %v2397_v43 = vcombine.high %v560_v33, %v568_v36  ;;  %v2396_v45 = vcombine.low %v560_v33, %v568_v36  ;;  %v571_v33 = vld [vmem:[%s3061_s7 + $0x378] sm:$0xff] }
  0xa6   : > { %v2399_v44 = vcombine.high %v561_v37, %v569_v40  ;;  %v2398_v46 = vcombine.low %v561_v37, %v569_v40  ;;  %v2370_v27 = vcombine.low %v531_v17, %v539_v18 }
  0xa8   : > { %1374 = vmatpush1.bf16.msra.mxu0 %v1238_v47  ;;  %1417 = vmatpush1.bf16.msra.mxu1 %v1244_v48  ;;  %v466_v47 = vld [vmem:[%s3061_s7 + $0x30] sm:$0xff] }
  0xa9   : > { %1445 = vmatprep.subr.bf16.mxu0 %v2301_v49  ;;  %1488 = vmatprep.subr.bf16.mxu1 %v2303_v50  ;;  %v474_v48 = vld [vmem:[%s3061_s7 + $0x70] sm:$0xff]  ;;  %v467_v49 = vld [vmem:[%s3061_s7 + $0x38] sm:$0xff] }
  0xaa   : > { %v475_v50 = vld [vmem:[%s3061_s7 + $0x78] sm:$0xff]  ;;  %v2305_v51 = vcombine.high %v466_v47, %v474_v48 }
  0xab   : > { %2422 = vmatmul.mubr.msk.bf16.vlgmr.msra.gmra.mrb[4].mxu0 %vm1217_vm2, %v3108_v13  ;;  %2423 = vmatmul.mubr.msk.bf16.vlgmr.msra.gmra.mrb[4].mxu1 %vm1217_vm2, %v3108_v13  ;;  %v2307_v52 = vcombine.high %v467_v49, %v475_v50 }
  0xac   : > { %1446 = vmatpush1.bf16.msra.mxu0 %v2300_v55  ;;  %1489 = vmatpush1.bf16.msra.mxu1 %v2302_v56  ;;  %v483_v55 = vld [vmem:[%s3061_s7 + $0xb8] sm:$0xff] }
  0xad   : > { %1447 = vmatprep.subr.bf16.mxu0 %v2317_v57  ;;  %1490 = vmatprep.subr.bf16.mxu1 %v2319_v62  ;;  %v491_v56 = vld [vmem:[%s3061_s7 + $0xf8] sm:$0xff]  ;;  %v2304_v57 = vcombine.low %v466_v47, %v474_v48  ;;  %v2306_v62 = vcombine.low %v467_v49, %v475_v50 }
  0xae   : > { %1477 = vmatprep.mubr.bf16.mxu0 %v2683_v0  ;;  %1520 = vmatprep.mubr.bf16.mxu1 %v2683_v0  ;;  %v2323_v58 = vcombine.high %v483_v55, %v491_v56 }
  0xb0   : > { %1448 = vmatpush1.bf16.msra.mxu0 %v2316_v63  ;;  %1491 = vmatpush1.bf16.msra.mxu1 %v2318_v1  ;;  %v2339_v1 = vcombine.high %v499_v60, %v507_v61 }
  0xb1   : > { %1449 = vmatprep.subr.bf16.mxu0 %v2333_v2  ;;  %1492 = vmatprep.subr.bf16.mxu1 %v2335_v3  ;;  %v514_v2 = vld [vmem:[%s3061_s7 + $0x1b0] sm:$0xff] }
  0xb2   : > { %v522_v3 = vld [vmem:[%s3061_s7 + $0x1f0] sm:$0xff] }
  0xb3   : > { %v2352_v19 = vcombine.low %v514_v2, %v522_v3 }
  0xb4   : > { %1450 = vmatpush1.bf16.msra.mxu0 %v2332_v12  ;;  %1493 = vmatpush1.bf16.msra.mxu1 %v2334_v14  ;;  %v2353_v12 = vcombine.high %v514_v2, %v522_v3  ;;  %v2355_v14 = vcombine.high %v515_v4, %v523_v8 }
  0xb5   : > { %1451 = vmatprep.subr.bf16.mxu0 %v2349_v15  ;;  %1494 = vmatprep.subr.bf16.mxu1 %v2351_v16  ;;  %v530_v15 = vld [vmem:[%s3061_s7 + $0x230] sm:$0xff] }
  0xb6   : > { %v538_v16 = vld [vmem:[%s3061_s7 + $0x270] sm:$0xff] }
  0xb7   : > { %v2369_v20 = vcombine.high %v530_v15, %v538_v16  ;;  %v2368_v26 = vcombine.low %v530_v15, %v538_v16 }
  0xb8   : > { %1452 = vmatpush1.bf16.msra.mxu0 %v2348_v21  ;;  %1495 = vmatpush1.bf16.msra.mxu1 %v2350_v22  ;;  %v2371_v21 = vcombine.high %v531_v17, %v539_v18  ;;  %v546_v22 = vld [vmem:[%s3061_s7 + $0x2b0] sm:$0xff] }
  0xb9   : > { %1453 = vmatprep.subr.bf16.mxu0 %v2365_v23  ;;  %1496 = vmatprep.subr.bf16.mxu1 %v2367_v24  ;;  %v554_v23 = vld [vmem:[%s3061_s7 + $0x2f0] sm:$0xff]  ;;  %v547_v24 = vld [vmem:[%s3061_s7 + $0x2b8] sm:$0xff] }
  0xba   : > { %v2385_v28 = vcombine.high %v546_v22, %v554_v23  ;;  %v2384_v36 = vcombine.low %v546_v22, %v554_v23  ;;  %v2386_v37 = vcombine.low %v547_v24, %v555_v25 }
  0xbc   : > { %1454 = vmatpush1.bf16.msra.mxu0 %v2364_v29  ;;  %1497 = vmatpush1.bf16.msra.mxu1 %v2366_v30  ;;  %v2387_v29 = vcombine.high %v547_v24, %v555_v25  ;;  %v562_v30 = vld [vmem:[%s3061_s7 + $0x330] sm:$0xff] }
  0xbd   : > { %1455 = vmatprep.subr.bf16.mxu0 %v2381_v31  ;;  %1498 = vmatprep.subr.bf16.mxu1 %v2383_v32  ;;  %v570_v31 = vld [vmem:[%s3061_s7 + $0x370] sm:$0xff]  ;;  %v563_v32 = vld [vmem:[%s3061_s7 + $0x338] sm:$0xff] }
  0xbe   : > { %v2401_v40 = vcombine.high %v562_v30, %v570_v31 }
  0xc0   : > { %1456 = vmatpush1.bf16.msra.mxu0 %v2380_v41  ;;  %1499 = vmatpush1.bf16.msra.mxu1 %v2382_v42  ;;  %v2403_v41 = vcombine.high %v563_v32, %v571_v33  ;;  %v2400_v42 = vcombine.low %v562_v30, %v570_v31 }
  0xc1   : > { %1457 = vmatprep.subr.bf16.mxu0 %v2397_v43  ;;  %1500 = vmatprep.subr.bf16.mxu1 %v2399_v44  ;;  %v2402_v43 = vcombine.low %v563_v32, %v571_v33 }
  0xc4   : > { %1458 = vmatpush1.bf16.msra.mxu0 %v2396_v45  ;;  %1501 = vmatpush1.bf16.msra.mxu1 %v2398_v46 }
  0xc5   : > { %1459 = vmatprep.subr.bf16.mxu0 %v3121_v34  ;;  %1502 = vmatprep.subr.bf16.mxu1 %v3131_v38  ;;  %v2321_v34 = vcombine.high %v482_v53, %v490_v54  ;;  %v498_v38 = vld [vmem:[%s3061_s7 + $0x130] sm:$0xff] }
  0xc6   : > { %v2337_v63 = vcombine.high %v498_v38, %v506_v59  ;;  %v2336_v9 = vcombine.low %v498_v38, %v506_v59 }
  0xc8   : > { %1460 = vmatpush1.bf16.msra.mxu0 %v3124_v35  ;;  %1503 = vmatpush1.bf16.msra.mxu1 %v3134_v39  ;;  %v2320_v35 = vcombine.low %v482_v53, %v490_v54  ;;  %v2322_v39 = vcombine.low %v483_v55, %v491_v56 }
  0xc9   : > { %1531 = vmatprep.subr.bf16.mxu0 %v2305_v51  ;;  %1574 = vmatprep.subr.bf16.mxu1 %v2307_v52 }
  0xcb   : > { %2424 = vmatmul.mubr.msk.bf16.vlgmr.msra.gmra.mrb[8].mxu0 %vm1217_vm2, %v3108_v13  ;;  %2425 = vmatmul.mubr.msk.bf16.vlgmr.msra.gmra.mrb[8].mxu1 %vm1217_vm2, %v3108_v13 }
  0xcc   : > { %1532 = vmatpush1.bf16.msra.mxu0 %v2304_v57  ;;  %1575 = vmatpush1.bf16.msra.mxu1 %v2306_v62 }
  0xcd   : > { %1533 = vmatprep.subr.bf16.mxu0 %v2321_v34  ;;  %1576 = vmatprep.subr.bf16.mxu1 %v2323_v58 }
  0xce   : > { %1563 = vmatprep.mubr.bf16.mxu0 %v2683_v0  ;;  %1606 = vmatprep.mubr.bf16.mxu1 %v2683_v0  ;;  %v2354_v0 = vcombine.low %v515_v4, %v523_v8 }
  0xd0   : > { %1534 = vmatpush1.bf16.msra.mxu0 %v2320_v35  ;;  %1577 = vmatpush1.bf16.msra.mxu1 %v2322_v39 }
  0xd1   : > { %1535 = vmatprep.subr.bf16.mxu0 %v2337_v63  ;;  %1578 = vmatprep.subr.bf16.mxu1 %v2339_v1 }
  0xd4   : > { %1536 = vmatpush1.bf16.msra.mxu0 %v2336_v9  ;;  %1579 = vmatpush1.bf16.msra.mxu1 %v2338_v10 }
  0xd5   : > { %1537 = vmatprep.subr.bf16.mxu0 %v2353_v12  ;;  %1580 = vmatprep.subr.bf16.mxu1 %v2355_v14 }
  0xd8   : > { %1538 = vmatpush1.bf16.msra.mxu0 %v2352_v19  ;;  %1581 = vmatpush1.bf16.msra.mxu1 %v2354_v0 }
  0xd9   : > { %1539 = vmatprep.subr.bf16.mxu0 %v2369_v20  ;;  %1582 = vmatprep.subr.bf16.mxu1 %v2371_v21 }
  0xdc   : > { %1540 = vmatpush1.bf16.msra.mxu0 %v2368_v26  ;;  %1583 = vmatpush1.bf16.msra.mxu1 %v2370_v27 }
  0xdd   : > { %1541 = vmatprep.subr.bf16.mxu0 %v2385_v28  ;;  %1584 = vmatprep.subr.bf16.mxu1 %v2387_v29 }
  0xe0   : > { %1542 = vmatpush1.bf16.msra.mxu0 %v2384_v36  ;;  %1585 = vmatpush1.bf16.msra.mxu1 %v2386_v37 }
  0xe1   : > { %1543 = vmatprep.subr.bf16.mxu0 %v2401_v40  ;;  %1586 = vmatprep.subr.bf16.mxu1 %v2403_v41 }
  0xe4   : > { %1544 = vmatpush1.bf16.msra.mxu0 %v2400_v42  ;;  %1587 = vmatpush1.bf16.msra.mxu1 %v2402_v43 }
  0xe5   : > { %1545 = vmatprep.subr.bf16.mxu0 %v3153_v5  ;;  %1588 = vmatprep.subr.bf16.mxu1 %v3156_v6 }
  0xe8   : > { %1546 = vmatpush1.bf16.msra.mxu0 %v3159_v7  ;;  %1589 = vmatpush1.bf16.msra.mxu1 %v3164_v11 }
  0xeb   : > { %2426 = vmatmul.mubr.msk.bf16.vlgmr.msra.gmra.mrb[12].mxu0 %vm1217_vm2, %v3108_v13  ;;  %2427 = vmatmul.mubr.msk.bf16.vlgmr.msra.gmra.mrb[12].mxu1 %vm1217_vm2, %v3108_v13 }
 0x15e   : > { %v3260_v44 = vpop.f32.mrb[0].mxu0  ;;  %v3262_v45 = vpop.f32.mrb[0].mxu1 }
 0x15f   : > { %v3264_v46 = vpop.f32.mrb[1].mxu0  ;;  %v3266_v47 = vpop.f32.mrb[1].mxu1 }
 0x160   : > { %v3268_v5 = vpop.f32.mrb[2].mxu0  ;;  %v3270_v6 = vpop.f32.mrb[2].mxu1  ;;  %v2484_v4 = vpack.c.bf16 (!%p2428_p0), %v3264_v46, %v3260_v44  ;;  %v2485_v8 = vpack.c.bf16 (!%p2428_p0), %v3266_v47, %v3262_v45 }
 0x161   : > { %v3272_v7 = vpop.f32.mrb[3].mxu0  ;;  %v3274_v11 = vpop.f32.mrb[3].mxu1 }
 0x162   : > { %1717 = vst [vmem:[%s3325_s8] sm:$0xff] (!%p2428_p0), %v2484_v4  ;;  %1718 = vst [vmem:[%s3325_s8 + $0x8] sm:$0xff] (!%p2428_p0), %v2485_v8  ;;  %v2492_v17 = vpack.c.bf16 (!%p2428_p0), %v3272_v7, %v3268_v5  ;;  %v2493_v18 = vpack.c.bf16 (!%p2428_p0), %v3274_v11, %v3270_v6 }
 0x164   : > { %1725 = vst [vmem:[%s3325_s8 + $0x40] sm:$0x11] (!%p2428_p0), %v2492_v17  ;;  %1726 = vst [vmem:[%s3325_s8 + $0x48] sm:$0x11] (!%p2428_p0), %v2493_v18 }
 0x17e   : > { %v3276_v48 = vpop.f32.mrb[4].mxu0  ;;  %v3278_v49 = vpop.f32.mrb[4].mxu1 }
 0x17f   : > { %v3280_v13 = vpop.f32.mrb[5].mxu0  ;;  %v3282_v50 = vpop.f32.mrb[5].mxu1 }
 0x180   : > { %v3284_v51 = vpop.f32.mrb[6].mxu0  ;;  %v3286_v52 = vpop.f32.mrb[6].mxu1  ;;  %v2486_v9 = vpack.c.bf16 (!%p2428_p0), %v3280_v13, %v3276_v48  ;;  %v2487_v10 = vpack.c.bf16 (!%p2428_p0), %v3282_v50, %v3278_v49 }
 0x181   : > { %v3288_v53 = vpop.f32.mrb[7].mxu0  ;;  %v3290_v54 = vpop.f32.mrb[7].mxu1 }
 0x182   : > { %1719 = vst [vmem:[%s3325_s8 + $0x10] sm:$0xff] (!%p2428_p0), %v2486_v9  ;;  %1720 = vst [vmem:[%s3325_s8 + $0x18] sm:$0xff] (!%p2428_p0), %v2487_v10  ;;  %v2494_v19 = vpack.c.bf16 (!%p2428_p0), %v3288_v53, %v3284_v51  ;;  %v2495_v0 = vpack.c.bf16 (!%p2428_p0), %v3290_v54, %v3286_v52 }
 0x184   : > { %1727 = vst [vmem:[%s3325_s8 + $0x50] sm:$0x11] (!%p2428_p0), %v2494_v19  ;;  %1728 = vst [vmem:[%s3325_s8 + $0x58] sm:$0x11] (!%p2428_p0), %v2495_v0 }
 0x19e   : > { %v3292_v55 = vpop.f32.mrb[8].mxu0  ;;  %v3294_v56 = vpop.f32.mrb[8].mxu1 }
 0x19f   : > { %v3296_v57 = vpop.f32.mrb[9].mxu0  ;;  %v3298_v62 = vpop.f32.mrb[9].mxu1 }
 0x1a0   : > { %v3300_v34 = vpop.f32.mrb[10].mxu0  ;;  %v3302_v58 = vpop.f32.mrb[10].mxu1  ;;  %v2488_v12 = vpack.c.bf16 (!%p2428_p0), %v3296_v57, %v3292_v55  ;;  %v2489_v14 = vpack.c.bf16 (!%p2428_p0), %v3298_v62, %v3294_v56 }
 0x1a1   : > { %v3304_v38 = vpop.f32.mrb[11].mxu0  ;;  %v3306_v59 = vpop.f32.mrb[11].mxu1 }
 0x1a2   : > { %1721 = vst [vmem:[%s3325_s8 + $0x20] sm:$0xff] (!%p2428_p0), %v2488_v12  ;;  %1722 = vst [vmem:[%s3325_s8 + $0x28] sm:$0xff] (!%p2428_p0), %v2489_v14  ;;  %v2496_v20 = vpack.c.bf16 (!%p2428_p0), %v3304_v38, %v3300_v34  ;;  %v2497_v21 = vpack.c.bf16 (!%p2428_p0), %v3306_v59, %v3302_v58 }
 0x1a4   : > { %1729 = vst [vmem:[%s3325_s8 + $0x60] sm:$0x11] (!%p2428_p0), %v2496_v20  ;;  %1730 = vst [vmem:[%s3325_s8 + $0x68] sm:$0x11] (!%p2428_p0), %v2497_v21 }
 0x1bb   : > { %1620 = sbr.rel (%p2428_p0) target bundleno = 453 (0x1c5), region = 59 }
 0x1be   : > { %v3308_v60 = vpop.f32.mrb[12].mxu0  ;;  %v3310_v61 = vpop.f32.mrb[12].mxu1 }
 0x1bf   : > { %v3312_v35 = vpop.f32.mrb[13].mxu0  ;;  %v3314_v39 = vpop.f32.mrb[13].mxu1 }
 0x1c0   : > { %v3316_v63 = vpop.f32.mrb[14].mxu0  ;;  %v3318_v1 = vpop.f32.mrb[14].mxu1  ;;  %v2490_v15 = vpack.c.bf16 (!%p2428_p0), %v3312_v35, %v3308_v60  ;;  %v2491_v16 = vpack.c.bf16 (!%p2428_p0), %v3314_v39, %v3310_v61 }
 0x1c1   : > { %v3320_v2 = vpop.f32.mrb[15].mxu0  ;;  %v3322_v3 = vpop.f32.mrb[15].mxu1 }
 0x1c2   : > { %1723 = vst [vmem:[%s3325_s8 + $0x30] sm:$0xff] %v2490_v15  ;;  %1724 = vst [vmem:[%s3325_s8 + $0x38] sm:$0xff] %v2491_v16  ;;  %v2498_v22 = vpack.c.bf16 %v3320_v2, %v3316_v63  ;;  %v2499_v23 = vpack.c.bf16 %v3322_v3, %v3318_v1 }
 0x1c4   : > { %1731 = vst [vmem:[%s3325_s8 + $0x70] sm:$0x11] %v2498_v22  ;;  %1732 = vst [vmem:[%s3325_s8 + $0x78] sm:$0x11] %v2499_v23 }
 0x1c5 PF: > { %p2445_p1 = scmp.le.s32.totalorder %s2665_s16, 0 }
 0x1c6   : > { %v1737_v24 = vld [vmem:[%s3325_s8] sm:$0xff] (!%p2445_p1)  ;;  %v2500_v25 = vpack.c.bf16 (!%p2445_p1), %v3264_v46, %v3260_v44  ;;  %v1738_v26 = vld [vmem:[%s3325_s8 + $0x8] sm:$0xff] (!%p2445_p1)  ;;  %v2501_v27 = vpack.c.bf16 (!%p2445_p1), %v3266_v47, %v3262_v45  ;;  %v1739_v28 = vld [vmem:[%s3325_s8 + $0x10] sm:$0xff] (!%p2445_p1)  ;;  %v2502_v29 = vpack.c.bf16 (!%p2445_p1), %v3280_v13, %v3276_v48  ;;  %v2503_v30 = vpack.c.bf16 (!%p2445_p1), %v3282_v50, %v3278_v49 }
 0x1c7   : > { %1736 = sbr.rel (%p2445_p1) target bundleno = 467 (0x1d3), region = 63  ;;  %v1740_v31 = vld [vmem:[%s3325_s8 + $0x18] sm:$0xff] (!%p2445_p1)  ;;  %v1741_v32 = vld [vmem:[%s3325_s8 + $0x20] sm:$0xff] (!%p2445_p1)  ;;  %v2504_v33 = vpack.c.bf16 (!%p2445_p1), %v3296_v57, %v3292_v55  ;;  %v1742_v36 = vld [vmem:[%s3325_s8 + $0x28] sm:$0xff] (!%p2445_p1)  ;;  %v2505_v37 = vpack.c.bf16 (!%p2445_p1), %v3298_v62, %v3294_v56  ;;  %v2506_v40 = vpack.c.bf16 (!%p2445_p1), %v3312_v35, %v3308_v60  ;;  %v2507_v41 = vpack.c.bf16 (!%p2445_p1), %v3314_v39, %v3310_v61 }
 0x1c8   : > { %v1849_v42 = vmax.bf16 (!%p2445_p1), %v2500_v25, %v1737_v24  ;;  %v1850_v43 = vmax.bf16 (!%p2445_p1), %v2501_v27, %v1738_v26  ;;  %v1851_v44 = vmax.bf16 (!%p2445_p1), %v2502_v29, %v1739_v28  ;;  %v1852_v45 = vmax.bf16 (!%p2445_p1), %v2503_v30, %v1740_v31  ;;  %v1745_v48 = vld [vmem:[%s3325_s8 + $0x40] sm:$0x11] (!%p2445_p1)  ;;  %v1746_v56 = vld [vmem:[%s3325_s8 + $0x48] sm:$0x11] (!%p2445_p1)  ;;  %v1747_v57 = vld [vmem:[%s3325_s8 + $0x50] sm:$0x11] (!%p2445_p1) }
 0x1c9   : > { %v1853_v49 = vmax.bf16 (!%p2445_p1), %v2504_v33, %v1741_v32  ;;  %v1854_v13 = vmax.bf16 (!%p2445_p1), %v2505_v37, %v1742_v36  ;;  %v1748_v62 = vld [vmem:[%s3325_s8 + $0x58] sm:$0x11] (!%p2445_p1)  ;;  %v2508_v60 = vpack.c.bf16 (!%p2445_p1), %v3272_v7, %v3268_v5  ;;  %v2509_v61 = vpack.c.bf16 (!%p2445_p1), %v3274_v11, %v3270_v6  ;;  %v1749_v4 = vld [vmem:[%s3325_s8 + $0x60] sm:$0x11] (!%p2445_p1)  ;;  %v1750_v8 = vld [vmem:[%s3325_s8 + $0x68] sm:$0x11] (!%p2445_p1) }
 0x1ca   : > { %1865 = vst [vmem:[%s3325_s8] sm:$0xff] (!%p2445_p1), %v1849_v42  ;;  %1866 = vst [vmem:[%s3325_s8 + $0x8] sm:$0xff] (!%p2445_p1), %v1850_v43  ;;  %v2510_v35 = vpack.c.bf16 (!%p2445_p1), %v3288_v53, %v3284_v51  ;;  %v2511_v39 = vpack.c.bf16 (!%p2445_p1), %v3290_v54, %v3286_v52  ;;  %v2512_v5 = vpack.c.bf16 (!%p2445_p1), %v3304_v38, %v3300_v34 }
 0x1cb   : > { %1867 = vst [vmem:[%s3325_s8 + $0x10] sm:$0xff] (!%p2445_p1), %v1851_v44  ;;  %1868 = vst [vmem:[%s3325_s8 + $0x18] sm:$0xff] (!%p2445_p1), %v1852_v45  ;;  %v1751_v9 = vld [vmem:[%s3325_s8 + $0x70] sm:$0x11] (!%p2445_p1)  ;;  %v2513_v6 = vpack.c.bf16 (!%p2445_p1), %v3306_v59, %v3302_v58  ;;  %v2514_v7 = vpack.c.bf16 (!%p2445_p1), %v3320_v2, %v3316_v63  ;;  %v1752_v11 = vld [vmem:[%s3325_s8 + $0x78] sm:$0x11] (!%p2445_p1)  ;;  %v2515_v51 = vpack.c.bf16 (!%p2445_p1), %v3322_v3, %v3318_v1 }
 0x1cc   : > { %v1743_v46 = vld [vmem:[%s3325_s8 + $0x30] sm:$0xff] (!%p2445_p1)  ;;  %v1744_v47 = vld [vmem:[%s3325_s8 + $0x38] sm:$0xff] (!%p2445_p1)  ;;  %1869 = vst [vmem:[%s3325_s8 + $0x20] sm:$0xff] (!%p2445_p1), %v1853_v49  ;;  %1870 = vst [vmem:[%s3325_s8 + $0x28] sm:$0xff] (!%p2445_p1), %v1854_v13  ;;  %v1857_v52 = vmax.bf16 (!%p2445_p1), %v2508_v60, %v1745_v48  ;;  %v1858_v53 = vmax.bf16 (!%p2445_p1), %v2509_v61, %v1746_v56  ;;  %v1859_v54 = vmax.bf16 (!%p2445_p1), %v2510_v35, %v1747_v57 }
 0x1cd   : > { %v1855_v50 = vmax.bf16 (!%p2445_p1), %v2506_v40, %v1743_v46  ;;  %v1856_v55 = vmax.bf16 (!%p2445_p1), %v2507_v41, %v1744_v47  ;;  %v1860_v10 = vmax.bf16 (!%p2445_p1), %v2511_v39, %v1748_v62  ;;  %v1861_v34 = vmax.bf16 (!%p2445_p1), %v2512_v5, %v1749_v4 }
 0x1ce   : > { %v1862_v38 = vmax.bf16 %v2513_v6, %v1750_v8  ;;  %v1863_v12 = vmax.bf16 %v2514_v7, %v1751_v9  ;;  %v1864_v14 = vmax.bf16 %v2515_v51, %v1752_v11  ;;  %1873 = vst [vmem:[%s3325_s8 + $0x40] sm:$0x11] %v1857_v52  ;;  %1874 = vst [vmem:[%s3325_s8 + $0x48] sm:$0x11] %v1858_v53 }
 0x1cf   : > { %1871 = vst [vmem:[%s3325_s8 + $0x30] sm:$0xff] %v1855_v50  ;;  %1872 = vst [vmem:[%s3325_s8 + $0x38] sm:$0xff] %v1856_v55 }
 0x1d0   : > { %1875 = vst [vmem:[%s3325_s8 + $0x50] sm:$0x11] %v1859_v54  ;;  %1876 = vst [vmem:[%s3325_s8 + $0x58] sm:$0x11] %v1860_v10 }
 0x1d1   : > { %1877 = vst [vmem:[%s3325_s8 + $0x60] sm:$0x11] %v1861_v34  ;;  %1878 = vst [vmem:[%s3325_s8 + $0x68] sm:$0x11] %v1862_v38 }
 0x1d2   : > { %1879 = vst [vmem:[%s3325_s8 + $0x70] sm:$0x11] %v1863_v12  ;;  %1880 = vst [vmem:[%s3325_s8 + $0x78] sm:$0x11] %v1864_v14 }
 0x1d3 PF: > { %p2462_p2 = scmp.ne.s32.totalorder %s2665_s16, 3 }
 0x1d4   : > { %v1933_v58 = vld [vmem:[%s3591_s2] sm:$0xff] (!%p2462_p2)  ;;  %v2685_v59 = vmov (!%p2462_p2), 0   ;;  %v1934_v63 = vld [vmem:[%s3591_s2 + $0x8] sm:$0x3] (!%p2462_p2) }
 0x1d5   : > { %1884 = sbr.rel (%p2462_p2) target bundleno = 630 (0x276), region = 67  ;;  %2610 = vset.pattern.permute.xlu0 (!%p2462_p2), %v2685_v59 }
 0x1d6   : > { %1937 = vperm.xlu0 (!%p2462_p2), %2610, %v1933_v58   ;;  %v1885_v1 = vld [vmem:[%s3325_s8] sm:$0xff] (!%p2462_p2)  ;;  %v1886_v2 = vld [vmem:[%s3325_s8 + $0x8] sm:$0xff] (!%p2462_p2)  ;;  %v1891_v18 = vld [vmem:[%s3325_s8 + $0x30] sm:$0xff] (!%p2462_p2) }
 0x1d7   : > { %v1887_v3 = vld [vmem:[%s3325_s8 + $0x10] sm:$0xff] (!%p2462_p2)  ;;  %v1888_v15 = vld [vmem:[%s3325_s8 + $0x18] sm:$0xff] (!%p2462_p2)  ;;  %v1901_v0 = vunpack.c.l.bf16 (!%p2462_p2), %v1885_v1  ;;  %v1902_v20 = vunpack.c.h.bf16 (!%p2462_p2), %v1885_v1  ;;  %v1903_v21 = vunpack.c.l.bf16 (!%p2462_p2), %v1886_v2  ;;  %v1904_v22 = vunpack.c.h.bf16 (!%p2462_p2), %v1886_v2 }
 0x1d8   : > { %v1889_v16 = vld [vmem:[%s3325_s8 + $0x20] sm:$0xff] (!%p2462_p2)  ;;  %v1890_v17 = vld [vmem:[%s3325_s8 + $0x28] sm:$0xff] (!%p2462_p2)  ;;  %v1892_v19 = vld [vmem:[%s3325_s8 + $0x38] sm:$0xff] (!%p2462_p2)  ;;  %v1905_v23 = vunpack.c.l.bf16 (!%p2462_p2), %v1887_v3  ;;  %v1906_v24 = vunpack.c.h.bf16 (!%p2462_p2), %v1887_v3  ;;  %v1907_v25 = vunpack.c.l.bf16 (!%p2462_p2), %v1888_v15  ;;  %v1908_v26 = vunpack.c.h.bf16 (!%p2462_p2), %v1888_v15 }
 0x1d9   : > { %v1909_v29 = vunpack.c.l.bf16 (!%p2462_p2), %v1889_v16  ;;  %v1910_v30 = vunpack.c.h.bf16 (!%p2462_p2), %v1889_v16  ;;  %v1911_v31 = vunpack.c.l.bf16 (!%p2462_p2), %v1890_v17  ;;  %v1912_v32 = vunpack.c.h.bf16 (!%p2462_p2), %v1890_v17  ;;  %v3463_v33 = vld [vmem:[%s3325_s8 + $0x50] sm:$0x11] (!%p2462_p2)  ;;  %v3466_v36 = vld [vmem:[%s3325_s8 + $0x58] sm:$0x11] (!%p2462_p2)  ;;  %v3469_v43 = vld [vmem:[%s3325_s8 + $0x60] sm:$0x11] (!%p2462_p2) }
 0x1da   : > { %1942 = vperm.xlu0 (!%p2462_p2), %2610, %v1934_v63   ;;  %v3457_v27 = vld [vmem:[%s3325_s8 + $0x40] sm:$0x11] (!%p2462_p2)  ;;  %v3460_v28 = vld [vmem:[%s3325_s8 + $0x48] sm:$0x11] (!%p2462_p2)  ;;  %v1913_v37 = vunpack.c.l.bf16 (!%p2462_p2), %v1891_v18  ;;  %v1914_v40 = vunpack.c.h.bf16 (!%p2462_p2), %v1891_v18  ;;  %v1915_v41 = vunpack.c.l.bf16 (!%p2462_p2), %v1892_v19  ;;  %v1916_v42 = vunpack.c.h.bf16 (!%p2462_p2), %v1892_v19  ;;  %v3475_v45 = vld [vmem:[%s3325_s8 + $0x70] sm:$0x11] (!%p2462_p2) }
 0x1db   : > { %v3472_v44 = vld [vmem:[%s3325_s8 + $0x68] sm:$0x11] (!%p2462_p2)  ;;  %v3478_v46 = vld [vmem:[%s3325_s8 + $0x78] sm:$0x11] (!%p2462_p2)  ;;  %v1917_v47 = vunpack.c.l.bf16 (!%p2462_p2), %v3457_v27  ;;  %v1918_v48 = vunpack.c.h.bf16 (!%p2462_p2), %v3457_v27  ;;  %v1919_v49 = vunpack.c.l.bf16 (!%p2462_p2), %v3460_v28  ;;  %v1920_v13 = vunpack.c.h.bf16 (!%p2462_p2), %v3460_v28 }
 0x1dc   : > { %v1921_v50 = vunpack.c.l.bf16 %v3463_v33  ;;  %v1922_v55 = vunpack.c.h.bf16 %v3463_v33  ;;  %v1923_v56 = vunpack.c.l.bf16 %v3466_v36  ;;  %v1924_v57 = vunpack.c.h.bf16 %v3466_v36 }
 0x1dd   : > { %v1925_v62 = vunpack.c.l.bf16 %v3469_v43  ;;  %v1926_v60 = vunpack.c.h.bf16 %v3469_v43  ;;  %v1927_v61 = vunpack.c.l.bf16 %v3472_v44  ;;  %v1928_v35 = vunpack.c.h.bf16 %v3472_v44 }
 0x1de   : > { %v1929_v4 = vunpack.c.l.bf16 %v3475_v45  ;;  %v1930_v8 = vunpack.c.h.bf16 %v3475_v45  ;;  %v1931_v9 = vunpack.c.l.bf16 %v3478_v46  ;;  %v1932_v5 = vunpack.c.h.bf16 %v3478_v46 }
 0x255   : > { %v1938_v39 = vpop.permute.xlu0 %1937 }
 0x256   : > { %v1945_v6 = vadd.f32 %v1938_v39, %v1901_v0  ;;  %v1946_v7 = vadd.f32 %v1938_v39, %v1902_v20  ;;  %v1947_v11 = vadd.f32 %v1938_v39, %v1903_v21  ;;  %v1948_v51 = vadd.f32 %v1938_v39, %v1904_v22 }
 0x257   : > { %v1949_v52 = vadd.f32 %v1938_v39, %v1905_v23  ;;  %v1950_v53 = vadd.f32 %v1938_v39, %v1906_v24  ;;  %v1951_v54 = vadd.f32 %v1938_v39, %v1907_v25  ;;  %v1952_v10 = vadd.f32 %v1938_v39, %v1908_v26 }
 0x258   : > { %v1953_v34 = vadd.f32 %v1938_v39, %v1909_v29  ;;  %v1954_v38 = vadd.f32 %v1938_v39, %v1910_v30  ;;  %v1955_v12 = vadd.f32 %v1938_v39, %v1911_v31  ;;  %v1956_v14 = vadd.f32 %v1938_v39, %v1912_v32 }
 0x259   : > { %v1957_v58 = vadd.f32 %v1938_v39, %v1913_v37  ;;  %v1958_v59 = vadd.f32 %v1938_v39, %v1914_v40  ;;  %v1959_v63 = vadd.f32 %v1938_v39, %v1915_v41  ;;  %v1960_v1 = vadd.f32 %v1938_v39, %v1916_v42  ;;  %v1943_v20 = vpop.permute.xlu0 %1942 }
 0x25a   : > { %v1977_v2 = vmax.f32 %v1945_v6, 0.0  ;;  %v1978_v3 = vmax.f32 %v1946_v7, 0.0  ;;  %v1979_v15 = vmax.f32 %v1947_v11, 0.0  ;;  %v1980_v16 = vmax.f32 %v1948_v51, 0.0 }
 0x25b   : > { %v1981_v17 = vmax.f32 %v1949_v52, 0.0  ;;  %v1982_v18 = vmax.f32 %v1950_v53, 0.0  ;;  %v1983_v19 = vmax.f32 %v1951_v54, 0.0  ;;  %v1984_v0 = vmax.f32 %v1952_v10, 0.0 }
 0x25c   : > { %v1985_v21 = vmax.f32 %v1953_v34, 0.0  ;;  %v1986_v22 = vmax.f32 %v1954_v38, 0.0  ;;  %v1987_v23 = vmax.f32 %v1955_v12, 0.0  ;;  %v1988_v24 = vmax.f32 %v1956_v14, 0.0 }
 0x25d   : > { %v1989_v25 = vmax.f32 %v1957_v58, 0.0  ;;  %v1990_v26 = vmax.f32 %v1958_v59, 0.0  ;;  %v1991_v27 = vmax.f32 %v1959_v63, 0.0  ;;  %v1992_v29 = vmax.f32 %v1960_v1, 0.0 }
 0x25e   : > { %v2009_v30 = vmul.f32 0.999995, %v1977_v2  ;;  %v2010_v31 = vmul.f32 0.999995, %v1978_v3  ;;  %v2011_v32 = vmul.f32 0.999995, %v1979_v15  ;;  %v1961_v37 = vadd.f32 %v1943_v20, %v1917_v47 }
 0x25f   : > { %v2012_v40 = vmul.f32 0.999995, %v1980_v16  ;;  %v2013_v41 = vmul.f32 0.999995, %v1981_v17  ;;  %v2014_v42 = vmul.f32 0.999995, %v1982_v18  ;;  %v1962_v39 = vadd.f32 %v1943_v20, %v1918_v48 }
 0x260   : > { %v2015_v6 = vmul.f32 0.999995, %v1983_v19  ;;  %v2016_v7 = vmul.f32 0.999995, %v1984_v0  ;;  %v2017_v11 = vmul.f32 0.999995, %v1985_v21  ;;  %v2516_v51 = vpack.c.bf16 %v2010_v31, %v2009_v30 }
 0x261   : > { %v2018_v52 = vmul.f32 0.999995, %v1986_v22  ;;  %v2019_v53 = vmul.f32 0.999995, %v1987_v23  ;;  %v2020_v54 = vmul.f32 0.999995, %v1988_v24  ;;  %v2517_v10 = vpack.c.bf16 %v2012_v40, %v2011_v32 }
 0x262   : > { %v2021_v34 = vmul.f32 0.999995, %v1989_v25  ;;  %v2022_v38 = vmul.f32 0.999995, %v1990_v26  ;;  %v2023_v47 = vmul.f32 0.999995, %v1991_v27  ;;  %v2518_v12 = vpack.c.bf16 %v2014_v42, %v2013_v41  ;;  %2137 = vst [vmem:[%s3325_s8] sm:$0xff] %v2516_v51 }
 0x263   : > { %v2024_v14 = vmul.f32 0.999995, %v1992_v29  ;;  %v2519_v48 = vpack.c.bf16 %v2016_v7, %v2015_v6  ;;  %v2520_v58 = vpack.c.bf16 %v2018_v52, %v2017_v11  ;;  %v2521_v59 = vpack.c.bf16 %v2020_v54, %v2019_v53  ;;  %2138 = vst [vmem:[%s3325_s8 + $0x8] sm:$0xff] %v2517_v10 }
 0x264   : > { %v2522_v63 = vpack.c.bf16 %v2022_v38, %v2021_v34  ;;  %2139 = vst [vmem:[%s3325_s8 + $0x10] sm:$0xff] %v2518_v12  ;;  %v1963_v1 = vadd.f32 %v1943_v20, %v1919_v49  ;;  %v1964_v2 = vadd.f32 %v1943_v20, %v1920_v13  ;;  %v1965_v3 = vadd.f32 %v1943_v20, %v1921_v50 }
 0x265   : > { %v2523_v15 = vpack.c.bf16 %v2024_v14, %v2023_v47  ;;  %2140 = vst [vmem:[%s3325_s8 + $0x18] sm:$0xff] %v2519_v48  ;;  %2141 = vst [vmem:[%s3325_s8 + $0x20] sm:$0xff] %v2520_v58  ;;  %v1966_v16 = vadd.f32 %v1943_v20, %v1922_v55  ;;  %v1967_v17 = vadd.f32 %v1943_v20, %v1923_v56  ;;  %v1993_v56 = vmax.f32 %v1961_v37, 0.0 }
 0x266   : > { %2142 = vst [vmem:[%s3325_s8 + $0x28] sm:$0xff] %v2521_v59  ;;  %v1968_v18 = vadd.f32 %v1943_v20, %v1924_v57  ;;  %2143 = vst [vmem:[%s3325_s8 + $0x30] sm:$0xff] %v2522_v63  ;;  %v1969_v28 = vadd.f32 %v1943_v20, %v1925_v62  ;;  %v1970_v49 = vadd.f32 %v1943_v20, %v1926_v60  ;;  %v1994_v57 = vmax.f32 %v1962_v39, 0.0 }
 0x267   : > { %v1971_v13 = vadd.f32 %v1943_v20, %v1927_v61  ;;  %v1972_v33 = vadd.f32 %v1943_v20, %v1928_v35  ;;  %2144 = vst [vmem:[%s3325_s8 + $0x38] sm:$0xff] %v2523_v15  ;;  %v1973_v50 = vadd.f32 %v1943_v20, %v1929_v4  ;;  %v1974_v36 = vadd.f32 %v1943_v20, %v1930_v8 }
 0x268   : > { %v1975_v55 = vadd.f32 %v1943_v20, %v1931_v9  ;;  %v1976_v43 = vadd.f32 %v1943_v20, %v1932_v5  ;;  %v1995_v62 = vmax.f32 %v1963_v1, 0.0  ;;  %v1996_v60 = vmax.f32 %v1964_v2, 0.0 }
 0x269   : > { %v1997_v61 = vmax.f32 %v1965_v3, 0.0  ;;  %v1998_v44 = vmax.f32 %v1966_v16, 0.0  ;;  %v1999_v35 = vmax.f32 %v1967_v17, 0.0  ;;  %v2000_v19 = vmax.f32 %v1968_v18, 0.0 }
 0x26a   : > { %v2001_v0 = vmax.f32 %v1969_v28, 0.0  ;;  %v2002_v21 = vmax.f32 %v1970_v49, 0.0  ;;  %v2003_v4 = vmax.f32 %v1971_v13, 0.0  ;;  %v2004_v22 = vmax.f32 %v1972_v33, 0.0 }
 0x26b   : > { %v2005_v45 = vmax.f32 %v1973_v50, 0.0  ;;  %v2006_v8 = vmax.f32 %v1974_v36, 0.0  ;;  %v2007_v23 = vmax.f32 %v1975_v55, 0.0  ;;  %v2008_v24 = vmax.f32 %v1976_v43, 0.0 }
 0x26c   : > { %v2025_v9 = vmul.f32 0.999995, %v1993_v56  ;;  %v2026_v25 = vmul.f32 0.999995, %v1994_v57  ;;  %v2027_v46 = vmul.f32 0.999995, %v1995_v62 }
 0x26d   : > { %v2028_v5 = vmul.f32 0.999995, %v1996_v60  ;;  %v2029_v20 = vmul.f32 0.999995, %v1997_v61  ;;  %v2030_v26 = vmul.f32 0.999995, %v1998_v44 }
 0x26e   : > { %v2031_v27 = vmul.f32 0.999995, %v1999_v35  ;;  %v2032_v29 = vmul.f32 0.999995, %v2000_v19  ;;  %v2033_v30 = vmul.f32 0.999995, %v2001_v0  ;;  %v2524_v31 = vpack.c.bf16 %v2026_v25, %v2025_v9 }
 0x26f   : > { %v2034_v32 = vmul.f32 0.999995, %v2002_v21  ;;  %v2035_v37 = vmul.f32 0.999995, %v2003_v4  ;;  %v2036_v40 = vmul.f32 0.999995, %v2004_v22  ;;  %v2525_v41 = vpack.c.bf16 %v2028_v5, %v2027_v46 }
 0x270   : > { %v2037_v42 = vmul.f32 0.999995, %v2005_v45  ;;  %v2038_v39 = vmul.f32 0.999995, %v2006_v8  ;;  %v2039_v6 = vmul.f32 0.999995, %v2007_v23  ;;  %v2526_v7 = vpack.c.bf16 %v2030_v26, %v2029_v20 }
 0x271   : > { %2145 = vst [vmem:[%s3325_s8 + $0x40] sm:$0x11] %v2524_v31  ;;  %v2040_v11 = vmul.f32 0.999995, %v2008_v24  ;;  %v2527_v51 = vpack.c.bf16 %v2032_v29, %v2031_v27  ;;  %v2528_v52 = vpack.c.bf16 %v2034_v32, %v2033_v30  ;;  %v2529_v53 = vpack.c.bf16 %v2036_v40, %v2035_v37  ;;  %2146 = vst [vmem:[%s3325_s8 + $0x48] sm:$0x11] %v2525_v41 }
 0x272   : > { %v2530_v54 = vpack.c.bf16 %v2038_v39, %v2037_v42  ;;  %2147 = vst [vmem:[%s3325_s8 + $0x50] sm:$0x11] %v2526_v7 }
 0x273   : > { %v2531_v10 = vpack.c.bf16 %v2040_v11, %v2039_v6  ;;  %2148 = vst [vmem:[%s3325_s8 + $0x58] sm:$0x11] %v2527_v51  ;;  %2149 = vst [vmem:[%s3325_s8 + $0x60] sm:$0x11] %v2528_v52 }
 0x274   : > { %2150 = vst [vmem:[%s3325_s8 + $0x68] sm:$0x11] %v2529_v53  ;;  %2151 = vst [vmem:[%s3325_s8 + $0x70] sm:$0x11] %v2530_v54 }
 0x275   : > { %2152 = vst [vmem:[%s3325_s8 + $0x78] sm:$0x11] %v2531_v10 }
 0x276 PF: > { %2159 = sbr.rel (!%p2774_p9) target bundleno = 640 (0x280), region = 71  ;;  %s2532_s16 = sshll.u32 (%p2774_p9), %s2669_s17, 6  ;;  %v2175_v34 = vld [vmem:[%s3325_s8] sm:$0xff] (%p2774_p9)  ;;  %v2177_v38 = vld [vmem:[%s3325_s8 + $0x8] sm:$0xff] (%p2774_p9)  ;;  %v2179_v47 = vld [vmem:[%s3325_s8 + $0x10] sm:$0xff] (%p2774_p9) }
 0x277   : > { %s2162_s25 = scalar_lea.vmem (%p2774_p9), %s3592_s3, %s2532_s16  ;;  %v2181_v12 = vld [vmem:[%s3325_s8 + $0x18] sm:$0xff] (%p2774_p9)  ;;  %v2183_v14 = vld [vmem:[%s3325_s8 + $0x20] sm:$0xff] (%p2774_p9)  ;;  %v2185_v48 = vld [vmem:[%s3325_s8 + $0x28] sm:$0xff] (%p2774_p9) }
 0x278   : > { %2176 = vst [vmem:[%s2162_s25] sm:$0xff] (%p2774_p9), %v2175_v34  ;;  %2178 = vst [vmem:[%s2162_s25 + $0x8] sm:$0xff] (%p2774_p9), %v2177_v38  ;;  %v2187_v58 = vld [vmem:[%s3325_s8 + $0x30] sm:$0xff] (%p2774_p9)  ;;  %v2189_v59 = vld [vmem:[%s3325_s8 + $0x38] sm:$0xff] (%p2774_p9) }
 0x279   : > { %2180 = vst [vmem:[%s2162_s25 + $0x10] sm:$0xff] (%p2774_p9), %v2179_v47  ;;  %2182 = vst [vmem:[%s2162_s25 + $0x18] sm:$0xff] (%p2774_p9), %v2181_v12  ;;  %v2191_v63 = vld [vmem:[%s3325_s8 + $0x40] sm:$0xff] (%p2774_p9)  ;;  %v2193_v1 = vld [vmem:[%s3325_s8 + $0x48] sm:$0xff] (%p2774_p9) }
 0x27a   : > { %2184 = vst [vmem:[%s2162_s25 + $0x20] sm:$0xff] (%p2774_p9), %v2183_v14  ;;  %2186 = vst [vmem:[%s2162_s25 + $0x28] sm:$0xff] (%p2774_p9), %v2185_v48  ;;  %v2195_v2 = vld [vmem:[%s3325_s8 + $0x50] sm:$0xff] (%p2774_p9)  ;;  %v2197_v3 = vld [vmem:[%s3325_s8 + $0x58] sm:$0xff] (%p2774_p9) }
 0x27b   : > { %2188 = vst [vmem:[%s2162_s25 + $0x30] sm:$0xff] (%p2774_p9), %v2187_v58  ;;  %2190 = vst [vmem:[%s2162_s25 + $0x38] sm:$0xff] (%p2774_p9), %v2189_v59  ;;  %v2199_v15 = vld [vmem:[%s3325_s8 + $0x60] sm:$0xff] (%p2774_p9)  ;;  %v2201_v16 = vld [vmem:[%s3325_s8 + $0x68] sm:$0xff] (%p2774_p9) }
 0x27c   : > { %2192 = vst [vmem:[%s2162_s25 + $0xc0] sm:$0xff] (%p2774_p9), %v2191_v63  ;;  %2194 = vst [vmem:[%s2162_s25 + $0xc8] sm:$0xff] (%p2774_p9), %v2193_v1  ;;  %v2203_v17 = vld [vmem:[%s3325_s8 + $0x70] sm:$0xff] (%p2774_p9)  ;;  %v2205_v18 = vld [vmem:[%s3325_s8 + $0x78] sm:$0xff] (%p2774_p9) }
 0x27d   : > { %2196 = vst [vmem:[%s2162_s25 + $0xd0] sm:$0xff] %v2195_v2  ;;  %2198 = vst [vmem:[%s2162_s25 + $0xd8] sm:$0xff] %v2197_v3 }
 0x27e   : > { %2200 = vst [vmem:[%s2162_s25 + $0xe0] sm:$0xff] %v2199_v15  ;;  %2202 = vst [vmem:[%s2162_s25 + $0xe8] sm:$0xff] %v2201_v16 }
 0x27f   : > { %2204 = vst [vmem:[%s2162_s25 + $0xf0] sm:$0xff] %v2203_v17  ;;  %2206 = vst [vmem:[%s2162_s25 + $0xf8] sm:$0xff] %v2205_v18 }
 0x280 PF: > { %s13_s20 = sadd.s32 1, %s2681_s20   ;;  %s3595_s12 = smov %s2653_s13 }
 0x281   : > { %p10_p3 = scmp.ge.s32.totalorder %s13_s20, 14   ;;  %s3596_s13 = smov %s2779_s4 }
 0x282   : > { %s3597_s14 = smov %s2661_s15  ;;  %s3598_s15 = smov %s2782_s5 }
 0x283   : > { %s3599_s16 = smov %s2673_s18  ;;  %s3600_s17 = smov %s2677_s19 }
 0x284   : > { %s3601_s18 = smov %s3604_s21  ;;  %s3602_s19 = smov %s3608_s22 }
 0x285   :  { %12 = sbr.rel (!%p10_p3) target bundleno = 5 (0x5), region = 125 }

// kernel: net_forward.8
= control target key start
LH: loop header
LB: loop body
LE: loop exit
PB: predicated region body
PF: predicated region fallthrough
CT: control target
= control target key end

     0   :  { %s2171_s12 = smov 0   ;;  %s2173_s13 = smov 0   ;;  %s2811_s0 = inlined_call_operand.vmem [shape: bf16[20,160], index: 0, kind: input, shape index: {}]   ;;  %s2812_s1 = inlined_call_operand.vmem [shape: bf16[4,160,1250], index: 1, kind: input, shape index: {}]   ;;  %s2813_s2 = inlined_call_operand.vmem [shape: f32[20,1], index: 2, kind: input, shape index: {}]   ;;  %s2814_s3 = inlined_call_operand.vmem [shape: bf16[20,1250], index: 3, kind: output, shape index: {}]  }
   0x1   :  { %s2175_s14 = smov 0  }
   0x2 LB: > { %s22_s15 = sadd.s32 1, %s2144_s13  ;;  %p1710_p0 = scmp.ge.s32.totalorder %s2148_s14, 1  ;;  %s2148_s14 = sphi %s2175_s14, %s13_s14   ;;  %s2144_s13 = sphi %s2173_s13, %s2822_s13   ;;  %s2140_s12 = sphi %s2171_s12, %s2821_s12  }
   0x3   : > { %p23_p1 = scmp.ge.s32.totalorder %s22_s15, 4  ;;  %p156_p2 = scmp.lt.s32.totalorder %s2148_s14, 5 }
   0x5   : > { %s2824_s15 = smov (%p23_p1, %s22_s15), 0  ;;  %p157_p3 = pnand %p1710_p0, %p156_p2 }
   0x6   : > { %p185_p4 = scmp.lt.s32.totalorder (!%p157_p3), %s2140_s12, 3  ;;  %v2195_v0 = vld [vmem:[%s2811_s0 + $0x4] ss:$8 sps:$4 sm:$0xff] (!%p157_p3)   ;;  %vm819_vm0 = vcmask (!%p157_p3), 261120   ;;  %v2252_v43 = vld [vmem:[%s2811_s0] ss:$8 sps:$4 sm:$0xff] (!%p157_p3)  }
   0x7   : > { %160 = sbr.rel (%p157_p3) target bundleno = 533 (0x215), region = 32  ;;  %1816 = vmatprep.mubr.msk.bf16.mxu0 (!%p157_p3), %vm819_vm0, %v2195_v0  ;;  %1818 = vmatprep.mubr.msk.bf16.mxu1 (!%p157_p3), %vm819_vm0, %v2195_v0  ;;  %v203_v44 = vld [vmem:[%s2811_s0 + $0x10] sm:$0x33] (!%p157_p3)  ;;  %p1826_p5 = scmp.ne.s32.totalorder (!%p157_p3), %s2140_s12, 0 }
   0x8   : > { %v2261_v49 = vcombine.high (!%p157_p3), %v203_v44, %v203_v44  ;;  %v2275_v56 = vcombine.low (!%p157_p3), %v203_v44, %v203_v44 }
   0xe   : > { %s186_s18 = scalar_select %p185_p4, %s2140_s12, 3 }
   0xf   : > { %vm1189_vm1 = vcmask (!%p1826_p5), 1043456   ;;  %vm1190_vm2 = vcmask (!%p1826_p5), 801796   ;;  %vm1202_vm4 = vcmask (!%p1826_p5), 1041408   ;;  %vm1203_vm5 = vcmask (!%p1826_p5), 799748  }
  0x10   : > { %s1943_s19 = smul.u32 800, %s186_s18  ;;  %vm1191_vm3 = vmor (!%p1826_p5), %vm1190_vm2, %vm1189_vm1 }
  0x11   : > { %vm1204_vm6 = vmor (!%p1826_p5), %vm1203_vm5, %vm1202_vm4 }
  0x12   : > { %s2205_s22 = scalar_lea.vmem %s2812_s1, %s1943_s19 }
  0x13   : > { %v1969_v1 = vld [vmem:[%s2205_s22 + $0x4] ss:$40 sps:$4 sm:$0xff]   ;;  %v1973_v3 = vld [vmem:[%s2205_s22] ss:$40 sps:$4 sm:$0xff]   ;;  %v1975_v5 = vld [vmem:[%s2205_s22 + $0x54] ss:$40 sps:$4 sm:$0xff]  }
  0x14   : > { %v1971_v2 = vld [vmem:[%s2205_s22 + $0xc] ss:$40 sps:$4 sm:$0xff]   ;;  %826 = vmatprep.subr.bf16.mxu0 %v1969_v1  ;;  %v1974_v4 = vld [vmem:[%s2205_s22 + $0x8] ss:$40 sps:$4 sm:$0xff]   ;;  %v1977_v6 = vld [vmem:[%s2205_s22 + $0x5c] ss:$40 sps:$4 sm:$0xff]  }
  0x15   : > { %877 = vmatprep.subr.bf16.mxu1 %v1971_v2  ;;  %827 = vmatpush1.bf16.msra.mxu0 %v1973_v3  ;;  %v1979_v7 = vld [vmem:[%s2205_s22 + $0x50] ss:$40 sps:$4 sm:$0xff]   ;;  %v1981_v9 = vld [vmem:[%s2205_s22 + $0xa4] ss:$40 sps:$4 sm:$0xff]   ;;  %v1985_v11 = vld [vmem:[%s2205_s22 + $0xa0] ss:$40 sps:$4 sm:$0xff]  }
  0x16   : > { %878 = vmatpush1.bf16.msra.mxu1 %v1974_v4  ;;  %828 = vmatprep.subr.bf16.mxu0 %v1975_v5  ;;  %v1980_v8 = vld [vmem:[%s2205_s22 + $0x58] ss:$40 sps:$4 sm:$0xff]   ;;  %v1983_v10 = vld [vmem:[%s2205_s22 + $0xac] ss:$40 sps:$4 sm:$0xff]   ;;  %v1986_v12 = vld [vmem:[%s2205_s22 + $0xa8] ss:$40 sps:$4 sm:$0xff]  }
  0x17   : > { %879 = vmatprep.subr.bf16.mxu1 %v1977_v6  ;;  %v1987_v13 = vld [vmem:[%s2205_s22 + $0xf4] ss:$40 sps:$4 sm:$0xff]   ;;  %v1991_v15 = vld [vmem:[%s2205_s22 + $0xf0] ss:$40 sps:$4 sm:$0xff]   ;;  %v1993_v17 = vld [vmem:[%s2205_s22 + $0x144] ss:$40 sps:$4 sm:$0xff]  }
  0x18   : > { %v1989_v14 = vld [vmem:[%s2205_s22 + $0xfc] ss:$40 sps:$4 sm:$0xff]   ;;  %v1992_v16 = vld [vmem:[%s2205_s22 + $0xf8] ss:$40 sps:$4 sm:$0xff]   ;;  %v1995_v18 = vld [vmem:[%s2205_s22 + $0x14c] ss:$40 sps:$4 sm:$0xff]  }
  0x19   : > { %829 = vmatpush1.bf16.msra.mxu0 %v1979_v7  ;;  %v1997_v19 = vld [vmem:[%s2205_s22 + $0x140] ss:$40 sps:$4 sm:$0xff]   ;;  %v1999_v21 = vld [vmem:[%s2205_s22 + $0x194] ss:$40 sps:$4 sm:$0xff]   ;;  %v2003_v23 = vld [vmem:[%s2205_s22 + $0x190] ss:$40 sps:$4 sm:$0xff]  }
  0x1a   : > { %880 = vmatpush1.bf16.msra.mxu1 %v1980_v8  ;;  %830 = vmatprep.subr.bf16.mxu0 %v1981_v9  ;;  %v1998_v20 = vld [vmem:[%s2205_s22 + $0x148] ss:$40 sps:$4 sm:$0xff]   ;;  %v2001_v22 = vld [vmem:[%s2205_s22 + $0x19c] ss:$40 sps:$4 sm:$0xff]   ;;  %v2004_v24 = vld [vmem:[%s2205_s22 + $0x198] ss:$40 sps:$4 sm:$0xff]  }
  0x1b   : > { %881 = vmatprep.subr.bf16.mxu1 %v1983_v10  ;;  %v2005_v25 = vld [vmem:[%s2205_s22 + $0x1e4] ss:$40 sps:$4 sm:$0xff]   ;;  %v2009_v27 = vld [vmem:[%s2205_s22 + $0x1e0] ss:$40 sps:$4 sm:$0xff]   ;;  %v2011_v29 = vld [vmem:[%s2205_s22 + $0x234] ss:$40 sps:$4 sm:$0xff]  }
  0x1c   : > { %v2007_v26 = vld [vmem:[%s2205_s22 + $0x1ec] ss:$40 sps:$4 sm:$0xff]   ;;  %v2010_v28 = vld [vmem:[%s2205_s22 + $0x1e8] ss:$40 sps:$4 sm:$0xff]   ;;  %v2013_v30 = vld [vmem:[%s2205_s22 + $0x23c] ss:$40 sps:$4 sm:$0xff]  }
  0x1d   : > { %831 = vmatpush1.bf16.msra.mxu0 %v1985_v11  ;;  %v2015_v31 = vld [vmem:[%s2205_s22 + $0x230] ss:$40 sps:$4 sm:$0xff]   ;;  %v2017_v33 = vld [vmem:[%s2205_s22 + $0x284] ss:$40 sps:$4 sm:$0xff]   ;;  %v2021_v35 = vld [vmem:[%s2205_s22 + $0x280] ss:$40 sps:$4 sm:$0xff]  }
  0x1e   : > { %882 = vmatpush1.bf16.msra.mxu1 %v1986_v12  ;;  %832 = vmatprep.subr.bf16.mxu0 %v1987_v13  ;;  %v2016_v32 = vld [vmem:[%s2205_s22 + $0x238] ss:$40 sps:$4 sm:$0xff]   ;;  %v2019_v34 = vld [vmem:[%s2205_s22 + $0x28c] ss:$40 sps:$4 sm:$0xff]   ;;  %v2022_v36 = vld [vmem:[%s2205_s22 + $0x288] ss:$40 sps:$4 sm:$0xff]  }
  0x1f   : > { %883 = vmatprep.subr.bf16.mxu1 %v1989_v14  ;;  %v2023_v37 = vld [vmem:[%s2205_s22 + $0x2d4] ss:$40 sps:$4 sm:$0xff]   ;;  %v2027_v39 = vld [vmem:[%s2205_s22 + $0x2d0] ss:$40 sps:$4 sm:$0xff]   ;;  %v2040_v47 = vld [vmem:[%s2205_s22 + $0x64] ss:$40 sps:$4 sm:$0xff]  }
  0x20   : > { %v2025_v38 = vld [vmem:[%s2205_s22 + $0x2dc] ss:$40 sps:$4 sm:$0xff]   ;;  %v2028_v40 = vld [vmem:[%s2205_s22 + $0x2d8] ss:$40 sps:$4 sm:$0xff]   ;;  %v2043_v48 = vld [vmem:[%s2205_s22 + $0x6c] ss:$40 sps:$4 sm:$0xff]  }
  0x21   : > { %833 = vmatpush1.bf16.msra.mxu0 %v1991_v15  ;;  %v2034_v41 = vld [vmem:[%s2205_s22 + $0x14] ss:$40 sps:$4 sm:$0xff]   ;;  %v2032_v45 = vld [vmem:[%s2205_s22 + $0x10] ss:$40 sps:$4 sm:$0xff]   ;;  %v2038_v50 = vld [vmem:[%s2205_s22 + $0x60] ss:$40 sps:$4 sm:$0xff]  }
  0x22   : > { %884 = vmatpush1.bf16.msra.mxu1 %v1992_v16  ;;  %834 = vmatprep.subr.bf16.mxu0 %v1993_v17  ;;  %v2037_v42 = vld [vmem:[%s2205_s22 + $0x1c] ss:$40 sps:$4 sm:$0xff]   ;;  %v2035_v46 = vld [vmem:[%s2205_s22 + $0x18] ss:$40 sps:$4 sm:$0xff]   ;;  %v2041_v51 = vld [vmem:[%s2205_s22 + $0x68] ss:$40 sps:$4 sm:$0xff]  }
  0x23   : > { %885 = vmatprep.subr.bf16.mxu1 %v1995_v18  ;;  %v2046_v52 = vld [vmem:[%s2205_s22 + $0xb4] ss:$40 sps:$4 sm:$0xff]   ;;  %v2044_v54 = vld [vmem:[%s2205_s22 + $0xb0] ss:$40 sps:$4 sm:$0xff]   ;;  %v2052_v57 = vld [vmem:[%s2205_s22 + $0x104] ss:$40 sps:$4 sm:$0xff]  }
  0x24   : > { %v2049_v53 = vld [vmem:[%s2205_s22 + $0xbc] ss:$40 sps:$4 sm:$0xff]   ;;  %v2047_v55 = vld [vmem:[%s2205_s22 + $0xb8] ss:$40 sps:$4 sm:$0xff]   ;;  %v2055_v58 = vld [vmem:[%s2205_s22 + $0x10c] ss:$40 sps:$4 sm:$0xff]  }
  0x25   : > { %835 = vmatpush1.bf16.msra.mxu0 %v1997_v19  ;;  %v2050_v59 = vld [vmem:[%s2205_s22 + $0x100] ss:$40 sps:$4 sm:$0xff]   ;;  %v2058_v61 = vld [vmem:[%s2205_s22 + $0x154] ss:$40 sps:$4 sm:$0xff]   ;;  %v2056_v63 = vld [vmem:[%s2205_s22 + $0x150] ss:$40 sps:$4 sm:$0xff]  }
  0x26   : > { %886 = vmatpush1.bf16.msra.mxu1 %v1998_v20  ;;  %836 = vmatprep.subr.bf16.mxu0 %v1999_v21  ;;  %v2053_v60 = vld [vmem:[%s2205_s22 + $0x108] ss:$40 sps:$4 sm:$0xff]   ;;  %v2061_v62 = vld [vmem:[%s2205_s22 + $0x15c] ss:$40 sps:$4 sm:$0xff]   ;;  %v2059_v1 = vld [vmem:[%s2205_s22 + $0x158] ss:$40 sps:$4 sm:$0xff]  }
  0x27   : > { %887 = vmatprep.subr.bf16.mxu1 %v2001_v22  ;;  %v2064_v2 = vld [vmem:[%s2205_s22 + $0x1a4] ss:$40 sps:$4 sm:$0xff]   ;;  %v2062_v4 = vld [vmem:[%s2205_s22 + $0x1a0] ss:$40 sps:$4 sm:$0xff]   ;;  %v2070_v6 = vld [vmem:[%s2205_s22 + $0x1f4] ss:$40 sps:$4 sm:$0xff]  }
  0x28   : > { %v2067_v3 = vld [vmem:[%s2205_s22 + $0x1ac] ss:$40 sps:$4 sm:$0xff]   ;;  %v2065_v5 = vld [vmem:[%s2205_s22 + $0x1a8] ss:$40 sps:$4 sm:$0xff]   ;;  %v2073_v7 = vld [vmem:[%s2205_s22 + $0x1fc] ss:$40 sps:$4 sm:$0xff]  }
  0x29   : > { %837 = vmatpush1.bf16.msra.mxu0 %v2003_v23  ;;  %v2068_v8 = vld [vmem:[%s2205_s22 + $0x1f0] ss:$40 sps:$4 sm:$0xff]   ;;  %v2076_v10 = vld [vmem:[%s2205_s22 + $0x244] ss:$40 sps:$4 sm:$0xff]   ;;  %v2074_v12 = vld [vmem:[%s2205_s22 + $0x240] ss:$40 sps:$4 sm:$0xff]  }
  0x2a   : > { %888 = vmatpush1.bf16.msra.mxu1 %v2004_v24  ;;  %838 = vmatprep.subr.bf16.mxu0 %v2005_v25  ;;  %v2071_v9 = vld [vmem:[%s2205_s22 + $0x1f8] ss:$40 sps:$4 sm:$0xff]   ;;  %v2079_v11 = vld [vmem:[%s2205_s22 + $0x24c] ss:$40 sps:$4 sm:$0xff]   ;;  %v2077_v13 = vld [vmem:[%s2205_s22 + $0x248] ss:$40 sps:$4 sm:$0xff]  }
  0x2b   : > { %889 = vmatprep.subr.bf16.mxu1 %v2007_v26  ;;  %v2084_v14 = vld [vmem:[%s2205_s22 + $0x294] ss:$40 sps:$4 sm:$0xff]   ;;  %v2082_v16 = vld [vmem:[%s2205_s22 + $0x290] ss:$40 sps:$4 sm:$0xff]   ;;  %v2090_v18 = vld [vmem:[%s2205_s22 + $0x2e4] ss:$40 sps:$4 sm:$0xff]  }
  0x2c   : > { %v2087_v15 = vld [vmem:[%s2205_s22 + $0x29c] ss:$40 sps:$4 sm:$0xff]   ;;  %v2085_v17 = vld [vmem:[%s2205_s22 + $0x298] ss:$40 sps:$4 sm:$0xff]   ;;  %v2093_v19 = vld [vmem:[%s2205_s22 + $0x2ec] ss:$40 sps:$4 sm:$0xff]  }
  0x2d   : > { %839 = vmatpush1.bf16.msra.mxu0 %v2009_v27  ;;  %v2088_v20 = vld [vmem:[%s2205_s22 + $0x2e0] ss:$40 sps:$4 sm:$0xff]   ;;  %v2096_v22 = vld [vmem:[%s2205_s22 + $0x24] ss:$40 sps:$4 sm:$0xff]   ;;  %v2099_v24 = vld [vmem:[%s2205_s22 + $0x74] ss:$40 sps:$4 sm:$0xff]  }
  0x2e   : > { %890 = vmatpush1.bf16.msra.mxu1 %v2010_v28  ;;  %840 = vmatprep.subr.bf16.mxu0 %v2011_v29  ;;  %v2091_v21 = vld [vmem:[%s2205_s22 + $0x2e8] ss:$40 sps:$4 sm:$0xff]   ;;  %v2102_v26 = vld [vmem:[%s2205_s22 + $0xc4] ss:$40 sps:$4 sm:$0xff]   ;;  %v2105_v28 = vld [vmem:[%s2205_s22 + $0x114] ss:$40 sps:$4 sm:$0xff]  }
  0x2f   : > { %891 = vmatprep.subr.bf16.mxu1 %v2013_v30  ;;  %v2094_v23 = vld [vmem:[%s2205_s22 + $0x20] ss:$40 sps:$4 sm:$0xff]   ;;  %v2097_v25 = vld [vmem:[%s2205_s22 + $0x70] ss:$40 sps:$4 sm:$0xff]   ;;  %v2108_v30 = vld [vmem:[%s2205_s22 + $0x164] ss:$40 sps:$4 sm:$0xff]  }
  0x30   : > { %v2100_v27 = vld [vmem:[%s2205_s22 + $0xc0] ss:$40 sps:$4 sm:$0xff]   ;;  %v2103_v29 = vld [vmem:[%s2205_s22 + $0x110] ss:$40 sps:$4 sm:$0xff]  }
  0x31   : > { %841 = vmatpush1.bf16.msra.mxu0 %v2015_v31  ;;  %v2106_v31 = vld [vmem:[%s2205_s22 + $0x160] ss:$40 sps:$4 sm:$0xff]  }
  0x32   : > { %892 = vmatpush1.bf16.msra.mxu1 %v2016_v32  ;;  %842 = vmatprep.subr.bf16.mxu0 %v2017_v33  ;;  %v2111_v32 = vld [vmem:[%s2205_s22 + $0x1b4] ss:$40 sps:$4 sm:$0xff]   ;;  %v2109_v33 = vld [vmem:[%s2205_s22 + $0x1b0] ss:$40 sps:$4 sm:$0xff]  }
  0x33   : > { %893 = vmatprep.subr.bf16.mxu1 %v2019_v34  ;;  %v2112_v34 = vld [vmem:[%s2205_s22 + $0x200] ss:$40 sps:$4 sm:$0xff]  }
  0x35   : > { %843 = vmatpush1.bf16.msra.mxu0 %v2021_v35  ;;  %v2117_v35 = vld [vmem:[%s2205_s22 + $0x254] ss:$40 sps:$4 sm:$0xff]  }
  0x36   : > { %894 = vmatpush1.bf16.msra.mxu1 %v2022_v36  ;;  %844 = vmatprep.subr.bf16.mxu0 %v2023_v37  ;;  %v2115_v36 = vld [vmem:[%s2205_s22 + $0x250] ss:$40 sps:$4 sm:$0xff]   ;;  %v2120_v37 = vld [vmem:[%s2205_s22 + $0x2a4] ss:$40 sps:$4 sm:$0xff]  }
  0x37   : > { %895 = vmatprep.subr.bf16.mxu1 %v2025_v38  ;;  %v2118_v38 = vld [vmem:[%s2205_s22 + $0x2a0] ss:$40 sps:$4 sm:$0xff]  }
  0x39   : > { %845 = vmatpush1.bf16.msra.mxu0 %v2027_v39  ;;  %v2123_v39 = vld [vmem:[%s2205_s22 + $0x2f4] ss:$40 sps:$4 sm:$0xff]  }
  0x3a   : > { %896 = vmatpush1.bf16.msra.mxu1 %v2028_v40  ;;  %928 = vmatprep.subr.bf16.mxu0 %v2034_v41  ;;  %v2121_v40 = vld [vmem:[%s2205_s22 + $0x2f0] ss:$40 sps:$4 sm:$0xff]  }
  0x3b   : > { %979 = vmatprep.subr.bf16.mxu1 %v2037_v42 }
  0x3c   : > { %859 = vmatmul.mubr.bf16.vlgmr.msra.gmra.mrb[0].mxu0 %v2252_v43 }
  0x3d   : > { %910 = vmatmul.mubr.bf16.vlgmr.msra.gmra.mrb[0].mxu1 %v2252_v43  ;;  %929 = vmatpush1.bf16.msra.mxu0 %v2032_v45 }
  0x3e   : > { %980 = vmatpush1.bf16.msra.mxu1 %v2035_v46  ;;  %930 = vmatprep.subr.bf16.mxu0 %v2040_v47 }
  0x3f   : > { %981 = vmatprep.subr.bf16.mxu1 %v2043_v48  ;;  %1817 = vmatprep.mubr.msk.bf16.mxu0 %vm819_vm0, %v2261_v49 }
  0x40   : > { %1819 = vmatprep.mubr.msk.bf16.mxu1 %vm819_vm0, %v2261_v49 }
  0x41   : > { %931 = vmatpush1.bf16.msra.mxu0 %v2038_v50 }
  0x42   : > { %982 = vmatpush1.bf16.msra.mxu1 %v2041_v51  ;;  %932 = vmatprep.subr.bf16.mxu0 %v2046_v52 }
  0x43   : > { %983 = vmatprep.subr.bf16.mxu1 %v2049_v53 }
  0x44   : > { %869 = vmatmul.mubr.bf16.gmra.mrb[4].mxu0 %v2275_v56 }
  0x45   : > { %920 = vmatmul.mubr.bf16.gmra.mrb[4].mxu1 %v2275_v56  ;;  %933 = vmatpush1.bf16.msra.mxu0 %v2044_v54 }
  0x46   : > { %984 = vmatpush1.bf16.msra.mxu1 %v2047_v55  ;;  %934 = vmatprep.subr.bf16.mxu0 %v2052_v57 }
  0x47   : > { %985 = vmatprep.subr.bf16.mxu1 %v2055_v58  ;;  %1820 = vmatprep.mubr.msk.bf16.mxu0 %vm819_vm0, %v2195_v0 }
  0x48   : > { %1822 = vmatprep.mubr.msk.bf16.mxu1 %vm819_vm0, %v2195_v0 }
  0x49   : > { %935 = vmatpush1.bf16.msra.mxu0 %v2050_v59 }
  0x4a   : > { %986 = vmatpush1.bf16.msra.mxu1 %v2053_v60  ;;  %936 = vmatprep.subr.bf16.mxu0 %v2058_v61 }
  0x4b   : > { %987 = vmatprep.subr.bf16.mxu1 %v2061_v62 }
  0x4d   : > { %937 = vmatpush1.bf16.msra.mxu0 %v2056_v63 }
  0x4e   : > { %988 = vmatpush1.bf16.msra.mxu1 %v2059_v1  ;;  %938 = vmatprep.subr.bf16.mxu0 %v2064_v2 }
  0x4f   : > { %989 = vmatprep.subr.bf16.mxu1 %v2067_v3 }
  0x51   : > { %939 = vmatpush1.bf16.msra.mxu0 %v2062_v4 }
  0x52   : > { %990 = vmatpush1.bf16.msra.mxu1 %v2065_v5  ;;  %940 = vmatprep.subr.bf16.mxu0 %v2070_v6 }
  0x53   : > { %991 = vmatprep.subr.bf16.mxu1 %v2073_v7 }
  0x55   : > { %941 = vmatpush1.bf16.msra.mxu0 %v2068_v8 }
  0x56   : > { %992 = vmatpush1.bf16.msra.mxu1 %v2071_v9  ;;  %942 = vmatprep.subr.bf16.mxu0 %v2076_v10 }
  0x57   : > { %993 = vmatprep.subr.bf16.mxu1 %v2079_v11 }
  0x59   : > { %943 = vmatpush1.bf16.msra.mxu0 %v2074_v12 }
  0x5a   : > { %994 = vmatpush1.bf16.msra.mxu1 %v2077_v13  ;;  %944 = vmatprep.subr.bf16.mxu0 %v2084_v14 }
  0x5b   : > { %995 = vmatprep.subr.bf16.mxu1 %v2087_v15 }
  0x5d   : > { %945 = vmatpush1.bf16.msra.mxu0 %v2082_v16 }
  0x5e   : > { %996 = vmatpush1.bf16.msra.mxu1 %v2085_v17  ;;  %946 = vmatprep.subr.bf16.mxu0 %v2090_v18 }
  0x5f   : > { %997 = vmatprep.subr.bf16.mxu1 %v2093_v19 }
  0x61   : > { %947 = vmatpush1.bf16.msra.mxu0 %v2088_v20 }
  0x62   : > { %998 = vmatpush1.bf16.msra.mxu1 %v2091_v21  ;;  %1030 = vmatprep.subr.bf16.mxu0 %v2096_v22 }
  0x63   : > { %1923 = vmatprep.subr.bf16.mxu1 %v2096_v22 }
  0x64   : > { %961 = vmatmul.mubr.bf16.vlgmr.msra.gmra.mrb[8].mxu0 %v2252_v43 }
  0x65   : > { %1012 = vmatmul.mubr.bf16.vlgmr.msra.gmra.mrb[8].mxu1 %v2252_v43  ;;  %1031 = vmatpush1.bf16.msra.mxu0 %v2094_v23 }
  0x66   : > { %1933 = vmatpush1.bf16.msra.mxu1 %v2094_v23  ;;  %1032 = vmatprep.subr.bf16.mxu0 %v2099_v24 }
  0x67   : > { %1924 = vmatprep.subr.bf16.mxu1 %v2099_v24  ;;  %1821 = vmatprep.mubr.msk.bf16.mxu0 %vm819_vm0, %v2261_v49 }
  0x68   : > { %1823 = vmatprep.mubr.msk.bf16.mxu1 %vm819_vm0, %v2261_v49 }
  0x69   : > { %1033 = vmatpush1.bf16.msra.mxu0 %v2097_v25 }
  0x6a   : > { %1934 = vmatpush1.bf16.msra.mxu1 %v2097_v25  ;;  %1034 = vmatprep.subr.bf16.mxu0 %v2102_v26 }
  0x6b   : > { %1925 = vmatprep.subr.bf16.mxu1 %v2102_v26 }
  0x6c   : > { %971 = vmatmul.mubr.bf16.gmra.mrb[12].mxu0 %v2275_v56 }
  0x6d   : > { %1022 = vmatmul.mubr.bf16.gmra.mrb[12].mxu1 %v2275_v56  ;;  %1035 = vmatpush1.bf16.msra.mxu0 %v2100_v27 }
  0x6e   : > { %1935 = vmatpush1.bf16.msra.mxu1 %v2100_v27  ;;  %1036 = vmatprep.subr.bf16.mxu0 %v2105_v28 }
  0x6f   : > { %1926 = vmatprep.subr.bf16.mxu1 %v2105_v28  ;;  %1824 = vmatprep.mubr.msk.bf16.mxu0 %vm819_vm0, %v2195_v0  ;;  %v2114_v0 = vld [vmem:[%s2205_s22 + $0x204] ss:$40 sps:$4 sm:$0xff]  }
  0x70   : > { %1825 = vmatprep.mubr.msk.bf16.mxu1 %vm819_vm0, %v2261_v49 }
  0x71   : > { %1037 = vmatpush1.bf16.msra.mxu0 %v2103_v29 }
  0x72   : > { %1936 = vmatpush1.bf16.msra.mxu1 %v2103_v29  ;;  %1038 = vmatprep.subr.bf16.mxu0 %v2108_v30 }
  0x73   : > { %1927 = vmatprep.subr.bf16.mxu1 %v2108_v30 }
  0x75   : > { %1039 = vmatpush1.bf16.msra.mxu0 %v2106_v31 }
  0x76   : > { %1937 = vmatpush1.bf16.msra.mxu1 %v2106_v31  ;;  %1040 = vmatprep.subr.bf16.mxu0 %v2111_v32 }
  0x77   : > { %1928 = vmatprep.subr.bf16.mxu1 %v2111_v32 }
  0x79   : > { %1041 = vmatpush1.bf16.msra.mxu0 %v2109_v33 }
  0x7a   : > { %1938 = vmatpush1.bf16.msra.mxu1 %v2109_v33  ;;  %1042 = vmatprep.subr.bf16.mxu0 %v2114_v0 }
  0x7b   : > { %1929 = vmatprep.subr.bf16.mxu1 %v2114_v0 }
  0x7d   : > { %1043 = vmatpush1.bf16.msra.mxu0 %v2112_v34 }
  0x7e   : > { %1939 = vmatpush1.bf16.msra.mxu1 %v2112_v34  ;;  %1044 = vmatprep.subr.bf16.mxu0 %v2117_v35 }
  0x7f   : > { %1930 = vmatprep.subr.bf16.mxu1 %v2117_v35 }
  0x81   : > { %1045 = vmatpush1.bf16.msra.mxu0 %v2115_v36 }
  0x82   : > { %1940 = vmatpush1.bf16.msra.mxu1 %v2115_v36  ;;  %1046 = vmatprep.subr.bf16.mxu0 %v2120_v37 }
  0x83   : > { %1931 = vmatprep.subr.bf16.mxu1 %v2120_v37 }
  0x85   : > { %1047 = vmatpush1.bf16.msra.mxu0 %v2118_v38 }
  0x86   : > { %1941 = vmatpush1.bf16.msra.mxu1 %v2118_v38  ;;  %1048 = vmatprep.subr.bf16.mxu0 %v2123_v39 }
  0x87   : > { %1932 = vmatprep.subr.bf16.mxu1 %v2123_v39 }
  0x89   : > { %1049 = vmatpush1.bf16.msra.mxu0 %v2121_v40 }
  0x8a   : > { %1942 = vmatpush1.bf16.msra.mxu1 %v2121_v40 }
  0x8c   : > { %1063 = vmatmul.mubr.bf16.vlgmr.msra.gmra.mrb[16].mxu0 %v2252_v43 }
  0x8d   : > { %1073 = vmatmul.mubr.bf16.vlgmr.msra.gmra.mrb[16].mxu1 %v2275_v56 }
 0x10f   : > { %v2345_v41 = vpop.f32.mrb[0].mxu0 }
 0x110   : > { %v2347_v42 = vpop.f32.mrb[0].mxu1  ;;  %v2349_v44 = vpop.f32.mrb[1].mxu0 }
 0x111   : > { %v2351_v45 = vpop.f32.mrb[1].mxu1  ;;  %v2353_v46 = vpop.f32.mrb[2].mxu0  ;;  %v1878_v18 = vpack.c.bf16 (!%p1826_p5), %v2349_v44, %v2345_v41 }
 0x112   : > { %v2355_v47 = vpop.f32.mrb[2].mxu1  ;;  %v2357_v48 = vpop.f32.mrb[3].mxu0  ;;  %v1879_v19 = vpack.c.bf16 (!%p1826_p5), %v2351_v45, %v2347_v42 }
 0x113   : > { %v2359_v49 = vpop.f32.mrb[3].mxu1  ;;  %v1883_v23 = vpack.c.bf16 (!%p1826_p5), %v2357_v48, %v2353_v46  ;;  %1185 = vst [vmem:[%s2814_s3] sm:$0xff] (!%p1826_p5), %v1878_v18 }
 0x114   : > { %1186 = vst [vmem:[%s2814_s3 + $0x8] sm:$0xff] (!%p1826_p5), %v1879_v19  ;;  %v1884_v24 = vpack.c.bf16 (!%p1826_p5), %v2359_v49, %v2355_v47 }
 0x115   : > { %1193 = vst [vmem:[%s2814_s3 + $0x28] sm:$0xff] (!%p1826_p5), %v1883_v23 }
 0x116   : > { %1194 = vst [vmem:[%s2814_s3 + $0x30] sm:$0xff] (!%p1826_p5), %v1884_v24 }
 0x117   : > { %v2361_v50 = vpop.f32.mrb[4].mxu0 }
 0x118   : > { %v2363_v43 = vpop.f32.mrb[4].mxu1  ;;  %v2365_v51 = vpop.f32.mrb[5].mxu0 }
 0x119   : > { %v2367_v52 = vpop.f32.mrb[5].mxu1  ;;  %v874_v53 = vpop.f32.mrb[6].mxu0  ;;  %v1888_v28 = vpack.c.bf16 (!%p1826_p5), %v2365_v51, %v2361_v50 }
 0x11a   : > { %v925_v54 = vpop.f32.mrb[6].mxu1  ;;  %v875_v55 = vpop.f32.mrb[7].mxu0  ;;  %v1889_v29 = vpack.c.bf16 (!%p1826_p5), %v2367_v52, %v2363_v43 }
 0x11b   : > { %v926_v56 = vpop.f32.mrb[7].mxu1  ;;  %1198 = vst [vmem:[%s2814_s3 + $0x50] sm:$0x33] (!%p1826_p5), %v1888_v28 }
 0x11c   : > { %1199 = vst [vmem:[%s2814_s3 + $0x58] sm:$0x33] (!%p1826_p5), %v1889_v29 }
 0x137   : > { %v2369_v57 = vpop.f32.mrb[8].mxu0 }
 0x138   : > { %v2371_v58 = vpop.f32.mrb[8].mxu1  ;;  %v2373_v59 = vpop.f32.mrb[9].mxu0 }
 0x139   : > { %v2375_v60 = vpop.f32.mrb[9].mxu1  ;;  %v2377_v61 = vpop.f32.mrb[10].mxu0  ;;  %v1880_v20 = vpack.c.bf16 (!%p1826_p5), %v2373_v59, %v2369_v57 }
 0x13a   : > { %v2379_v62 = vpop.f32.mrb[10].mxu1  ;;  %v2381_v63 = vpop.f32.mrb[11].mxu0  ;;  %v1881_v21 = vpack.c.bf16 (!%p1826_p5), %v2375_v60, %v2371_v58 }
 0x13b   : > { %v2383_v1 = vpop.f32.mrb[11].mxu1  ;;  %1187 = vst [vmem:[%s2814_s3 + $0x10] sm:$0xff] (!%p1826_p5), %v1880_v20  ;;  %v1885_v25 = vpack.c.bf16 (!%p1826_p5), %v2381_v63, %v2377_v61 }
 0x13c   : > { %1188 = vst [vmem:[%s2814_s3 + $0x18] sm:$0xff] (!%p1826_p5), %v1881_v21  ;;  %v1886_v26 = vpack.c.bf16 (!%p1826_p5), %v2383_v1, %v2379_v62 }
 0x13d   : > { %1195 = vst [vmem:[%s2814_s3 + $0x38] sm:$0xff] (!%p1826_p5), %v1885_v25 }
 0x13e   : > { %1196 = vst [vmem:[%s2814_s3 + $0x40] sm:$0xff] (!%p1826_p5), %v1886_v26 }
 0x13f   : > { %v2385_v2 = vpop.f32.mrb[12].mxu0 }
 0x140   : > { %v2387_v3 = vpop.f32.mrb[12].mxu1  ;;  %v2389_v4 = vpop.f32.mrb[13].mxu0 }
 0x141   : > { %v2391_v5 = vpop.f32.mrb[13].mxu1  ;;  %v976_v6 = vpop.f32.mrb[14].mxu0  ;;  %v1890_v30 = vpack.c.bf16 (!%p1826_p5), %v2389_v4, %v2385_v2 }
 0x142   : > { %v1027_v7 = vpop.f32.mrb[14].mxu1  ;;  %v977_v8 = vpop.f32.mrb[15].mxu0  ;;  %v1891_v31 = vpack.c.bf16 (!%p1826_p5), %v2391_v5, %v2387_v3 }
 0x143   : > { %v1028_v9 = vpop.f32.mrb[15].mxu1  ;;  %1200 = vst [vmem:[%s2814_s3 + $0x60] sm:$0x33] (!%p1826_p5), %v1890_v30 }
 0x144   : > { %1201 = vst [vmem:[%s2814_s3 + $0x68] sm:$0x33] (!%p1826_p5), %v1891_v31 }
 0x15d   : > { %1084 = sbr.rel (%p1826_p5) target bundleno = 358 (0x166), region = 36 }
 0x15f   : > { %v2393_v10 = vpop.f32.mrb[16].mxu0 }
 0x160   : > { %v2395_v11 = vpop.f32.mrb[16].mxu1  ;;  %v2397_v12 = vpop.f32.mrb[17].mxu0 }
 0x161   : > { %v2399_v13 = vpop.f32.mrb[17].mxu1  ;;  %v2401_v14 = vpop.f32.mrb[18].mxu0  ;;  %v1882_v22 = vpack.c.bf16 (!%p1826_p5), %v2397_v12, %v2393_v10 }
 0x162   : > { %v1078_v15 = vpop.f32.mrb[18].mxu1  ;;  %v2403_v16 = vpop.f32.mrb[19].mxu0  ;;  %v1892_v32 = vpack.c.bf16 (!%p1826_p5), %v2399_v13, %v2395_v11 }
 0x163   : > { %v1079_v17 = vpop.f32.mrb[19].mxu1  ;;  %v1887_v27 = vpack.c.bf16 (!%p1826_p5), %v2403_v16, %v2401_v14  ;;  %1192 = vst.msk [vmem:[%s2814_s3 + $0x20] sm:$0xff] (!%p1826_p5), %vm1191_vm3, %v1882_v22 }
 0x164   : > { %1205 = vst.msk [vmem:[%s2814_s3 + $0x70] sm:$0x33] %vm1204_vm6, %v1892_v32 }
 0x165   : > { %1197 = vst.msk [vmem:[%s2814_s3 + $0x48] sm:$0xff] %vm1191_vm3, %v1887_v27 }
 0x166 PF: > { %p1842_p6 = scmp.le.s32.totalorder %s2140_s12, 0 }
 0x167   : > { %v1210_v33 = vld [vmem:[%s2814_s3] sm:$0xff] (!%p1842_p6)  ;;  %v1893_v0 = vpack.c.bf16 (!%p1842_p6), %v2349_v44, %v2345_v41  ;;  %v1211_v34 = vld [vmem:[%s2814_s3 + $0x8] sm:$0xff] (!%p1842_p6)  ;;  %v1894_v35 = vpack.c.bf16 (!%p1842_p6), %v2351_v45, %v2347_v42  ;;  %v1212_v36 = vld [vmem:[%s2814_s3 + $0x10] sm:$0xff] (!%p1842_p6)  ;;  %v1895_v37 = vpack.c.bf16 (!%p1842_p6), %v2373_v59, %v2369_v57  ;;  %v1896_v38 = vpack.c.bf16 (!%p1842_p6), %v2375_v60, %v2371_v58 }
 0x168   : > { %1209 = sbr.rel (%p1842_p6) target bundleno = 372 (0x174), region = 40  ;;  %v1213_v39 = vld [vmem:[%s2814_s3 + $0x18] sm:$0xff] (!%p1842_p6)  ;;  %v1897_v41 = vpack.c.bf16 (!%p1842_p6), %v2397_v12, %v2393_v10  ;;  %vm1344_vm7 = vcmask (!%p1842_p6), 1043456   ;;  %vm1345_vm8 = vcmask (!%p1842_p6), 801796   ;;  %v1215_v42 = vld [vmem:[%s2814_s3 + $0x28] sm:$0xff] (!%p1842_p6)  ;;  %v1898_v44 = vpack.c.bf16 (!%p1842_p6), %v2357_v48, %v2353_v46  ;;  %v1216_v57 = vld [vmem:[%s2814_s3 + $0x30] sm:$0xff] (!%p1842_p6) }
 0x169   : > { %v1325_v45 = vmax.bf16 (!%p1842_p6), %v1893_v0, %v1210_v33  ;;  %v1326_v53 = vmax.bf16 (!%p1842_p6), %v1894_v35, %v1211_v34  ;;  %v1327_v54 = vmax.bf16 (!%p1842_p6), %v1895_v37, %v1212_v36  ;;  %v1328_v55 = vmax.bf16 (!%p1842_p6), %v1896_v38, %v1213_v39  ;;  %vm2512_vm9 = vmor (!%p1842_p6), %vm1345_vm8, %vm1344_vm7  ;;  %v1217_v58 = vld [vmem:[%s2814_s3 + $0x38] sm:$0xff] (!%p1842_p6)  ;;  %v1218_v6 = vld [vmem:[%s2814_s3 + $0x40] sm:$0xff] (!%p1842_p6) }
 0x16a   : > { %v1330_v60 = vmax.bf16 (!%p1842_p6), %v1898_v44, %v1215_v42  ;;  %v1899_v46 = vpack.c.bf16 (!%p1842_p6), %v2359_v49, %v2355_v47  ;;  %v1900_v48 = vpack.c.bf16 (!%p1842_p6), %v2381_v63, %v2377_v61  ;;  %v1220_v8 = vld [vmem:[%s2814_s3 + $0x50] sm:$0x33] (!%p1842_p6)  ;;  %v1901_v47 = vpack.c.bf16 (!%p1842_p6), %v2383_v1, %v2379_v62  ;;  %v1221_v63 = vld [vmem:[%s2814_s3 + $0x58] sm:$0x33] (!%p1842_p6)  ;;  %v1222_v10 = vld [vmem:[%s2814_s3 + $0x60] sm:$0x33] (!%p1842_p6) }
 0x16b   : > { %1340 = vst [vmem:[%s2814_s3] sm:$0xff] (!%p1842_p6), %v1325_v45  ;;  %1341 = vst [vmem:[%s2814_s3 + $0x8] sm:$0xff] (!%p1842_p6), %v1326_v53  ;;  %v1902_v49 = vpack.c.bf16 (!%p1842_p6), %v2403_v16, %v2401_v14  ;;  %v1903_v61 = vpack.c.bf16 (!%p1842_p6), %v2365_v51, %v2361_v50  ;;  %v1904_v9 = vpack.c.bf16 (!%p1842_p6), %v2367_v52, %v2363_v43  ;;  %v1223_v62 = vld [vmem:[%s2814_s3 + $0x68] sm:$0x33] (!%p1842_p6)  ;;  %vm1357_vm10 = vcmask (!%p1842_p6), 1041408  }
 0x16c   : > { %v1214_v40 = vld [vmem:[%s2814_s3 + $0x20] sm:$0xff] (!%p1842_p6)  ;;  %v1219_v7 = vld [vmem:[%s2814_s3 + $0x48] sm:$0xff] (!%p1842_p6)  ;;  %1342 = vst [vmem:[%s2814_s3 + $0x10] sm:$0xff] (!%p1842_p6), %v1327_v54  ;;  %1343 = vst [vmem:[%s2814_s3 + $0x18] sm:$0xff] (!%p1842_p6), %v1328_v55  ;;  %v1331_v50 = vmax.bf16 (!%p1842_p6), %v1899_v46, %v1216_v57  ;;  %v1332_v43 = vmax.bf16 (!%p1842_p6), %v1900_v48, %v1217_v58  ;;  %v1905_v51 = vpack.c.bf16 (!%p1842_p6), %v2389_v4, %v2385_v2  ;;  %vm1358_vm11 = vcmask (!%p1842_p6), 799748  }
 0x16d   : > { %v1329_v59 = vmax.bf16 (!%p1842_p6), %v1897_v41, %v1214_v40  ;;  %1348 = vst [vmem:[%s2814_s3 + $0x28] sm:$0xff] (!%p1842_p6), %v1330_v60  ;;  %v1906_v52 = vpack.c.bf16 (!%p1842_p6), %v2391_v5, %v2387_v3  ;;  %v1333_v1 = vmax.bf16 (!%p1842_p6), %v1901_v47, %v1218_v6  ;;  %v1334_v12 = vmax.bf16 (!%p1842_p6), %v1902_v49, %v1219_v7  ;;  %v1224_v16 = vld [vmem:[%s2814_s3 + $0x70] sm:$0x33] (!%p1842_p6)  ;;  %vm1359_vm12 = vmor (!%p1842_p6), %vm1358_vm11, %vm1357_vm10 }
 0x16e   : > { %v1335_v14 = vmax.bf16 (!%p1842_p6), %v1903_v61, %v1220_v8  ;;  %v1336_v15 = vmax.bf16 (!%p1842_p6), %v1904_v9, %v1221_v63  ;;  %1349 = vst [vmem:[%s2814_s3 + $0x30] sm:$0xff] (!%p1842_p6), %v1331_v50  ;;  %1350 = vst [vmem:[%s2814_s3 + $0x38] sm:$0xff] (!%p1842_p6), %v1332_v43  ;;  %v1337_v2 = vmax.bf16 (!%p1842_p6), %v1905_v51, %v1222_v10 }
 0x16f   : > { %1347 = vst.msk [vmem:[%s2814_s3 + $0x20] sm:$0xff] %vm2512_vm9, %v1329_v59  ;;  %v1338_v4 = vmax.bf16 %v1906_v52, %v1223_v62  ;;  %v1907_v3 = vpack.c.bf16 %v2399_v13, %v2395_v11  ;;  %1351 = vst [vmem:[%s2814_s3 + $0x40] sm:$0xff] %v1333_v1 }
 0x170   : > { %1352 = vst.msk [vmem:[%s2814_s3 + $0x48] sm:$0xff] %vm2512_vm9, %v1334_v12  ;;  %1353 = vst [vmem:[%s2814_s3 + $0x50] sm:$0x33] %v1335_v14 }
 0x171   : > { %1354 = vst [vmem:[%s2814_s3 + $0x58] sm:$0x33] %v1336_v15  ;;  %1355 = vst [vmem:[%s2814_s3 + $0x60] sm:$0x33] %v1337_v2  ;;  %v1339_v5 = vmax.bf16 %v1907_v3, %v1224_v16 }
 0x172   : > { %1356 = vst [vmem:[%s2814_s3 + $0x68] sm:$0x33] %v1338_v4 }
 0x173   : > { %1360 = vst.msk [vmem:[%s2814_s3 + $0x70] sm:$0x33] %vm1359_vm12, %v1339_v5 }
 0x174 PF: > { %p1858_p7 = scmp.ne.s32.totalorder %s2140_s12, 3 }
 0x175   : > { %v1410_v11 = vld [vmem:[%s2813_s2] sm:$0xff] (!%p1858_p7)  ;;  %v1412_v13 = vld [vmem:[%s2813_s2 + $0x10] sm:$0xf] (!%p1858_p7)  ;;  %v2150_v17 = vmov (!%p1858_p7), 0   ;;  %v1411_v18 = vld [vmem:[%s2813_s2 + $0x8] sm:$0xff] (!%p1858_p7)  ;;  %vm1622_vm13 = vcmask (!%p1858_p7), 1043456  }
 0x176   : > { %1364 = sbr.rel (%p1858_p7) target bundleno = 533 (0x215), region = 44  ;;  %2124 = vset.pattern.permute.xlu0 (!%p1858_p7), %v2150_v17  ;;  %2125 = vset.pattern.permute.xlu1 (!%p1858_p7), %v2150_v17  ;;  %vm1623_vm14 = vcmask (!%p1858_p7), 801796   ;;  %vm1635_vm15 = vcmask (!%p1858_p7), 1041408   ;;  %vm1636_vm0 = vcmask (!%p1858_p7), 799748  }
 0x177   : > { %1415 = vperm.xlu0 (!%p1858_p7), %2124, %v1410_v11   ;;  %1425 = vperm.xlu1 (!%p1858_p7), %2125, %v1412_v13   ;;  %v1365_v19 = vld [vmem:[%s2814_s3] sm:$0xff] (!%p1858_p7)  ;;  %v1366_v20 = vld [vmem:[%s2814_s3 + $0x8] sm:$0xff] (!%p1858_p7)  ;;  %v2638_v24 = vld [vmem:[%s2814_s3 + $0x50] sm:$0x33] (!%p1858_p7) }
 0x178   : > { %v1367_v21 = vld [vmem:[%s2814_s3 + $0x10] sm:$0xff] (!%p1858_p7)  ;;  %v1368_v22 = vld [vmem:[%s2814_s3 + $0x18] sm:$0xff] (!%p1858_p7)  ;;  %v1380_v25 = vunpack.c.l.bf16 (!%p1858_p7), %v1365_v19  ;;  %v1381_v26 = vunpack.c.h.bf16 (!%p1858_p7), %v1365_v19  ;;  %v1382_v27 = vunpack.c.l.bf16 (!%p1858_p7), %v1366_v20  ;;  %v1383_v28 = vunpack.c.h.bf16 (!%p1858_p7), %v1366_v20  ;;  %v2648_v30 = vld [vmem:[%s2814_s3 + $0x60] sm:$0x33] (!%p1858_p7) }
 0x179   : > { %v2643_v29 = vld [vmem:[%s2814_s3 + $0x58] sm:$0x33] (!%p1858_p7)  ;;  %v1384_v31 = vunpack.c.l.bf16 (!%p1858_p7), %v1367_v21  ;;  %v1385_v32 = vunpack.c.h.bf16 (!%p1858_p7), %v1367_v21  ;;  %v1386_v33 = vunpack.c.l.bf16 (!%p1858_p7), %v1368_v22  ;;  %v1387_v0 = vunpack.c.h.bf16 (!%p1858_p7), %v1368_v22  ;;  %v2653_v34 = vld [vmem:[%s2814_s3 + $0x68] sm:$0x33] (!%p1858_p7)  ;;  %vm2716_vm1 = vmor (!%p1858_p7), %vm1623_vm14, %vm1622_vm13 }
 0x17a   : > { %v2658_v35 = vld [vmem:[%s2814_s3 + $0x70] sm:$0x33] (!%p1858_p7)  ;;  %v1400_v38 = vunpack.c.l.bf16 (!%p1858_p7), %v2638_v24  ;;  %v1401_v39 = vunpack.c.h.bf16 (!%p1858_p7), %v2638_v24  ;;  %v2665_v40 = vld [vmem:[%s2814_s3 + $0x28] sm:$0xff] (!%p1858_p7)  ;;  %v1402_v42 = vunpack.c.l.bf16 (!%p1858_p7), %v2643_v29  ;;  %v1403_v44 = vunpack.c.h.bf16 (!%p1858_p7), %v2643_v29  ;;  %v2679_v54 = vld [vmem:[%s2814_s3 + $0x38] sm:$0xff] (!%p1858_p7) }
 0x17b   : > { %1420 = vperm.xlu0 (!%p1858_p7), %2124, %v1411_v18   ;;  %v1369_v23 = vld [vmem:[%s2814_s3 + $0x20] sm:$0xff] (!%p1858_p7)  ;;  %v2670_v41 = vld [vmem:[%s2814_s3 + $0x30] sm:$0xff] (!%p1858_p7)  ;;  %v1404_v45 = vunpack.c.l.bf16 (!%p1858_p7), %v2648_v30  ;;  %v1405_v53 = vunpack.c.h.bf16 (!%p1858_p7), %v2648_v30  ;;  %v1406_v56 = vunpack.c.l.bf16 (!%p1858_p7), %v2653_v34  ;;  %v1407_v57 = vunpack.c.h.bf16 (!%p1858_p7), %v2653_v34  ;;  %v2693_v60 = vld [vmem:[%s2814_s3 + $0x48] sm:$0xff] (!%p1858_p7) }
 0x17c   : > { %v1388_v36 = vunpack.c.l.bf16 (!%p1858_p7), %v1369_v23  ;;  %v1389_v37 = vunpack.c.h.bf16 (!%p1858_p7), %v1369_v23  ;;  %v2684_v55 = vld [vmem:[%s2814_s3 + $0x40] sm:$0xff] (!%p1858_p7)  ;;  %v1408_v58 = vunpack.c.l.bf16 (!%p1858_p7), %v2658_v35  ;;  %v1409_v59 = vunpack.c.h.bf16 (!%p1858_p7), %v2658_v35  ;;  %vm2748_vm2 = vmor (!%p1858_p7), %vm1636_vm0, %vm1635_vm15 }
 0x17d   : > { %v1390_v46 = vunpack.c.l.bf16 %v2665_v40  ;;  %v1391_v48 = vunpack.c.h.bf16 %v2665_v40  ;;  %v1392_v6 = vunpack.c.l.bf16 %v2670_v41  ;;  %v1393_v7 = vunpack.c.h.bf16 %v2670_v41 }
 0x17e   : > { %v1394_v8 = vunpack.c.l.bf16 %v2679_v54  ;;  %v1395_v47 = vunpack.c.h.bf16 %v2679_v54  ;;  %v1396_v49 = vunpack.c.l.bf16 %v2684_v55  ;;  %v1397_v61 = vunpack.c.h.bf16 %v2684_v55 }
 0x17f   : > { %v1398_v9 = vunpack.c.l.bf16 %v2693_v60  ;;  %v1399_v10 = vunpack.c.h.bf16 %v2693_v60 }
 0x1f6   : > { %v1416_v63 = vpop.permute.xlu0 %1415  ;;  %v1426_v3 = vpop.permute.xlu1 %1425 }
 0x1f7   : > { %v1428_v62 = vadd.f32 %v1416_v63, %v1380_v25  ;;  %v1429_v50 = vadd.f32 %v1416_v63, %v1381_v26  ;;  %v1430_v43 = vadd.f32 %v1416_v63, %v1382_v27  ;;  %v1431_v51 = vadd.f32 %v1416_v63, %v1383_v28 }
 0x1f8   : > { %v1432_v52 = vadd.f32 %v1416_v63, %v1384_v31  ;;  %v1433_v1 = vadd.f32 %v1416_v63, %v1385_v32  ;;  %v1434_v12 = vadd.f32 %v1416_v63, %v1386_v33  ;;  %v1435_v14 = vadd.f32 %v1416_v63, %v1387_v0 }
 0x1f9   : > { %v1436_v15 = vadd.f32 %v1416_v63, %v1388_v36  ;;  %v1437_v16 = vadd.f32 %v1416_v63, %v1389_v37  ;;  %v1458_v2 = vmax.f32 %v1428_v62, 0.0  ;;  %v1459_v4 = vmax.f32 %v1429_v50, 0.0 }
 0x1fa   : > { %v1460_v5 = vmax.f32 %v1430_v43, 0.0  ;;  %v1461_v11 = vmax.f32 %v1431_v51, 0.0  ;;  %v1462_v13 = vmax.f32 %v1432_v52, 0.0  ;;  %v1463_v17 = vmax.f32 %v1433_v1, 0.0 }
 0x1fb   : > { %v1464_v18 = vmax.f32 %v1434_v12, 0.0  ;;  %v1465_v19 = vmax.f32 %v1435_v14, 0.0  ;;  %v1466_v20 = vmax.f32 %v1436_v15, 0.0  ;;  %v1467_v21 = vmax.f32 %v1437_v16, 0.0  ;;  %v1421_v14 = vpop.permute.xlu0 %1420 }
 0x1fc   : > { %v1488_v22 = vmul.f32 0.999995, %v1458_v2  ;;  %v1489_v23 = vmul.f32 0.999995, %v1459_v4  ;;  %v1490_v24 = vmul.f32 0.999995, %v1460_v5  ;;  %v1448_v25 = vadd.f32 %v1426_v3, %v1400_v38 }
 0x1fd   : > { %v1491_v26 = vmul.f32 0.999995, %v1461_v11  ;;  %v1492_v27 = vmul.f32 0.999995, %v1462_v13  ;;  %v1493_v28 = vmul.f32 0.999995, %v1463_v17  ;;  %v1449_v31 = vadd.f32 %v1426_v3, %v1401_v39 }
 0x1fe   : > { %v1494_v32 = vmul.f32 0.999995, %v1464_v18  ;;  %v1495_v33 = vmul.f32 0.999995, %v1465_v19  ;;  %v1496_v0 = vmul.f32 0.999995, %v1466_v20  ;;  %v1908_v36 = vpack.c.bf16 %v1489_v23, %v1488_v22 }
 0x1ff   : > { %v1497_v37 = vmul.f32 0.999995, %v1467_v21  ;;  %v1909_v63 = vpack.c.bf16 %v1491_v26, %v1490_v24  ;;  %v1910_v62 = vpack.c.bf16 %v1493_v28, %v1492_v27  ;;  %v1450_v50 = vadd.f32 %v1426_v3, %v1402_v42 }
 0x200   : > { %v1911_v43 = vpack.c.bf16 %v1495_v33, %v1494_v32  ;;  %1618 = vst [vmem:[%s2814_s3] sm:$0xff] %v1908_v36  ;;  %v1451_v38 = vadd.f32 %v1426_v3, %v1403_v44  ;;  %v1452_v51 = vadd.f32 %v1426_v3, %v1404_v45  ;;  %v1453_v39 = vadd.f32 %v1426_v3, %v1405_v53 }
 0x201   : > { %v1912_v42 = vpack.c.bf16 %v1497_v37, %v1496_v0  ;;  %1619 = vst [vmem:[%s2814_s3 + $0x8] sm:$0xff] %v1909_v63  ;;  %1620 = vst [vmem:[%s2814_s3 + $0x10] sm:$0xff] %v1910_v62  ;;  %v1454_v29 = vadd.f32 %v1426_v3, %v1406_v56  ;;  %v1455_v30 = vadd.f32 %v1426_v3, %v1407_v57  ;;  %v1478_v53 = vmax.f32 %v1448_v25, 0.0 }
 0x202   : > { %v1456_v44 = vadd.f32 %v1426_v3, %v1408_v58  ;;  %1621 = vst [vmem:[%s2814_s3 + $0x18] sm:$0xff] %v1911_v43  ;;  %v1457_v45 = vadd.f32 %v1426_v3, %v1409_v59  ;;  %v1479_v1 = vmax.f32 %v1449_v31, 0.0  ;;  %v1480_v12 = vmax.f32 %v1450_v50, 0.0 }
 0x203   : > { %v1481_v15 = vmax.f32 %v1451_v38, 0.0  ;;  %v1482_v16 = vmax.f32 %v1452_v51, 0.0  ;;  %v1483_v56 = vmax.f32 %v1453_v39, 0.0  ;;  %v1484_v2 = vmax.f32 %v1454_v29, 0.0  ;;  %1625 = vst.msk [vmem:[%s2814_s3 + $0x20] sm:$0xff] %vm2716_vm1, %v1912_v42 }
 0x204   : > { %v1485_v34 = vmax.f32 %v1455_v30, 0.0  ;;  %v1486_v57 = vmax.f32 %v1456_v44, 0.0  ;;  %v1487_v58 = vmax.f32 %v1457_v45, 0.0  ;;  %v1508_v4 = vmul.f32 0.999995, %v1478_v53 }
 0x205   : > { %v1509_v35 = vmul.f32 0.999995, %v1479_v1  ;;  %v1510_v59 = vmul.f32 0.999995, %v1480_v12  ;;  %v1511_v3 = vmul.f32 0.999995, %v1481_v15  ;;  %v1438_v5 = vadd.f32 %v1421_v14, %v1390_v46 }
 0x206   : > { %v1512_v11 = vmul.f32 0.999995, %v1482_v16  ;;  %v1513_v13 = vmul.f32 0.999995, %v1483_v56  ;;  %v1514_v17 = vmul.f32 0.999995, %v1484_v2  ;;  %v1439_v18 = vadd.f32 %v1421_v14, %v1391_v48 }
 0x207   : > { %v1515_v19 = vmul.f32 0.999995, %v1485_v34  ;;  %v1516_v20 = vmul.f32 0.999995, %v1486_v57  ;;  %v1517_v21 = vmul.f32 0.999995, %v1487_v58  ;;  %v1918_v22 = vpack.c.bf16 %v1509_v35, %v1508_v4 }
 0x208   : > { %v1919_v24 = vpack.c.bf16 %v1511_v3, %v1510_v59  ;;  %v1920_v25 = vpack.c.bf16 %v1513_v13, %v1512_v11  ;;  %v1440_v46 = vadd.f32 %v1421_v14, %v1392_v6  ;;  %v1441_v26 = vadd.f32 %v1421_v14, %v1393_v7 }
 0x209   : > { %v1921_v40 = vpack.c.bf16 %v1515_v19, %v1514_v17  ;;  %v1922_v48 = vpack.c.bf16 %v1517_v21, %v1516_v20  ;;  %1631 = vst [vmem:[%s2814_s3 + $0x50] sm:$0x33] %v1918_v22  ;;  %v1442_v27 = vadd.f32 %v1421_v14, %v1394_v8  ;;  %v1443_v28 = vadd.f32 %v1421_v14, %v1395_v47 }
 0x20a   : > { %1632 = vst [vmem:[%s2814_s3 + $0x58] sm:$0x33] %v1919_v24  ;;  %1633 = vst [vmem:[%s2814_s3 + $0x60] sm:$0x33] %v1920_v25  ;;  %v1444_v41 = vadd.f32 %v1421_v14, %v1396_v49  ;;  %v1445_v6 = vadd.f32 %v1421_v14, %v1397_v61  ;;  %v1446_v7 = vadd.f32 %v1421_v14, %v1398_v9  ;;  %v1468_v8 = vmax.f32 %v1438_v5, 0.0 }
 0x20b   : > { %v1447_v54 = vadd.f32 %v1421_v14, %v1399_v10  ;;  %1634 = vst [vmem:[%s2814_s3 + $0x68] sm:$0x33] %v1921_v40  ;;  %1638 = vst.msk [vmem:[%s2814_s3 + $0x70] sm:$0x33] %vm2748_vm2, %v1922_v48  ;;  %v1469_v47 = vmax.f32 %v1439_v18, 0.0  ;;  %v1470_v55 = vmax.f32 %v1440_v46, 0.0 }
 0x20c   : > { %v1471_v49 = vmax.f32 %v1441_v26, 0.0  ;;  %v1472_v61 = vmax.f32 %v1442_v27, 0.0  ;;  %v1473_v31 = vmax.f32 %v1443_v28, 0.0  ;;  %v1474_v9 = vmax.f32 %v1444_v41, 0.0 }
 0x20d   : > { %v1475_v32 = vmax.f32 %v1445_v6, 0.0  ;;  %v1476_v60 = vmax.f32 %v1446_v7, 0.0  ;;  %v1477_v10 = vmax.f32 %v1447_v54, 0.0  ;;  %v1498_v33 = vmul.f32 0.999995, %v1468_v8 }
 0x20e   : > { %v1499_v0 = vmul.f32 0.999995, %v1469_v47  ;;  %v1500_v36 = vmul.f32 0.999995, %v1470_v55  ;;  %v1501_v37 = vmul.f32 0.999995, %v1471_v49 }
 0x20f   : > { %v1502_v63 = vmul.f32 0.999995, %v1472_v61  ;;  %v1503_v62 = vmul.f32 0.999995, %v1473_v31  ;;  %v1504_v50 = vmul.f32 0.999995, %v1474_v9 }
 0x210   : > { %v1505_v43 = vmul.f32 0.999995, %v1475_v32  ;;  %v1913_v38 = vpack.c.bf16 %v1499_v0, %v1498_v33  ;;  %v1506_v51 = vmul.f32 0.999995, %v1476_v60  ;;  %v1507_v39 = vmul.f32 0.999995, %v1477_v10 }
 0x211   : > { %v1914_v42 = vpack.c.bf16 %v1501_v37, %v1500_v36  ;;  %v1915_v29 = vpack.c.bf16 %v1503_v62, %v1502_v63 }
 0x212   : > { %v1916_v30 = vpack.c.bf16 %v1505_v43, %v1504_v50  ;;  %1626 = vst [vmem:[%s2814_s3 + $0x28] sm:$0xff] %v1913_v38  ;;  %v1917_v44 = vpack.c.bf16 %v1507_v39, %v1506_v51 }
 0x213   : > { %1627 = vst [vmem:[%s2814_s3 + $0x30] sm:$0xff] %v1914_v42  ;;  %1628 = vst [vmem:[%s2814_s3 + $0x38] sm:$0xff] %v1915_v29 }
 0x214   : > { %1629 = vst [vmem:[%s2814_s3 + $0x40] sm:$0xff] %v1916_v30  ;;  %1630 = vst.msk [vmem:[%s2814_s3 + $0x48] sm:$0xff] %vm2716_vm1, %v1917_v44 }
 0x215 PF: > { %s13_s14 = sadd.s32 1, %s2148_s14   ;;  %s2821_s12 = smov %s2144_s13 }
 0x216   : > { %p10_p8 = scmp.ge.s32.totalorder %s13_s14, 6   ;;  %s2822_s13 = smov %s2824_s15 }
 0x218   :  { %12 = sbr.rel (!%p10_p8) target bundleno = 2 (0x2), region = 74 }

// kernel: net_forward.9
= control target key start
LH: loop header
LB: loop body
LE: loop exit
PB: predicated region body
PF: predicated region fallthrough
CT: control target
= control target key end

     0   :  { %s1158_s12 = smov 0   ;;  %s1160_s13 = smov 0   ;;  %s1371_s0 = inlined_call_operand.vmem [shape: bf16[40,320], index: 0, kind: input, shape index: {}]   ;;  %s1372_s1 = inlined_call_operand.vmem [shape: bf16[4,320,242], index: 1, kind: input, shape index: {}]   ;;  %s1373_s2 = inlined_call_operand.vmem [shape: f32[40,1], index: 2, kind: input, shape index: {}]   ;;  %s1374_s3 = inlined_call_operand.vmem [shape: bf16[40,242], index: 3, kind: output, shape index: {}]  }
   0x1   :  { %s1162_s14 = smov 0  }
   0x2 LB: > { %s22_s15 = sadd.s32 1, %s1130_s13  ;;  %p911_p0 = scmp.ge.s32.totalorder %s1134_s14, 1  ;;  %s1134_s14 = sphi %s1162_s14, %s13_s14   ;;  %s1130_s13 = sphi %s1160_s13, %s1378_s13   ;;  %s1126_s12 = sphi %s1158_s12, %s1377_s12  }
   0x3   : > { %p23_p1 = scmp.ge.s32.totalorder %s22_s15, 4  ;;  %p156_p2 = scmp.lt.s32.totalorder %s1134_s14, 5 }
   0x5   : > { %s1380_s15 = smov (%p23_p1, %s22_s15), 0  ;;  %p157_p3 = pnand %p911_p0, %p156_p2 }
   0x6   : > { %p185_p4 = scmp.lt.s32.totalorder (!%p157_p3), %s1126_s12, 3  ;;  %v1136_v0 = vmov (!%p157_p3), 0   ;;  %v1102_v1 = vld [vmem:[%s1371_s0 + $0x4] ss:$12 sps:$4 sm:$0xff] (!%p157_p3)   ;;  %v1099_v27 = vld [vmem:[%s1371_s0 + $0x8] ss:$12 sps:$4 sm:$0xff] (!%p157_p3)  }
   0x7   : > { %160 = sbr.rel (%p157_p3) target bundleno = 476 (0x1dc), region = 32  ;;  %594 = vmatprep.mubr.bf16.mxu0 (!%p157_p3), %v1136_v0  ;;  %533 = vmatprep.mubr.bf16.mxu1 (!%p157_p3), %v1102_v1  ;;  %vm491_vm0 = vcmask (!%p157_p3), 523264   ;;  %v1103_v32 = vld [vmem:[%s1371_s0 + $0x20] ss:$12 sps:$4 sm:$0xff] (!%p157_p3)   ;;  %v1107_v37 = vld [vmem:[%s1371_s0 + $0x38] ss:$0 sps:$4 sm:$0xff] (!%p157_p3)  }
   0x8   : > { %v1100_v45 = vld [vmem:[%s1371_s0] ss:$12 sps:$4 sm:$0xff] (!%p157_p3)   ;;  %v1104_v46 = vld [vmem:[%s1371_s0 + $0x1c] ss:$12 sps:$4 sm:$0xff] (!%p157_p3)   ;;  %v209_v47 = vld [vmem:[%s1371_s0 + $0x30] sm:$0xff] (!%p157_p3)  ;;  %p965_p5 = scmp.ne.s32.totalorder (!%p157_p3), %s1126_s12, 0 }
   0x9   : > { %v1106_v48 = vld [vmem:[%s1371_s0 + $0x18] ss:$12 sps:$4 sm:$0xff] (!%p157_p3)   ;;  %v920_v49 = vcombine.high (!%p157_p3), %v209_v47, %v209_v47  ;;  %v919_v50 = vcombine.low (!%p157_p3), %v209_v47, %v209_v47 }
   0xe   : > { %s186_s16 = scalar_select %p185_p4, %s1126_s12, 3 }
   0xf   : > { %vm659_vm1 = vcmask (!%p965_p5), 1043456   ;;  %vm660_vm2 = vcmask (!%p965_p5), 932868  }
  0x10   : > { %s1012_s19 = smul.u32 320, %s186_s16  ;;  %vm661_vm3 = vmor (!%p965_p5), %vm660_vm2, %vm659_vm1 }
  0x12   : > { %s1187_s22 = scalar_lea.vmem %s1372_s1, %s1012_s19 }
  0x13   : > { %v1039_v2 = vld [vmem:[%s1187_s22 + $0x4] ss:$8 sps:$4 sm:$0xff]   ;;  %v1041_v3 = vld [vmem:[%s1187_s22] ss:$8 sps:$4 sm:$0xff]   ;;  %v1042_v4 = vld [vmem:[%s1187_s22 + $0x14] ss:$8 sps:$4 sm:$0xff]  }
  0x14   : > { %501 = vmatprep.subr.bf16.mxu1 %v1039_v2  ;;  %v1044_v5 = vld [vmem:[%s1187_s22 + $0x10] ss:$8 sps:$4 sm:$0xff]   ;;  %v1045_v6 = vld [vmem:[%s1187_s22 + $0x24] ss:$8 sps:$4 sm:$0xff]   ;;  %v1047_v7 = vld [vmem:[%s1187_s22 + $0x20] ss:$8 sps:$4 sm:$0xff]  }
  0x15   : > { %502 = vmatpush1.bf16.msra.mxu1 %v1041_v3  ;;  %v1048_v8 = vld [vmem:[%s1187_s22 + $0x34] ss:$8 sps:$4 sm:$0xff]   ;;  %v1050_v9 = vld [vmem:[%s1187_s22 + $0x30] ss:$8 sps:$4 sm:$0xff]   ;;  %v1051_v10 = vld [vmem:[%s1187_s22 + $0x44] ss:$8 sps:$4 sm:$0xff]  }
  0x16   : > { %503 = vmatprep.subr.bf16.mxu1 %v1042_v4  ;;  %v1053_v11 = vld [vmem:[%s1187_s22 + $0x40] ss:$8 sps:$4 sm:$0xff]   ;;  %v1054_v12 = vld [vmem:[%s1187_s22 + $0x54] ss:$8 sps:$4 sm:$0xff]   ;;  %v1075_v13 = vld [vmem:[%s1187_s22 + $0x104] ss:$8 sps:$4 sm:$0xff]  }
  0x17   : > { %v1077_v14 = vld [vmem:[%s1187_s22 + $0x100] ss:$8 sps:$4 sm:$0xff]   ;;  %v1056_v15 = vld [vmem:[%s1187_s22 + $0x50] ss:$8 sps:$4 sm:$0xff]   ;;  %562 = vmatprep.subr.bf16.mxu0 %v1075_v13  ;;  %v1081_v16 = vld [vmem:[%s1187_s22 + $0x114] ss:$8 sps:$4 sm:$0xff]  }
  0x18   : > { %563 = vmatpush1.bf16.msra.mxu0 %v1077_v14  ;;  %v1083_v17 = vld [vmem:[%s1187_s22 + $0x110] ss:$8 sps:$4 sm:$0xff]   ;;  %v1057_v18 = vld [vmem:[%s1187_s22 + $0x64] ss:$8 sps:$4 sm:$0xff]   ;;  %v1059_v19 = vld [vmem:[%s1187_s22 + $0x60] ss:$8 sps:$4 sm:$0xff]  }
  0x19   : > { %504 = vmatpush1.bf16.msra.mxu1 %v1044_v5  ;;  %564 = vmatprep.subr.bf16.mxu0 %v1081_v16  ;;  %v1087_v20 = vld [vmem:[%s1187_s22 + $0x124] ss:$8 sps:$4 sm:$0xff]   ;;  %v1060_v21 = vld [vmem:[%s1187_s22 + $0x74] ss:$8 sps:$4 sm:$0xff]   ;;  %v1089_v22 = vld [vmem:[%s1187_s22 + $0x120] ss:$8 sps:$4 sm:$0xff]  }
  0x1a   : > { %505 = vmatprep.subr.bf16.mxu1 %v1045_v6  ;;  %v1093_v23 = vld [vmem:[%s1187_s22 + $0x134] ss:$8 sps:$4 sm:$0xff]   ;;  %v1062_v24 = vld [vmem:[%s1187_s22 + $0x70] ss:$8 sps:$4 sm:$0xff]   ;;  %v1063_v26 = vld [vmem:[%s1187_s22 + $0x84] ss:$8 sps:$4 sm:$0xff]  }
  0x1b   : > { %v1095_v25 = vld [vmem:[%s1187_s22 + $0x130] ss:$8 sps:$4 sm:$0xff]   ;;  %v1065_v28 = vld [vmem:[%s1187_s22 + $0x80] ss:$8 sps:$4 sm:$0xff]   ;;  %v1066_v29 = vld [vmem:[%s1187_s22 + $0x94] ss:$8 sps:$4 sm:$0xff]  }
  0x1c   : > { %565 = vmatpush1.bf16.msra.mxu0 %v1083_v17  ;;  %v1068_v30 = vld [vmem:[%s1187_s22 + $0x90] ss:$8 sps:$4 sm:$0xff]   ;;  %v1069_v31 = vld [vmem:[%s1187_s22 + $0xa4] ss:$8 sps:$4 sm:$0xff]   ;;  %v1071_v33 = vld [vmem:[%s1187_s22 + $0xa0] ss:$8 sps:$4 sm:$0xff]  }
  0x1d   : > { %506 = vmatpush1.bf16.msra.mxu1 %v1047_v7  ;;  %566 = vmatprep.subr.bf16.mxu0 %v1087_v20  ;;  %v1072_v34 = vld [vmem:[%s1187_s22 + $0xb4] ss:$8 sps:$4 sm:$0xff]   ;;  %v1074_v35 = vld [vmem:[%s1187_s22 + $0xb0] ss:$8 sps:$4 sm:$0xff]   ;;  %v1078_v36 = vld [vmem:[%s1187_s22 + $0xc4] ss:$8 sps:$4 sm:$0xff]  }
  0x1e   : > { %507 = vmatprep.subr.bf16.mxu1 %v1048_v8  ;;  %v1080_v38 = vld [vmem:[%s1187_s22 + $0xc0] ss:$8 sps:$4 sm:$0xff]   ;;  %v1084_v39 = vld [vmem:[%s1187_s22 + $0xd4] ss:$8 sps:$4 sm:$0xff]   ;;  %v1086_v40 = vld [vmem:[%s1187_s22 + $0xd0] ss:$8 sps:$4 sm:$0xff]  }
  0x1f   : > { %v1090_v41 = vld [vmem:[%s1187_s22 + $0xe4] ss:$8 sps:$4 sm:$0xff]   ;;  %v1092_v42 = vld [vmem:[%s1187_s22 + $0xe0] ss:$8 sps:$4 sm:$0xff]   ;;  %v1096_v43 = vld [vmem:[%s1187_s22 + $0xf4] ss:$8 sps:$4 sm:$0xff]  }
  0x20   : > { %567 = vmatpush1.bf16.msra.mxu0 %v1089_v22  ;;  %v1098_v44 = vld [vmem:[%s1187_s22 + $0xf0] ss:$8 sps:$4 sm:$0xff]  }
  0x21   : > { %508 = vmatpush1.bf16.msra.mxu1 %v1050_v9  ;;  %568 = vmatprep.subr.bf16.mxu0 %v1093_v23 }
  0x22   : > { %509 = vmatprep.subr.bf16.mxu1 %v1051_v10 }
  0x24   : > { %569 = vmatpush1.bf16.msra.mxu0 %v1095_v25 }
  0x25   : > { %510 = vmatpush1.bf16.msra.mxu1 %v1053_v11 }
  0x26   : > { %511 = vmatprep.subr.bf16.mxu1 %v1054_v12 }
  0x27   : > { %962 = vmatmul.mubr.msk.bf16.vlgmr.msra.gmra.mrb[0].mxu0 %vm491_vm0, %v1099_v27 }
  0x28   : > { %604 = vmatprep.mubr.bf16.mxu0 %v1136_v0 }
  0x29   : > { %512 = vmatpush1.bf16.msra.mxu1 %v1056_v15 }
  0x2a   : > { %513 = vmatprep.subr.bf16.mxu1 %v1057_v18 }
  0x2d   : > { %514 = vmatpush1.bf16.msra.mxu1 %v1059_v19 }
  0x2e   : > { %515 = vmatprep.subr.bf16.mxu1 %v1060_v21 }
  0x2f   : > { %963 = vmatmul.mubr.msk.bf16.gmra.mrb[4].mxu0 %vm491_vm0, %v1103_v32 }
  0x30   : > { %614 = vmatprep.mubr.bf16.mxu0 %v1136_v0 }
  0x31   : > { %516 = vmatpush1.bf16.msra.mxu1 %v1062_v24 }
  0x32   : > { %517 = vmatprep.subr.bf16.mxu1 %v1063_v26 }
  0x35   : > { %518 = vmatpush1.bf16.msra.mxu1 %v1065_v28 }
  0x36   : > { %519 = vmatprep.subr.bf16.mxu1 %v1066_v29 }
  0x37   : > { %964 = vmatmul.mubr.msk.bf16.gmra.mrb[8].mxu0 %vm491_vm0, %v1107_v37 }
  0x39   : > { %520 = vmatpush1.bf16.msra.mxu1 %v1068_v30 }
  0x3a   : > { %521 = vmatprep.subr.bf16.mxu1 %v1069_v31 }
  0x3d   : > { %522 = vmatpush1.bf16.msra.mxu1 %v1071_v33 }
  0x3e   : > { %523 = vmatprep.subr.bf16.mxu1 %v1072_v34 }
  0x41   : > { %524 = vmatpush1.bf16.msra.mxu1 %v1074_v35 }
  0x42   : > { %525 = vmatprep.subr.bf16.mxu1 %v1078_v36 }
  0x45   : > { %526 = vmatpush1.bf16.msra.mxu1 %v1080_v38 }
  0x46   : > { %527 = vmatprep.subr.bf16.mxu1 %v1084_v39 }
  0x49   : > { %528 = vmatpush1.bf16.msra.mxu1 %v1086_v40 }
  0x4a   : > { %529 = vmatprep.subr.bf16.mxu1 %v1090_v41 }
  0x4d   : > { %530 = vmatpush1.bf16.msra.mxu1 %v1092_v42 }
  0x4e   : > { %531 = vmatprep.subr.bf16.mxu1 %v1096_v43 }
  0x51   : > { %532 = vmatpush1.bf16.msra.mxu1 %v1098_v44 }
  0x54   : > { %534 = vmatmul.mubr.bf16.vlgmr.msra.gmra.mrb[0].mxu1 %v1100_v45 }
  0x55   : > { %543 = vmatprep.mubr.bf16.mxu1 %v1104_v46 }
  0x5c   : > { %544 = vmatmul.mubr.bf16.gmra.mrb[4].mxu1 %v1106_v48 }
  0x5d   : > { %553 = vmatprep.mubr.bf16.mxu1 %v920_v49 }
  0x64   : > { %554 = vmatmul.mubr.bf16.gmra.mrb[8].mxu1 %v919_v50 }
  0xfa   : > { %v596_v51 = vpop.f32.mrb[0].mxu0 }
  0xfb   : > { %v598_v52 = vpop.f32.mrb[1].mxu0 }
  0xfc   : > { %v600_v53 = vpop.f32.mrb[2].mxu0 }
  0xfd   : > { %v602_v54 = vpop.f32.mrb[3].mxu0 }
 0x102   : > { %v606_v55 = vpop.f32.mrb[4].mxu0 }
 0x103   : > { %v608_v56 = vpop.f32.mrb[5].mxu0 }
 0x104   : > { %v610_v57 = vpop.f32.mrb[6].mxu0 }
 0x105   : > { %v612_v58 = vpop.f32.mrb[7].mxu0 }
 0x10a   : > { %v616_v59 = vpop.f32.mrb[8].mxu0 }
 0x10b   : > { %v618_v60 = vpop.f32.mrb[9].mxu0 }
 0x10c   : > { %v620_v61 = vpop.f32.mrb[10].mxu0 }
 0x10d   : > { %v621_v62 = vpop.f32.mrb[11].mxu0 }
 0x127   : > { %v535_v63 = vpop.f32.mrb[0].mxu1 }
 0x128   : > { %v597_v0 = vadd.f32 %v596_v51, %v535_v63  ;;  %v537_v1 = vpop.f32.mrb[1].mxu1 }
 0x129   : > { %v599_v2 = vadd.f32 %v598_v52, %v537_v1  ;;  %v539_v3 = vpop.f32.mrb[2].mxu1 }
 0x12a   : > { %v601_v4 = vadd.f32 %v600_v53, %v539_v3  ;;  %v541_v5 = vpop.f32.mrb[3].mxu1 }
 0x12b   : > { %v603_v6 = vadd.f32 %v602_v54, %v541_v5  ;;  %v987_v21 = vpack.c.bf16 (!%p965_p5), %v599_v2, %v597_v0 }
 0x12d   : > { %v988_v22 = vpack.c.bf16 (!%p965_p5), %v603_v6, %v601_v4  ;;  %662 = vst.msk [vmem:[%s1374_s3] sm:$0xff] (!%p965_p5), %vm661_vm3, %v987_v21 }
 0x12f   : > { %v545_v7 = vpop.f32.mrb[4].mxu1  ;;  %663 = vst.msk [vmem:[%s1374_s3 + $0x8] sm:$0xff] (!%p965_p5), %vm661_vm3, %v988_v22 }
 0x130   : > { %v607_v8 = vadd.f32 %v606_v55, %v545_v7  ;;  %v547_v9 = vpop.f32.mrb[5].mxu1 }
 0x131   : > { %v609_v10 = vadd.f32 %v608_v56, %v547_v9  ;;  %v549_v11 = vpop.f32.mrb[6].mxu1 }
 0x132   : > { %v611_v12 = vadd.f32 %v610_v57, %v549_v11  ;;  %v551_v13 = vpop.f32.mrb[7].mxu1 }
 0x133   : > { %v613_v14 = vadd.f32 %v612_v58, %v551_v13  ;;  %v989_v23 = vpack.c.bf16 (!%p965_p5), %v609_v10, %v607_v8 }
 0x134   : > { %626 = sbr.rel (%p965_p5) target bundleno = 318 (0x13e), region = 36 }
 0x135   : > { %v990_v24 = vpack.c.bf16 (!%p965_p5), %v613_v14, %v611_v12  ;;  %664 = vst.msk [vmem:[%s1374_s3 + $0x10] sm:$0xff] (!%p965_p5), %vm661_vm3, %v989_v23 }
 0x137   : > { %v555_v15 = vpop.f32.mrb[8].mxu1  ;;  %665 = vst.msk [vmem:[%s1374_s3 + $0x18] sm:$0xff] (!%p965_p5), %vm661_vm3, %v990_v24 }
 0x138   : > { %v617_v16 = vadd.f32 %v616_v59, %v555_v15  ;;  %v557_v17 = vpop.f32.mrb[9].mxu1 }
 0x139   : > { %v619_v18 = vadd.f32 %v618_v60, %v557_v17  ;;  %v559_v19 = vpop.f32.mrb[10].mxu1 }
 0x13a   : > { %v560_v20 = vpop.f32.mrb[11].mxu1 }
 0x13b   : > { %v991_v25 = vpack.c.bf16 %v619_v18, %v617_v16 }
 0x13d   : > { %666 = vst.msk [vmem:[%s1374_s3 + $0x20] sm:$0xff] %vm661_vm3, %v991_v25 }
 0x13e PF: > { %p971_p6 = scmp.le.s32.totalorder %s1126_s12, 0 }
 0x13f   : > { %v671_v26 = vld [vmem:[%s1374_s3] sm:$0xff] (!%p971_p6)  ;;  %v992_v27 = vpack.c.bf16 (!%p971_p6), %v599_v2, %v597_v0  ;;  %vm713_vm4 = vcmask (!%p971_p6), 1043456   ;;  %vm714_vm5 = vcmask (!%p971_p6), 932868   ;;  %v672_v28 = vld [vmem:[%s1374_s3 + $0x8] sm:$0xff] (!%p971_p6)  ;;  %v993_v29 = vpack.c.bf16 (!%p971_p6), %v603_v6, %v601_v4  ;;  %v673_v30 = vld [vmem:[%s1374_s3 + $0x10] sm:$0xff] (!%p971_p6) }
 0x140   : > { %670 = sbr.rel (%p971_p6) target bundleno = 328 (0x148), region = 40  ;;  %vm715_vm6 = vmor (!%p971_p6), %vm714_vm5, %vm713_vm4  ;;  %v994_v31 = vpack.c.bf16 (!%p971_p6), %v609_v10, %v607_v8  ;;  %v995_v33 = vpack.c.bf16 (!%p971_p6), %v613_v14, %v611_v12  ;;  %v996_v35 = vpack.c.bf16 (!%p971_p6), %v619_v18, %v617_v16 }
 0x141   : > { %v674_v32 = vld [vmem:[%s1374_s3 + $0x18] sm:$0xff] (!%p971_p6)  ;;  %v708_v36 = vmax.bf16 (!%p971_p6), %v992_v27, %v671_v26  ;;  %v709_v37 = vmax.bf16 (!%p971_p6), %v993_v29, %v672_v28 }
 0x142   : > { %v710_v38 = vmax.bf16 (!%p971_p6), %v994_v31, %v673_v30  ;;  %v711_v39 = vmax.bf16 (!%p971_p6), %v995_v33, %v674_v32 }
 0x143   : > { %716 = vst.msk [vmem:[%s1374_s3] sm:$0xff] (!%p971_p6), %vm715_vm6, %v708_v36  ;;  %717 = vst.msk [vmem:[%s1374_s3 + $0x8] sm:$0xff] (!%p971_p6), %vm715_vm6, %v709_v37 }
 0x144   : > { %v675_v34 = vld [vmem:[%s1374_s3 + $0x20] sm:$0xff] (!%p971_p6)  ;;  %718 = vst.msk [vmem:[%s1374_s3 + $0x10] sm:$0xff] (!%p971_p6), %vm715_vm6, %v710_v38  ;;  %719 = vst.msk [vmem:[%s1374_s3 + $0x18] sm:$0xff] (!%p971_p6), %vm715_vm6, %v711_v39 }
 0x145   : > { %v712_v40 = vmax.bf16 (!%p971_p6), %v996_v35, %v675_v34 }
 0x147   : > { %720 = vst.msk [vmem:[%s1374_s3 + $0x20] sm:$0xff] %vm715_vm6, %v712_v40 }
 0x148 PF: > { %p977_p7 = scmp.ne.s32.totalorder %s1126_s12, 3 }
 0x149   : > { %v742_v41 = vld [vmem:[%s1373_s2 + $0x10] sm:$0xff] (!%p977_p7)  ;;  %v740_v42 = vld [vmem:[%s1373_s2] sm:$0xff] (!%p977_p7)  ;;  %v1137_v43 = vmov (!%p977_p7), 0   ;;  %v743_v44 = vld [vmem:[%s1373_s2 + $0x18] sm:$0xff] (!%p977_p7)  ;;  %vm832_vm7 = vcmask (!%p977_p7), 1043456   ;;  %vm833_vm8 = vcmask (!%p977_p7), 932868  }
 0x14a   : > { %724 = sbr.rel (%p977_p7) target bundleno = 476 (0x1dc), region = 44  ;;  %1111 = vset.pattern.permute.xlu1 (!%p977_p7), %v1137_v43  ;;  %1110 = vset.pattern.permute.xlu0 (!%p977_p7), %v1137_v43  ;;  %v741_v45 = vld [vmem:[%s1373_s2 + $0x8] sm:$0xff] (!%p977_p7)  ;;  %v744_v46 = vld [vmem:[%s1373_s2 + $0x20] sm:$0xff] (!%p977_p7)  ;;  %vm1333_vm9 = vmor (!%p977_p7), %vm833_vm8, %vm832_vm7 }
 0x14b   : > { %757 = vperm.xlu1 (!%p977_p7), %1111, %v742_v41   ;;  %747 = vperm.xlu0 (!%p977_p7), %1110, %v740_v42   ;;  %v725_v48 = vld [vmem:[%s1374_s3] sm:$0xff] (!%p977_p7)  ;;  %v726_v54 = vld [vmem:[%s1374_s3 + $0x8] sm:$0xff] (!%p977_p7) }
 0x14c   : > { %v727_v47 = vld [vmem:[%s1374_s3 + $0x10] sm:$0xff] (!%p977_p7)  ;;  %v730_v51 = vunpack.c.l.bf16 (!%p977_p7), %v725_v48  ;;  %v731_v52 = vunpack.c.h.bf16 (!%p977_p7), %v725_v48  ;;  %v728_v53 = vld [vmem:[%s1374_s3 + $0x18] sm:$0xff] (!%p977_p7)  ;;  %v732_v0 = vunpack.c.l.bf16 (!%p977_p7), %v726_v54  ;;  %v733_v1 = vunpack.c.h.bf16 (!%p977_p7), %v726_v54 }
 0x14d   : > { %v734_v49 = vunpack.c.l.bf16 (!%p977_p7), %v727_v47  ;;  %v735_v50 = vunpack.c.h.bf16 (!%p977_p7), %v727_v47  ;;  %v736_v57 = vunpack.c.l.bf16 (!%p977_p7), %v728_v53  ;;  %v737_v63 = vunpack.c.h.bf16 (!%p977_p7), %v728_v53 }
 0x14e   : > { %v729_v62 = vld [vmem:[%s1374_s3 + $0x20] sm:$0xff] (!%p977_p7) }
 0x14f   : > { %762 = vperm.xlu1 (!%p977_p7), %1111, %v743_v44   ;;  %752 = vperm.xlu0 (!%p977_p7), %1110, %v741_v45   ;;  %v738_v8 = vunpack.c.l.bf16 (!%p977_p7), %v729_v62  ;;  %v739_v9 = vunpack.c.h.bf16 (!%p977_p7), %v729_v62 }
 0x153   : > { %767 = vperm.xlu0 %1110, %v744_v46  }
 0x1ca   : > { %v758_v55 = vpop.permute.xlu1 %757  ;;  %v748_v56 = vpop.permute.xlu0 %747 }
 0x1cb   : > { %v774_v58 = vadd.f32 %v758_v55, %v734_v49  ;;  %v775_v59 = vadd.f32 %v758_v55, %v735_v50  ;;  %v770_v60 = vadd.f32 %v748_v56, %v730_v51  ;;  %v771_v61 = vadd.f32 %v748_v56, %v731_v52 }
 0x1cd   : > { %v784_v2 = vmax.f32 %v774_v58, 0.0  ;;  %v785_v3 = vmax.f32 %v775_v59, 0.0  ;;  %v780_v4 = vmax.f32 %v770_v60, 0.0  ;;  %v781_v5 = vmax.f32 %v771_v61, 0.0 }
 0x1ce   : > { %v763_v6 = vpop.permute.xlu1 %762  ;;  %v753_v7 = vpop.permute.xlu0 %752 }
 0x1cf   : > { %v794_v10 = vmul.f32 0.999995, %v784_v2  ;;  %v795_v11 = vmul.f32 0.999995, %v785_v3  ;;  %v790_v12 = vmul.f32 0.999995, %v780_v4  ;;  %v776_v13 = vadd.f32 %v763_v6, %v736_v57 }
 0x1d0   : > { %v791_v14 = vmul.f32 0.999995, %v781_v5  ;;  %v777_v15 = vadd.f32 %v763_v6, %v737_v63  ;;  %v772_v16 = vadd.f32 %v753_v7, %v732_v0  ;;  %v773_v17 = vadd.f32 %v753_v7, %v733_v1 }
 0x1d1   : > { %v999_v19 = vpack.c.bf16 %v795_v11, %v794_v10  ;;  %v786_v20 = vmax.f32 %v776_v13, 0.0 }
 0x1d2   : > { %v997_v21 = vpack.c.bf16 %v791_v14, %v790_v12  ;;  %v787_v22 = vmax.f32 %v777_v15, 0.0  ;;  %v782_v23 = vmax.f32 %v772_v16, 0.0  ;;  %v783_v24 = vmax.f32 %v773_v17, 0.0  ;;  %v768_v25 = vpop.permute.xlu0 %767 }
 0x1d3   : > { %837 = vst.msk [vmem:[%s1374_s3 + $0x10] sm:$0xff] %vm1333_vm9, %v999_v19  ;;  %v796_v26 = vmul.f32 0.999995, %v786_v20  ;;  %v778_v27 = vadd.f32 %v768_v25, %v738_v8  ;;  %v779_v28 = vadd.f32 %v768_v25, %v739_v9 }
 0x1d4   : > { %835 = vst.msk [vmem:[%s1374_s3] sm:$0xff] %vm1333_vm9, %v997_v21  ;;  %v797_v29 = vmul.f32 0.999995, %v787_v22  ;;  %v792_v30 = vmul.f32 0.999995, %v782_v23 }
 0x1d5   : > { %v793_v31 = vmul.f32 0.999995, %v783_v24  ;;  %v788_v32 = vmax.f32 %v778_v27, 0.0  ;;  %v789_v33 = vmax.f32 %v779_v28, 0.0 }
 0x1d6   : > { %v1000_v34 = vpack.c.bf16 %v797_v29, %v796_v26 }
 0x1d7   : > { %v998_v35 = vpack.c.bf16 %v793_v31, %v792_v30  ;;  %v798_v36 = vmul.f32 0.999995, %v788_v32  ;;  %v799_v37 = vmul.f32 0.999995, %v789_v33 }
 0x1d8   : > { %838 = vst.msk [vmem:[%s1374_s3 + $0x18] sm:$0xff] %vm1333_vm9, %v1000_v34 }
 0x1d9   : > { %836 = vst.msk [vmem:[%s1374_s3 + $0x8] sm:$0xff] %vm1333_vm9, %v998_v35  ;;  %v1001_v38 = vpack.c.bf16 %v799_v37, %v798_v36 }
 0x1db   : > { %839 = vst.msk [vmem:[%s1374_s3 + $0x20] sm:$0xff] %vm1333_vm9, %v1001_v38 }
 0x1dc PF: > { %s13_s14 = sadd.s32 1, %s1134_s14   ;;  %s1377_s12 = smov %s1130_s13 }
 0x1dd   : > { %p10_p8 = scmp.ge.s32.totalorder %s13_s14, 6   ;;  %s1378_s13 = smov %s1380_s15 }
 0x1df   :  { %12 = sbr.rel (!%p10_p8) target bundleno = 2 (0x2), region = 74 }

// kernel: net_forward.10
= control target key start
LH: loop header
LB: loop body
LE: loop exit
PB: predicated region body
PF: predicated region fallthrough
CT: control target
= control target key end

     0   :  { %s1017_s12 = smov 0   ;;  %s1019_s13 = smov 0   ;;  %s1320_s0 = inlined_call_operand.vmem [shape: bf16[80,160], index: 0, kind: input, shape index: {}]   ;;  %s1321_s1 = inlined_call_operand.vmem [shape: bf16[4,160,50], index: 1, kind: input, shape index: {}]   ;;  %s1322_s2 = inlined_call_operand.vmem [shape: f32[80,1], index: 2, kind: input, shape index: {}]   ;;  %s1323_s3 = inlined_call_operand.vmem [shape: bf16[80,50], index: 3, kind: output, shape index: {}]  }
   0x1   :  { %s1021_s14 = smov 0  }
   0x2 LB: > { %s22_s15 = sadd.s32 1, %s989_s13  ;;  %p780_p0 = scmp.ge.s32.totalorder %s993_s14, 1  ;;  %s993_s14 = sphi %s1021_s14, %s13_s14   ;;  %s989_s13 = sphi %s1019_s13, %s1325_s13   ;;  %s985_s12 = sphi %s1017_s12, %s1324_s12  }
   0x3   : > { %p23_p1 = scmp.ge.s32.totalorder %s22_s15, 4  ;;  %p154_p2 = scmp.lt.s32.totalorder %s993_s14, 5 }
   0x5   : > { %s1327_s15 = smov (%p23_p1, %s22_s15), 0  ;;  %p155_p3 = pnand %p780_p0, %p154_p2 }
   0x6   : > { %p180_p4 = scmp.lt.s32.totalorder (!%p155_p3), %s985_s12, 3  ;;  %v995_v0 = vmov (!%p155_p3), 0   ;;  %v956_v1 = vld [vmem:[%s1320_s0 + $0x4] ss:$8 sps:$4 sm:$0xff] (!%p155_p3)   ;;  %vm328_vm0 = vcmask (!%p155_p3), 261120   ;;  %p807_p5 = scmp.ne.s32.totalorder (!%p155_p3), %s985_s12, 0 }
   0x7   : > { %158 = sbr.rel (%p155_p3) target bundleno = 459 (0x1cb), region = 32  ;;  %344 = vmatprep.subr.bf16.mxu0 (!%p155_p3), %v995_v0  ;;  %897 = vmatprep.subr.bf16.mxu1 (!%p155_p3), %v995_v0  ;;  %v959_v2 = vld [vmem:[%s1320_s0 + $0x34] ss:$8 sps:$4 sm:$0xff] (!%p155_p3)   ;;  %v954_v13 = vld [vmem:[%s1320_s0] ss:$8 sps:$4 sm:$0xff] (!%p155_p3)  }
   0x8   : > { %802 = vmatprep.mubr.msk.bf16.mxu0 (!%p155_p3), %vm328_vm0, %v956_v1  ;;  %805 = vmatprep.mubr.msk.bf16.mxu1 (!%p155_p3), %vm328_vm0, %v959_v2  ;;  %v957_v14 = vld [vmem:[%s1320_s0 + $0x30] ss:$8 sps:$4 sm:$0xff] (!%p155_p3)   ;;  %v960_v15 = vld [vmem:[%s1320_s0 + $0x14] ss:$8 sps:$4 sm:$0xff] (!%p155_p3)   ;;  %v963_v16 = vld [vmem:[%s1320_s0 + $0x44] ss:$8 sps:$4 sm:$0xff] (!%p155_p3)  }
   0x9   : > { %v962_v17 = vld [vmem:[%s1320_s0 + $0x10] ss:$8 sps:$4 sm:$0xff] (!%p155_p3)   ;;  %v965_v18 = vld [vmem:[%s1320_s0 + $0x40] ss:$8 sps:$4 sm:$0xff] (!%p155_p3)   ;;  %v966_v19 = vld [vmem:[%s1320_s0 + $0x24] ss:$8 sps:$4 sm:$0xff] (!%p155_p3)  }
   0xa   : > { %v968_v20 = vld [vmem:[%s1320_s0 + $0x20] ss:$8 sps:$4 sm:$0xff] (!%p155_p3)  }
   0xe   : > { %s181_s18 = scalar_select %p180_p4, %s985_s12, 3 }
   0xf   : > { %vm461_vm1 = vcmask (!%p807_p5), 404480  }
  0x10   : > { %s917_s21 = smul.u32 80, %s181_s18 }
  0x12   : > { %s1050_s24 = scalar_lea.vmem %s1321_s1, %s917_s21 }
  0x13   : > { %v944_v3 = vld [vmem:[%s1050_s24] sm:$0xff]   ;;  %v945_v4 = vld [vmem:[%s1050_s24 + $0x8] sm:$0xff]   ;;  %v946_v5 = vld [vmem:[%s1050_s24 + $0x10] sm:$0xff]  }
  0x14   : > { %345 = vmatpush1.bf16.msra.mxu0 %v944_v3  ;;  %907 = vmatpush1.bf16.msra.mxu1 %v944_v3  ;;  %v947_v6 = vld [vmem:[%s1050_s24 + $0x18] sm:$0xff]   ;;  %v948_v7 = vld [vmem:[%s1050_s24 + $0x20] sm:$0xff]   ;;  %v949_v8 = vld [vmem:[%s1050_s24 + $0x28] sm:$0xff]  }
  0x15   : > { %346 = vmatprep.subr.bf16.mxu0 %v995_v0  ;;  %898 = vmatprep.subr.bf16.mxu1 %v995_v0  ;;  %v950_v9 = vld [vmem:[%s1050_s24 + $0x30] sm:$0xff]   ;;  %v951_v10 = vld [vmem:[%s1050_s24 + $0x38] sm:$0xff]   ;;  %v952_v11 = vld [vmem:[%s1050_s24 + $0x40] sm:$0xff]  }
  0x16   : > { %v953_v12 = vld [vmem:[%s1050_s24 + $0x48] sm:$0xff]  }
  0x18   : > { %347 = vmatpush1.bf16.msra.mxu0 %v945_v4  ;;  %908 = vmatpush1.bf16.msra.mxu1 %v945_v4 }
  0x19   : > { %348 = vmatprep.subr.bf16.mxu0 %v995_v0  ;;  %899 = vmatprep.subr.bf16.mxu1 %v995_v0 }
  0x1c   : > { %349 = vmatpush1.bf16.msra.mxu0 %v946_v5  ;;  %909 = vmatpush1.bf16.msra.mxu1 %v946_v5 }
  0x1d   : > { %350 = vmatprep.subr.bf16.mxu0 %v995_v0  ;;  %900 = vmatprep.subr.bf16.mxu1 %v995_v0 }
  0x20   : > { %351 = vmatpush1.bf16.msra.mxu0 %v947_v6  ;;  %910 = vmatpush1.bf16.msra.mxu1 %v947_v6 }
  0x21   : > { %352 = vmatprep.subr.bf16.mxu0 %v995_v0  ;;  %901 = vmatprep.subr.bf16.mxu1 %v995_v0 }
  0x24   : > { %353 = vmatpush1.bf16.msra.mxu0 %v948_v7  ;;  %911 = vmatpush1.bf16.msra.mxu1 %v948_v7 }
  0x25   : > { %354 = vmatprep.subr.bf16.mxu0 %v995_v0  ;;  %902 = vmatprep.subr.bf16.mxu1 %v995_v0 }
  0x28   : > { %355 = vmatpush1.bf16.msra.mxu0 %v949_v8  ;;  %912 = vmatpush1.bf16.msra.mxu1 %v949_v8 }
  0x29   : > { %356 = vmatprep.subr.bf16.mxu0 %v995_v0  ;;  %903 = vmatprep.subr.bf16.mxu1 %v995_v0 }
  0x2c   : > { %357 = vmatpush1.bf16.msra.mxu0 %v950_v9  ;;  %913 = vmatpush1.bf16.msra.mxu1 %v950_v9 }
  0x2d   : > { %358 = vmatprep.subr.bf16.mxu0 %v995_v0  ;;  %904 = vmatprep.subr.bf16.mxu1 %v995_v0 }
  0x30   : > { %359 = vmatpush1.bf16.msra.mxu0 %v951_v10  ;;  %914 = vmatpush1.bf16.msra.mxu1 %v951_v10 }
  0x31   : > { %360 = vmatprep.subr.bf16.mxu0 %v995_v0  ;;  %905 = vmatprep.subr.bf16.mxu1 %v995_v0 }
  0x34   : > { %361 = vmatpush1.bf16.msra.mxu0 %v952_v11  ;;  %915 = vmatpush1.bf16.msra.mxu1 %v952_v11 }
  0x35   : > { %362 = vmatprep.subr.bf16.mxu0 %v995_v0  ;;  %906 = vmatprep.subr.bf16.mxu1 %v995_v0 }
  0x38   : > { %363 = vmatpush1.bf16.msra.mxu0 %v953_v12  ;;  %916 = vmatpush1.bf16.msra.mxu1 %v953_v12 }
  0x3b   : > { %377 = vmatmul.mubr.bf16.vlgmr.msra.gmra.mrb[0].mxu0 %v954_v13  ;;  %401 = vmatmul.mubr.bf16.vlgmr.msra.gmra.mrb[0].mxu1 %v957_v14 }
  0x3c   : > { %803 = vmatprep.mubr.msk.bf16.mxu0 %vm328_vm0, %v960_v15  ;;  %806 = vmatprep.mubr.msk.bf16.mxu1 %vm328_vm0, %v963_v16 }
  0x43   : > { %385 = vmatmul.mubr.bf16.gmra.mrb[4].mxu0 %v962_v17  ;;  %409 = vmatmul.mubr.bf16.gmra.mrb[4].mxu1 %v965_v18 }
  0x44   : > { %804 = vmatprep.mubr.msk.bf16.mxu0 %vm328_vm0, %v966_v19 }
  0x4b   : > { %393 = vmatmul.mubr.bf16.gmra.mrb[8].mxu0 %v968_v20 }
 0x10e   : > { %v378_v21 = vpop.f32.mrb[0].mxu0  ;;  %v1089_v22 = vpop.f32.mrb[0].mxu1 }
 0x10f   : > { %v380_v23 = vpop.f32.mrb[1].mxu0  ;;  %v404_v24 = vpop.f32.mrb[1].mxu1  ;;  %v843_v41 = vpack.c.bf16 (!%p807_p5), %v378_v21, %v378_v21  ;;  %v849_v47 = vpack.c.bf16 (!%p807_p5), %v1089_v22, %v1089_v22 }
 0x110   : > { %v381_v25 = vpop.f32.mrb[2].mxu0  ;;  %v1091_v26 = vpop.f32.mrb[2].mxu1 }
 0x111   : > { %v383_v27 = vpop.f32.mrb[3].mxu0  ;;  %v407_v28 = vpop.f32.mrb[3].mxu1  ;;  %v844_v42 = vpack.c.bf16 (!%p807_p5), %v381_v25, %v381_v25  ;;  %462 = vst.msk [vmem:[%s1323_s3] sm:$0xf] (!%p807_p5), %vm461_vm1, %v843_v41  ;;  %v850_v48 = vpack.c.bf16 (!%p807_p5), %v1091_v26, %v1091_v26  ;;  %468 = vst.msk [vmem:[%s1323_s3 + $0x18] sm:$0xf] (!%p807_p5), %vm461_vm1, %v849_v47 }
 0x113   : > { %463 = vst.msk [vmem:[%s1323_s3 + $0x4] sm:$0xf] (!%p807_p5), %vm461_vm1, %v844_v42  ;;  %469 = vst.msk [vmem:[%s1323_s3 + $0x1c] sm:$0xf] (!%p807_p5), %vm461_vm1, %v850_v48 }
 0x116   : > { %v386_v29 = vpop.f32.mrb[4].mxu0  ;;  %v1093_v30 = vpop.f32.mrb[4].mxu1 }
 0x117   : > { %v388_v31 = vpop.f32.mrb[5].mxu0  ;;  %v412_v32 = vpop.f32.mrb[5].mxu1  ;;  %v845_v43 = vpack.c.bf16 (!%p807_p5), %v386_v29, %v386_v29  ;;  %v851_v49 = vpack.c.bf16 (!%p807_p5), %v1093_v30, %v1093_v30 }
 0x118   : > { %v389_v33 = vpop.f32.mrb[6].mxu0  ;;  %v1095_v34 = vpop.f32.mrb[6].mxu1 }
 0x119   : > { %v391_v35 = vpop.f32.mrb[7].mxu0  ;;  %v415_v36 = vpop.f32.mrb[7].mxu1  ;;  %v846_v44 = vpack.c.bf16 (!%p807_p5), %v389_v33, %v389_v33  ;;  %464 = vst.msk [vmem:[%s1323_s3 + $0x8] sm:$0xf] (!%p807_p5), %vm461_vm1, %v845_v43  ;;  %v852_v50 = vpack.c.bf16 (!%p807_p5), %v1095_v34, %v1095_v34  ;;  %470 = vst.msk [vmem:[%s1323_s3 + $0x20] sm:$0xf] (!%p807_p5), %vm461_vm1, %v851_v49 }
 0x11b   : > { %420 = sbr.rel (%p807_p5) target bundleno = 292 (0x124), region = 36  ;;  %465 = vst.msk [vmem:[%s1323_s3 + $0xc] sm:$0xf] (!%p807_p5), %vm461_vm1, %v846_v44  ;;  %471 = vst.msk [vmem:[%s1323_s3 + $0x24] sm:$0xf] (!%p807_p5), %vm461_vm1, %v852_v50 }
 0x11e   : > { %v394_v37 = vpop.f32.mrb[8].mxu0 }
 0x11f   : > { %v396_v38 = vpop.f32.mrb[9].mxu0  ;;  %v847_v45 = vpack.c.bf16 (!%p807_p5), %v394_v37, %v394_v37 }
 0x120   : > { %v397_v39 = vpop.f32.mrb[10].mxu0 }
 0x121   : > { %v399_v40 = vpop.f32.mrb[11].mxu0  ;;  %v848_v46 = vpack.c.bf16 (!%p807_p5), %v397_v39, %v397_v39  ;;  %466 = vst.msk [vmem:[%s1323_s3 + $0x10] sm:$0xf] (!%p807_p5), %vm461_vm1, %v847_v45 }
 0x123   : > { %467 = vst.msk [vmem:[%s1323_s3 + $0x14] sm:$0xf] %vm461_vm1, %v848_v46 }
 0x124 PF: > { %p818_p6 = scmp.le.s32.totalorder %s985_s12, 0 }
 0x125   : > { %v476_v51 = vld [vmem:[%s1323_s3] sm:$0xf] (!%p818_p6)  ;;  %v853_v52 = vpack.c.bf16 (!%p818_p6), %v378_v21, %v378_v21  ;;  %vm536_vm2 = vcmask (!%p818_p6), 404480   ;;  %v477_v53 = vld [vmem:[%s1323_s3 + $0x4] sm:$0xf] (!%p818_p6)  ;;  %v854_v54 = vpack.c.bf16 (!%p818_p6), %v381_v25, %v381_v25  ;;  %v855_v55 = vpack.c.bf16 (!%p818_p6), %v386_v29, %v386_v29 }
 0x126   : > { %475 = sbr.rel (%p818_p6) target bundleno = 303 (0x12f), region = 40  ;;  %v478_v56 = vld [vmem:[%s1323_s3 + $0x8] sm:$0xf] (!%p818_p6)  ;;  %v479_v57 = vld [vmem:[%s1323_s3 + $0xc] sm:$0xf] (!%p818_p6)  ;;  %v856_v58 = vpack.c.bf16 (!%p818_p6), %v389_v33, %v389_v33  ;;  %v857_v60 = vpack.c.bf16 (!%p818_p6), %v394_v37, %v394_v37  ;;  %v858_v61 = vpack.c.bf16 (!%p818_p6), %v397_v39, %v397_v39  ;;  %v859_v62 = vpack.c.bf16 (!%p818_p6), %v1089_v22, %v1089_v22 }
 0x127   : > { %v526_v63 = vmax.bf16 (!%p818_p6), %v853_v52, %v476_v51  ;;  %v527_v0 = vmax.bf16 (!%p818_p6), %v854_v54, %v477_v53  ;;  %v528_v1 = vmax.bf16 (!%p818_p6), %v855_v55, %v478_v56  ;;  %v482_v3 = vld [vmem:[%s1323_s3 + $0x18] sm:$0xf] (!%p818_p6)  ;;  %v483_v4 = vld [vmem:[%s1323_s3 + $0x1c] sm:$0xf] (!%p818_p6)  ;;  %v860_v5 = vpack.c.bf16 (!%p818_p6), %v1091_v26, %v1091_v26  ;;  %v484_v10 = vld [vmem:[%s1323_s3 + $0x20] sm:$0xf] (!%p818_p6) }
 0x128   : > { %v529_v6 = vmax.bf16 (!%p818_p6), %v856_v58, %v479_v57  ;;  %v532_v9 = vmax.bf16 (!%p818_p6), %v859_v62, %v482_v3  ;;  %v485_v11 = vld [vmem:[%s1323_s3 + $0x24] sm:$0xf] (!%p818_p6)  ;;  %v861_v13 = vpack.c.bf16 (!%p818_p6), %v1093_v30, %v1093_v30  ;;  %v862_v14 = vpack.c.bf16 (!%p818_p6), %v1095_v34, %v1095_v34 }
 0x129   : > { %537 = vst.msk [vmem:[%s1323_s3] sm:$0xf] (!%p818_p6), %vm536_vm2, %v526_v63  ;;  %538 = vst.msk [vmem:[%s1323_s3 + $0x4] sm:$0xf] (!%p818_p6), %vm536_vm2, %v527_v0  ;;  %v533_v12 = vmax.bf16 (!%p818_p6), %v860_v5, %v483_v4 }
 0x12a   : > { %v480_v59 = vld [vmem:[%s1323_s3 + $0x10] sm:$0xf] (!%p818_p6)  ;;  %v481_v2 = vld [vmem:[%s1323_s3 + $0x14] sm:$0xf] (!%p818_p6)  ;;  %539 = vst.msk [vmem:[%s1323_s3 + $0x8] sm:$0xf] (!%p818_p6), %vm536_vm2, %v528_v1  ;;  %v534_v15 = vmax.bf16 (!%p818_p6), %v861_v13, %v484_v10  ;;  %v535_v16 = vmax.bf16 (!%p818_p6), %v862_v14, %v485_v11 }
 0x12b   : > { %v530_v7 = vmax.bf16 (!%p818_p6), %v857_v60, %v480_v59  ;;  %v531_v8 = vmax.bf16 (!%p818_p6), %v858_v61, %v481_v2  ;;  %540 = vst.msk [vmem:[%s1323_s3 + $0xc] sm:$0xf] (!%p818_p6), %vm536_vm2, %v529_v6  ;;  %543 = vst.msk [vmem:[%s1323_s3 + $0x18] sm:$0xf] (!%p818_p6), %vm536_vm2, %v532_v9 }
 0x12c   : > { %544 = vst.msk [vmem:[%s1323_s3 + $0x1c] sm:$0xf] (!%p818_p6), %vm536_vm2, %v533_v12  ;;  %545 = vst.msk [vmem:[%s1323_s3 + $0x20] sm:$0xf] (!%p818_p6), %vm536_vm2, %v534_v15 }
 0x12d   : > { %541 = vst.msk [vmem:[%s1323_s3 + $0x10] sm:$0xf] %vm536_vm2, %v530_v7  ;;  %542 = vst.msk [vmem:[%s1323_s3 + $0x14] sm:$0xf] %vm536_vm2, %v531_v8 }
 0x12e   : > { %546 = vst.msk [vmem:[%s1323_s3 + $0x24] sm:$0xf] %vm536_vm2, %v535_v16 }
 0x12f PF: > { %p829_p7 = scmp.ne.s32.totalorder %s985_s12, 3 }
 0x130   : > { %v573_v17 = vld [vmem:[%s1322_s2 + $0x10] sm:$0xff] (!%p829_p7)  ;;  %v571_v18 = vld [vmem:[%s1322_s2] sm:$0xff] (!%p829_p7)  ;;  %v996_v19 = vmov (!%p829_p7), 0   ;;  %v574_v20 = vld [vmem:[%s1322_s2 + $0x18] sm:$0xff] (!%p829_p7)  ;;  %vm701_vm3 = vcmask (!%p829_p7), 404480  }
 0x131   : > { %550 = sbr.rel (%p829_p7) target bundleno = 459 (0x1cb), region = 44  ;;  %970 = vset.pattern.permute.xlu1 (!%p829_p7), %v996_v19  ;;  %969 = vset.pattern.permute.xlu0 (!%p829_p7), %v996_v19  ;;  %v572_v21 = vld [vmem:[%s1322_s2 + $0x8] sm:$0xff] (!%p829_p7)  ;;  %v575_v23 = vld [vmem:[%s1322_s2 + $0x20] sm:$0xff] (!%p829_p7)  ;;  %v578_v24 = vld [vmem:[%s1322_s2 + $0x38] sm:$0xff] (!%p829_p7) }
 0x132   : > { %593 = vperm.xlu1 (!%p829_p7), %970, %v573_v17   ;;  %583 = vperm.xlu0 (!%p829_p7), %969, %v571_v18   ;;  %v576_v22 = vld [vmem:[%s1322_s2 + $0x28] sm:$0xff] (!%p829_p7)  ;;  %v577_v25 = vld [vmem:[%s1322_s2 + $0x30] sm:$0xff] (!%p829_p7)  ;;  %v579_v27 = vld [vmem:[%s1322_s2 + $0x40] sm:$0xff] (!%p829_p7) }
 0x133   : > { %v580_v26 = vld [vmem:[%s1322_s2 + $0x48] sm:$0xff] (!%p829_p7)  ;;  %v874_v29 = vld [vmem:[%s1323_s3] sm:$0xff] (!%p829_p7)  }
 0x134   : > { %v893_v28 = vld [vmem:[%s1323_s3 + $0x8] sm:$0xff] (!%p829_p7)   ;;  %v875_v31 = vunpack.c.l.bf16 (!%p829_p7), %v874_v29  ;;  %v876_v37 = vunpack.c.h.bf16 (!%p829_p7), %v874_v29 }
 0x135   : > { %v879_v30 = vunpack.c.l.bf16 (!%p829_p7), %v893_v28  ;;  %v880_v36 = vunpack.c.h.bf16 (!%p829_p7), %v893_v28  ;;  %v895_v49 = vld [vmem:[%s1323_s3 + $0x18] sm:$0xff] (!%p829_p7)   ;;  %v896_v62 = vld [vmem:[%s1323_s3 + $0x20] sm:$0xff] (!%p829_p7)  }
 0x136   : > { %598 = vperm.xlu1 (!%p829_p7), %970, %v574_v20   ;;  %588 = vperm.xlu0 (!%p829_p7), %969, %v572_v21   ;;  %v894_v38 = vld [vmem:[%s1323_s3 + $0x10] sm:$0xff] (!%p829_p7)   ;;  %v888_v56 = vunpack.c.h.bf16 (!%p829_p7), %v895_v49  ;;  %v887_v57 = vunpack.c.l.bf16 (!%p829_p7), %v895_v49  ;;  %v892_v5 = vunpack.c.h.bf16 (!%p829_p7), %v896_v62  ;;  %v891_v6 = vunpack.c.l.bf16 (!%p829_p7), %v896_v62 }
 0x137   : > { %v884_v43 = vunpack.c.h.bf16 (!%p829_p7), %v894_v38  ;;  %v883_v44 = vunpack.c.l.bf16 (!%p829_p7), %v894_v38 }
 0x13a   : > { %608 = vperm.xlu1 %970, %v576_v22   ;;  %603 = vperm.xlu0 %969, %v575_v23  }
 0x13e   : > { %618 = vperm.xlu1 %970, %v578_v24   ;;  %613 = vperm.xlu0 %969, %v577_v25  }
 0x142   : > { %628 = vperm.xlu1 %970, %v580_v26   ;;  %623 = vperm.xlu0 %969, %v579_v27  }
 0x1b1   : > { %v594_v32 = vpop.permute.xlu1 %593  ;;  %v584_v33 = vpop.permute.xlu0 %583 }
 0x1b2   : > { %v633_v34 = vadd.f32 %v879_v30, %v594_v32  ;;  %v631_v35 = vadd.f32 %v875_v31, %v584_v33 }
 0x1b4   : > { %v643_v39 = vmax.f32 %v633_v34, 0.0  ;;  %v641_v40 = vmax.f32 %v631_v35, 0.0 }
 0x1b5   : > { %v599_v41 = vpop.permute.xlu1 %598  ;;  %v589_v42 = vpop.permute.xlu0 %588 }
 0x1b6   : > { %v653_v45 = vmul.f32 0.999995, %v643_v39  ;;  %v651_v46 = vmul.f32 0.999995, %v641_v40  ;;  %v634_v47 = vadd.f32 %v880_v36, %v599_v41  ;;  %v632_v48 = vadd.f32 %v876_v37, %v589_v42 }
 0x1b8   : > { %v865_v50 = vpack.c.bf16 %v653_v45, %v653_v45  ;;  %v863_v51 = vpack.c.bf16 %v651_v46, %v651_v46  ;;  %v644_v52 = vmax.f32 %v634_v47, 0.0  ;;  %v642_v53 = vmax.f32 %v632_v48, 0.0 }
 0x1b9   : > { %v609_v54 = vpop.permute.xlu1 %608  ;;  %v604_v55 = vpop.permute.xlu0 %603 }
 0x1ba   : > { %704 = vst.msk [vmem:[%s1323_s3 + $0x8] sm:$0xf] %vm701_vm3, %v865_v50  ;;  %702 = vst.msk [vmem:[%s1323_s3] sm:$0xf] %vm701_vm3, %v863_v51  ;;  %v654_v58 = vmul.f32 0.999995, %v644_v52  ;;  %v636_v60 = vadd.f32 %v884_v43, %v609_v54  ;;  %v635_v61 = vadd.f32 %v883_v44, %v604_v55 }
 0x1bb   : > { %v652_v59 = vmul.f32 0.999995, %v642_v53 }
 0x1bc   : > { %v866_v63 = vpack.c.bf16 %v654_v58, %v654_v58  ;;  %v646_v1 = vmax.f32 %v636_v60, 0.0  ;;  %v645_v2 = vmax.f32 %v635_v61, 0.0 }
 0x1bd   : > { %v864_v0 = vpack.c.bf16 %v652_v59, %v652_v59  ;;  %v619_v3 = vpop.permute.xlu1 %618  ;;  %v614_v4 = vpop.permute.xlu0 %613 }
 0x1be   : > { %705 = vst.msk [vmem:[%s1323_s3 + $0xc] sm:$0xf] %vm701_vm3, %v866_v63  ;;  %v656_v7 = vmul.f32 0.999995, %v646_v1  ;;  %v655_v8 = vmul.f32 0.999995, %v645_v2  ;;  %v638_v9 = vadd.f32 %v888_v56, %v619_v3  ;;  %v637_v10 = vadd.f32 %v887_v57, %v614_v4 }
 0x1bf   : > { %703 = vst.msk [vmem:[%s1323_s3 + $0x4] sm:$0xf] %vm701_vm3, %v864_v0 }
 0x1c0   : > { %v868_v11 = vpack.c.bf16 %v656_v7, %v656_v7  ;;  %v867_v12 = vpack.c.bf16 %v655_v8, %v655_v8  ;;  %v648_v13 = vmax.f32 %v638_v9, 0.0  ;;  %v647_v14 = vmax.f32 %v637_v10, 0.0 }
 0x1c1   : > { %v629_v15 = vpop.permute.xlu1 %628  ;;  %v624_v16 = vpop.permute.xlu0 %623 }
 0x1c2   : > { %707 = vst.msk [vmem:[%s1323_s3 + $0x14] sm:$0xf] %vm701_vm3, %v868_v11  ;;  %706 = vst.msk [vmem:[%s1323_s3 + $0x10] sm:$0xf] %vm701_vm3, %v867_v12  ;;  %v658_v17 = vmul.f32 0.999995, %v648_v13  ;;  %v640_v19 = vadd.f32 %v892_v5, %v629_v15  ;;  %v639_v20 = vadd.f32 %v891_v6, %v624_v16 }
 0x1c3   : > { %v657_v18 = vmul.f32 0.999995, %v647_v14 }
 0x1c4   : > { %v870_v21 = vpack.c.bf16 %v658_v17, %v658_v17  ;;  %v650_v23 = vmax.f32 %v640_v19, 0.0  ;;  %v649_v24 = vmax.f32 %v639_v20, 0.0 }
 0x1c5   : > { %v869_v22 = vpack.c.bf16 %v657_v18, %v657_v18 }
 0x1c6   : > { %709 = vst.msk [vmem:[%s1323_s3 + $0x1c] sm:$0xf] %vm701_vm3, %v870_v21  ;;  %v660_v25 = vmul.f32 0.999995, %v650_v23  ;;  %v659_v26 = vmul.f32 0.999995, %v649_v24 }
 0x1c7   : > { %708 = vst.msk [vmem:[%s1323_s3 + $0x18] sm:$0xf] %vm701_vm3, %v869_v22 }
 0x1c8   : > { %v872_v27 = vpack.c.bf16 %v660_v25, %v660_v25  ;;  %v871_v28 = vpack.c.bf16 %v659_v26, %v659_v26 }
 0x1ca   : > { %711 = vst.msk [vmem:[%s1323_s3 + $0x24] sm:$0xf] %vm701_vm3, %v872_v27  ;;  %710 = vst.msk [vmem:[%s1323_s3 + $0x20] sm:$0xf] %vm701_vm3, %v871_v28 }
 0x1cb PF: > { %s13_s14 = sadd.s32 1, %s993_s14   ;;  %s1324_s12 = smov %s989_s13 }
 0x1cc   : > { %p10_p8 = scmp.ge.s32.totalorder %s13_s14, 6   ;;  %s1325_s13 = smov %s1327_s15 }
 0x1ce   :  { %12 = sbr.rel (!%p10_p8) target bundleno = 2 (0x2), region = 74 }

// kernel: net_forward.11
= control target key start
LH: loop header
LB: loop body
LE: loop exit
PB: predicated region body
PF: predicated region fallthrough
CT: control target
= control target key end

     0   :  { %v776_v36 = vlaneseq  ;;  %v7653_v37 = vmov 1966171168   ;;  %vm4166_vm0 = vcmask 654336   ;;  %s9970_s0 = inlined_call_operand.vmem [shape: bf16[2,2000], index: 0, kind: input, shape index: {}]   ;;  %s9971_s1 = inlined_call_operand.vmem [shape: bf16[2000,544], index: 1, kind: input, shape index: {}]   ;;  %s9972_s2 = inlined_call_operand.vmem [shape: f32[1,544], index: 2, kind: input, shape index: {}]   ;;  %s9973_s3 = inlined_call_operand.vmem [shape: bf16[544,136], index: 3, kind: input, shape index: {}]   ;;  %s9974_s4 = inlined_call_operand.vmem [shape: f32[1,136], index: 4, kind: input, shape index: {}]   ;;  %s9975_s5 = inlined_call_operand.hbm [shape: f32[2,136], index: 5, kind: output, shape index: {}]  }
   0x1   :  { %v6650_v0 = vld [vmem:[%s9971_s1 + $0x4] ss:$20 sps:$4 sm:$0xff]   ;;  %v6654_v2 = vld [vmem:[%s9971_s1] ss:$20 sps:$4 sm:$0xff]   ;;  %v6660_v6 = vld [vmem:[%s9971_s1 + $0x28] ss:$20 sps:$4 sm:$0xff]   ;;  %v805_v38 = vunpack.c.l.s4 %v7653_v37 }
   0x2   :  { %v6652_v1 = vld [vmem:[%s9971_s1 + $0x284] ss:$20 sps:$4 sm:$0xff]   ;;  %4170 = vmatprep.subr.bf16.mxu1 %v6650_v0  ;;  %v6655_v3 = vld [vmem:[%s9971_s1 + $0x280] ss:$20 sps:$4 sm:$0xff]   ;;  %v6661_v7 = vld [vmem:[%s9971_s1 + $0x2a8] ss:$20 sps:$4 sm:$0xff]  }
   0x3   :  { %4211 = vmatprep.subr.bf16.mxu0 %v6652_v1  ;;  %v6656_v4 = vld [vmem:[%s9971_s1 + $0x2c] ss:$20 sps:$4 sm:$0xff]   ;;  %4171 = vmatpush1.bf16.msra.mxu1 %v6654_v2  ;;  %v6662_v8 = vld [vmem:[%s9971_s1 + $0x54] ss:$20 sps:$4 sm:$0xff]   ;;  %v6666_v10 = vld [vmem:[%s9971_s1 + $0x50] ss:$20 sps:$4 sm:$0xff]   ;;  %v806_v43 = vunpack.c.0.s8 %v805_v38 }
   0x4   :  { %4212 = vmatpush1.bf16.msra.mxu0 %v6655_v3  ;;  %v6658_v5 = vld [vmem:[%s9971_s1 + $0x2ac] ss:$20 sps:$4 sm:$0xff]   ;;  %4172 = vmatprep.subr.bf16.mxu1 %v6656_v4  ;;  %v6664_v9 = vld [vmem:[%s9971_s1 + $0x2d4] ss:$20 sps:$4 sm:$0xff]   ;;  %v6667_v11 = vld [vmem:[%s9971_s1 + $0x2d0] ss:$20 sps:$4 sm:$0xff]  }
   0x5   :  { %4213 = vmatprep.subr.bf16.mxu0 %v6658_v5  ;;  %v6668_v12 = vld [vmem:[%s9971_s1 + $0x7c] ss:$20 sps:$4 sm:$0xff]   ;;  %v6672_v14 = vld [vmem:[%s9971_s1 + $0x78] ss:$20 sps:$4 sm:$0xff]   ;;  %v6678_v18 = vld [vmem:[%s9971_s1 + $0xa0] ss:$20 sps:$4 sm:$0xff]  }
   0x6   :  { %v6670_v13 = vld [vmem:[%s9971_s1 + $0x2fc] ss:$20 sps:$4 sm:$0xff]   ;;  %v6673_v15 = vld [vmem:[%s9971_s1 + $0x2f8] ss:$20 sps:$4 sm:$0xff]   ;;  %v6679_v19 = vld [vmem:[%s9971_s1 + $0x320] ss:$20 sps:$4 sm:$0xff]  }
   0x7   :  { %4173 = vmatpush1.bf16.msra.mxu1 %v6660_v6  ;;  %v6674_v16 = vld [vmem:[%s9971_s1 + $0xa4] ss:$20 sps:$4 sm:$0xff]   ;;  %v6680_v20 = vld [vmem:[%s9971_s1 + $0xcc] ss:$20 sps:$4 sm:$0xff]   ;;  %v6684_v22 = vld [vmem:[%s9971_s1 + $0xc8] ss:$20 sps:$4 sm:$0xff]  }
   0x8   :  { %4214 = vmatpush1.bf16.msra.mxu0 %v6661_v7  ;;  %4174 = vmatprep.subr.bf16.mxu1 %v6662_v8  ;;  %v6676_v17 = vld [vmem:[%s9971_s1 + $0x324] ss:$20 sps:$4 sm:$0xff]   ;;  %v6682_v21 = vld [vmem:[%s9971_s1 + $0x34c] ss:$20 sps:$4 sm:$0xff]   ;;  %v6685_v23 = vld [vmem:[%s9971_s1 + $0x348] ss:$20 sps:$4 sm:$0xff]  }
   0x9   :  { %4215 = vmatprep.subr.bf16.mxu0 %v6664_v9  ;;  %v6686_v24 = vld [vmem:[%s9971_s1 + $0xf4] ss:$20 sps:$4 sm:$0xff]   ;;  %v6690_v26 = vld [vmem:[%s9971_s1 + $0xf0] ss:$20 sps:$4 sm:$0xff]   ;;  %v6696_v30 = vld [vmem:[%s9971_s1 + $0x118] ss:$20 sps:$4 sm:$0xff]  }
   0xa   :  { %v6688_v25 = vld [vmem:[%s9971_s1 + $0x374] ss:$20 sps:$4 sm:$0xff]   ;;  %v6691_v27 = vld [vmem:[%s9971_s1 + $0x370] ss:$20 sps:$4 sm:$0xff]   ;;  %v6697_v31 = vld [vmem:[%s9971_s1 + $0x398] ss:$20 sps:$4 sm:$0xff]  }
   0xb   :  { %4175 = vmatpush1.bf16.msra.mxu1 %v6666_v10  ;;  %v6692_v28 = vld [vmem:[%s9971_s1 + $0x11c] ss:$20 sps:$4 sm:$0xff]   ;;  %v6698_v32 = vld [vmem:[%s9971_s1 + $0x144] ss:$20 sps:$4 sm:$0xff]   ;;  %v6702_v34 = vld [vmem:[%s9971_s1 + $0x140] ss:$20 sps:$4 sm:$0xff]  }
   0xc   :  { %4216 = vmatpush1.bf16.msra.mxu0 %v6667_v11  ;;  %4176 = vmatprep.subr.bf16.mxu1 %v6668_v12  ;;  %v6694_v29 = vld [vmem:[%s9971_s1 + $0x39c] ss:$20 sps:$4 sm:$0xff]   ;;  %v6700_v33 = vld [vmem:[%s9971_s1 + $0x3c4] ss:$20 sps:$4 sm:$0xff]   ;;  %v6703_v35 = vld [vmem:[%s9971_s1 + $0x3c0] ss:$20 sps:$4 sm:$0xff]  }
   0xd   :  { %4217 = vmatprep.subr.bf16.mxu0 %v6670_v13  ;;  %v6704_v39 = vld [vmem:[%s9971_s1 + $0x16c] ss:$20 sps:$4 sm:$0xff]   ;;  %v6708_v41 = vld [vmem:[%s9971_s1 + $0x168] ss:$20 sps:$4 sm:$0xff]   ;;  %v7804_v42 = vshrl.u32 %v776_v36, 7 }
   0xe   :  { %v6706_v40 = vld [vmem:[%s9971_s1 + $0x3ec] ss:$20 sps:$4 sm:$0xff]   ;;  %v6709_v44 = vld [vmem:[%s9971_s1 + $0x3e8] ss:$20 sps:$4 sm:$0xff]   ;;  %v6714_v47 = vld [vmem:[%s9971_s1 + $0x190] ss:$20 sps:$4 sm:$0xff]  }
   0xf   :  { %4177 = vmatpush1.bf16.msra.mxu1 %v6672_v14  ;;  %v6710_v45 = vld [vmem:[%s9971_s1 + $0x194] ss:$20 sps:$4 sm:$0xff]   ;;  %v6715_v48 = vld [vmem:[%s9971_s1 + $0x410] ss:$20 sps:$4 sm:$0xff]   ;;  %v7822_v49 = vsub.s32 %v806_v43, %v7804_v42  ;;  %v6720_v53 = vld [vmem:[%s9971_s1 + $0x1b8] ss:$20 sps:$4 sm:$0xff]  }
  0x10   :  { %4218 = vmatpush1.bf16.msra.mxu0 %v6673_v15  ;;  %4178 = vmatprep.subr.bf16.mxu1 %v6674_v16  ;;  %v6712_v46 = vld [vmem:[%s9971_s1 + $0x414] ss:$20 sps:$4 sm:$0xff]   ;;  %v6716_v50 = vld [vmem:[%s9971_s1 + $0x1bc] ss:$20 sps:$4 sm:$0xff]   ;;  %v22_v52 = vld [vmem:[%s9970_s0] sm:$0xff] }
  0x11   :  { %4219 = vmatprep.subr.bf16.mxu0 %v6676_v17  ;;  %v6718_v51 = vld [vmem:[%s9971_s1 + $0x43c] ss:$20 sps:$4 sm:$0xff]   ;;  %v810_v54 = vrot.slane %v22_v52, %v7822_v49  ;;  %v6721_v55 = vld [vmem:[%s9971_s1 + $0x438] ss:$20 sps:$4 sm:$0xff]   ;;  %v6726_v59 = vld [vmem:[%s9971_s1 + $0x1e0] ss:$20 sps:$4 sm:$0xff]   ;;  %v803_v5 = vcombine.high %v22_v52, %v22_v52 }
  0x12   :  { %v6722_v56 = vld [vmem:[%s9971_s1 + $0x1e4] ss:$20 sps:$4 sm:$0xff]   ;;  %v6727_v61 = vld [vmem:[%s9971_s1 + $0x460] ss:$20 sps:$4 sm:$0xff]   ;;  %v6732_v1 = vld [vmem:[%s9971_s1 + $0x208] ss:$20 sps:$4 sm:$0xff]  }
  0x13   :  { %4179 = vmatpush1.bf16.msra.mxu1 %v6678_v18  ;;  %v6724_v57 = vld [vmem:[%s9971_s1 + $0x464] ss:$20 sps:$4 sm:$0xff]   ;;  %v818_v58 = vcombine.high %v810_v54, %v810_v54  ;;  %v6728_v62 = vld [vmem:[%s9971_s1 + $0x20c] ss:$20 sps:$4 sm:$0xff]   ;;  %v6733_v2 = vld [vmem:[%s9971_s1 + $0x488] ss:$20 sps:$4 sm:$0xff]   ;;  %v7892_v10 = vrot.slane %v803_v5, %v7822_v49  ;;  %v7898_v12 = vrot.slane %v810_v54, %v7822_v49 }
  0x14   :  { %4220 = vmatpush1.bf16.msra.mxu0 %v6679_v19  ;;  %4180 = vmatprep.subr.bf16.mxu1 %v6680_v20  ;;  %v6730_v63 = vld [vmem:[%s9971_s1 + $0x48c] ss:$20 sps:$4 sm:$0xff]   ;;  %v6734_v3 = vld [vmem:[%s9971_s1 + $0x234] ss:$20 sps:$4 sm:$0xff]   ;;  %v6738_v6 = vld [vmem:[%s9971_s1 + $0x230] ss:$20 sps:$4 sm:$0xff]  }
  0x15   :  { %4221 = vmatprep.subr.bf16.mxu0 %v6682_v21  ;;  %v7850_v60 = vrot.slane %v818_v58, %v7822_v49  ;;  %v6736_v4 = vld [vmem:[%s9971_s1 + $0x4b4] ss:$20 sps:$4 sm:$0xff]   ;;  %v6739_v7 = vld [vmem:[%s9971_s1 + $0x4b0] ss:$20 sps:$4 sm:$0xff]   ;;  %v6744_v11 = vld [vmem:[%s9971_s1 + $0x258] ss:$20 sps:$4 sm:$0xff]   ;;  %v819_v16 = vcombine.high %v7892_v10, %v7892_v10  ;;  %v7916_v18 = vcombine.high %v7898_v12, %v7898_v12 }
  0x16   :  { %v6740_v8 = vld [vmem:[%s9971_s1 + $0x25c] ss:$20 sps:$4 sm:$0xff]   ;;  %v6745_v13 = vld [vmem:[%s9971_s1 + $0x4d8] ss:$20 sps:$4 sm:$0xff]   ;;  %v6746_v17 = vld [vmem:[%s9971_s1 + $0x500] ss:$20 sps:$4 sm:$0xff]  }
  0x17   :  { %4181 = vmatpush1.bf16.msra.mxu1 %v6684_v22  ;;  %v7863_v0 = vcombine.high %v7850_v60, %v7850_v60  ;;  %4202 = vmatprep.mubr.bf16.mxu1 %v7850_v60  ;;  %v6742_v9 = vld [vmem:[%s9971_s1 + $0x4dc] ss:$20 sps:$4 sm:$0xff]   ;;  %v6748_v14 = vld [vmem:[%s9971_s1 + $0x504] ss:$20 sps:$4 sm:$0xff]   ;;  %v6751_v15 = vld [vmem:[%s9971_s1 + $0xc] ss:$20 sps:$4 sm:$0xff]   ;;  %v7928_v22 = vrot.slane %v819_v16, %v7822_v49 }
  0x18   :  { %4222 = vmatpush1.bf16.msra.mxu0 %v6685_v23  ;;  %4182 = vmatprep.subr.bf16.mxu1 %v6686_v24  ;;  %v6749_v19 = vld [vmem:[%s9971_s1 + $0x8] ss:$20 sps:$4 sm:$0xff]   ;;  %v6754_v20 = vld [vmem:[%s9971_s1 + $0x52c] ss:$20 sps:$4 sm:$0xff]   ;;  %v6755_v24 = vld [vmem:[%s9971_s1 + $0x30] ss:$20 sps:$4 sm:$0xff]  }
  0x19   :  { %4223 = vmatprep.subr.bf16.mxu0 %v6688_v25  ;;  %4243 = vmatprep.mubr.bf16.mxu0 %v7863_v0  ;;  %v6757_v21 = vld [vmem:[%s9971_s1 + $0x34] ss:$20 sps:$4 sm:$0xff]   ;;  %v6778_v37 = vld [vmem:[%s9971_s1 + $0x5cc] ss:$20 sps:$4 sm:$0xff]   ;;  %v6787_v43 = vld [vmem:[%s9971_s1 + $0xfc] ss:$20 sps:$4 sm:$0xff]  }
  0x1a   :  { %v6752_v23 = vld [vmem:[%s9971_s1 + $0x528] ss:$20 sps:$4 sm:$0xff]   ;;  %v6799_v52 = vld [vmem:[%s9971_s1 + $0x14c] ss:$20 sps:$4 sm:$0xff]   ;;  %v6803_v58 = vld [vmem:[%s9971_s1 + $0x170] ss:$20 sps:$4 sm:$0xff]  }
  0x1b   :  { %4183 = vmatpush1.bf16.msra.mxu1 %v6690_v26  ;;  %v6760_v25 = vld [vmem:[%s9971_s1 + $0x554] ss:$20 sps:$4 sm:$0xff]   ;;  %v6763_v26 = vld [vmem:[%s9971_s1 + $0x5c] ss:$20 sps:$4 sm:$0xff]   ;;  %v6820_v5 = vld [vmem:[%s9971_s1 + $0x6e4] ss:$20 sps:$4 sm:$0xff]  }
  0x1c   :  { %4224 = vmatpush1.bf16.msra.mxu0 %v6691_v27  ;;  %4184 = vmatprep.subr.bf16.mxu1 %v6692_v28  ;;  %v6758_v27 = vld [vmem:[%s9971_s1 + $0x550] ss:$20 sps:$4 sm:$0xff]   ;;  %v6761_v28 = vld [vmem:[%s9971_s1 + $0x58] ss:$20 sps:$4 sm:$0xff]   ;;  %v6773_v36 = vld [vmem:[%s9971_s1 + $0xa8] ss:$20 sps:$4 sm:$0xff]  }
  0x1d   :  { %4225 = vmatprep.subr.bf16.mxu0 %v6694_v29  ;;  %v6766_v29 = vld [vmem:[%s9971_s1 + $0x57c] ss:$20 sps:$4 sm:$0xff]   ;;  %v6781_v38 = vld [vmem:[%s9971_s1 + $0xd4] ss:$20 sps:$4 sm:$0xff]  }
  0x1e   :  { %v6797_v54 = vld [vmem:[%s9971_s1 + $0x148] ss:$20 sps:$4 sm:$0xff]  }
  0x1f   :  { %4185 = vmatpush1.bf16.msra.mxu1 %v6696_v30  ;;  %v6769_v30 = vld [vmem:[%s9971_s1 + $0x84] ss:$20 sps:$4 sm:$0xff]   ;;  %v6835_v16 = vld [vmem:[%s9971_s1 + $0x23c] ss:$20 sps:$4 sm:$0xff]  }
  0x20   :  { %4226 = vmatpush1.bf16.msra.mxu0 %v6697_v31  ;;  %4186 = vmatprep.subr.bf16.mxu1 %v6698_v32  ;;  %v6764_v31 = vld [vmem:[%s9971_s1 + $0x578] ss:$20 sps:$4 sm:$0xff]   ;;  %v6767_v32 = vld [vmem:[%s9971_s1 + $0x80] ss:$20 sps:$4 sm:$0xff]  }
  0x21   :  { %4227 = vmatprep.subr.bf16.mxu0 %v6700_v33  ;;  %v6772_v33 = vld [vmem:[%s9971_s1 + $0x5a4] ss:$20 sps:$4 sm:$0xff]  }
  0x23   :  { %4187 = vmatpush1.bf16.msra.mxu1 %v6702_v34  ;;  %v6775_v34 = vld [vmem:[%s9971_s1 + $0xac] ss:$20 sps:$4 sm:$0xff]  }
  0x24   :  { %4228 = vmatpush1.bf16.msra.mxu0 %v6703_v35  ;;  %4188 = vmatprep.subr.bf16.mxu1 %v6704_v39  ;;  %v6770_v35 = vld [vmem:[%s9971_s1 + $0x5a0] ss:$20 sps:$4 sm:$0xff]   ;;  %v6776_v39 = vld [vmem:[%s9971_s1 + $0x5c8] ss:$20 sps:$4 sm:$0xff]  }
  0x25   :  { %4229 = vmatprep.subr.bf16.mxu0 %v6706_v40  ;;  %v6779_v40 = vld [vmem:[%s9971_s1 + $0xd0] ss:$20 sps:$4 sm:$0xff]  }
  0x27   :  { %4189 = vmatpush1.bf16.msra.mxu1 %v6708_v41  ;;  %v6784_v41 = vld [vmem:[%s9971_s1 + $0x5f4] ss:$20 sps:$4 sm:$0xff]  }
  0x28   :  { %4230 = vmatpush1.bf16.msra.mxu0 %v6709_v44  ;;  %4190 = vmatprep.subr.bf16.mxu1 %v6710_v45  ;;  %v6782_v44 = vld [vmem:[%s9971_s1 + $0x5f0] ss:$20 sps:$4 sm:$0xff]   ;;  %v6785_v45 = vld [vmem:[%s9971_s1 + $0xf8] ss:$20 sps:$4 sm:$0xff]  }
  0x29   :  { %4231 = vmatprep.subr.bf16.mxu0 %v6712_v46  ;;  %v6790_v46 = vld [vmem:[%s9971_s1 + $0x61c] ss:$20 sps:$4 sm:$0xff]  }
  0x2b   :  { %4191 = vmatpush1.bf16.msra.mxu1 %v6714_v47  ;;  %v6793_v47 = vld [vmem:[%s9971_s1 + $0x124] ss:$20 sps:$4 sm:$0xff]  }
  0x2c   :  { %4232 = vmatpush1.bf16.msra.mxu0 %v6715_v48  ;;  %4192 = vmatprep.subr.bf16.mxu1 %v6716_v50  ;;  %v6788_v48 = vld [vmem:[%s9971_s1 + $0x618] ss:$20 sps:$4 sm:$0xff]   ;;  %v6791_v50 = vld [vmem:[%s9971_s1 + $0x120] ss:$20 sps:$4 sm:$0xff]  }
  0x2d   :  { %4233 = vmatprep.subr.bf16.mxu0 %v6718_v51  ;;  %v6796_v51 = vld [vmem:[%s9971_s1 + $0x644] ss:$20 sps:$4 sm:$0xff]  }
  0x2f   :  { %4193 = vmatpush1.bf16.msra.mxu1 %v6720_v53  ;;  %v6794_v53 = vld [vmem:[%s9971_s1 + $0x640] ss:$20 sps:$4 sm:$0xff]  }
  0x30   :  { %4234 = vmatpush1.bf16.msra.mxu0 %v6721_v55  ;;  %4194 = vmatprep.subr.bf16.mxu1 %v6722_v56  ;;  %v6802_v55 = vld [vmem:[%s9971_s1 + $0x66c] ss:$20 sps:$4 sm:$0xff]   ;;  %v6805_v56 = vld [vmem:[%s9971_s1 + $0x174] ss:$20 sps:$4 sm:$0xff]  }
  0x31   :  { %4235 = vmatprep.subr.bf16.mxu0 %v6724_v57  ;;  %v6800_v57 = vld [vmem:[%s9971_s1 + $0x668] ss:$20 sps:$4 sm:$0xff]  }
  0x33   :  { %4195 = vmatpush1.bf16.msra.mxu1 %v6726_v59  ;;  %v6808_v59 = vld [vmem:[%s9971_s1 + $0x694] ss:$20 sps:$4 sm:$0xff]  }
  0x34   :  { %4236 = vmatpush1.bf16.msra.mxu0 %v6727_v61  ;;  %4196 = vmatprep.subr.bf16.mxu1 %v6728_v62  ;;  %v6811_v61 = vld [vmem:[%s9971_s1 + $0x19c] ss:$20 sps:$4 sm:$0xff]  }
  0x35   :  { %4237 = vmatprep.subr.bf16.mxu0 %v6730_v63  ;;  %v6806_v62 = vld [vmem:[%s9971_s1 + $0x690] ss:$20 sps:$4 sm:$0xff]   ;;  %v6809_v63 = vld [vmem:[%s9971_s1 + $0x198] ss:$20 sps:$4 sm:$0xff]  }
  0x37   :  { %4197 = vmatpush1.bf16.msra.mxu1 %v6732_v1  ;;  %v6814_v1 = vld [vmem:[%s9971_s1 + $0x6bc] ss:$20 sps:$4 sm:$0xff]  }
  0x38   :  { %4238 = vmatpush1.bf16.msra.mxu0 %v6733_v2  ;;  %4198 = vmatprep.subr.bf16.mxu1 %v6734_v3  ;;  %v6817_v2 = vld [vmem:[%s9971_s1 + $0x1c4] ss:$20 sps:$4 sm:$0xff]  }
  0x39   :  { %4239 = vmatprep.subr.bf16.mxu0 %v6736_v4  ;;  %v6812_v3 = vld [vmem:[%s9971_s1 + $0x6b8] ss:$20 sps:$4 sm:$0xff]   ;;  %v6815_v4 = vld [vmem:[%s9971_s1 + $0x1c0] ss:$20 sps:$4 sm:$0xff]  }
  0x3b   :  { %4199 = vmatpush1.bf16.msra.mxu1 %v6738_v6  ;;  %v6823_v6 = vld [vmem:[%s9971_s1 + $0x1ec] ss:$20 sps:$4 sm:$0xff]  }
  0x3c   :  { %4240 = vmatpush1.bf16.msra.mxu0 %v6739_v7  ;;  %4200 = vmatprep.subr.bf16.mxu1 %v6740_v8  ;;  %v6818_v7 = vld [vmem:[%s9971_s1 + $0x6e0] ss:$20 sps:$4 sm:$0xff]   ;;  %v6821_v8 = vld [vmem:[%s9971_s1 + $0x1e8] ss:$20 sps:$4 sm:$0xff]  }
  0x3d   :  { %4241 = vmatprep.subr.bf16.mxu0 %v6742_v9  ;;  %v6826_v9 = vld [vmem:[%s9971_s1 + $0x70c] ss:$20 sps:$4 sm:$0xff]  }
  0x3f   :  { %4201 = vmatpush1.bf16.msra.mxu1 %v6744_v11  ;;  %v6829_v11 = vld [vmem:[%s9971_s1 + $0x214] ss:$20 sps:$4 sm:$0xff]  }
  0x40   :  { %4242 = vmatpush1.bf16.msra.mxu0 %v6745_v13  ;;  %4498 = vmatprep.subr.bf16.mxu1 %v6751_v15  ;;  %v6824_v13 = vld [vmem:[%s9971_s1 + $0x708] ss:$20 sps:$4 sm:$0xff]  }
  0x41   :  { %4252 = vmatprep.subr.bf16.mxu0 %v6748_v14  ;;  %v6827_v14 = vld [vmem:[%s9971_s1 + $0x210] ss:$20 sps:$4 sm:$0xff]   ;;  %v6832_v15 = vld [vmem:[%s9971_s1 + $0x734] ss:$20 sps:$4 sm:$0xff]  }
  0x42   :  { %4203 = vmatmul.mubr.bf16.vlgmr.msra.gmra.mrb[0].mxu1 %v7898_v12 }
  0x43   :  { %4244 = vmatmul.mubr.bf16.vlgmr.msra.gmra.mrb[0].mxu0 %v7916_v18  ;;  %4499 = vmatpush1.bf16.msra.mxu1 %v6749_v19  ;;  %v6833_v19 = vld [vmem:[%s9971_s1 + $0x238] ss:$20 sps:$4 sm:$0xff]  }
  0x44   :  { %4253 = vmatpush1.bf16.msra.mxu0 %v6746_v17  ;;  %4500 = vmatprep.subr.bf16.mxu1 %v6757_v21  ;;  %v6830_v17 = vld [vmem:[%s9971_s1 + $0x730] ss:$20 sps:$4 sm:$0xff]  }
  0x45   :  { %4254 = vmatprep.subr.bf16.mxu0 %v6754_v20  ;;  %4284 = vmatprep.mubr.bf16.mxu0 %v7928_v22  ;;  %v6838_v20 = vld [vmem:[%s9971_s1 + $0x75c] ss:$20 sps:$4 sm:$0xff]   ;;  %v6841_v21 = vld [vmem:[%s9971_s1 + $0x264] ss:$20 sps:$4 sm:$0xff]  }
  0x46   :  { %4530 = vmatprep.mubr.bf16.mxu1 %v7850_v60 }
  0x47   :  { %4501 = vmatpush1.bf16.msra.mxu1 %v6755_v24  ;;  %v6839_v24 = vld [vmem:[%s9971_s1 + $0x260] ss:$20 sps:$4 sm:$0xff]  }
  0x48   :  { %4255 = vmatpush1.bf16.msra.mxu0 %v6752_v23  ;;  %4502 = vmatprep.subr.bf16.mxu1 %v6763_v26  ;;  %v6836_v23 = vld [vmem:[%s9971_s1 + $0x758] ss:$20 sps:$4 sm:$0xff]  }
  0x49   :  { %4256 = vmatprep.subr.bf16.mxu0 %v6760_v25  ;;  %v6845_v25 = vld [vmem:[%s9971_s1 + $0x784] ss:$20 sps:$4 sm:$0xff]   ;;  %v6848_v26 = vld [vmem:[%s9971_s1 + $0x28c] ss:$20 sps:$4 sm:$0xff]  }
  0x4b   :  { %4503 = vmatpush1.bf16.msra.mxu1 %v6761_v28  ;;  %v8119_v28 = vrot.slane %v7892_v10, %v7822_v49  ;;  %v8132_v10 = vcombine.high %v7928_v22, %v7928_v22 }
  0x4c   :  { %4257 = vmatpush1.bf16.msra.mxu0 %v6758_v27  ;;  %4504 = vmatprep.subr.bf16.mxu1 %v6769_v30  ;;  %v6843_v27 = vld [vmem:[%s9971_s1 + $0x780] ss:$20 sps:$4 sm:$0xff]  }
  0x4d   :  { %4258 = vmatprep.subr.bf16.mxu0 %v6766_v29  ;;  %v6846_v29 = vld [vmem:[%s9971_s1 + $0x288] ss:$20 sps:$4 sm:$0xff]   ;;  %v6851_v30 = vld [vmem:[%s9971_s1 + $0x7ac] ss:$20 sps:$4 sm:$0xff]  }
  0x4f   :  { %4505 = vmatpush1.bf16.msra.mxu1 %v6767_v32  ;;  %v6849_v32 = vld [vmem:[%s9971_s1 + $0x7a8] ss:$20 sps:$4 sm:$0xff]  }
  0x50   :  { %4259 = vmatpush1.bf16.msra.mxu0 %v6764_v31  ;;  %4506 = vmatprep.subr.bf16.mxu1 %v6775_v34  ;;  %v6854_v31 = vld [vmem:[%s9971_s1 + $0x2b4] ss:$20 sps:$4 sm:$0xff]  }
  0x51   :  { %4260 = vmatprep.subr.bf16.mxu0 %v6772_v33  ;;  %v6852_v33 = vld [vmem:[%s9971_s1 + $0x2b0] ss:$20 sps:$4 sm:$0xff]   ;;  %v6857_v34 = vld [vmem:[%s9971_s1 + $0x7d4] ss:$20 sps:$4 sm:$0xff]  }
  0x53   :  { %4507 = vmatpush1.bf16.msra.mxu1 %v6773_v36  ;;  %v6855_v36 = vld [vmem:[%s9971_s1 + $0x7d0] ss:$20 sps:$4 sm:$0xff]  }
  0x54   :  { %4261 = vmatpush1.bf16.msra.mxu0 %v6770_v35  ;;  %4508 = vmatprep.subr.bf16.mxu1 %v6781_v38  ;;  %v6860_v35 = vld [vmem:[%s9971_s1 + $0x2dc] ss:$20 sps:$4 sm:$0xff]  }
  0x55   :  { %4262 = vmatprep.subr.bf16.mxu0 %v6778_v37  ;;  %v6858_v37 = vld [vmem:[%s9971_s1 + $0x2d8] ss:$20 sps:$4 sm:$0xff]   ;;  %v6863_v38 = vld [vmem:[%s9971_s1 + $0x7fc] ss:$20 sps:$4 sm:$0xff]  }
  0x57   :  { %4509 = vmatpush1.bf16.msra.mxu1 %v6779_v40  ;;  %v6861_v40 = vld [vmem:[%s9971_s1 + $0x7f8] ss:$20 sps:$4 sm:$0xff]  }
  0x58   :  { %4263 = vmatpush1.bf16.msra.mxu0 %v6776_v39  ;;  %4510 = vmatprep.subr.bf16.mxu1 %v6787_v43  ;;  %v6866_v39 = vld [vmem:[%s9971_s1 + $0x304] ss:$20 sps:$4 sm:$0xff]  }
  0x59   :  { %4264 = vmatprep.subr.bf16.mxu0 %v6784_v41  ;;  %v6864_v41 = vld [vmem:[%s9971_s1 + $0x300] ss:$20 sps:$4 sm:$0xff]   ;;  %v6869_v43 = vld [vmem:[%s9971_s1 + $0x824] ss:$20 sps:$4 sm:$0xff]  }
  0x5b   :  { %4511 = vmatpush1.bf16.msra.mxu1 %v6785_v45  ;;  %v6867_v45 = vld [vmem:[%s9971_s1 + $0x820] ss:$20 sps:$4 sm:$0xff]  }
  0x5c   :  { %4265 = vmatpush1.bf16.msra.mxu0 %v6782_v44  ;;  %4512 = vmatprep.subr.bf16.mxu1 %v6793_v47  ;;  %v6872_v44 = vld [vmem:[%s9971_s1 + $0x32c] ss:$20 sps:$4 sm:$0xff]  }
  0x5d   :  { %4266 = vmatprep.subr.bf16.mxu0 %v6790_v46  ;;  %v6870_v46 = vld [vmem:[%s9971_s1 + $0x328] ss:$20 sps:$4 sm:$0xff]   ;;  %v6875_v47 = vld [vmem:[%s9971_s1 + $0x84c] ss:$20 sps:$4 sm:$0xff]  }
  0x5f   :  { %4513 = vmatpush1.bf16.msra.mxu1 %v6791_v50  ;;  %v6873_v50 = vld [vmem:[%s9971_s1 + $0x848] ss:$20 sps:$4 sm:$0xff]  }
  0x60   :  { %4267 = vmatpush1.bf16.msra.mxu0 %v6788_v48  ;;  %4514 = vmatprep.subr.bf16.mxu1 %v6799_v52  ;;  %v6878_v48 = vld [vmem:[%s9971_s1 + $0x354] ss:$20 sps:$4 sm:$0xff]  }
  0x61   :  { %4268 = vmatprep.subr.bf16.mxu0 %v6796_v51  ;;  %v6876_v51 = vld [vmem:[%s9971_s1 + $0x350] ss:$20 sps:$4 sm:$0xff]   ;;  %v6881_v52 = vld [vmem:[%s9971_s1 + $0x874] ss:$20 sps:$4 sm:$0xff]  }
  0x63   :  { %4515 = vmatpush1.bf16.msra.mxu1 %v6797_v54  ;;  %v6879_v54 = vld [vmem:[%s9971_s1 + $0x870] ss:$20 sps:$4 sm:$0xff]  }
  0x64   :  { %4269 = vmatpush1.bf16.msra.mxu0 %v6794_v53  ;;  %4516 = vmatprep.subr.bf16.mxu1 %v6805_v56  ;;  %v6884_v53 = vld [vmem:[%s9971_s1 + $0x37c] ss:$20 sps:$4 sm:$0xff]  }
  0x65   :  { %4270 = vmatprep.subr.bf16.mxu0 %v6802_v55  ;;  %v6882_v55 = vld [vmem:[%s9971_s1 + $0x378] ss:$20 sps:$4 sm:$0xff]   ;;  %v6887_v56 = vld [vmem:[%s9971_s1 + $0x89c] ss:$20 sps:$4 sm:$0xff]  }
  0x67   :  { %4517 = vmatpush1.bf16.msra.mxu1 %v6803_v58  ;;  %v6885_v58 = vld [vmem:[%s9971_s1 + $0x898] ss:$20 sps:$4 sm:$0xff]  }
  0x68   :  { %4271 = vmatpush1.bf16.msra.mxu0 %v6800_v57  ;;  %4518 = vmatprep.subr.bf16.mxu1 %v6811_v61  ;;  %v6890_v57 = vld [vmem:[%s9971_s1 + $0x3a4] ss:$20 sps:$4 sm:$0xff]  }
  0x69   :  { %4272 = vmatprep.subr.bf16.mxu0 %v6808_v59  ;;  %v6888_v59 = vld [vmem:[%s9971_s1 + $0x3a0] ss:$20 sps:$4 sm:$0xff]   ;;  %v6893_v61 = vld [vmem:[%s9971_s1 + $0x8c4] ss:$20 sps:$4 sm:$0xff]  }
  0x6b   :  { %4519 = vmatpush1.bf16.msra.mxu1 %v6809_v63  ;;  %v6891_v63 = vld [vmem:[%s9971_s1 + $0x8c0] ss:$20 sps:$4 sm:$0xff]  }
  0x6c   :  { %4273 = vmatpush1.bf16.msra.mxu0 %v6806_v62  ;;  %4520 = vmatprep.subr.bf16.mxu1 %v6817_v2  ;;  %v6896_v62 = vld [vmem:[%s9971_s1 + $0x3cc] ss:$20 sps:$4 sm:$0xff]  }
  0x6d   :  { %4274 = vmatprep.subr.bf16.mxu0 %v6814_v1  ;;  %v6894_v1 = vld [vmem:[%s9971_s1 + $0x3c8] ss:$20 sps:$4 sm:$0xff]   ;;  %v6899_v2 = vld [vmem:[%s9971_s1 + $0x8ec] ss:$20 sps:$4 sm:$0xff]  }
  0x6f   :  { %4521 = vmatpush1.bf16.msra.mxu1 %v6815_v4  ;;  %v6897_v4 = vld [vmem:[%s9971_s1 + $0x8e8] ss:$20 sps:$4 sm:$0xff]  }
  0x70   :  { %4275 = vmatpush1.bf16.msra.mxu0 %v6812_v3  ;;  %4522 = vmatprep.subr.bf16.mxu1 %v6823_v6  ;;  %v6902_v3 = vld [vmem:[%s9971_s1 + $0x3f4] ss:$20 sps:$4 sm:$0xff]  }
  0x71   :  { %4276 = vmatprep.subr.bf16.mxu0 %v6820_v5  ;;  %v6900_v5 = vld [vmem:[%s9971_s1 + $0x3f0] ss:$20 sps:$4 sm:$0xff]   ;;  %v6905_v6 = vld [vmem:[%s9971_s1 + $0x914] ss:$20 sps:$4 sm:$0xff]  }
  0x73   :  { %4523 = vmatpush1.bf16.msra.mxu1 %v6821_v8  ;;  %v6903_v8 = vld [vmem:[%s9971_s1 + $0x910] ss:$20 sps:$4 sm:$0xff]  }
  0x74   :  { %4277 = vmatpush1.bf16.msra.mxu0 %v6818_v7  ;;  %4524 = vmatprep.subr.bf16.mxu1 %v6829_v11  ;;  %v6908_v7 = vld [vmem:[%s9971_s1 + $0x41c] ss:$20 sps:$4 sm:$0xff]  }
  0x75   :  { %4278 = vmatprep.subr.bf16.mxu0 %v6826_v9  ;;  %v6906_v9 = vld [vmem:[%s9971_s1 + $0x418] ss:$20 sps:$4 sm:$0xff]   ;;  %v6911_v11 = vld [vmem:[%s9971_s1 + $0x93c] ss:$20 sps:$4 sm:$0xff]  }
  0x77   :  { %4525 = vmatpush1.bf16.msra.mxu1 %v6827_v14  ;;  %v6909_v14 = vld [vmem:[%s9971_s1 + $0x938] ss:$20 sps:$4 sm:$0xff]  }
  0x78   :  { %4279 = vmatpush1.bf16.msra.mxu0 %v6824_v13  ;;  %4526 = vmatprep.subr.bf16.mxu1 %v6835_v16  ;;  %v6914_v13 = vld [vmem:[%s9971_s1 + $0x444] ss:$20 sps:$4 sm:$0xff]  }
  0x79   :  { %4280 = vmatprep.subr.bf16.mxu0 %v6832_v15  ;;  %v6912_v15 = vld [vmem:[%s9971_s1 + $0x440] ss:$20 sps:$4 sm:$0xff]   ;;  %v6917_v16 = vld [vmem:[%s9971_s1 + $0x964] ss:$20 sps:$4 sm:$0xff]  }
  0x7b   :  { %4527 = vmatpush1.bf16.msra.mxu1 %v6833_v19  ;;  %v6915_v19 = vld [vmem:[%s9971_s1 + $0x960] ss:$20 sps:$4 sm:$0xff]  }
  0x7c   :  { %4281 = vmatpush1.bf16.msra.mxu0 %v6830_v17  ;;  %4528 = vmatprep.subr.bf16.mxu1 %v6841_v21  ;;  %v6920_v17 = vld [vmem:[%s9971_s1 + $0x46c] ss:$20 sps:$4 sm:$0xff]  }
  0x7d   :  { %4282 = vmatprep.subr.bf16.mxu0 %v6838_v20  ;;  %v6918_v20 = vld [vmem:[%s9971_s1 + $0x468] ss:$20 sps:$4 sm:$0xff]   ;;  %v6923_v21 = vld [vmem:[%s9971_s1 + $0x98c] ss:$20 sps:$4 sm:$0xff]  }
  0x7f   :  { %4529 = vmatpush1.bf16.msra.mxu1 %v6839_v24  ;;  %v6921_v24 = vld [vmem:[%s9971_s1 + $0x988] ss:$20 sps:$4 sm:$0xff]  }
  0x80   :  { %4283 = vmatpush1.bf16.msra.mxu0 %v6836_v23  ;;  %4539 = vmatprep.subr.bf16.mxu1 %v6848_v26  ;;  %v6926_v23 = vld [vmem:[%s9971_s1 + $0x494] ss:$20 sps:$4 sm:$0xff]  }
  0x81   :  { %4293 = vmatprep.subr.bf16.mxu0 %v6845_v25  ;;  %v6924_v25 = vld [vmem:[%s9971_s1 + $0x490] ss:$20 sps:$4 sm:$0xff]   ;;  %v6929_v26 = vld [vmem:[%s9971_s1 + $0x9b4] ss:$20 sps:$4 sm:$0xff]  }
  0x82   :  { %4531 = vmatmul.mubr.bf16.vlgmr.msra.gmra.mrb[4].mxu1 %v7898_v12 }
  0x83   :  { %4285 = vmatmul.mubr.bf16.vlgmr.msra.gmra.mrb[0].mxu0 %v8119_v28  ;;  %4540 = vmatpush1.bf16.msra.mxu1 %v6846_v29  ;;  %v8297_v29 = vld [vmem:[%s9970_s0 + $0x8] sm:$0xff] }
  0x84   :  { %4294 = vmatpush1.bf16.msra.mxu0 %v6843_v27  ;;  %4541 = vmatprep.subr.bf16.mxu1 %v6854_v31  ;;  %v6932_v27 = vld [vmem:[%s9971_s1 + $0x4bc] ss:$20 sps:$4 sm:$0xff]   ;;  %v6930_v31 = vld [vmem:[%s9971_s1 + $0x4b8] ss:$20 sps:$4 sm:$0xff]  }
  0x85   :  { %4295 = vmatprep.subr.bf16.mxu0 %v6851_v30  ;;  %4325 = vmatprep.mubr.bf16.mxu0 %v8132_v10  ;;  %v6927_v30 = vld [vmem:[%s9971_s1 + $0x9b0] ss:$20 sps:$4 sm:$0xff]  }
  0x86   :  { %4571 = vmatprep.mubr.bf16.mxu1 %v7863_v0 }
  0x87   :  { %4542 = vmatpush1.bf16.msra.mxu1 %v6852_v33  ;;  %v6938_v33 = vld [vmem:[%s9971_s1 + $0x4e4] ss:$20 sps:$4 sm:$0xff]  }
  0x88   :  { %4296 = vmatpush1.bf16.msra.mxu0 %v6849_v32  ;;  %4543 = vmatprep.subr.bf16.mxu1 %v6860_v35  ;;  %v6935_v32 = vld [vmem:[%s9971_s1 + $0x9dc] ss:$20 sps:$4 sm:$0xff]   ;;  %v6933_v35 = vld [vmem:[%s9971_s1 + $0x9d8] ss:$20 sps:$4 sm:$0xff]  }
  0x89   :  { %4297 = vmatprep.subr.bf16.mxu0 %v6857_v34  ;;  %v8313_v34 = vrot.slane %v8297_v29, %v7822_v49 }
  0x8b   :  { %4544 = vmatpush1.bf16.msra.mxu1 %v6858_v37  ;;  %v6941_v37 = vld [vmem:[%s9971_s1 + $0xa04] ss:$20 sps:$4 sm:$0xff]  }
  0x8c   :  { %4298 = vmatpush1.bf16.msra.mxu0 %v6855_v36  ;;  %4545 = vmatprep.subr.bf16.mxu1 %v6866_v39  ;;  %v6936_v36 = vld [vmem:[%s9971_s1 + $0x4e0] ss:$20 sps:$4 sm:$0xff]   ;;  %v867_v39 = vcombine.high %v8313_v34, %v8313_v34 }
  0x8d   :  { %4299 = vmatprep.subr.bf16.mxu0 %v6863_v38  ;;  %v6944_v38 = vld [vmem:[%s9971_s1 + $0x50c] ss:$20 sps:$4 sm:$0xff]  }
  0x8f   :  { %4546 = vmatpush1.bf16.msra.mxu1 %v6864_v41  ;;  %v8334_v41 = vcombine.high %v8119_v28, %v8119_v28 }
  0x90   :  { %4300 = vmatpush1.bf16.msra.mxu0 %v6861_v40  ;;  %4547 = vmatprep.subr.bf16.mxu1 %v6872_v44  ;;  %v6939_v40 = vld [vmem:[%s9971_s1 + $0xa00] ss:$20 sps:$4 sm:$0xff]  }
  0x91   :  { %4301 = vmatprep.subr.bf16.mxu0 %v6869_v43  ;;  %v6942_v43 = vld [vmem:[%s9971_s1 + $0x508] ss:$20 sps:$4 sm:$0xff]   ;;  %v6947_v44 = vld [vmem:[%s9971_s1 + $0xa2c] ss:$20 sps:$4 sm:$0xff]  }
  0x93   :  { %4548 = vmatpush1.bf16.msra.mxu1 %v6870_v46  ;;  %v8346_v46 = vrot.slane %v867_v39, %v7822_v49  ;;  %v7019_v39 = vld [vmem:[%s9971_s1 + $0xc0c] ss:$20 sps:$4 sm:$0xff]  }
  0x94   :  { %4302 = vmatpush1.bf16.msra.mxu0 %v6867_v45  ;;  %4549 = vmatprep.subr.bf16.mxu1 %v6878_v48  ;;  %v6950_v45 = vld [vmem:[%s9971_s1 + $0x534] ss:$20 sps:$4 sm:$0xff]   ;;  %v6948_v48 = vld [vmem:[%s9971_s1 + $0x530] ss:$20 sps:$4 sm:$0xff]  }
  0x95   :  { %4303 = vmatprep.subr.bf16.mxu0 %v6875_v47  ;;  %v6945_v47 = vld [vmem:[%s9971_s1 + $0xa28] ss:$20 sps:$4 sm:$0xff]  }
  0x97   :  { %4550 = vmatpush1.bf16.msra.mxu1 %v6876_v51  ;;  %v6956_v51 = vld [vmem:[%s9971_s1 + $0x55c] ss:$20 sps:$4 sm:$0xff]  }
  0x98   :  { %4304 = vmatpush1.bf16.msra.mxu0 %v6873_v50  ;;  %4551 = vmatprep.subr.bf16.mxu1 %v6884_v53  ;;  %v6953_v50 = vld [vmem:[%s9971_s1 + $0xa54] ss:$20 sps:$4 sm:$0xff]   ;;  %v6954_v53 = vld [vmem:[%s9971_s1 + $0x558] ss:$20 sps:$4 sm:$0xff]  }
  0x99   :  { %4305 = vmatprep.subr.bf16.mxu0 %v6881_v52  ;;  %v6951_v52 = vld [vmem:[%s9971_s1 + $0xa50] ss:$20 sps:$4 sm:$0xff]  }
  0x9b   :  { %4552 = vmatpush1.bf16.msra.mxu1 %v6882_v55  ;;  %v6962_v55 = vld [vmem:[%s9971_s1 + $0x584] ss:$20 sps:$4 sm:$0xff]  }
  0x9c   :  { %4306 = vmatpush1.bf16.msra.mxu0 %v6879_v54  ;;  %4553 = vmatprep.subr.bf16.mxu1 %v6890_v57  ;;  %v6959_v54 = vld [vmem:[%s9971_s1 + $0xa7c] ss:$20 sps:$4 sm:$0xff]   ;;  %v6960_v57 = vld [vmem:[%s9971_s1 + $0x580] ss:$20 sps:$4 sm:$0xff]  }
  0x9d   :  { %4307 = vmatprep.subr.bf16.mxu0 %v6887_v56  ;;  %v6957_v56 = vld [vmem:[%s9971_s1 + $0xa78] ss:$20 sps:$4 sm:$0xff]  }
  0x9f   :  { %4554 = vmatpush1.bf16.msra.mxu1 %v6888_v59  ;;  %v6968_v59 = vld [vmem:[%s9971_s1 + $0x5ac] ss:$20 sps:$4 sm:$0xff]  }
  0xa0   :  { %4308 = vmatpush1.bf16.msra.mxu0 %v6885_v58  ;;  %4555 = vmatprep.subr.bf16.mxu1 %v6896_v62  ;;  %v6965_v58 = vld [vmem:[%s9971_s1 + $0xaa4] ss:$20 sps:$4 sm:$0xff]   ;;  %v6966_v62 = vld [vmem:[%s9971_s1 + $0x5a8] ss:$20 sps:$4 sm:$0xff]  }
  0xa1   :  { %4309 = vmatprep.subr.bf16.mxu0 %v6893_v61  ;;  %v6963_v61 = vld [vmem:[%s9971_s1 + $0xaa0] ss:$20 sps:$4 sm:$0xff]  }
  0xa3   :  { %4556 = vmatpush1.bf16.msra.mxu1 %v6894_v1  ;;  %v6974_v1 = vld [vmem:[%s9971_s1 + $0x5d4] ss:$20 sps:$4 sm:$0xff]  }
  0xa4   :  { %4310 = vmatpush1.bf16.msra.mxu0 %v6891_v63  ;;  %4557 = vmatprep.subr.bf16.mxu1 %v6902_v3  ;;  %v6971_v63 = vld [vmem:[%s9971_s1 + $0xacc] ss:$20 sps:$4 sm:$0xff]   ;;  %v6972_v3 = vld [vmem:[%s9971_s1 + $0x5d0] ss:$20 sps:$4 sm:$0xff]  }
  0xa5   :  { %4311 = vmatprep.subr.bf16.mxu0 %v6899_v2  ;;  %v6969_v2 = vld [vmem:[%s9971_s1 + $0xac8] ss:$20 sps:$4 sm:$0xff]  }
  0xa7   :  { %4558 = vmatpush1.bf16.msra.mxu1 %v6900_v5  ;;  %v6980_v5 = vld [vmem:[%s9971_s1 + $0x5fc] ss:$20 sps:$4 sm:$0xff]  }
  0xa8   :  { %4312 = vmatpush1.bf16.msra.mxu0 %v6897_v4  ;;  %4559 = vmatprep.subr.bf16.mxu1 %v6908_v7  ;;  %v6977_v4 = vld [vmem:[%s9971_s1 + $0xaf4] ss:$20 sps:$4 sm:$0xff]   ;;  %v6978_v7 = vld [vmem:[%s9971_s1 + $0x5f8] ss:$20 sps:$4 sm:$0xff]  }
  0xa9   :  { %4313 = vmatprep.subr.bf16.mxu0 %v6905_v6  ;;  %v6975_v6 = vld [vmem:[%s9971_s1 + $0xaf0] ss:$20 sps:$4 sm:$0xff]  }
  0xab   :  { %4560 = vmatpush1.bf16.msra.mxu1 %v6906_v9  ;;  %v6986_v9 = vld [vmem:[%s9971_s1 + $0x624] ss:$20 sps:$4 sm:$0xff]  }
  0xac   :  { %4314 = vmatpush1.bf16.msra.mxu0 %v6903_v8  ;;  %4561 = vmatprep.subr.bf16.mxu1 %v6914_v13  ;;  %v6983_v8 = vld [vmem:[%s9971_s1 + $0xb1c] ss:$20 sps:$4 sm:$0xff]   ;;  %v6984_v13 = vld [vmem:[%s9971_s1 + $0x620] ss:$20 sps:$4 sm:$0xff]  }
  0xad   :  { %4315 = vmatprep.subr.bf16.mxu0 %v6911_v11  ;;  %v6981_v11 = vld [vmem:[%s9971_s1 + $0xb18] ss:$20 sps:$4 sm:$0xff]  }
  0xaf   :  { %4562 = vmatpush1.bf16.msra.mxu1 %v6912_v15  ;;  %v6992_v15 = vld [vmem:[%s9971_s1 + $0x64c] ss:$20 sps:$4 sm:$0xff]  }
  0xb0   :  { %4316 = vmatpush1.bf16.msra.mxu0 %v6909_v14  ;;  %4563 = vmatprep.subr.bf16.mxu1 %v6920_v17  ;;  %v6989_v14 = vld [vmem:[%s9971_s1 + $0xb44] ss:$20 sps:$4 sm:$0xff]   ;;  %v6990_v17 = vld [vmem:[%s9971_s1 + $0x648] ss:$20 sps:$4 sm:$0xff]  }
  0xb1   :  { %4317 = vmatprep.subr.bf16.mxu0 %v6917_v16  ;;  %v6987_v16 = vld [vmem:[%s9971_s1 + $0xb40] ss:$20 sps:$4 sm:$0xff]  }
  0xb3   :  { %4564 = vmatpush1.bf16.msra.mxu1 %v6918_v20  ;;  %v6998_v20 = vld [vmem:[%s9971_s1 + $0x674] ss:$20 sps:$4 sm:$0xff]  }
  0xb4   :  { %4318 = vmatpush1.bf16.msra.mxu0 %v6915_v19  ;;  %4565 = vmatprep.subr.bf16.mxu1 %v6926_v23  ;;  %v6995_v19 = vld [vmem:[%s9971_s1 + $0xb6c] ss:$20 sps:$4 sm:$0xff]   ;;  %v6996_v23 = vld [vmem:[%s9971_s1 + $0x670] ss:$20 sps:$4 sm:$0xff]  }
  0xb5   :  { %4319 = vmatprep.subr.bf16.mxu0 %v6923_v21  ;;  %v6993_v21 = vld [vmem:[%s9971_s1 + $0xb68] ss:$20 sps:$4 sm:$0xff]  }
  0xb7   :  { %4566 = vmatpush1.bf16.msra.mxu1 %v6924_v25  ;;  %v7004_v25 = vld [vmem:[%s9971_s1 + $0x69c] ss:$20 sps:$4 sm:$0xff]  }
  0xb8   :  { %4320 = vmatpush1.bf16.msra.mxu0 %v6921_v24  ;;  %4567 = vmatprep.subr.bf16.mxu1 %v6932_v27  ;;  %v7001_v24 = vld [vmem:[%s9971_s1 + $0xb94] ss:$20 sps:$4 sm:$0xff]   ;;  %v7002_v27 = vld [vmem:[%s9971_s1 + $0x698] ss:$20 sps:$4 sm:$0xff]  }
  0xb9   :  { %4321 = vmatprep.subr.bf16.mxu0 %v6929_v26  ;;  %v6999_v26 = vld [vmem:[%s9971_s1 + $0xb90] ss:$20 sps:$4 sm:$0xff]  }
  0xbb   :  { %4568 = vmatpush1.bf16.msra.mxu1 %v6930_v31  ;;  %v7010_v31 = vld [vmem:[%s9971_s1 + $0x6c4] ss:$20 sps:$4 sm:$0xff]  }
  0xbc   :  { %4322 = vmatpush1.bf16.msra.mxu0 %v6927_v30  ;;  %4569 = vmatprep.subr.bf16.mxu1 %v6938_v33  ;;  %v7007_v30 = vld [vmem:[%s9971_s1 + $0xbbc] ss:$20 sps:$4 sm:$0xff]   ;;  %v7008_v33 = vld [vmem:[%s9971_s1 + $0x6c0] ss:$20 sps:$4 sm:$0xff]  }
  0xbd   :  { %4323 = vmatprep.subr.bf16.mxu0 %v6935_v32  ;;  %v7005_v32 = vld [vmem:[%s9971_s1 + $0xbb8] ss:$20 sps:$4 sm:$0xff]  }
  0xbf   :  { %4570 = vmatpush1.bf16.msra.mxu1 %v6936_v36  ;;  %v7016_v36 = vld [vmem:[%s9971_s1 + $0x6ec] ss:$20 sps:$4 sm:$0xff]  }
  0xc0   :  { %4324 = vmatpush1.bf16.msra.mxu0 %v6933_v35  ;;  %4580 = vmatprep.subr.bf16.mxu1 %v6944_v38  ;;  %v7013_v35 = vld [vmem:[%s9971_s1 + $0xbe4] ss:$20 sps:$4 sm:$0xff]   ;;  %v7014_v38 = vld [vmem:[%s9971_s1 + $0x6e8] ss:$20 sps:$4 sm:$0xff]  }
  0xc1   :  { %4334 = vmatprep.subr.bf16.mxu0 %v6941_v37  ;;  %v7011_v37 = vld [vmem:[%s9971_s1 + $0xbe0] ss:$20 sps:$4 sm:$0xff]  }
  0xc2   :  { %4572 = vmatmul.mubr.bf16.vlgmr.msra.gmra.mrb[4].mxu1 %v7916_v18 }
  0xc3   :  { %4326 = vmatmul.mubr.bf16.vlgmr.msra.gmra.mrb[0].mxu0 %v8334_v41  ;;  %4581 = vmatpush1.bf16.msra.mxu1 %v6942_v43  ;;  %v7017_v43 = vld [vmem:[%s9971_s1 + $0xc08] ss:$20 sps:$4 sm:$0xff]  }
  0xc4   :  { %4335 = vmatpush1.bf16.msra.mxu0 %v6939_v40  ;;  %4582 = vmatprep.subr.bf16.mxu1 %v6950_v45  ;;  %v7022_v40 = vld [vmem:[%s9971_s1 + $0x714] ss:$20 sps:$4 sm:$0xff]  }
  0xc5   :  { %4336 = vmatprep.subr.bf16.mxu0 %v6947_v44  ;;  %4366 = vmatprep.mubr.bf16.mxu0 %v8346_v46  ;;  %v7020_v44 = vld [vmem:[%s9971_s1 + $0x710] ss:$20 sps:$4 sm:$0xff]   ;;  %v7025_v45 = vld [vmem:[%s9971_s1 + $0xc34] ss:$20 sps:$4 sm:$0xff]  }
  0xc6   :  { %4612 = vmatprep.mubr.bf16.mxu1 %v7928_v22 }
  0xc7   :  { %4583 = vmatpush1.bf16.msra.mxu1 %v6948_v48  ;;  %v7023_v48 = vld [vmem:[%s9971_s1 + $0xc30] ss:$20 sps:$4 sm:$0xff]  }
  0xc8   :  { %4337 = vmatpush1.bf16.msra.mxu0 %v6945_v47  ;;  %4584 = vmatprep.subr.bf16.mxu1 %v6956_v51  ;;  %v7028_v47 = vld [vmem:[%s9971_s1 + $0x73c] ss:$20 sps:$4 sm:$0xff]  }
  0xc9   :  { %4338 = vmatprep.subr.bf16.mxu0 %v6953_v50  ;;  %v7026_v50 = vld [vmem:[%s9971_s1 + $0x738] ss:$20 sps:$4 sm:$0xff]   ;;  %v7031_v51 = vld [vmem:[%s9971_s1 + $0xc5c] ss:$20 sps:$4 sm:$0xff]  }
  0xcb   :  { %4585 = vmatpush1.bf16.msra.mxu1 %v6954_v53  ;;  %v7029_v53 = vld [vmem:[%s9971_s1 + $0xc58] ss:$20 sps:$4 sm:$0xff]  }
  0xcc   :  { %4339 = vmatpush1.bf16.msra.mxu0 %v6951_v52  ;;  %4586 = vmatprep.subr.bf16.mxu1 %v6962_v55  ;;  %v7034_v52 = vld [vmem:[%s9971_s1 + $0x764] ss:$20 sps:$4 sm:$0xff]  }
  0xcd   :  { %4340 = vmatprep.subr.bf16.mxu0 %v6959_v54  ;;  %v7032_v54 = vld [vmem:[%s9971_s1 + $0x760] ss:$20 sps:$4 sm:$0xff]   ;;  %v7037_v55 = vld [vmem:[%s9971_s1 + $0xc84] ss:$20 sps:$4 sm:$0xff]  }
  0xcf   :  { %4587 = vmatpush1.bf16.msra.mxu1 %v6960_v57  ;;  %v7035_v57 = vld [vmem:[%s9971_s1 + $0xc80] ss:$20 sps:$4 sm:$0xff]  }
  0xd0   :  { %4341 = vmatpush1.bf16.msra.mxu0 %v6957_v56  ;;  %4588 = vmatprep.subr.bf16.mxu1 %v6968_v59  ;;  %v7040_v56 = vld [vmem:[%s9971_s1 + $0x78c] ss:$20 sps:$4 sm:$0xff]   ;;  %v7038_v59 = vld [vmem:[%s9971_s1 + $0x788] ss:$20 sps:$4 sm:$0xff]  }
  0xd1   :  { %4342 = vmatprep.subr.bf16.mxu0 %v6965_v58  ;;  %v8537_v58 = vrot.slane %v8313_v34, %v7822_v49  ;;  %v8550_v34 = vcombine.high %v8346_v46, %v8346_v46 }
  0xd3   :  { %4589 = vmatpush1.bf16.msra.mxu1 %v6966_v62  ;;  %v7046_v62 = vld [vmem:[%s9971_s1 + $0x7b4] ss:$20 sps:$4 sm:$0xff]  }
  0xd4   :  { %4343 = vmatpush1.bf16.msra.mxu0 %v6963_v61  ;;  %4590 = vmatprep.subr.bf16.mxu1 %v6974_v1  ;;  %v7043_v61 = vld [vmem:[%s9971_s1 + $0xcac] ss:$20 sps:$4 sm:$0xff]   ;;  %v7044_v1 = vld [vmem:[%s9971_s1 + $0x7b0] ss:$20 sps:$4 sm:$0xff]  }
  0xd5   :  { %4344 = vmatprep.subr.bf16.mxu0 %v6971_v63  ;;  %v7041_v63 = vld [vmem:[%s9971_s1 + $0xca8] ss:$20 sps:$4 sm:$0xff]  }
  0xd7   :  { %4591 = vmatpush1.bf16.msra.mxu1 %v6972_v3  ;;  %v7052_v3 = vld [vmem:[%s9971_s1 + $0x7dc] ss:$20 sps:$4 sm:$0xff]  }
  0xd8   :  { %4345 = vmatpush1.bf16.msra.mxu0 %v6969_v2  ;;  %4592 = vmatprep.subr.bf16.mxu1 %v6980_v5  ;;  %v7049_v2 = vld [vmem:[%s9971_s1 + $0xcd4] ss:$20 sps:$4 sm:$0xff]   ;;  %v7050_v5 = vld [vmem:[%s9971_s1 + $0x7d8] ss:$20 sps:$4 sm:$0xff]  }
  0xd9   :  { %4346 = vmatprep.subr.bf16.mxu0 %v6977_v4  ;;  %v7047_v4 = vld [vmem:[%s9971_s1 + $0xcd0] ss:$20 sps:$4 sm:$0xff]  }
  0xdb   :  { %4593 = vmatpush1.bf16.msra.mxu1 %v6978_v7  ;;  %v7058_v7 = vld [vmem:[%s9971_s1 + $0x804] ss:$20 sps:$4 sm:$0xff]  }
  0xdc   :  { %4347 = vmatpush1.bf16.msra.mxu0 %v6975_v6  ;;  %4594 = vmatprep.subr.bf16.mxu1 %v6986_v9  ;;  %v7055_v6 = vld [vmem:[%s9971_s1 + $0xcfc] ss:$20 sps:$4 sm:$0xff]   ;;  %v7056_v9 = vld [vmem:[%s9971_s1 + $0x800] ss:$20 sps:$4 sm:$0xff]  }
  0xdd   :  { %4348 = vmatprep.subr.bf16.mxu0 %v6983_v8  ;;  %v7053_v8 = vld [vmem:[%s9971_s1 + $0xcf8] ss:$20 sps:$4 sm:$0xff]  }
  0xdf   :  { %4595 = vmatpush1.bf16.msra.mxu1 %v6984_v13  ;;  %v7064_v13 = vld [vmem:[%s9971_s1 + $0x82c] ss:$20 sps:$4 sm:$0xff]  }
  0xe0   :  { %4349 = vmatpush1.bf16.msra.mxu0 %v6981_v11  ;;  %4596 = vmatprep.subr.bf16.mxu1 %v6992_v15  ;;  %v7061_v11 = vld [vmem:[%s9971_s1 + $0xd24] ss:$20 sps:$4 sm:$0xff]   ;;  %v7062_v15 = vld [vmem:[%s9971_s1 + $0x828] ss:$20 sps:$4 sm:$0xff]  }
  0xe1   :  { %4350 = vmatprep.subr.bf16.mxu0 %v6989_v14  ;;  %v7059_v14 = vld [vmem:[%s9971_s1 + $0xd20] ss:$20 sps:$4 sm:$0xff]  }
  0xe3   :  { %4597 = vmatpush1.bf16.msra.mxu1 %v6990_v17  ;;  %v7070_v17 = vld [vmem:[%s9971_s1 + $0x854] ss:$20 sps:$4 sm:$0xff]  }
  0xe4   :  { %4351 = vmatpush1.bf16.msra.mxu0 %v6987_v16  ;;  %4598 = vmatprep.subr.bf16.mxu1 %v6998_v20  ;;  %v7067_v16 = vld [vmem:[%s9971_s1 + $0xd4c] ss:$20 sps:$4 sm:$0xff]   ;;  %v7068_v20 = vld [vmem:[%s9971_s1 + $0x850] ss:$20 sps:$4 sm:$0xff]  }
  0xe5   :  { %4352 = vmatprep.subr.bf16.mxu0 %v6995_v19  ;;  %v7065_v19 = vld [vmem:[%s9971_s1 + $0xd48] ss:$20 sps:$4 sm:$0xff]  }
  0xe7   :  { %4599 = vmatpush1.bf16.msra.mxu1 %v6996_v23  ;;  %v7076_v23 = vld [vmem:[%s9971_s1 + $0x87c] ss:$20 sps:$4 sm:$0xff]  }
  0xe8   :  { %4353 = vmatpush1.bf16.msra.mxu0 %v6993_v21  ;;  %4600 = vmatprep.subr.bf16.mxu1 %v7004_v25  ;;  %v7073_v21 = vld [vmem:[%s9971_s1 + $0xd74] ss:$20 sps:$4 sm:$0xff]  }
  0xe9   :  { %4354 = vmatprep.subr.bf16.mxu0 %v7001_v24 }
  0xeb   :  { %4601 = vmatpush1.bf16.msra.mxu1 %v7002_v27  ;;  %v7071_v27 = vld [vmem:[%s9971_s1 + $0xd70] ss:$20 sps:$4 sm:$0xff]  }
  0xec   :  { %4355 = vmatpush1.bf16.msra.mxu0 %v6999_v26  ;;  %4602 = vmatprep.subr.bf16.mxu1 %v7010_v31 }
  0xed   :  { %4356 = vmatprep.subr.bf16.mxu0 %v7007_v30  ;;  %v7074_v30 = vld [vmem:[%s9971_s1 + $0x878] ss:$20 sps:$4 sm:$0xff]  }
  0xef   :  { %4603 = vmatpush1.bf16.msra.mxu1 %v7008_v33  ;;  %v7082_v33 = vld [vmem:[%s9971_s1 + $0x8a4] ss:$20 sps:$4 sm:$0xff]  }
  0xf0   :  { %4357 = vmatpush1.bf16.msra.mxu0 %v7005_v32  ;;  %4604 = vmatprep.subr.bf16.mxu1 %v7016_v36  ;;  %v7079_v32 = vld [vmem:[%s9971_s1 + $0xd9c] ss:$20 sps:$4 sm:$0xff]   ;;  %v7080_v36 = vld [vmem:[%s9971_s1 + $0x8a0] ss:$20 sps:$4 sm:$0xff]  }
  0xf1   :  { %4358 = vmatprep.subr.bf16.mxu0 %v7013_v35  ;;  %v7077_v35 = vld [vmem:[%s9971_s1 + $0xd98] ss:$20 sps:$4 sm:$0xff]  }
  0xf3   :  { %4605 = vmatpush1.bf16.msra.mxu1 %v7014_v38  ;;  %v7088_v38 = vld [vmem:[%s9971_s1 + $0x8cc] ss:$20 sps:$4 sm:$0xff]  }
  0xf4   :  { %4359 = vmatpush1.bf16.msra.mxu0 %v7011_v37  ;;  %4606 = vmatprep.subr.bf16.mxu1 %v7022_v40  ;;  %v7085_v37 = vld [vmem:[%s9971_s1 + $0xdc4] ss:$20 sps:$4 sm:$0xff]   ;;  %v7086_v40 = vld [vmem:[%s9971_s1 + $0x8c8] ss:$20 sps:$4 sm:$0xff]  }
  0xf5   :  { %4360 = vmatprep.subr.bf16.mxu0 %v7019_v39  ;;  %v7083_v39 = vld [vmem:[%s9971_s1 + $0xdc0] ss:$20 sps:$4 sm:$0xff]  }
  0xf7   :  { %4607 = vmatpush1.bf16.msra.mxu1 %v7020_v44  ;;  %v7094_v44 = vld [vmem:[%s9971_s1 + $0x8f4] ss:$20 sps:$4 sm:$0xff]  }
  0xf8   :  { %4361 = vmatpush1.bf16.msra.mxu0 %v7017_v43  ;;  %4608 = vmatprep.subr.bf16.mxu1 %v7028_v47  ;;  %v7091_v43 = vld [vmem:[%s9971_s1 + $0xdec] ss:$20 sps:$4 sm:$0xff]   ;;  %v7092_v47 = vld [vmem:[%s9971_s1 + $0x8f0] ss:$20 sps:$4 sm:$0xff]  }
  0xf9   :  { %4362 = vmatprep.subr.bf16.mxu0 %v7025_v45  ;;  %v7089_v45 = vld [vmem:[%s9971_s1 + $0xde8] ss:$20 sps:$4 sm:$0xff]  }
  0xfb   :  { %4609 = vmatpush1.bf16.msra.mxu1 %v7026_v50  ;;  %v7100_v50 = vld [vmem:[%s9971_s1 + $0x91c] ss:$20 sps:$4 sm:$0xff]  }
  0xfc   :  { %4363 = vmatpush1.bf16.msra.mxu0 %v7023_v48  ;;  %4610 = vmatprep.subr.bf16.mxu1 %v7034_v52  ;;  %v7097_v48 = vld [vmem:[%s9971_s1 + $0xe14] ss:$20 sps:$4 sm:$0xff]   ;;  %v7098_v52 = vld [vmem:[%s9971_s1 + $0x918] ss:$20 sps:$4 sm:$0xff]  }
  0xfd   :  { %4364 = vmatprep.subr.bf16.mxu0 %v7031_v51  ;;  %v7095_v51 = vld [vmem:[%s9971_s1 + $0xe10] ss:$20 sps:$4 sm:$0xff]  }
  0xff   :  { %4611 = vmatpush1.bf16.msra.mxu1 %v7032_v54  ;;  %v7106_v54 = vld [vmem:[%s9971_s1 + $0x944] ss:$20 sps:$4 sm:$0xff]  }
 0x100   :  { %4365 = vmatpush1.bf16.msra.mxu0 %v7029_v53  ;;  %4621 = vmatprep.subr.bf16.mxu1 %v7040_v56  ;;  %v7103_v53 = vld [vmem:[%s9971_s1 + $0xe3c] ss:$20 sps:$4 sm:$0xff]   ;;  %v7104_v56 = vld [vmem:[%s9971_s1 + $0x940] ss:$20 sps:$4 sm:$0xff]  }
 0x101   :  { %4375 = vmatprep.subr.bf16.mxu0 %v7037_v55  ;;  %v7101_v55 = vld [vmem:[%s9971_s1 + $0xe38] ss:$20 sps:$4 sm:$0xff]  }
 0x102   :  { %4613 = vmatmul.mubr.bf16.vlgmr.msra.gmra.mrb[4].mxu1 %v8119_v28 }
 0x103   :  { %4367 = vmatmul.mubr.bf16.vlgmr.msra.gmra.mrb[0].mxu0 %v8537_v58  ;;  %4622 = vmatpush1.bf16.msra.mxu1 %v7038_v59  ;;  %v7112_v59 = vld [vmem:[%s9971_s1 + $0x96c] ss:$20 sps:$4 sm:$0xff]  }
 0x104   :  { %4376 = vmatpush1.bf16.msra.mxu0 %v7035_v57  ;;  %4623 = vmatprep.subr.bf16.mxu1 %v7046_v62  ;;  %v7109_v57 = vld [vmem:[%s9971_s1 + $0xe64] ss:$20 sps:$4 sm:$0xff]   ;;  %v7110_v62 = vld [vmem:[%s9971_s1 + $0x968] ss:$20 sps:$4 sm:$0xff]  }
 0x105   :  { %4377 = vmatprep.subr.bf16.mxu0 %v7043_v61  ;;  %4407 = vmatprep.mubr.bf16.mxu0 %v8550_v34  ;;  %v7107_v61 = vld [vmem:[%s9971_s1 + $0xe60] ss:$20 sps:$4 sm:$0xff]  }
 0x106   :  { %4653 = vmatprep.mubr.bf16.mxu1 %v8132_v10 }
 0x107   :  { %4624 = vmatpush1.bf16.msra.mxu1 %v7044_v1  ;;  %v7118_v1 = vld [vmem:[%s9971_s1 + $0x994] ss:$20 sps:$4 sm:$0xff]  }
 0x108   :  { %4378 = vmatpush1.bf16.msra.mxu0 %v7041_v63  ;;  %4625 = vmatprep.subr.bf16.mxu1 %v7052_v3  ;;  %v7115_v63 = vld [vmem:[%s9971_s1 + $0xe8c] ss:$20 sps:$4 sm:$0xff]   ;;  %v7116_v3 = vld [vmem:[%s9971_s1 + $0x990] ss:$20 sps:$4 sm:$0xff]  }
 0x109   :  { %4379 = vmatprep.subr.bf16.mxu0 %v7049_v2  ;;  %v7113_v2 = vld [vmem:[%s9971_s1 + $0xe88] ss:$20 sps:$4 sm:$0xff]  }
 0x10b   :  { %4626 = vmatpush1.bf16.msra.mxu1 %v7050_v5  ;;  %v7124_v5 = vld [vmem:[%s9971_s1 + $0x9bc] ss:$20 sps:$4 sm:$0xff]  }
 0x10c   :  { %4380 = vmatpush1.bf16.msra.mxu0 %v7047_v4  ;;  %4627 = vmatprep.subr.bf16.mxu1 %v7058_v7  ;;  %v7121_v4 = vld [vmem:[%s9971_s1 + $0xeb4] ss:$20 sps:$4 sm:$0xff]   ;;  %v7122_v7 = vld [vmem:[%s9971_s1 + $0x9b8] ss:$20 sps:$4 sm:$0xff]  }
 0x10d   :  { %4381 = vmatprep.subr.bf16.mxu0 %v7055_v6  ;;  %v7119_v6 = vld [vmem:[%s9971_s1 + $0xeb0] ss:$20 sps:$4 sm:$0xff]  }
 0x10f   :  { %4628 = vmatpush1.bf16.msra.mxu1 %v7056_v9  ;;  %v7127_v9 = vld [vmem:[%s9971_s1 + $0xedc] ss:$20 sps:$4 sm:$0xff]  }
 0x110   :  { %4382 = vmatpush1.bf16.msra.mxu0 %v7053_v8  ;;  %4629 = vmatprep.subr.bf16.mxu1 %v7064_v13  ;;  %v852_v8 = vcombine.high %v8297_v29, %v8297_v29  ;;  %v7125_v13 = vld [vmem:[%s9971_s1 + $0xed8] ss:$20 sps:$4 sm:$0xff]   ;;  %v7128_v29 = vld [vmem:[%s9971_s1 + $0x9e0] ss:$20 sps:$4 sm:$0xff]  }
 0x111   :  { %4383 = vmatprep.subr.bf16.mxu0 %v7061_v11  ;;  %v7130_v11 = vld [vmem:[%s9971_s1 + $0x9e4] ss:$20 sps:$4 sm:$0xff]  }
 0x113   :  { %4630 = vmatpush1.bf16.msra.mxu1 %v7062_v15  ;;  %v7133_v15 = vld [vmem:[%s9971_s1 + $0xf04] ss:$20 sps:$4 sm:$0xff]  }
 0x114   :  { %4384 = vmatpush1.bf16.msra.mxu0 %v7059_v14  ;;  %4631 = vmatprep.subr.bf16.mxu1 %v7070_v17  ;;  %v8737_v14 = vrot.slane %v852_v8, %v7822_v49  ;;  %v7131_v17 = vld [vmem:[%s9971_s1 + $0xf00] ss:$20 sps:$4 sm:$0xff]  }
 0x115   :  { %4385 = vmatprep.subr.bf16.mxu0 %v7067_v16  ;;  %v8616_v24 = vpop.f32.mrb[0].mxu1  ;;  %v7136_v16 = vld [vmem:[%s9971_s1 + $0xa0c] ss:$20 sps:$4 sm:$0xff]   ;;  %v7193_v8 = vld [vmem:[%s9971_s1 + $0x1094] ss:$20 sps:$4 sm:$0xff]  }
 0x116   :  { %v8618_v25 = vpop.f32.mrb[1].mxu1 }
 0x117   :  { %v4208_v26 = vpop.f32.mrb[2].mxu1  ;;  %4632 = vmatpush1.bf16.msra.mxu1 %v7068_v20  ;;  %v868_v20 = vcombine.high %v8737_v14, %v8737_v14 }
 0x118   :  { %4386 = vmatpush1.bf16.msra.mxu0 %v7065_v19  ;;  %v4209_v31 = vpop.f32.mrb[3].mxu1  ;;  %4633 = vmatprep.subr.bf16.mxu1 %v7076_v23  ;;  %v7134_v19 = vld [vmem:[%s9971_s1 + $0xa08] ss:$20 sps:$4 sm:$0xff]   ;;  %v7139_v23 = vld [vmem:[%s9971_s1 + $0xf2c] ss:$20 sps:$4 sm:$0xff]  }
 0x119   :  { %4387 = vmatprep.subr.bf16.mxu0 %v7073_v21  ;;  %v8755_v21 = vcombine.high %v8537_v58, %v8537_v58  ;;  %v7142_v26 = vld [vmem:[%s9971_s1 + $0xa34] ss:$20 sps:$4 sm:$0xff]   ;;  %v8770_v31 = vrot.slane %v868_v20, %v7822_v49  ;;  %v7208_v20 = vld [vmem:[%s9971_s1 + $0xbec] ss:$20 sps:$4 sm:$0xff]  }
 0x11b   :  { %4634 = vmatpush1.bf16.msra.mxu1 %v7074_v30  ;;  %v7140_v30 = vld [vmem:[%s9971_s1 + $0xa30] ss:$20 sps:$4 sm:$0xff]  }
 0x11c   :  { %4388 = vmatpush1.bf16.msra.mxu0 %v7071_v27  ;;  %4635 = vmatprep.subr.bf16.mxu1 %v7082_v33  ;;  %v7137_v27 = vld [vmem:[%s9971_s1 + $0xf28] ss:$20 sps:$4 sm:$0xff]  }
 0x11d   :  { %4389 = vmatprep.subr.bf16.mxu0 %v7079_v32  ;;  %v7145_v32 = vld [vmem:[%s9971_s1 + $0xf54] ss:$20 sps:$4 sm:$0xff]   ;;  %v7148_v33 = vld [vmem:[%s9971_s1 + $0xa5c] ss:$20 sps:$4 sm:$0xff]  }
 0x11f   :  { %4636 = vmatpush1.bf16.msra.mxu1 %v7080_v36  ;;  %v7146_v36 = vld [vmem:[%s9971_s1 + $0xa58] ss:$20 sps:$4 sm:$0xff]  }
 0x120   :  { %4390 = vmatpush1.bf16.msra.mxu0 %v7077_v35  ;;  %4637 = vmatprep.subr.bf16.mxu1 %v7088_v38  ;;  %v7143_v35 = vld [vmem:[%s9971_s1 + $0xf50] ss:$20 sps:$4 sm:$0xff]  }
 0x121   :  { %4391 = vmatprep.subr.bf16.mxu0 %v7085_v37  ;;  %v7151_v37 = vld [vmem:[%s9971_s1 + $0xf7c] ss:$20 sps:$4 sm:$0xff]   ;;  %v7154_v38 = vld [vmem:[%s9971_s1 + $0xa84] ss:$20 sps:$4 sm:$0xff]  }
 0x123   :  { %4638 = vmatpush1.bf16.msra.mxu1 %v7086_v40  ;;  %v7152_v40 = vld [vmem:[%s9971_s1 + $0xa80] ss:$20 sps:$4 sm:$0xff]  }
 0x124   :  { %4392 = vmatpush1.bf16.msra.mxu0 %v7083_v39  ;;  %4639 = vmatprep.subr.bf16.mxu1 %v7094_v44  ;;  %v7149_v39 = vld [vmem:[%s9971_s1 + $0xf78] ss:$20 sps:$4 sm:$0xff]  }
 0x125   :  { %4393 = vmatprep.subr.bf16.mxu0 %v7091_v43  ;;  %v7157_v43 = vld [vmem:[%s9971_s1 + $0xfa4] ss:$20 sps:$4 sm:$0xff]   ;;  %v7160_v44 = vld [vmem:[%s9971_s1 + $0xaac] ss:$20 sps:$4 sm:$0xff]  }
 0x127   :  { %4640 = vmatpush1.bf16.msra.mxu1 %v7092_v47  ;;  %v7158_v47 = vld [vmem:[%s9971_s1 + $0xaa8] ss:$20 sps:$4 sm:$0xff]  }
 0x128   :  { %4394 = vmatpush1.bf16.msra.mxu0 %v7089_v45  ;;  %4641 = vmatprep.subr.bf16.mxu1 %v7100_v50  ;;  %v7155_v45 = vld [vmem:[%s9971_s1 + $0xfa0] ss:$20 sps:$4 sm:$0xff]  }
 0x129   :  { %4395 = vmatprep.subr.bf16.mxu0 %v7097_v48  ;;  %v7163_v48 = vld [vmem:[%s9971_s1 + $0xfcc] ss:$20 sps:$4 sm:$0xff]   ;;  %v7166_v50 = vld [vmem:[%s9971_s1 + $0xad4] ss:$20 sps:$4 sm:$0xff]  }
 0x12b   :  { %4642 = vmatpush1.bf16.msra.mxu1 %v7098_v52  ;;  %v7164_v52 = vld [vmem:[%s9971_s1 + $0xad0] ss:$20 sps:$4 sm:$0xff]  }
 0x12c   :  { %4396 = vmatpush1.bf16.msra.mxu0 %v7095_v51  ;;  %4643 = vmatprep.subr.bf16.mxu1 %v7106_v54  ;;  %v7161_v51 = vld [vmem:[%s9971_s1 + $0xfc8] ss:$20 sps:$4 sm:$0xff]  }
 0x12d   :  { %4397 = vmatprep.subr.bf16.mxu0 %v7103_v53  ;;  %v7169_v53 = vld [vmem:[%s9971_s1 + $0xff4] ss:$20 sps:$4 sm:$0xff]   ;;  %v7172_v54 = vld [vmem:[%s9971_s1 + $0xafc] ss:$20 sps:$4 sm:$0xff]  }
 0x12f   :  { %4644 = vmatpush1.bf16.msra.mxu1 %v7104_v56  ;;  %v7170_v56 = vld [vmem:[%s9971_s1 + $0xaf8] ss:$20 sps:$4 sm:$0xff]  }
 0x130   :  { %4398 = vmatpush1.bf16.msra.mxu0 %v7101_v55  ;;  %4645 = vmatprep.subr.bf16.mxu1 %v7112_v59  ;;  %v7167_v55 = vld [vmem:[%s9971_s1 + $0xff0] ss:$20 sps:$4 sm:$0xff]  }
 0x131   :  { %4399 = vmatprep.subr.bf16.mxu0 %v7109_v57  ;;  %v7175_v57 = vld [vmem:[%s9971_s1 + $0x101c] ss:$20 sps:$4 sm:$0xff]   ;;  %v7178_v59 = vld [vmem:[%s9971_s1 + $0xb24] ss:$20 sps:$4 sm:$0xff]  }
 0x133   :  { %4646 = vmatpush1.bf16.msra.mxu1 %v7110_v62  ;;  %v7176_v62 = vld [vmem:[%s9971_s1 + $0xb20] ss:$20 sps:$4 sm:$0xff]  }
 0x134   :  { %4400 = vmatpush1.bf16.msra.mxu0 %v7107_v61  ;;  %4647 = vmatprep.subr.bf16.mxu1 %v7118_v1  ;;  %v7173_v61 = vld [vmem:[%s9971_s1 + $0x1018] ss:$20 sps:$4 sm:$0xff]  }
 0x135   :  { %4401 = vmatprep.subr.bf16.mxu0 %v7115_v63  ;;  %v7181_v63 = vld [vmem:[%s9971_s1 + $0x1044] ss:$20 sps:$4 sm:$0xff]   ;;  %v7184_v1 = vld [vmem:[%s9971_s1 + $0xb4c] ss:$20 sps:$4 sm:$0xff]  }
 0x137   :  { %4648 = vmatpush1.bf16.msra.mxu1 %v7116_v3  ;;  %v7182_v3 = vld [vmem:[%s9971_s1 + $0xb48] ss:$20 sps:$4 sm:$0xff]  }
 0x138   :  { %4402 = vmatpush1.bf16.msra.mxu0 %v7113_v2  ;;  %4649 = vmatprep.subr.bf16.mxu1 %v7124_v5  ;;  %v7179_v2 = vld [vmem:[%s9971_s1 + $0x1040] ss:$20 sps:$4 sm:$0xff]  }
 0x139   :  { %4403 = vmatprep.subr.bf16.mxu0 %v7121_v4  ;;  %v7187_v4 = vld [vmem:[%s9971_s1 + $0x106c] ss:$20 sps:$4 sm:$0xff]   ;;  %v7190_v5 = vld [vmem:[%s9971_s1 + $0xb74] ss:$20 sps:$4 sm:$0xff]  }
 0x13b   :  { %4650 = vmatpush1.bf16.msra.mxu1 %v7122_v7  ;;  %v7188_v7 = vld [vmem:[%s9971_s1 + $0xb70] ss:$20 sps:$4 sm:$0xff]  }
 0x13c   :  { %4404 = vmatpush1.bf16.msra.mxu0 %v7119_v6  ;;  %4651 = vmatprep.subr.bf16.mxu1 %v7130_v11  ;;  %v7185_v6 = vld [vmem:[%s9971_s1 + $0x1068] ss:$20 sps:$4 sm:$0xff]   ;;  %v7191_v11 = vld [vmem:[%s9971_s1 + $0x1090] ss:$20 sps:$4 sm:$0xff]  }
 0x13d   :  { %4405 = vmatprep.subr.bf16.mxu0 %v7127_v9  ;;  %v7196_v9 = vld [vmem:[%s9971_s1 + $0xb9c] ss:$20 sps:$4 sm:$0xff]  }
 0x13f   :  { %4652 = vmatpush1.bf16.msra.mxu1 %v7128_v29  ;;  %v7199_v29 = vld [vmem:[%s9971_s1 + $0x10bc] ss:$20 sps:$4 sm:$0xff]  }
 0x140   :  { %4406 = vmatpush1.bf16.msra.mxu0 %v7125_v13  ;;  %4662 = vmatprep.subr.bf16.mxu1 %v7136_v16  ;;  %v7194_v13 = vld [vmem:[%s9971_s1 + $0xb98] ss:$20 sps:$4 sm:$0xff]  }
 0x141   :  { %4416 = vmatprep.subr.bf16.mxu0 %v7133_v15  ;;  %v7202_v15 = vld [vmem:[%s9971_s1 + $0xbc4] ss:$20 sps:$4 sm:$0xff]  }
 0x142   :  { %4654 = vmatmul.mubr.bf16.vlgmr.msra.gmra.mrb[4].mxu1 %v8334_v41  ;;  %v7197_v16 = vld [vmem:[%s9971_s1 + $0x10b8] ss:$20 sps:$4 sm:$0xff]  }
 0x143   :  { %4408 = vmatmul.mubr.bf16.vlgmr.msra.gmra.mrb[0].mxu0 %v8755_v21  ;;  %4663 = vmatpush1.bf16.msra.mxu1 %v7134_v19  ;;  %v7205_v19 = vld [vmem:[%s9971_s1 + $0x10e4] ss:$20 sps:$4 sm:$0xff]  }
 0x144   :  { %4417 = vmatpush1.bf16.msra.mxu0 %v7131_v17  ;;  %4664 = vmatprep.subr.bf16.mxu1 %v7142_v26  ;;  %v7200_v17 = vld [vmem:[%s9971_s1 + $0xbc0] ss:$20 sps:$4 sm:$0xff]   ;;  %v7206_v26 = vld [vmem:[%s9971_s1 + $0xbe8] ss:$20 sps:$4 sm:$0xff]  }
 0x145   :  { %4418 = vmatprep.subr.bf16.mxu0 %v7139_v23  ;;  %4448 = vmatprep.mubr.bf16.mxu0 %v8770_v31  ;;  %v7203_v23 = vld [vmem:[%s9971_s1 + $0x10e0] ss:$20 sps:$4 sm:$0xff]  }
 0x146   :  { %4694 = vmatprep.mubr.bf16.mxu1 %v8346_v46 }
 0x147   :  { %4665 = vmatpush1.bf16.msra.mxu1 %v7140_v30  ;;  %v7214_v30 = vld [vmem:[%s9971_s1 + $0xc14] ss:$20 sps:$4 sm:$0xff]  }
 0x148   :  { %4419 = vmatpush1.bf16.msra.mxu0 %v7137_v27  ;;  %4666 = vmatprep.subr.bf16.mxu1 %v7148_v33  ;;  %v7211_v27 = vld [vmem:[%s9971_s1 + $0x110c] ss:$20 sps:$4 sm:$0xff]   ;;  %v7212_v33 = vld [vmem:[%s9971_s1 + $0xc10] ss:$20 sps:$4 sm:$0xff]  }
 0x149   :  { %4420 = vmatprep.subr.bf16.mxu0 %v7145_v32  ;;  %v7209_v32 = vld [vmem:[%s9971_s1 + $0x1108] ss:$20 sps:$4 sm:$0xff]  }
 0x14b   :  { %4667 = vmatpush1.bf16.msra.mxu1 %v7146_v36  ;;  %v7220_v36 = vld [vmem:[%s9971_s1 + $0xc3c] ss:$20 sps:$4 sm:$0xff]  }
 0x14c   :  { %4421 = vmatpush1.bf16.msra.mxu0 %v7143_v35  ;;  %4668 = vmatprep.subr.bf16.mxu1 %v7154_v38  ;;  %v7217_v35 = vld [vmem:[%s9971_s1 + $0x1134] ss:$20 sps:$4 sm:$0xff]   ;;  %v7218_v38 = vld [vmem:[%s9971_s1 + $0xc38] ss:$20 sps:$4 sm:$0xff]  }
 0x14d   :  { %4422 = vmatprep.subr.bf16.mxu0 %v7151_v37  ;;  %v7215_v37 = vld [vmem:[%s9971_s1 + $0x1130] ss:$20 sps:$4 sm:$0xff]  }
 0x14f   :  { %4669 = vmatpush1.bf16.msra.mxu1 %v7152_v40  ;;  %v7226_v40 = vld [vmem:[%s9971_s1 + $0xc64] ss:$20 sps:$4 sm:$0xff]  }
 0x150   :  { %4423 = vmatpush1.bf16.msra.mxu0 %v7149_v39  ;;  %4670 = vmatprep.subr.bf16.mxu1 %v7160_v44  ;;  %v7223_v39 = vld [vmem:[%s9971_s1 + $0x115c] ss:$20 sps:$4 sm:$0xff]   ;;  %v7224_v44 = vld [vmem:[%s9971_s1 + $0xc60] ss:$20 sps:$4 sm:$0xff]  }
 0x151   :  { %4424 = vmatprep.subr.bf16.mxu0 %v7157_v43  ;;  %v7221_v43 = vld [vmem:[%s9971_s1 + $0x1158] ss:$20 sps:$4 sm:$0xff]  }
 0x153   :  { %4671 = vmatpush1.bf16.msra.mxu1 %v7158_v47  ;;  %v7233_v47 = vld [vmem:[%s9971_s1 + $0xc8c] ss:$20 sps:$4 sm:$0xff]  }
 0x154   :  { %4425 = vmatpush1.bf16.msra.mxu0 %v7155_v45  ;;  %4672 = vmatprep.subr.bf16.mxu1 %v7166_v50  ;;  %v7230_v45 = vld [vmem:[%s9971_s1 + $0x1184] ss:$20 sps:$4 sm:$0xff]   ;;  %v8955_v50 = vrot.slane %v8737_v14, %v7822_v49  ;;  %v8968_v49 = vcombine.high %v8770_v31, %v8770_v31  ;;  %v7234_v14 = vld [vmem:[%s9971_s1 + $0x11a8] ss:$20 sps:$4 sm:$0xff]  }
 0x155   :  { %4426 = vmatprep.subr.bf16.mxu0 %v7163_v48  ;;  %v7228_v48 = vld [vmem:[%s9971_s1 + $0x1180] ss:$20 sps:$4 sm:$0xff]  }
 0x157   :  { %4673 = vmatpush1.bf16.msra.mxu1 %v7164_v52  ;;  %v7236_v52 = vld [vmem:[%s9971_s1 + $0x11ac] ss:$20 sps:$4 sm:$0xff]  }
 0x158   :  { %4427 = vmatpush1.bf16.msra.mxu0 %v7161_v51  ;;  %4674 = vmatprep.subr.bf16.mxu1 %v7172_v54  ;;  %v7231_v51 = vld [vmem:[%s9971_s1 + $0xc88] ss:$20 sps:$4 sm:$0xff]   ;;  %v7237_v54 = vld [vmem:[%s9971_s1 + $0xcb0] ss:$20 sps:$4 sm:$0xff]  }
 0x159   :  { %4428 = vmatprep.subr.bf16.mxu0 %v7169_v53  ;;  %v7239_v53 = vld [vmem:[%s9971_s1 + $0xcb4] ss:$20 sps:$4 sm:$0xff]  }
 0x15b   :  { %4675 = vmatpush1.bf16.msra.mxu1 %v7170_v56  ;;  %v7245_v56 = vld [vmem:[%s9971_s1 + $0xcdc] ss:$20 sps:$4 sm:$0xff]  }
 0x15c   :  { %4429 = vmatpush1.bf16.msra.mxu0 %v7167_v55  ;;  %4676 = vmatprep.subr.bf16.mxu1 %v7178_v59  ;;  %v7242_v55 = vld [vmem:[%s9971_s1 + $0x11d4] ss:$20 sps:$4 sm:$0xff]   ;;  %v7243_v59 = vld [vmem:[%s9971_s1 + $0xcd8] ss:$20 sps:$4 sm:$0xff]  }
 0x15d   :  { %4430 = vmatprep.subr.bf16.mxu0 %v7175_v57  ;;  %v7240_v57 = vld [vmem:[%s9971_s1 + $0x11d0] ss:$20 sps:$4 sm:$0xff]  }
 0x15f   :  { %4677 = vmatpush1.bf16.msra.mxu1 %v7176_v62  ;;  %v7251_v62 = vld [vmem:[%s9971_s1 + $0xd04] ss:$20 sps:$4 sm:$0xff]  }
 0x160   :  { %4431 = vmatpush1.bf16.msra.mxu0 %v7173_v61  ;;  %4678 = vmatprep.subr.bf16.mxu1 %v7184_v1  ;;  %v7248_v61 = vld [vmem:[%s9971_s1 + $0x11fc] ss:$20 sps:$4 sm:$0xff]   ;;  %v7249_v1 = vld [vmem:[%s9971_s1 + $0xd00] ss:$20 sps:$4 sm:$0xff]  }
 0x161   :  { %4432 = vmatprep.subr.bf16.mxu0 %v7181_v63  ;;  %v7246_v63 = vld [vmem:[%s9971_s1 + $0x11f8] ss:$20 sps:$4 sm:$0xff]  }
 0x163   :  { %4679 = vmatpush1.bf16.msra.mxu1 %v7182_v3  ;;  %v7257_v3 = vld [vmem:[%s9971_s1 + $0xd2c] ss:$20 sps:$4 sm:$0xff]  }
 0x164   :  { %4433 = vmatpush1.bf16.msra.mxu0 %v7179_v2  ;;  %4680 = vmatprep.subr.bf16.mxu1 %v7190_v5  ;;  %v7254_v2 = vld [vmem:[%s9971_s1 + $0x1224] ss:$20 sps:$4 sm:$0xff]   ;;  %v7255_v5 = vld [vmem:[%s9971_s1 + $0xd28] ss:$20 sps:$4 sm:$0xff]  }
 0x165   :  { %4434 = vmatprep.subr.bf16.mxu0 %v7187_v4  ;;  %v7252_v4 = vld [vmem:[%s9971_s1 + $0x1220] ss:$20 sps:$4 sm:$0xff]  }
 0x167   :  { %4681 = vmatpush1.bf16.msra.mxu1 %v7188_v7  ;;  %v7263_v7 = vld [vmem:[%s9971_s1 + $0xd54] ss:$20 sps:$4 sm:$0xff]  }
 0x168   :  { %4435 = vmatpush1.bf16.msra.mxu0 %v7185_v6  ;;  %4682 = vmatprep.subr.bf16.mxu1 %v7196_v9  ;;  %v7260_v6 = vld [vmem:[%s9971_s1 + $0x124c] ss:$20 sps:$4 sm:$0xff]   ;;  %v7261_v9 = vld [vmem:[%s9971_s1 + $0xd50] ss:$20 sps:$4 sm:$0xff]  }
 0x169   :  { %4436 = vmatprep.subr.bf16.mxu0 %v7193_v8  ;;  %v7258_v8 = vld [vmem:[%s9971_s1 + $0x1248] ss:$20 sps:$4 sm:$0xff]  }
 0x16b   :  { %4683 = vmatpush1.bf16.msra.mxu1 %v7194_v13  ;;  %v7269_v13 = vld [vmem:[%s9971_s1 + $0xd7c] ss:$20 sps:$4 sm:$0xff]  }
 0x16c   :  { %4437 = vmatpush1.bf16.msra.mxu0 %v7191_v11  ;;  %4684 = vmatprep.subr.bf16.mxu1 %v7202_v15  ;;  %v7266_v11 = vld [vmem:[%s9971_s1 + $0x1274] ss:$20 sps:$4 sm:$0xff]   ;;  %v7267_v15 = vld [vmem:[%s9971_s1 + $0xd78] ss:$20 sps:$4 sm:$0xff]  }
 0x16d   :  { %4438 = vmatprep.subr.bf16.mxu0 %v7199_v29  ;;  %v7264_v29 = vld [vmem:[%s9971_s1 + $0x1270] ss:$20 sps:$4 sm:$0xff]  }
 0x16f   :  { %4685 = vmatpush1.bf16.msra.mxu1 %v7200_v17  ;;  %v7275_v17 = vld [vmem:[%s9971_s1 + $0xda4] ss:$20 sps:$4 sm:$0xff]  }
 0x170   :  { %4439 = vmatpush1.bf16.msra.mxu0 %v7197_v16  ;;  %4686 = vmatprep.subr.bf16.mxu1 %v7208_v20  ;;  %v7272_v16 = vld [vmem:[%s9971_s1 + $0x129c] ss:$20 sps:$4 sm:$0xff]   ;;  %v7273_v20 = vld [vmem:[%s9971_s1 + $0xda0] ss:$20 sps:$4 sm:$0xff]  }
 0x171   :  { %4440 = vmatprep.subr.bf16.mxu0 %v7205_v19  ;;  %v7270_v19 = vld [vmem:[%s9971_s1 + $0x1298] ss:$20 sps:$4 sm:$0xff]  }
 0x173   :  { %4687 = vmatpush1.bf16.msra.mxu1 %v7206_v26  ;;  %v7281_v26 = vld [vmem:[%s9971_s1 + $0xdcc] ss:$20 sps:$4 sm:$0xff]  }
 0x174   :  { %4441 = vmatpush1.bf16.msra.mxu0 %v7203_v23  ;;  %4688 = vmatprep.subr.bf16.mxu1 %v7214_v30  ;;  %v7278_v23 = vld [vmem:[%s9971_s1 + $0x12c4] ss:$20 sps:$4 sm:$0xff]   ;;  %v7279_v30 = vld [vmem:[%s9971_s1 + $0xdc8] ss:$20 sps:$4 sm:$0xff]  }
 0x175   :  { %4442 = vmatprep.subr.bf16.mxu0 %v7211_v27  ;;  %v7276_v27 = vld [vmem:[%s9971_s1 + $0x12c0] ss:$20 sps:$4 sm:$0xff]  }
 0x177   :  { %4689 = vmatpush1.bf16.msra.mxu1 %v7212_v33  ;;  %v7287_v33 = vld [vmem:[%s9971_s1 + $0xdf4] ss:$20 sps:$4 sm:$0xff]  }
 0x178   :  { %4443 = vmatpush1.bf16.msra.mxu0 %v7209_v32  ;;  %4690 = vmatprep.subr.bf16.mxu1 %v7220_v36  ;;  %v7284_v32 = vld [vmem:[%s9971_s1 + $0x12ec] ss:$20 sps:$4 sm:$0xff]   ;;  %v7285_v36 = vld [vmem:[%s9971_s1 + $0xdf0] ss:$20 sps:$4 sm:$0xff]  }
 0x179   :  { %4444 = vmatprep.subr.bf16.mxu0 %v7217_v35  ;;  %v7282_v35 = vld [vmem:[%s9971_s1 + $0x12e8] ss:$20 sps:$4 sm:$0xff]  }
 0x17b   :  { %4691 = vmatpush1.bf16.msra.mxu1 %v7218_v38  ;;  %v7293_v38 = vld [vmem:[%s9971_s1 + $0xe1c] ss:$20 sps:$4 sm:$0xff]  }
 0x17c   :  { %4445 = vmatpush1.bf16.msra.mxu0 %v7215_v37  ;;  %4692 = vmatprep.subr.bf16.mxu1 %v7226_v40  ;;  %v7290_v37 = vld [vmem:[%s9971_s1 + $0x1314] ss:$20 sps:$4 sm:$0xff]   ;;  %v7291_v40 = vld [vmem:[%s9971_s1 + $0xe18] ss:$20 sps:$4 sm:$0xff]  }
 0x17d   :  { %4446 = vmatprep.subr.bf16.mxu0 %v7223_v39  ;;  %v7288_v39 = vld [vmem:[%s9971_s1 + $0x1310] ss:$20 sps:$4 sm:$0xff]  }
 0x17f   :  { %4693 = vmatpush1.bf16.msra.mxu1 %v7224_v44  ;;  %v7299_v44 = vld [vmem:[%s9971_s1 + $0xe44] ss:$20 sps:$4 sm:$0xff]  }
 0x180   :  { %4447 = vmatpush1.bf16.msra.mxu0 %v7221_v43  ;;  %4703 = vmatprep.subr.bf16.mxu1 %v7233_v47  ;;  %v7296_v43 = vld [vmem:[%s9971_s1 + $0x133c] ss:$20 sps:$4 sm:$0xff]   ;;  %v7297_v47 = vld [vmem:[%s9971_s1 + $0xe40] ss:$20 sps:$4 sm:$0xff]  }
 0x181   :  { %4457 = vmatprep.subr.bf16.mxu0 %v7230_v45  ;;  %v7294_v45 = vld [vmem:[%s9971_s1 + $0x1338] ss:$20 sps:$4 sm:$0xff]  }
 0x182   :  { %4695 = vmatmul.mubr.bf16.vlgmr.msra.gmra.mrb[4].mxu1 %v8537_v58 }
 0x183   :  { %4449 = vmatmul.mubr.bf16.vlgmr.msra.gmra.mrb[0].mxu0 %v8955_v50  ;;  %4704 = vmatpush1.bf16.msra.mxu1 %v7231_v51  ;;  %v7305_v51 = vld [vmem:[%s9971_s1 + $0xe6c] ss:$20 sps:$4 sm:$0xff]  }
 0x184   :  { %4458 = vmatpush1.bf16.msra.mxu0 %v7228_v48  ;;  %4705 = vmatprep.subr.bf16.mxu1 %v7239_v53  ;;  %v7302_v48 = vld [vmem:[%s9971_s1 + $0x1364] ss:$20 sps:$4 sm:$0xff]   ;;  %v7303_v53 = vld [vmem:[%s9971_s1 + $0xe68] ss:$20 sps:$4 sm:$0xff]  }
 0x185   :  { %4459 = vmatprep.subr.bf16.mxu0 %v7236_v52  ;;  %6352 = vmatprep.mubr.msk.bf16.mxu0 %vm4166_vm0, %v8968_v49  ;;  %v7300_v52 = vld [vmem:[%s9971_s1 + $0x1360] ss:$20 sps:$4 sm:$0xff]  }
 0x186   :  { %4735 = vmatprep.mubr.bf16.mxu1 %v8550_v34 }
 0x187   :  { %4706 = vmatpush1.bf16.msra.mxu1 %v7237_v54  ;;  %v7327_v54 = vld [vmem:[%s9971_s1 + $0x150] ss:$20 sps:$4 sm:$0xff]  }
 0x188   :  { %4460 = vmatpush1.bf16.msra.mxu0 %v7234_v14  ;;  %4707 = vmatprep.subr.bf16.mxu1 %v7245_v56  ;;  %v7308_v14 = vld [vmem:[%s9971_s1 + $0xe94] ss:$20 sps:$4 sm:$0xff]   ;;  %v9124_v56 = vcombine.high %v8955_v50, %v8955_v50 }
 0x189   :  { %4461 = vmatprep.subr.bf16.mxu0 %v7242_v55  ;;  %v7306_v55 = vld [vmem:[%s9971_s1 + $0xe90] ss:$20 sps:$4 sm:$0xff]  }
 0x18b   :  { %4708 = vmatpush1.bf16.msra.mxu1 %v7243_v59  ;;  %v7328_v59 = vld [vmem:[%s9971_s1 + $0x10] ss:$20 sps:$4 sm:$0xff]  }
 0x18c   :  { %4462 = vmatpush1.bf16.msra.mxu0 %v7240_v57  ;;  %4709 = vmatprep.subr.bf16.mxu1 %v7251_v62  ;;  %v7311_v57 = vld [vmem:[%s9971_s1 + $0xebc] ss:$20 sps:$4 sm:$0xff]   ;;  %v7309_v62 = vld [vmem:[%s9971_s1 + $0xeb8] ss:$20 sps:$4 sm:$0xff]  }
 0x18d   :  { %4463 = vmatprep.subr.bf16.mxu0 %v7248_v61  ;;  %v7332_v61 = vld [vmem:[%s9971_s1 + $0x178] ss:$20 sps:$4 sm:$0xff]  }
 0x18f   :  { %4710 = vmatpush1.bf16.msra.mxu1 %v7249_v1  ;;  %v7333_v1 = vld [vmem:[%s9971_s1 + $0x38] ss:$20 sps:$4 sm:$0xff]  }
 0x190   :  { %4464 = vmatpush1.bf16.msra.mxu0 %v7246_v63  ;;  %4711 = vmatprep.subr.bf16.mxu1 %v7257_v3  ;;  %v7314_v63 = vld [vmem:[%s9971_s1 + $0xee4] ss:$20 sps:$4 sm:$0xff]   ;;  %v7312_v3 = vld [vmem:[%s9971_s1 + $0xee0] ss:$20 sps:$4 sm:$0xff]  }
 0x191   :  { %4465 = vmatprep.subr.bf16.mxu0 %v7254_v2  ;;  %v7337_v2 = vld [vmem:[%s9971_s1 + $0x1a0] ss:$20 sps:$4 sm:$0xff]  }
 0x193   :  { %4712 = vmatpush1.bf16.msra.mxu1 %v7255_v5  ;;  %v7338_v5 = vld [vmem:[%s9971_s1 + $0x60] ss:$20 sps:$4 sm:$0xff]  }
 0x194   :  { %4466 = vmatpush1.bf16.msra.mxu0 %v7252_v4  ;;  %4713 = vmatprep.subr.bf16.mxu1 %v7263_v7  ;;  %v7317_v4 = vld [vmem:[%s9971_s1 + $0xf0c] ss:$20 sps:$4 sm:$0xff]   ;;  %v7320_v7 = vld [vmem:[%s9971_s1 + $0xf34] ss:$20 sps:$4 sm:$0xff]  }
 0x195   :  { %4467 = vmatprep.subr.bf16.mxu0 %v7260_v6  ;;  %v7315_v6 = vld [vmem:[%s9971_s1 + $0xf08] ss:$20 sps:$4 sm:$0xff]  }
 0x197   :  { %4714 = vmatpush1.bf16.msra.mxu1 %v7261_v9  ;;  %v7347_v9 = vld [vmem:[%s9971_s1 + $0x1f0] ss:$20 sps:$4 sm:$0xff]  }
 0x198   :  { %4468 = vmatpush1.bf16.msra.mxu0 %v7258_v8  ;;  %4715 = vmatprep.subr.bf16.mxu1 %v7269_v13  ;;  %v7343_v8 = vld [vmem:[%s9971_s1 + $0x88] ss:$20 sps:$4 sm:$0xff]  }
 0x199   :  { %4469 = vmatprep.subr.bf16.mxu0 %v7266_v11  ;;  %v7318_v11 = vld [vmem:[%s9971_s1 + $0xf30] ss:$20 sps:$4 sm:$0xff]  }
 0x19a   :  { %v7323_v13 = vld [vmem:[%s9971_s1 + $0xf5c] ss:$20 sps:$4 sm:$0xff]  }
 0x19b   :  { %4716 = vmatpush1.bf16.msra.mxu1 %v7267_v15  ;;  %v7352_v15 = vld [vmem:[%s9971_s1 + $0x218] ss:$20 sps:$4 sm:$0xff]  }
 0x19c   :  { %4470 = vmatpush1.bf16.msra.mxu0 %v7264_v29  ;;  %4717 = vmatprep.subr.bf16.mxu1 %v7275_v17  ;;  %v7348_v29 = vld [vmem:[%s9971_s1 + $0xb0] ss:$20 sps:$4 sm:$0xff]  }
 0x19d   :  { %4471 = vmatprep.subr.bf16.mxu0 %v7272_v16  ;;  %v7321_v16 = vld [vmem:[%s9971_s1 + $0xf58] ss:$20 sps:$4 sm:$0xff]  }
 0x19e   :  { %v7326_v17 = vld [vmem:[%s9971_s1 + $0xf84] ss:$20 sps:$4 sm:$0xff]  }
 0x19f   :  { %4718 = vmatpush1.bf16.msra.mxu1 %v7273_v20  ;;  %v7357_v20 = vld [vmem:[%s9971_s1 + $0x240] ss:$20 sps:$4 sm:$0xff]  }
 0x1a0   :  { %4472 = vmatpush1.bf16.msra.mxu0 %v7270_v19  ;;  %4719 = vmatprep.subr.bf16.mxu1 %v7281_v26  ;;  %v7353_v19 = vld [vmem:[%s9971_s1 + $0xd8] ss:$20 sps:$4 sm:$0xff]  }
 0x1a1   :  { %4473 = vmatprep.subr.bf16.mxu0 %v7278_v23  ;;  %v7324_v23 = vld [vmem:[%s9971_s1 + $0xf80] ss:$20 sps:$4 sm:$0xff]  }
 0x1a2   :  { %v7331_v26 = vld [vmem:[%s9971_s1 + $0xfac] ss:$20 sps:$4 sm:$0xff]  }
 0x1a3   :  { %4720 = vmatpush1.bf16.msra.mxu1 %v7279_v30  ;;  %v7362_v30 = vld [vmem:[%s9971_s1 + $0x268] ss:$20 sps:$4 sm:$0xff]  }
 0x1a4   :  { %4474 = vmatpush1.bf16.msra.mxu0 %v7276_v27  ;;  %4721 = vmatprep.subr.bf16.mxu1 %v7287_v33  ;;  %v7358_v27 = vld [vmem:[%s9971_s1 + $0x100] ss:$20 sps:$4 sm:$0xff]  }
 0x1a5   :  { %4475 = vmatprep.subr.bf16.mxu0 %v7284_v32  ;;  %v7329_v32 = vld [vmem:[%s9971_s1 + $0xfa8] ss:$20 sps:$4 sm:$0xff]  }
 0x1a6   :  { %v7336_v33 = vld [vmem:[%s9971_s1 + $0xfd4] ss:$20 sps:$4 sm:$0xff]  }
 0x1a7   :  { %4722 = vmatpush1.bf16.msra.mxu1 %v7285_v36  ;;  %v7367_v36 = vld [vmem:[%s9971_s1 + $0x650] ss:$20 sps:$4 sm:$0xff]  }
 0x1a8   :  { %4476 = vmatpush1.bf16.msra.mxu0 %v7282_v35  ;;  %4723 = vmatprep.subr.bf16.mxu1 %v7293_v38  ;;  %v7363_v35 = vld [vmem:[%s9971_s1 + $0x128] ss:$20 sps:$4 sm:$0xff]   ;;  %v7368_v38 = vld [vmem:[%s9971_s1 + $0x510] ss:$20 sps:$4 sm:$0xff]  }
 0x1a9   :  { %4477 = vmatprep.subr.bf16.mxu0 %v7290_v37  ;;  %v7334_v37 = vld [vmem:[%s9971_s1 + $0xfd0] ss:$20 sps:$4 sm:$0xff]  }
 0x1ab   :  { %4724 = vmatpush1.bf16.msra.mxu1 %v7291_v40 }
 0x1ac   :  { %4478 = vmatpush1.bf16.msra.mxu0 %v7288_v39  ;;  %4725 = vmatprep.subr.bf16.mxu1 %v7299_v44 }
 0x1ad   :  { %4479 = vmatprep.subr.bf16.mxu0 %v7296_v43 }
 0x1af   :  { %4726 = vmatpush1.bf16.msra.mxu1 %v7297_v47 }
 0x1b0   :  { %4480 = vmatpush1.bf16.msra.mxu0 %v7294_v45  ;;  %4727 = vmatprep.subr.bf16.mxu1 %v7305_v51 }
 0x1b1   :  { %4481 = vmatprep.subr.bf16.mxu0 %v7302_v48 }
 0x1b3   :  { %4728 = vmatpush1.bf16.msra.mxu1 %v7303_v53 }
 0x1b4   :  { %4482 = vmatpush1.bf16.msra.mxu0 %v7300_v52  ;;  %4729 = vmatprep.subr.bf16.mxu1 %v7308_v14 }
 0x1b5   :  { %6424 = vmatprep.subr.bf16.mxu0 %v7327_v54 }
 0x1b7   :  { %4490 = vmatmul.mubr.bf16.vlgmr.msra.gmra.mrb[0].mxu0 %v9124_v56  ;;  %4730 = vmatpush1.bf16.msra.mxu1 %v7306_v55 }
 0x1b8   :  { %6425 = vmatpush3.bf16.msra.mxu0 %v7328_v59  ;;  %4731 = vmatprep.subr.bf16.mxu1 %v7311_v57 }
 0x1b9   :  { %6426 = vmatprep.subr.bf16.mxu0 %v7332_v61  ;;  %4858 = vmatprep.mubr.bf16.mxu0 %v7850_v60  ;;  %v7342_v60 = vld [vmem:[%s9971_s1 + $0x1c8] ss:$20 sps:$4 sm:$0xff]  }
 0x1bb   :  { %4732 = vmatpush1.bf16.msra.mxu1 %v7309_v62 }
 0x1bc   :  { %6427 = vmatpush3.bf16.msra.mxu0 %v7333_v1  ;;  %4733 = vmatprep.subr.bf16.mxu1 %v7314_v63 }
 0x1bd   :  { %6428 = vmatprep.subr.bf16.mxu0 %v7337_v2 }
 0x1bf   :  { %4734 = vmatpush1.bf16.msra.mxu1 %v7312_v3 }
 0x1c0   :  { %6429 = vmatpush3.bf16.msra.mxu0 %v7338_v5  ;;  %4744 = vmatprep.subr.bf16.mxu1 %v7317_v4 }
 0x1c1   :  { %6430 = vmatprep.subr.bf16.mxu0 %v7342_v60 }
 0x1c2   :  { %4736 = vmatmul.mubr.bf16.vlgmr.msra.gmra.mrb[4].mxu1 %v8755_v21 }
 0x1c3   :  { %4745 = vmatpush1.bf16.msra.mxu1 %v7315_v6  ;;  %4776 = vmatprep.mubr.bf16.mxu1 %v8770_v31 }
 0x1c4   :  { %6431 = vmatpush3.bf16.msra.mxu0 %v7343_v8  ;;  %4746 = vmatprep.subr.bf16.mxu1 %v7320_v7 }
 0x1c5   :  { %6432 = vmatprep.subr.bf16.mxu0 %v7347_v9 }
 0x1c7   :  { %4747 = vmatpush1.bf16.msra.mxu1 %v7318_v11 }
 0x1c8   :  { %6433 = vmatpush3.bf16.msra.mxu0 %v7348_v29  ;;  %4748 = vmatprep.subr.bf16.mxu1 %v7323_v13 }
 0x1c9   :  { %6434 = vmatprep.subr.bf16.mxu0 %v7352_v15 }
 0x1cb   :  { %4749 = vmatpush1.bf16.msra.mxu1 %v7321_v16 }
 0x1cc   :  { %6435 = vmatpush3.bf16.msra.mxu0 %v7353_v19  ;;  %4750 = vmatprep.subr.bf16.mxu1 %v7326_v17 }
 0x1cd   :  { %6436 = vmatprep.subr.bf16.mxu0 %v7357_v20 }
 0x1cf   :  { %4751 = vmatpush1.bf16.msra.mxu1 %v7324_v23 }
 0x1d0   :  { %6437 = vmatpush3.bf16.msra.mxu0 %v7358_v27  ;;  %4752 = vmatprep.subr.bf16.mxu1 %v7331_v26 }
 0x1d1   :  { %6438 = vmatprep.subr.bf16.mxu0 %v7362_v30 }
 0x1d3   :  { %4753 = vmatpush1.bf16.msra.mxu1 %v7329_v32 }
 0x1d4   :  { %6439 = vmatpush3.bf16.msra.mxu0 %v7363_v35 }
 0x1d5   :  { %10 = vsyncpa [#allocation3], 0  ;;  %4754 = vmatprep.subr.bf16.mxu1 %v7336_v33  ;;  %v7341_v39 = vld [vmem:[%s9971_s1 + $0xffc] ss:$20 sps:$4 sm:$0xff]   ;;  %6468 = vmatprep.subr.bf16.mxu0 %v7367_v36  ;;  %v7372_v40 = vld [vmem:[%s9971_s1 + $0x678] ss:$20 sps:$4 sm:$0xff]  }
 0x1d6   :  { %v7339_v43 = vld [vmem:[%s9971_s1 + $0xff8] ss:$20 sps:$4 sm:$0xff]   ;;  %v7344_v47 = vld [vmem:[%s9971_s1 + $0x1020] ss:$20 sps:$4 sm:$0xff]   ;;  %v7349_v52 = vld [vmem:[%s9971_s1 + $0x1048] ss:$20 sps:$4 sm:$0xff]  }
 0x1d7   :  { %4859 = vmatmul.mubr.bf16.vlgmr.msra.gmra.mrb[4].mxu0 %v7898_v12  ;;  %4755 = vmatpush1.bf16.msra.mxu1 %v7334_v37  ;;  %v7373_v44 = vld [vmem:[%s9971_s1 + $0x538] ss:$20 sps:$4 sm:$0xff]   ;;  %v7377_v12 = vld [vmem:[%s9971_s1 + $0x6a0] ss:$20 sps:$4 sm:$0xff]   ;;  %v7383_v53 = vld [vmem:[%s9971_s1 + $0x588] ss:$20 sps:$4 sm:$0xff]  }
 0x1d8   :  { %6469 = vmatpush3.bf16.msra.mxu0 %v7368_v38  ;;  %4756 = vmatprep.subr.bf16.mxu1 %v7341_v39  ;;  %v7346_v45 = vld [vmem:[%s9971_s1 + $0x1024] ss:$20 sps:$4 sm:$0xff]   ;;  %v7378_v48 = vld [vmem:[%s9971_s1 + $0x560] ss:$20 sps:$4 sm:$0xff]   ;;  %v7361_v59 = vld [vmem:[%s9971_s1 + $0x109c] ss:$20 sps:$4 sm:$0xff]  }
 0x1d9   :  { %6470 = vmatprep.subr.bf16.mxu0 %v7372_v40  ;;  %4938 = vmatprep.mubr.bf16.mxu0 %v7928_v22  ;;  %v7351_v51 = vld [vmem:[%s9971_s1 + $0x104c] ss:$20 sps:$4 sm:$0xff]   ;;  %v7382_v22 = vld [vmem:[%s9971_s1 + $0x6c8] ss:$20 sps:$4 sm:$0xff]   ;;  %v7387_v54 = vld [vmem:[%s9971_s1 + $0x6f0] ss:$20 sps:$4 sm:$0xff]  }
 0x1da   :  { %v7356_v14 = vld [vmem:[%s9971_s1 + $0x1074] ss:$20 sps:$4 sm:$0xff]   ;;  %v7354_v55 = vld [vmem:[%s9971_s1 + $0x1070] ss:$20 sps:$4 sm:$0xff]   ;;  %v7392_v61 = vld [vmem:[%s9971_s1 + $0x718] ss:$20 sps:$4 sm:$0xff]  }
 0x1db   :  { %4757 = vmatpush1.bf16.msra.mxu1 %v7339_v43  ;;  %v7388_v57 = vld [vmem:[%s9971_s1 + $0x5b0] ss:$20 sps:$4 sm:$0xff]   ;;  %v7359_v62 = vld [vmem:[%s9971_s1 + $0x1098] ss:$20 sps:$4 sm:$0xff]   ;;  %v7397_v2 = vld [vmem:[%s9971_s1 + $0x740] ss:$20 sps:$4 sm:$0xff]  }
 0x1dc   :  { %6471 = vmatpush3.bf16.msra.mxu0 %v7373_v44  ;;  %4758 = vmatprep.subr.bf16.mxu1 %v7346_v45  ;;  %v7393_v63 = vld [vmem:[%s9971_s1 + $0x5d8] ss:$20 sps:$4 sm:$0xff]   ;;  %v7364_v3 = vld [vmem:[%s9971_s1 + $0x10c0] ss:$20 sps:$4 sm:$0xff]   ;;  %v7402_v60 = vld [vmem:[%s9971_s1 + $0x768] ss:$20 sps:$4 sm:$0xff]  }
 0x1dd   :  { %6472 = vmatprep.subr.bf16.mxu0 %v7377_v12  ;;  %v7366_v1 = vld [vmem:[%s9971_s1 + $0x10c4] ss:$20 sps:$4 sm:$0xff]   ;;  %v7398_v4 = vld [vmem:[%s9971_s1 + $0x600] ss:$20 sps:$4 sm:$0xff]   ;;  %v7369_v6 = vld [vmem:[%s9971_s1 + $0x10e8] ss:$20 sps:$4 sm:$0xff]  }
 0x1de   :  { %v7371_v5 = vld [vmem:[%s9971_s1 + $0x10ec] ss:$20 sps:$4 sm:$0xff]   ;;  %v7403_v7 = vld [vmem:[%s9971_s1 + $0x628] ss:$20 sps:$4 sm:$0xff]   ;;  %v7407_v9 = vld [vmem:[%s9971_s1 + $0xb50] ss:$20 sps:$4 sm:$0xff]  }
 0x1df   :  { %4759 = vmatpush1.bf16.msra.mxu1 %v7344_v47  ;;  %v7376_v8 = vld [vmem:[%s9971_s1 + $0x1114] ss:$20 sps:$4 sm:$0xff]   ;;  %v7374_v11 = vld [vmem:[%s9971_s1 + $0x1110] ss:$20 sps:$4 sm:$0xff]   ;;  %v7412_v15 = vld [vmem:[%s9971_s1 + $0xb78] ss:$20 sps:$4 sm:$0xff]  }
 0x1e0   :  { %6473 = vmatpush3.bf16.msra.mxu0 %v7378_v48  ;;  %4760 = vmatprep.subr.bf16.mxu1 %v7351_v51  ;;  %v7408_v13 = vld [vmem:[%s9971_s1 + $0xa10] ss:$20 sps:$4 sm:$0xff]   ;;  %v7379_v16 = vld [vmem:[%s9971_s1 + $0x1138] ss:$20 sps:$4 sm:$0xff]   ;;  %v7384_v20 = vld [vmem:[%s9971_s1 + $0x1160] ss:$20 sps:$4 sm:$0xff]  }
 0x1e1   :  { %6474 = vmatprep.subr.bf16.mxu0 %v7382_v22  ;;  %v7381_v29 = vld [vmem:[%s9971_s1 + $0x113c] ss:$20 sps:$4 sm:$0xff]   ;;  %v7413_v17 = vld [vmem:[%s9971_s1 + $0xa38] ss:$20 sps:$4 sm:$0xff]   ;;  %v7418_v23 = vld [vmem:[%s9971_s1 + $0xa60] ss:$20 sps:$4 sm:$0xff]  }
 0x1e2   :  { %v7386_v19 = vld [vmem:[%s9971_s1 + $0x1164] ss:$20 sps:$4 sm:$0xff]   ;;  %v7391_v26 = vld [vmem:[%s9971_s1 + $0x118c] ss:$20 sps:$4 sm:$0xff]   ;;  %v7389_v27 = vld [vmem:[%s9971_s1 + $0x1188] ss:$20 sps:$4 sm:$0xff]  }
 0x1e3   :  { %4761 = vmatpush1.bf16.msra.mxu1 %v7349_v52  ;;  %v7423_v30 = vld [vmem:[%s9971_s1 + $0xa88] ss:$20 sps:$4 sm:$0xff]   ;;  %v7427_v33 = vld [vmem:[%s9971_s1 + $0xbf0] ss:$20 sps:$4 sm:$0xff]   ;;  %v7432_v38 = vld [vmem:[%s9971_s1 + $0xc18] ss:$20 sps:$4 sm:$0xff]  }
 0x1e4   :  { %6475 = vmatpush3.bf16.msra.mxu0 %v7383_v53  ;;  %4762 = vmatprep.subr.bf16.mxu1 %v7356_v14  ;;  %v7396_v32 = vld [vmem:[%s9971_s1 + $0x11b4] ss:$20 sps:$4 sm:$0xff]   ;;  %v7394_v35 = vld [vmem:[%s9971_s1 + $0x11b0] ss:$20 sps:$4 sm:$0xff]   ;;  %v7399_v39 = vld [vmem:[%s9971_s1 + $0x11d8] ss:$20 sps:$4 sm:$0xff]  }
 0x1e5   :  { %6476 = vmatprep.subr.bf16.mxu0 %v7387_v54  ;;  %v7428_v36 = vld [vmem:[%s9971_s1 + $0xab0] ss:$20 sps:$4 sm:$0xff]   ;;  %v7433_v40 = vld [vmem:[%s9971_s1 + $0xad8] ss:$20 sps:$4 sm:$0xff]   ;;  %v7437_v44 = vld [vmem:[%s9971_s1 + $0xc40] ss:$20 sps:$4 sm:$0xff]  }
 0x1e6   :  { %v7401_v37 = vld [vmem:[%s9971_s1 + $0x11dc] ss:$20 sps:$4 sm:$0xff]   ;;  %v7406_v43 = vld [vmem:[%s9971_s1 + $0x1204] ss:$20 sps:$4 sm:$0xff]   ;;  %v7404_v45 = vld [vmem:[%s9971_s1 + $0x1200] ss:$20 sps:$4 sm:$0xff]  }
 0x1e7   :  { %4763 = vmatpush1.bf16.msra.mxu1 %v7354_v55  ;;  %v7438_v12 = vld [vmem:[%s9971_s1 + $0xb00] ss:$20 sps:$4 sm:$0xff]   ;;  %v7442_v48 = vld [vmem:[%s9971_s1 + $0xc68] ss:$20 sps:$4 sm:$0xff]   ;;  %v7447_v53 = vld [vmem:[%s9971_s1 + $0x1050] ss:$20 sps:$4 sm:$0xff]  }
 0x1e8   :  { %6477 = vmatpush3.bf16.msra.mxu0 %v7388_v57  ;;  %4764 = vmatprep.subr.bf16.mxu1 %v7361_v59  ;;  %v7411_v47 = vld [vmem:[%s9971_s1 + $0x122c] ss:$20 sps:$4 sm:$0xff]   ;;  %v7409_v51 = vld [vmem:[%s9971_s1 + $0x1228] ss:$20 sps:$4 sm:$0xff]   ;;  %v7414_v14 = vld [vmem:[%s9971_s1 + $0x1250] ss:$20 sps:$4 sm:$0xff]  }
 0x1e9   :  { %6478 = vmatprep.subr.bf16.mxu0 %v7392_v61  ;;  %v7443_v22 = vld [vmem:[%s9971_s1 + $0xb28] ss:$20 sps:$4 sm:$0xff]   ;;  %v7448_v54 = vld [vmem:[%s9971_s1 + $0xf10] ss:$20 sps:$4 sm:$0xff]   ;;  %v7452_v57 = vld [vmem:[%s9971_s1 + $0x1078] ss:$20 sps:$4 sm:$0xff]  }
 0x1ea   :  { %v7416_v52 = vld [vmem:[%s9971_s1 + $0x1254] ss:$20 sps:$4 sm:$0xff]   ;;  %v7421_v55 = vld [vmem:[%s9971_s1 + $0x127c] ss:$20 sps:$4 sm:$0xff]   ;;  %v7419_v59 = vld [vmem:[%s9971_s1 + $0x1278] ss:$20 sps:$4 sm:$0xff]  }
 0x1eb   :  { %4765 = vmatpush1.bf16.msra.mxu1 %v7359_v62  ;;  %v7453_v61 = vld [vmem:[%s9971_s1 + $0xf38] ss:$20 sps:$4 sm:$0xff]   ;;  %vm5571_vm1 = vcmask 261120   ;;  %vm5709_vm2 = vcmask 1041408   ;;  %vm5710_vm3 = vcmask 60418  }
 0x1ec   :  { %6479 = vmatpush3.bf16.msra.mxu0 %v7393_v63  ;;  %4766 = vmatprep.subr.bf16.mxu1 %v7366_v1  ;;  %v7426_v62 = vld [vmem:[%s9971_s1 + $0x12a4] ss:$20 sps:$4 sm:$0xff]   ;;  %v7424_v63 = vld [vmem:[%s9971_s1 + $0x12a0] ss:$20 sps:$4 sm:$0xff]   ;;  %vm5711_vm4 = vmor %vm5710_vm3, %vm5709_vm2 }
 0x1ed   :  { %6480 = vmatprep.subr.bf16.mxu0 %v7397_v2  ;;  %v7457_v1 = vld [vmem:[%s9971_s1 + $0xf60] ss:$20 sps:$4 sm:$0xff]  }
 0x1ee   :  { %v7431_v2 = vld [vmem:[%s9971_s1 + $0x12cc] ss:$20 sps:$4 sm:$0xff]  }
 0x1ef   :  { %4767 = vmatpush1.bf16.msra.mxu1 %v7364_v3  ;;  %v7429_v3 = vld [vmem:[%s9971_s1 + $0x12c8] ss:$20 sps:$4 sm:$0xff]  }
 0x1f0   :  { %6481 = vmatpush3.bf16.msra.mxu0 %v7398_v4  ;;  %4768 = vmatprep.subr.bf16.mxu1 %v7371_v5  ;;  %v7461_v4 = vld [vmem:[%s9971_s1 + $0xf88] ss:$20 sps:$4 sm:$0xff]  }
 0x1f1   :  { %6482 = vmatprep.subr.bf16.mxu0 %v7402_v60  ;;  %v7436_v5 = vld [vmem:[%s9971_s1 + $0x12f4] ss:$20 sps:$4 sm:$0xff]   ;;  %v7464_v60 = vld [vmem:[%s9971_s1 + $0x10f0] ss:$20 sps:$4 sm:$0xff]  }
 0x1f3   :  { %4769 = vmatpush1.bf16.msra.mxu1 %v7369_v6  ;;  %v7434_v6 = vld [vmem:[%s9971_s1 + $0x12f0] ss:$20 sps:$4 sm:$0xff]  }
 0x1f4   :  { %6483 = vmatpush3.bf16.msra.mxu0 %v7403_v7  ;;  %4770 = vmatprep.subr.bf16.mxu1 %v7376_v8  ;;  %v7465_v7 = vld [vmem:[%s9971_s1 + $0xfb0] ss:$20 sps:$4 sm:$0xff]  }
 0x1f5   :  { %6512 = vmatprep.subr.bf16.mxu0 %v7407_v9  ;;  %v7441_v8 = vld [vmem:[%s9971_s1 + $0x131c] ss:$20 sps:$4 sm:$0xff]   ;;  %v7468_v9 = vld [vmem:[%s9971_s1 + $0x1118] ss:$20 sps:$4 sm:$0xff]  }
 0x1f7   :  { %4939 = vmatmul.mubr.bf16.vlgmr.msra.gmra.mrb[8].mxu0 %v8119_v28  ;;  %4771 = vmatpush1.bf16.msra.mxu1 %v7374_v11  ;;  %v7417_v28 = vld [vmem:[%s9971_s1 + $0xba0] ss:$20 sps:$4 sm:$0xff]   ;;  %v7439_v11 = vld [vmem:[%s9971_s1 + $0x1318] ss:$20 sps:$4 sm:$0xff]  }
 0x1f8   :  { %6513 = vmatpush3.bf16.msra.mxu0 %v7408_v13  ;;  %4772 = vmatprep.subr.bf16.mxu1 %v7381_v29  ;;  %v7469_v13 = vld [vmem:[%s9971_s1 + $0xfd8] ss:$20 sps:$4 sm:$0xff]  }
 0x1f9   :  { %6514 = vmatprep.subr.bf16.mxu0 %v7412_v15  ;;  %5018 = vmatprep.mubr.bf16.mxu0 %v8346_v46  ;;  %v7422_v46 = vld [vmem:[%s9971_s1 + $0xbc8] ss:$20 sps:$4 sm:$0xff]   ;;  %v7446_v29 = vld [vmem:[%s9971_s1 + $0x1344] ss:$20 sps:$4 sm:$0xff]   ;;  %v7472_v15 = vld [vmem:[%s9971_s1 + $0x1140] ss:$20 sps:$4 sm:$0xff]  }
 0x1fb   :  { %4773 = vmatpush1.bf16.msra.mxu1 %v7379_v16  ;;  %v7444_v16 = vld [vmem:[%s9971_s1 + $0x1340] ss:$20 sps:$4 sm:$0xff]  }
 0x1fc   :  { %6515 = vmatpush3.bf16.msra.mxu0 %v7413_v17  ;;  %4774 = vmatprep.subr.bf16.mxu1 %v7386_v19  ;;  %v7473_v17 = vld [vmem:[%s9971_s1 + $0x1000] ss:$20 sps:$4 sm:$0xff]  }
 0x1fd   :  { %6516 = vmatprep.subr.bf16.mxu0 %v7417_v28  ;;  %v7451_v19 = vld [vmem:[%s9971_s1 + $0x136c] ss:$20 sps:$4 sm:$0xff]   ;;  %v7476_v28 = vld [vmem:[%s9971_s1 + $0x1168] ss:$20 sps:$4 sm:$0xff]  }
 0x1ff   :  { %4775 = vmatpush1.bf16.msra.mxu1 %v7384_v20  ;;  %v7449_v20 = vld [vmem:[%s9971_s1 + $0x1368] ss:$20 sps:$4 sm:$0xff]  }
 0x200   :  { %6517 = vmatpush3.bf16.msra.mxu0 %v7418_v23  ;;  %4785 = vmatprep.subr.bf16.mxu1 %v7391_v26  ;;  %v7477_v23 = vld [vmem:[%s9971_s1 + $0x1028] ss:$20 sps:$4 sm:$0xff]   ;;  %v7454_v26 = vld [vmem:[%s9971_s1 + $0x3d0] ss:$20 sps:$4 sm:$0xff]  }
 0x201   :  { %6518 = vmatprep.subr.bf16.mxu0 %v7422_v46  ;;  %v7482_v46 = vld [vmem:[%s9973_s3 + $0x4] ss:$8 sps:$4 sm:$0xff]  }
 0x202   :  { %4777 = vmatmul.mubr.bf16.vlgmr.msra.gmra.mrb[4].mxu1 %v8955_v50 }
 0x203   :  { %4786 = vmatpush1.bf16.msra.mxu1 %v7389_v27  ;;  %6353 = vmatprep.mubr.msk.bf16.mxu1 %vm4166_vm0, %v8968_v49  ;;  %v7455_v27 = vld [vmem:[%s9971_s1 + $0x290] ss:$20 sps:$4 sm:$0xff]  }
 0x204   :  { %6519 = vmatpush3.bf16.msra.mxu0 %v7423_v30  ;;  %4787 = vmatprep.subr.bf16.mxu1 %v7396_v32  ;;  %v7480_v30 = vld [vmem:[%s9973_s3] ss:$8 sps:$4 sm:$0xff]   ;;  %v7458_v32 = vld [vmem:[%s9971_s1 + $0x3f8] ss:$20 sps:$4 sm:$0xff]  }
 0x205   :  { %6520 = vmatprep.subr.bf16.mxu0 %v7427_v33  ;;  %v7487_v33 = vld [vmem:[%s9973_s3 + $0x14] ss:$8 sps:$4 sm:$0xff]  }
 0x207   :  { %4788 = vmatpush1.bf16.msra.mxu1 %v7394_v35  ;;  %v7459_v35 = vld [vmem:[%s9971_s1 + $0x2b8] ss:$20 sps:$4 sm:$0xff]  }
 0x208   :  { %6521 = vmatpush3.bf16.msra.mxu0 %v7428_v36  ;;  %4789 = vmatprep.subr.bf16.mxu1 %v7401_v37  ;;  %v7485_v36 = vld [vmem:[%s9973_s3 + $0x10] ss:$8 sps:$4 sm:$0xff]   ;;  %v7462_v37 = vld [vmem:[%s9971_s1 + $0x420] ss:$20 sps:$4 sm:$0xff]  }
 0x209   :  { %6522 = vmatprep.subr.bf16.mxu0 %v7432_v38  ;;  %v7463_v38 = vld [vmem:[%s9971_s1 + $0x2e0] ss:$20 sps:$4 sm:$0xff]  }
 0x20b   :  { %4790 = vmatpush1.bf16.msra.mxu1 %v7399_v39  ;;  %v7490_v39 = vld [vmem:[%s9973_s3 + $0x20] ss:$8 sps:$4 sm:$0xff]  }
 0x20c   :  { %6523 = vmatpush3.bf16.msra.mxu0 %v7433_v40  ;;  %4791 = vmatprep.subr.bf16.mxu1 %v7406_v43  ;;  %v7466_v40 = vld [vmem:[%s9971_s1 + $0x448] ss:$20 sps:$4 sm:$0xff]  }
 0x20d   :  { %6524 = vmatprep.subr.bf16.mxu0 %v7437_v44  ;;  %v7467_v43 = vld [vmem:[%s9971_s1 + $0x308] ss:$20 sps:$4 sm:$0xff]   ;;  %v7495_v44 = vld [vmem:[%s9973_s3 + $0x30] ss:$8 sps:$4 sm:$0xff]  }
 0x20f   :  { %4792 = vmatpush1.bf16.msra.mxu1 %v7404_v45  ;;  %v7470_v45 = vld [vmem:[%s9971_s1 + $0x470] ss:$20 sps:$4 sm:$0xff]  }
 0x210   :  { %6525 = vmatpush3.bf16.msra.mxu0 %v7438_v12  ;;  %4793 = vmatprep.subr.bf16.mxu1 %v7411_v47  ;;  %v7502_v12 = vld [vmem:[%s9973_s3 + $0x44] ss:$8 sps:$4 sm:$0xff]  }
 0x211   :  { %6526 = vmatprep.subr.bf16.mxu0 %v7442_v48  ;;  %v7471_v47 = vld [vmem:[%s9971_s1 + $0x330] ss:$20 sps:$4 sm:$0xff]   ;;  %v7500_v48 = vld [vmem:[%s9973_s3 + $0x40] ss:$8 sps:$4 sm:$0xff]  }
 0x213   :  { %4794 = vmatpush1.bf16.msra.mxu1 %v7409_v51  ;;  %v7474_v51 = vld [vmem:[%s9971_s1 + $0x498] ss:$20 sps:$4 sm:$0xff]  }
 0x214   :  { %6527 = vmatpush3.bf16.msra.mxu0 %v7443_v22  ;;  %4795 = vmatprep.subr.bf16.mxu1 %v7416_v52  ;;  %v7507_v22 = vld [vmem:[%s9973_s3 + $0x54] ss:$8 sps:$4 sm:$0xff]   ;;  %v7475_v52 = vld [vmem:[%s9971_s1 + $0x358] ss:$20 sps:$4 sm:$0xff]  }
 0x215   :  { %6556 = vmatprep.subr.bf16.mxu0 %v7447_v53  ;;  %v7505_v53 = vld [vmem:[%s9973_s3 + $0x50] ss:$8 sps:$4 sm:$0xff]  }
 0x217   :  { %5019 = vmatmul.mubr.bf16.vlgmr.msra.gmra.mrb[12].mxu0 %v8537_v58  ;;  %4796 = vmatpush1.bf16.msra.mxu1 %v7414_v14  ;;  %v7456_v58 = vld [vmem:[%s9971_s1 + $0x10a0] ss:$20 sps:$4 sm:$0xff]  }
 0x218   :  { %6557 = vmatpush3.bf16.msra.mxu0 %v7448_v54  ;;  %4797 = vmatprep.subr.bf16.mxu1 %v7421_v55  ;;  %v7478_v14 = vld [vmem:[%s9971_s1 + $0x4c0] ss:$20 sps:$4 sm:$0xff]   ;;  %v7512_v54 = vld [vmem:[%s9973_s3 + $0x64] ss:$8 sps:$4 sm:$0xff]  }
 0x219   :  { %6558 = vmatprep.subr.bf16.mxu0 %v7452_v57  ;;  %5098 = vmatprep.mubr.bf16.mxu0 %v8770_v31  ;;  %v7460_v31 = vld [vmem:[%s9971_s1 + $0x10c8] ss:$20 sps:$4 sm:$0xff]   ;;  %v7479_v55 = vld [vmem:[%s9971_s1 + $0x380] ss:$20 sps:$4 sm:$0xff]  }
 0x21a   :  { %v7510_v57 = vld [vmem:[%s9973_s3 + $0x60] ss:$8 sps:$4 sm:$0xff]  }
 0x21b   :  { %4798 = vmatpush1.bf16.msra.mxu1 %v7419_v59  ;;  %v7483_v59 = vld [vmem:[%s9971_s1 + $0x4e8] ss:$20 sps:$4 sm:$0xff]  }
 0x21c   :  { %6559 = vmatpush3.bf16.msra.mxu0 %v7453_v61  ;;  %4799 = vmatprep.subr.bf16.mxu1 %v7426_v62  ;;  %v7517_v61 = vld [vmem:[%s9973_s3 + $0x74] ss:$8 sps:$4 sm:$0xff]  }
 0x21d   :  { %6560 = vmatprep.subr.bf16.mxu0 %v7456_v58  ;;  %v7484_v62 = vld [vmem:[%s9971_s1 + $0x3a8] ss:$20 sps:$4 sm:$0xff]   ;;  %v7515_v58 = vld [vmem:[%s9973_s3 + $0x70] ss:$8 sps:$4 sm:$0xff]  }
 0x21f   :  { %4800 = vmatpush1.bf16.msra.mxu1 %v7424_v63  ;;  %v7488_v63 = vld [vmem:[%s9971_s1 + $0x8d0] ss:$20 sps:$4 sm:$0xff]  }
 0x220   :  { %6561 = vmatpush3.bf16.msra.mxu0 %v7457_v1  ;;  %4801 = vmatprep.subr.bf16.mxu1 %v7431_v2  ;;  %v7522_v1 = vld [vmem:[%s9973_s3 + $0x84] ss:$8 sps:$4 sm:$0xff]  }
 0x221   :  { %6562 = vmatprep.subr.bf16.mxu0 %v7460_v31  ;;  %v7489_v2 = vld [vmem:[%s9971_s1 + $0x790] ss:$20 sps:$4 sm:$0xff]   ;;  %v7520_v31 = vld [vmem:[%s9973_s3 + $0x80] ss:$8 sps:$4 sm:$0xff]  }
 0x223   :  { %4802 = vmatpush1.bf16.msra.mxu1 %v7429_v3  ;;  %v7493_v3 = vld [vmem:[%s9971_s1 + $0x8f8] ss:$20 sps:$4 sm:$0xff]  }
 0x224   :  { %6563 = vmatpush3.bf16.msra.mxu0 %v7461_v4  ;;  %4803 = vmatprep.subr.bf16.mxu1 %v7436_v5  ;;  %v7527_v4 = vld [vmem:[%s9973_s3 + $0x94] ss:$8 sps:$4 sm:$0xff]   ;;  %v7494_v5 = vld [vmem:[%s9971_s1 + $0x7b8] ss:$20 sps:$4 sm:$0xff]  }
 0x225   :  { %6564 = vmatprep.subr.bf16.mxu0 %v7464_v60  ;;  %v7525_v60 = vld [vmem:[%s9973_s3 + $0x90] ss:$8 sps:$4 sm:$0xff]  }
 0x227   :  { %4804 = vmatpush1.bf16.msra.mxu1 %v7434_v6  ;;  %v7498_v6 = vld [vmem:[%s9971_s1 + $0x920] ss:$20 sps:$4 sm:$0xff]  }
 0x228   :  { %6565 = vmatpush3.bf16.msra.mxu0 %v7465_v7  ;;  %4805 = vmatprep.subr.bf16.mxu1 %v7441_v8  ;;  %v7499_v7 = vld [vmem:[%s9971_s1 + $0x7e0] ss:$20 sps:$4 sm:$0xff]  }
 0x229   :  { %6566 = vmatprep.subr.bf16.mxu0 %v7468_v9  ;;  %v7530_v8 = vld [vmem:[%s9973_s3 + $0xa0] ss:$8 sps:$4 sm:$0xff]  }
 0x22a   :  { %v7503_v9 = vld [vmem:[%s9971_s1 + $0x948] ss:$20 sps:$4 sm:$0xff]  }
 0x22b   :  { %4806 = vmatpush1.bf16.msra.mxu1 %v7439_v11  ;;  %v7504_v11 = vld [vmem:[%s9971_s1 + $0x808] ss:$20 sps:$4 sm:$0xff]  }
 0x22c   :  { %6567 = vmatpush3.bf16.msra.mxu0 %v7469_v13  ;;  %4807 = vmatprep.subr.bf16.mxu1 %v7446_v29  ;;  %v7535_v13 = vld [vmem:[%s9973_s3 + $0xb0] ss:$8 sps:$4 sm:$0xff]  }
 0x22d   :  { %6568 = vmatprep.subr.bf16.mxu0 %v7472_v15  ;;  %v7508_v29 = vld [vmem:[%s9971_s1 + $0x970] ss:$20 sps:$4 sm:$0xff]  }
 0x22e   :  { %v7542_v15 = vld [vmem:[%s9973_s3 + $0xc4] ss:$8 sps:$4 sm:$0xff]  }
 0x22f   :  { %4808 = vmatpush1.bf16.msra.mxu1 %v7444_v16  ;;  %v7509_v16 = vld [vmem:[%s9971_s1 + $0x830] ss:$20 sps:$4 sm:$0xff]  }
 0x230   :  { %6569 = vmatpush3.bf16.msra.mxu0 %v7473_v17  ;;  %4809 = vmatprep.subr.bf16.mxu1 %v7451_v19  ;;  %v7540_v17 = vld [vmem:[%s9973_s3 + $0xc0] ss:$8 sps:$4 sm:$0xff]   ;;  %v7513_v19 = vld [vmem:[%s9971_s1 + $0x998] ss:$20 sps:$4 sm:$0xff]  }
 0x231   :  { %6570 = vmatprep.subr.bf16.mxu0 %v7476_v28  ;;  %v7547_v28 = vld [vmem:[%s9973_s3 + $0xd4] ss:$8 sps:$4 sm:$0xff]  }
 0x233   :  { %4810 = vmatpush1.bf16.msra.mxu1 %v7449_v20  ;;  %v7514_v20 = vld [vmem:[%s9971_s1 + $0x858] ss:$20 sps:$4 sm:$0xff]  }
 0x234   :  { %6571 = vmatpush3.bf16.msra.mxu0 %v7477_v23  ;;  %6446 = vmatprep.subr.bf16.mxu1 %v7454_v26  ;;  %v7545_v23 = vld [vmem:[%s9973_s3 + $0xd0] ss:$8 sps:$4 sm:$0xff]   ;;  %v7518_v26 = vld [vmem:[%s9971_s1 + $0x9c0] ss:$20 sps:$4 sm:$0xff]  }
 0x235   :  { %5575 = vmatprep.subr.bf16.mxu0 %v7482_v46  ;;  %v7552_v46 = vld [vmem:[%s9973_s3 + $0xe4] ss:$8 sps:$4 sm:$0xff]  }
 0x236   :  { %4818 = vmatmul.mubr.bf16.vlgmr.msra.gmra.mrb[4].mxu1 %v9124_v56 }
 0x237   :  { %5099 = vmatmul.mubr.bf16.vlgmr.msra.gmra.mrb[16].mxu0 %v8955_v50  ;;  %6447 = vmatpush3.bf16.msra.mxu1 %v7455_v27  ;;  %v7492_v50 = vld [vmem:[%s9973_s3 + $0x24] ss:$8 sps:$4 sm:$0xff]   ;;  %v7519_v27 = vld [vmem:[%s9971_s1 + $0x880] ss:$20 sps:$4 sm:$0xff]  }
 0x238   :  { %5576 = vmatpush1.bf16.msra.mxu0 %v7480_v30  ;;  %6448 = vmatprep.subr.bf16.mxu1 %v7458_v32  ;;  %v7550_v30 = vld [vmem:[%s9973_s3 + $0xe0] ss:$8 sps:$4 sm:$0xff]  }
 0x239   :  { %5577 = vmatprep.subr.bf16.mxu0 %v7487_v33  ;;  %4898 = vmatprep.mubr.bf16.mxu1 %v7863_v0  ;;  %v7497_v0 = vld [vmem:[%s9973_s3 + $0x34] ss:$8 sps:$4 sm:$0xff]  }
 0x23a   :  { %v7523_v32 = vld [vmem:[%s9971_s1 + $0x9e8] ss:$20 sps:$4 sm:$0xff]  }
 0x23b   :  { %6449 = vmatpush3.bf16.msra.mxu1 %v7459_v35  ;;  %v7557_v33 = vld [vmem:[%s9973_s3 + $0xf4] ss:$8 sps:$4 sm:$0xff]  }
 0x23c   :  { %5578 = vmatpush1.bf16.msra.mxu0 %v7485_v36  ;;  %6450 = vmatprep.subr.bf16.mxu1 %v7462_v37  ;;  %v7524_v35 = vld [vmem:[%s9971_s1 + $0x8a8] ss:$20 sps:$4 sm:$0xff]   ;;  %v7555_v36 = vld [vmem:[%s9973_s3 + $0xf0] ss:$8 sps:$4 sm:$0xff]  }
 0x23d   :  { %5579 = vmatprep.subr.bf16.mxu0 %v7492_v50  ;;  %v7528_v37 = vld [vmem:[%s9971_s1 + $0xdd0] ss:$20 sps:$4 sm:$0xff]  }
 0x23e   :  { %v7577_v50 = vld [vmem:[%s9973_s3 + $0x104] ss:$8 sps:$4 sm:$0xff]  }
 0x23f   :  { %6451 = vmatpush3.bf16.msra.mxu1 %v7463_v38  ;;  %v7529_v38 = vld [vmem:[%s9971_s1 + $0xc90] ss:$20 sps:$4 sm:$0xff]  }
 0x240   :  { %5580 = vmatpush1.bf16.msra.mxu0 %v7490_v39  ;;  %6452 = vmatprep.subr.bf16.mxu1 %v7466_v40  ;;  %v7533_v39 = vld [vmem:[%s9971_s1 + $0xdf8] ss:$20 sps:$4 sm:$0xff]  }
 0x241   :  { %5581 = vmatprep.subr.bf16.mxu0 %v7497_v0  ;;  %v7534_v40 = vld [vmem:[%s9971_s1 + $0xcb8] ss:$20 sps:$4 sm:$0xff]   ;;  %v7538_v0 = vld [vmem:[%s9971_s1 + $0xe20] ss:$20 sps:$4 sm:$0xff]  }
 0x243   :  { %6453 = vmatpush3.bf16.msra.mxu1 %v7467_v43  ;;  %v7539_v43 = vld [vmem:[%s9971_s1 + $0xce0] ss:$20 sps:$4 sm:$0xff]  }
 0x244   :  { %5582 = vmatpush1.bf16.msra.mxu0 %v7495_v44  ;;  %6454 = vmatprep.subr.bf16.mxu1 %v7470_v45  ;;  %v778_v44 = vsub.s32 0, %v7804_v42  ;;  %v7548_v45 = vld [vmem:[%s9971_s1 + $0xe70] ss:$20 sps:$4 sm:$0xff]  }
 0x245   :  { %5583 = vmatprep.subr.bf16.mxu0 %v7502_v12  ;;  %v9747_v12 = vld [vmem:[%s9972_s2] sm:$0x1f] }
 0x247   :  { %6455 = vmatpush3.bf16.msra.mxu1 %v7471_v47  ;;  %v782_v47 = vsub.s32 1, %v7804_v42 }
 0x248   :  { %5584 = vmatpush1.bf16.msra.mxu0 %v7500_v48  ;;  %6456 = vmatprep.subr.bf16.mxu1 %v7474_v51  ;;  %v7549_v48 = vld [vmem:[%s9971_s1 + $0xd30] ss:$20 sps:$4 sm:$0xff]   ;;  %v779_v51 = vrot.slane %v9747_v12, %v778_v44 }
 0x249   :  { %5585 = vmatprep.subr.bf16.mxu0 %v7507_v22  ;;  %v7553_v22 = vld [vmem:[%s9971_s1 + $0xe98] ss:$20 sps:$4 sm:$0xff]  }
 0x24b   :  { %6457 = vmatpush3.bf16.msra.mxu1 %v7475_v52  ;;  %v783_v52 = vrot.slane %v9747_v12, %v782_v47 }
 0x24c   :  { %5586 = vmatpush1.bf16.msra.mxu0 %v7505_v53  ;;  %6458 = vmatprep.subr.bf16.mxu1 %v7478_v14  ;;  %v7554_v53 = vld [vmem:[%s9971_s1 + $0xd58] ss:$20 sps:$4 sm:$0xff]   ;;  %v4205_v14 = vadd.f32 %v8616_v24, %v779_v51  ;;  %v7560_v24 = vld [vmem:[%s9971_s1 + $0xee8] ss:$20 sps:$4 sm:$0xff]  }
 0x24d   :  { %5587 = vmatprep.subr.bf16.mxu0 %v7512_v54  ;;  %v7558_v54 = vld [vmem:[%s9971_s1 + $0xec0] ss:$20 sps:$4 sm:$0xff]  }
 0x24e   :  { %v7611_v51 = vld [vmem:[%s9973_s3 + $0x1c0] ss:$8 sps:$4 sm:$0xff]  }
 0x24f   :  { %6459 = vmatpush3.bf16.msra.mxu1 %v7479_v55  ;;  %v4207_v55 = vadd.f32 %v8618_v25, %v783_v52  ;;  %v7575_v25 = vld [vmem:[%s9973_s3 + $0x100] ss:$8 sps:$4 sm:$0xff]  }
 0x250   :  { %5588 = vmatpush1.bf16.msra.mxu0 %v7510_v57  ;;  %6460 = vmatprep.subr.bf16.mxu1 %v7483_v59  ;;  %v7573_v52 = vld [vmem:[%s9971_s1 + $0x1348] ss:$20 sps:$4 sm:$0xff]  }
 0x251   :  { %5589 = vmatprep.subr.bf16.mxu0 %v7517_v61 }
 0x253   :  { %6461 = vmatpush3.bf16.msra.mxu1 %v7484_v62 }
 0x254   :  { %5590 = vmatpush1.bf16.msra.mxu0 %v7515_v58  ;;  %6490 = vmatprep.subr.bf16.mxu1 %v7488_v63  ;;  %v7559_v63 = vld [vmem:[%s9971_s1 + $0xd80] ss:$20 sps:$4 sm:$0xff]  }
 0x255   :  { %5591 = vmatprep.subr.bf16.mxu0 %v7522_v1 }
 0x256   :  { %4899 = vmatmul.mubr.bf16.vlgmr.msra.gmra.mrb[8].mxu1 %v7916_v18  ;;  %v7532_v18 = vld [vmem:[%s9973_s3 + $0xa4] ss:$8 sps:$4 sm:$0xff]  }
 0x257   :  { %6491 = vmatpush3.bf16.msra.mxu1 %v7489_v2  ;;  %4978 = vmatprep.mubr.bf16.mxu1 %v8132_v10  ;;  %v7537_v10 = vld [vmem:[%s9973_s3 + $0xb4] ss:$8 sps:$4 sm:$0xff]  }
 0x258   :  { %5592 = vmatpush1.bf16.msra.mxu0 %v7520_v31  ;;  %6492 = vmatprep.subr.bf16.mxu1 %v7493_v3  ;;  %v7580_v3 = vld [vmem:[%s9973_s3 + $0x114] ss:$8 sps:$4 sm:$0xff]  }
 0x259   :  { %5593 = vmatprep.subr.bf16.mxu0 %v7527_v4  ;;  %v7561_v4 = vld [vmem:[%s9971_s1 + $0xda8] ss:$20 sps:$4 sm:$0xff]  }
 0x25b   :  { %6493 = vmatpush3.bf16.msra.mxu1 %v7494_v5  ;;  %v7578_v5 = vld [vmem:[%s9973_s3 + $0x110] ss:$8 sps:$4 sm:$0xff]  }
 0x25c   :  { %5594 = vmatpush1.bf16.msra.mxu0 %v7525_v60  ;;  %6494 = vmatprep.subr.bf16.mxu1 %v7498_v6  ;;  %v7583_v60 = vld [vmem:[%s9973_s3 + $0x124] ss:$8 sps:$4 sm:$0xff]  }
 0x25d   :  { %5595 = vmatprep.subr.bf16.mxu0 %v7532_v18  ;;  %v7562_v6 = vld [vmem:[%s9971_s1 + $0x1190] ss:$20 sps:$4 sm:$0xff]   ;;  %v7654_v18 = vmov 0  }
 0x25f   :  { %6495 = vmatpush3.bf16.msra.mxu1 %v7499_v7  ;;  %v7581_v7 = vld [vmem:[%s9973_s3 + $0x120] ss:$8 sps:$4 sm:$0xff]  }
 0x260   :  { %5596 = vmatpush1.bf16.msra.mxu0 %v7530_v8  ;;  %6496 = vmatprep.subr.bf16.mxu1 %v7503_v9  ;;  %v7586_v8 = vld [vmem:[%s9973_s3 + $0x134] ss:$8 sps:$4 sm:$0xff]   ;;  %v7563_v9 = vld [vmem:[%s9971_s1 + $0x11b8] ss:$20 sps:$4 sm:$0xff]  }
 0x261   :  { %5597 = vmatprep.subr.bf16.mxu0 %v7537_v10  ;;  %v7589_v10 = vld [vmem:[%s9973_s3 + $0x144] ss:$8 sps:$4 sm:$0xff]  }
 0x263   :  { %6497 = vmatpush3.bf16.msra.mxu1 %v7504_v11  ;;  %v7564_v11 = vld [vmem:[%s9971_s1 + $0x11e0] ss:$20 sps:$4 sm:$0xff]  }
 0x264   :  { %5598 = vmatpush1.bf16.msra.mxu0 %v7535_v13  ;;  %6498 = vmatprep.subr.bf16.mxu1 %v7508_v29  ;;  %v7592_v13 = vld [vmem:[%s9973_s3 + $0x154] ss:$8 sps:$4 sm:$0xff]  }
 0x265   :  { %5599 = vmatprep.subr.bf16.mxu0 %v7542_v15  ;;  %v7565_v29 = vld [vmem:[%s9971_s1 + $0x1208] ss:$20 sps:$4 sm:$0xff]   ;;  %v7590_v15 = vld [vmem:[%s9973_s3 + $0x150] ss:$8 sps:$4 sm:$0xff]  }
 0x267   :  { %6499 = vmatpush3.bf16.msra.mxu1 %v7509_v16  ;;  %v7595_v16 = vld [vmem:[%s9973_s3 + $0x164] ss:$8 sps:$4 sm:$0xff]  }
 0x268   :  { %5600 = vmatpush1.bf16.msra.mxu0 %v7540_v17  ;;  %6500 = vmatprep.subr.bf16.mxu1 %v7513_v19  ;;  %v7566_v17 = vld [vmem:[%s9971_s1 + $0x1230] ss:$20 sps:$4 sm:$0xff]   ;;  %v7593_v19 = vld [vmem:[%s9973_s3 + $0x160] ss:$8 sps:$4 sm:$0xff]  }
 0x269   :  { %5601 = vmatprep.subr.bf16.mxu0 %v7547_v28  ;;  %v7598_v28 = vld [vmem:[%s9973_s3 + $0x174] ss:$8 sps:$4 sm:$0xff]  }
 0x26b   :  { %6501 = vmatpush3.bf16.msra.mxu1 %v7514_v20  ;;  %v7567_v20 = vld [vmem:[%s9971_s1 + $0x1258] ss:$20 sps:$4 sm:$0xff]  }
 0x26c   :  { %5602 = vmatpush1.bf16.msra.mxu0 %v7545_v23  ;;  %6502 = vmatprep.subr.bf16.mxu1 %v7518_v26  ;;  %v7596_v23 = vld [vmem:[%s9973_s3 + $0x170] ss:$8 sps:$4 sm:$0xff]  }
 0x26d   :  { %5603 = vmatprep.subr.bf16.mxu0 %v7552_v46  ;;  %v7601_v46 = vld [vmem:[%s9973_s3 + $0x184] ss:$8 sps:$4 sm:$0xff]  }
 0x26f   :  { %6503 = vmatpush3.bf16.msra.mxu1 %v7519_v27 }
 0x270   :  { %5604 = vmatpush1.bf16.msra.mxu0 %v7550_v30  ;;  %6504 = vmatprep.subr.bf16.mxu1 %v7523_v32  ;;  %v7568_v30 = vld [vmem:[%s9971_s1 + $0x1280] ss:$20 sps:$4 sm:$0xff]  }
 0x271   :  { %5605 = vmatprep.subr.bf16.mxu0 %v7557_v33 }
 0x273   :  { %6505 = vmatpush3.bf16.msra.mxu1 %v7524_v35 }
 0x274   :  { %5606 = vmatpush1.bf16.msra.mxu0 %v7555_v36  ;;  %6534 = vmatprep.subr.bf16.mxu1 %v7528_v37  ;;  %v7599_v36 = vld [vmem:[%s9973_s3 + $0x180] ss:$8 sps:$4 sm:$0xff]   ;;  %v7604_v37 = vld [vmem:[%s9973_s3 + $0x194] ss:$8 sps:$4 sm:$0xff]  }
 0x275   :  { %5616 = vmatprep.subr.bf16.mxu0 %v7577_v50  ;;  %v7569_v50 = vld [vmem:[%s9971_s1 + $0x12a8] ss:$20 sps:$4 sm:$0xff]  }
 0x276   :  { %4979 = vmatmul.mubr.bf16.vlgmr.msra.gmra.mrb[12].mxu1 %v8334_v41  ;;  %v7543_v41 = vld [vmem:[%s9971_s1 + $0xe48] ss:$20 sps:$4 sm:$0xff]  }
 0x277   :  { %6535 = vmatpush3.bf16.msra.mxu1 %v7529_v38  ;;  %5058 = vmatprep.mubr.bf16.mxu1 %v8550_v34  ;;  %v7544_v34 = vld [vmem:[%s9971_s1 + $0xd08] ss:$20 sps:$4 sm:$0xff]   ;;  %v7602_v38 = vld [vmem:[%s9973_s3 + $0x190] ss:$8 sps:$4 sm:$0xff]  }
 0x278   :  { %6536 = vmatprep.subr.bf16.mxu1 %v7533_v39  ;;  %v7607_v39 = vld [vmem:[%s9973_s3 + $0x1a4] ss:$8 sps:$4 sm:$0xff]  }
 0x27b   :  { %6537 = vmatpush3.bf16.msra.mxu1 %v7534_v40  ;;  %v7570_v40 = vld [vmem:[%s9971_s1 + $0x12d0] ss:$20 sps:$4 sm:$0xff]  }
 0x27c   :  { %6538 = vmatprep.subr.bf16.mxu1 %v7538_v0  ;;  %v7605_v0 = vld [vmem:[%s9973_s3 + $0x1a0] ss:$8 sps:$4 sm:$0xff]  }
 0x27f   :  { %6539 = vmatpush3.bf16.msra.mxu1 %v7539_v43  ;;  %v7610_v43 = vld [vmem:[%s9973_s3 + $0x1b4] ss:$8 sps:$4 sm:$0xff]  }
 0x280   :  { %6540 = vmatprep.subr.bf16.mxu1 %v7543_v41  ;;  %v7571_v41 = vld [vmem:[%s9971_s1 + $0x12f8] ss:$20 sps:$4 sm:$0xff]  }
 0x283   :  { %6541 = vmatpush3.bf16.msra.mxu1 %v7544_v34  ;;  %v7608_v34 = vld [vmem:[%s9973_s3 + $0x1b0] ss:$8 sps:$4 sm:$0xff]  }
 0x284   :  { %6542 = vmatprep.subr.bf16.mxu1 %v7548_v45  ;;  %v7613_v45 = vld [vmem:[%s9973_s3 + $0x1c4] ss:$8 sps:$4 sm:$0xff]  }
 0x287   :  { %6543 = vmatpush3.bf16.msra.mxu1 %v7549_v48  ;;  %v7572_v48 = vld [vmem:[%s9971_s1 + $0x1320] ss:$20 sps:$4 sm:$0xff]  }
 0x288   :  { %6544 = vmatprep.subr.bf16.mxu1 %v7553_v22  ;;  %v7616_v22 = vld [vmem:[%s9973_s3 + $0x1d4] ss:$8 sps:$4 sm:$0xff]  }
 0x28a   :  { %v4491_v57 = vpop.f32.mrb[0].mxu0 }
 0x28b   :  { %v6579_v59 = vadd.f32 %v4491_v57, %v4205_v14  ;;  %v4493_v61 = vpop.f32.mrb[1].mxu0  ;;  %6545 = vmatpush3.bf16.msra.mxu1 %v7554_v53  ;;  %v7614_v53 = vld [vmem:[%s9973_s3 + $0x1d0] ss:$8 sps:$4 sm:$0xff]   ;;  %v7619_v14 = vld [vmem:[%s9973_s3 + $0x1e4] ss:$8 sps:$4 sm:$0xff]  }
 0x28c   :  { %v6581_v62 = vadd.f32 %v4493_v61, %v4207_v55  ;;  %v4495_v58 = vpop.f32.mrb[2].mxu0  ;;  %6546 = vmatprep.subr.bf16.mxu1 %v7558_v54  ;;  %v7574_v54 = vld [vmem:[%s9971_s1 + $0x1370] ss:$20 sps:$4 sm:$0xff]   ;;  %v7617_v55 = vld [vmem:[%s9973_s3 + $0x1e0] ss:$8 sps:$4 sm:$0xff]  }
 0x28d   :  { %v4496_v1 = vpop.f32.mrb[3].mxu0  ;;  %v5146_v31 = vpack.c.bf16 %v6579_v59, %v6579_v59  ;;  %v7622_v57 = vld [vmem:[%s9973_s3 + $0x1f4] ss:$8 sps:$4 sm:$0xff]   ;;  %v7620_v59 = vld [vmem:[%s9973_s3 + $0x1f0] ss:$8 sps:$4 sm:$0xff]  }
 0x28e   :  { %v5147_v2 = vpack.c.bf16 %v6581_v62, %v6581_v62 }
 0x28f   :  { %6547 = vmatpush3.bf16.msra.mxu1 %v7559_v63 }
 0x290   :  { %5607 = vmatprep.mubr.bf16.mxu0 %v5147_v2  ;;  %6548 = vmatprep.subr.bf16.mxu1 %v7560_v24 }
 0x291   :  { %5608 = vmatmul.mubr.bf16.vlgmr.msra.gmra.mrb[20].mxu0 %v5146_v31 }
 0x292   :  { %5617 = vmatpush1.bf16.msra.mxu0 %v7575_v25 }
 0x293   :  { %5618 = vmatprep.subr.bf16.mxu0 %v7580_v3  ;;  %6549 = vmatpush3.bf16.msra.mxu1 %v7561_v4  ;;  %v7625_v4 = vld [vmem:[%s9973_s3 + $0x204] ss:$8 sps:$4 sm:$0xff]  }
 0x294   :  { %5106 = vmatprep.subr.bf16.mxu1 %v7654_v18 }
 0x296   :  { %5619 = vmatpush1.bf16.msra.mxu0 %v7578_v5  ;;  %5059 = vmatmul.mubr.bf16.vlgmr.msra.gmra.mrb[16].mxu1 %v8755_v21  ;;  %v7584_v21 = vld [vmem:[%s9973_s3 + $0x130] ss:$8 sps:$4 sm:$0xff]   ;;  %v786_v5 = vsub.s32 2, %v7804_v42 }
 0x297   :  { %5620 = vmatprep.subr.bf16.mxu0 %v7583_v60  ;;  %5107 = vmatpush1.bf16.msra.mxu1 %v7562_v6 }
 0x298   :  { %6354 = vmatprep.mubr.msk.bf16.mxu1 %vm4166_vm0, %v8968_v49  ;;  %5108 = vmatprep.subr.bf16.mxu1 %v7654_v18  ;;  %v7587_v49 = vld [vmem:[%s9973_s3 + $0x140] ss:$8 sps:$4 sm:$0xff]   ;;  %v787_v60 = vrot.slane %v9747_v12, %v786_v5 }
 0x29a   :  { %5621 = vmatpush1.bf16.msra.mxu0 %v7581_v7 }
 0x29b   :  { %5622 = vmatprep.subr.bf16.mxu0 %v7586_v8  ;;  %5109 = vmatpush1.bf16.msra.mxu1 %v7563_v9 }
 0x29c   :  { %5110 = vmatprep.subr.bf16.mxu1 %v7654_v18 }
 0x29e   :  { %5623 = vmatpush1.bf16.msra.mxu0 %v7584_v21 }
 0x29f   :  { %5624 = vmatprep.subr.bf16.mxu0 %v7589_v10  ;;  %5111 = vmatpush1.bf16.msra.mxu1 %v7564_v11 }
 0x2a0   :  { %5112 = vmatprep.subr.bf16.mxu1 %v7654_v18 }
 0x2a2   :  { %5625 = vmatpush1.bf16.msra.mxu0 %v7587_v49 }
 0x2a3   :  { %5626 = vmatprep.subr.bf16.mxu0 %v7592_v13  ;;  %5113 = vmatpush1.bf16.msra.mxu1 %v7565_v29 }
 0x2a4   :  { %5114 = vmatprep.subr.bf16.mxu1 %v7654_v18 }
 0x2a6   :  { %5627 = vmatpush1.bf16.msra.mxu0 %v7590_v15 }
 0x2a7   :  { %5628 = vmatprep.subr.bf16.mxu0 %v7595_v16  ;;  %5115 = vmatpush1.bf16.msra.mxu1 %v7566_v17 }
 0x2a8   :  { %5116 = vmatprep.subr.bf16.mxu1 %v7654_v18 }
 0x2aa   :  { %5629 = vmatpush1.bf16.msra.mxu0 %v7593_v19  ;;  %v6440_v26 = vpop.f32.mrb[4].mxu0  ;;  %v7623_v19 = vld [vmem:[%s9973_s3 + $0x200] ss:$8 sps:$4 sm:$0xff]  }
 0x2ab   :  { %5630 = vmatprep.subr.bf16.mxu0 %v7598_v28  ;;  %v6441_v27 = vpop.f32.mrb[5].mxu0  ;;  %5117 = vmatpush1.bf16.msra.mxu1 %v7567_v20  ;;  %v7628_v20 = vld [vmem:[%s9973_s3 + $0x214] ss:$8 sps:$4 sm:$0xff]  }
 0x2ac   :  { %v9857_v32 = vadd.f32 %v6441_v27, %v6440_v26  ;;  %v6443_v33 = vpop.f32.mrb[6].mxu0  ;;  %5118 = vmatprep.subr.bf16.mxu1 %v7654_v18  ;;  %v794_v26 = vsub.s32 4, %v7804_v42 }
 0x2ad   :  { %v6444_v35 = vpop.f32.mrb[7].mxu0 }
 0x2ae   :  { %5631 = vmatpush1.bf16.msra.mxu0 %v7596_v23  ;;  %v7626_v23 = vld [vmem:[%s9973_s3 + $0x210] ss:$8 sps:$4 sm:$0xff]  }
 0x2af   :  { %5632 = vmatprep.subr.bf16.mxu0 %v7601_v46  ;;  %5119 = vmatpush1.bf16.msra.mxu1 %v7568_v30  ;;  %v795_v46 = vrot.slane %v9747_v12, %v794_v26 }
 0x2b0   :  { %5120 = vmatprep.subr.bf16.mxu1 %v7654_v18 }
 0x2b1   :  { %v4861_v27 = vadd.f32 %v9857_v32, %v795_v46 }
 0x2b2   :  { %5633 = vmatpush1.bf16.msra.mxu0 %v7599_v36 }
 0x2b3   :  { %5634 = vmatprep.subr.bf16.mxu0 %v7604_v37  ;;  %5121 = vmatpush1.bf16.msra.mxu1 %v7569_v50 }
 0x2b4   :  { %5122 = vmatprep.subr.bf16.mxu1 %v7654_v18 }
 0x2b6   :  { %5635 = vmatpush1.bf16.msra.mxu0 %v7602_v38 }
 0x2b7   :  { %5636 = vmatprep.subr.bf16.mxu0 %v7607_v39  ;;  %5123 = vmatpush1.bf16.msra.mxu1 %v7570_v40 }
 0x2b8   :  { %5124 = vmatprep.subr.bf16.mxu1 %v7654_v18 }
 0x2ba   :  { %5637 = vmatpush1.bf16.msra.mxu0 %v7605_v0 }
 0x2bb   :  { %5638 = vmatprep.subr.bf16.mxu0 %v7610_v43  ;;  %5125 = vmatpush1.bf16.msra.mxu1 %v7571_v41 }
 0x2bc   :  { %5126 = vmatprep.subr.bf16.mxu1 %v7654_v18 }
 0x2be   :  { %5639 = vmatpush1.bf16.msra.mxu0 %v7608_v34 }
 0x2bf   :  { %5640 = vmatprep.subr.bf16.mxu0 %v7613_v45  ;;  %5127 = vmatpush1.bf16.msra.mxu1 %v7572_v48 }
 0x2c0   :  { %5128 = vmatprep.subr.bf16.mxu1 %v7654_v18 }
 0x2c2   :  { %5641 = vmatpush1.bf16.msra.mxu0 %v7611_v51 }
 0x2c3   :  { %5642 = vmatprep.subr.bf16.mxu0 %v7616_v22  ;;  %5129 = vmatpush1.bf16.msra.mxu1 %v7573_v52 }
 0x2c4   :  { %5130 = vmatprep.subr.bf16.mxu1 %v7654_v18 }
 0x2c6   :  { %5643 = vmatpush1.bf16.msra.mxu0 %v7614_v53 }
 0x2c7   :  { %5644 = vmatprep.subr.bf16.mxu0 %v7619_v14  ;;  %5131 = vmatpush1.bf16.msra.mxu1 %v7574_v54 }
 0x2ca   :  { %5645 = vmatpush1.bf16.msra.mxu0 %v7617_v55  ;;  %v6484_v61 = vpop.f32.mrb[8].mxu0  ;;  %5139 = vmatmul.mubr.bf16.vlgmr.msra.gmra.mrb[20].mxu1 %v9124_v56  ;;  %v790_v56 = vsub.s32 3, %v7804_v42 }
 0x2cb   :  { %5646 = vmatprep.subr.bf16.mxu0 %v7622_v57  ;;  %v6485_v62 = vpop.f32.mrb[9].mxu0 }
 0x2cc   :  { %v6486_v58 = vadd.f32 %v6485_v62, %v6484_v61  ;;  %v6487_v63 = vpop.f32.mrb[10].mxu0  ;;  %v791_v6 = vrot.slane %v9747_v12, %v790_v56  ;;  %v5219_v61 = vld [vmem:[%s9974_s4] sm:$0x3]  ;;  %v7655_v62 = vmov 1983009808   ;;  %s7656_s4 = smov [#allocation2]  }
 0x2cd   :  { %v6488_v1 = vpop.f32.mrb[11].mxu0  ;;  %v5224_v63 = vrot.slane %v5219_v61, %v778_v44  ;;  %s5719_s17 = sshll.u32 %s7656_s4, 4  ;;  %s5720_s17 = int_to_ptr.vmem [resolvable:$true] %s5719_s17 }
 0x2ce   :  { %5647 = vmatpush1.bf16.msra.mxu0 %v7620_v59  ;;  %v5228_v1 = vrot.slane %v5219_v61, %v782_v47  ;;  %s7629_s18 = scalar_lea.vmem %s5720_s17, 64  ;;  %p7634_p1 = scmp.lt.s32.totalorder %s5720_s17, %s5720_s17 }
 0x2cf   :  { %5657 = vmatprep.subr.bf16.mxu0 %v7625_v4  ;;  %p7630_p0 = scmp.ne.s32.totalorder %s5720_s17, %s7629_s18  ;;  %p7635_p2 = scmp.lt.s32.totalorder %s7629_s18, %s7629_s18 }
 0x2d1   :  { %p7636_p3 = por %p7635_p2, %p7634_p1 }
 0x2d3   :  { %p7637_p4 = pnand %p7636_p3, %p7630_p0 }
 0x2ea   :  { %v6528_v24 = vpop.f32.mrb[12].mxu0 }
 0x2eb   :  { %v6529_v2 = vpop.f32.mrb[13].mxu0 }
 0x2ec   :  { %v6530_v25 = vadd.f32 %v6529_v2, %v6528_v24  ;;  %v6531_v31 = vpop.f32.mrb[14].mxu0 }
 0x2ed   :  { %v6532_v3 = vpop.f32.mrb[15].mxu0 }
 0x309   :  { %v4819_v7 = vpop.f32.mrb[4].mxu1 }
 0x30a   :  { %v6572_v8 = vpop.f32.mrb[16].mxu0  ;;  %v6582_v9 = vadd.f32 %v4819_v7, %v787_v60  ;;  %v4821_v21 = vpop.f32.mrb[5].mxu1 }
 0x30b   :  { %v6573_v10 = vpop.f32.mrb[17].mxu0  ;;  %v6583_v11 = vadd.f32 %v4821_v21, %v791_v6  ;;  %v4823_v49 = vpop.f32.mrb[6].mxu1 }
 0x30c   :  { %v6574_v13 = vadd.f32 %v6573_v10, %v6572_v8  ;;  %v6575_v29 = vpop.f32.mrb[18].mxu0  ;;  %v4824_v15 = vpop.f32.mrb[7].mxu1  ;;  %v5148_v28 = vpack.c.bf16 %v6582_v9, %v6582_v9 }
 0x30d   :  { %v6576_v16 = vpop.f32.mrb[19].mxu0  ;;  %v5149_v17 = vpack.c.bf16 %v6583_v11, %v6583_v11 }
 0x30f   :  { %5648 = vmatprep.mubr.bf16.mxu0 %v5149_v17 }
 0x310   :  { %5649 = vmatmul.mubr.bf16.vlgmr.msra.gmra.mrb[20].mxu0 %v5148_v28 }
 0x311   :  { %5658 = vmatpush1.bf16.msra.mxu0 %v7623_v19  ;;  %5689 = vmatprep.mubr.bf16.mxu0 %v7654_v18 }
 0x312   :  { %5659 = vmatprep.subr.bf16.mxu0 %v7628_v20 }
 0x315   :  { %5660 = vmatpush1.bf16.msra.mxu0 %v7626_v23 }
 0x329   :  { %v6462_v30 = vpop.f32.mrb[8].mxu1 }
 0x32a   :  { %v6463_v33 = vpop.f32.mrb[9].mxu1 }
 0x32b   :  { %v6464_v35 = vadd.f32 %v6463_v33, %v6462_v30  ;;  %v6465_v36 = vpop.f32.mrb[10].mxu1 }
 0x32c   :  { %v6466_v37 = vpop.f32.mrb[11].mxu1 }
 0x32d   :  { %v4901_v50 = vadd.f32 %v6464_v35, %v4861_v27 }
 0x32f   :  { %v4941_v38 = vadd.f32 %v6486_v58, %v4901_v50  ;;  %v5702_v58 = vunpack.c.l.s4 %v7655_v62 }
 0x331   :  { %v5703_v24 = vunpack.c.0.s8 %v5702_v58 }
 0x333   :  { %v5706_v5 = vsub.s32 %v5703_v24, %v7804_v42 }
 0x349   :  { %v6506_v39 = vpop.f32.mrb[12].mxu1 }
 0x34a   :  { %v6507_v40 = vpop.f32.mrb[13].mxu1 }
 0x34b   :  { %v6508_v0 = vadd.f32 %v6507_v40, %v6506_v39  ;;  %v6509_v43 = vpop.f32.mrb[14].mxu1 }
 0x34c   :  { %v6510_v18 = vpop.f32.mrb[15].mxu1 }
 0x34d   :  { %v4981_v41 = vadd.f32 %v6508_v0, %v4941_v38 }
 0x34f   :  { %v5021_v34 = vadd.f32 %v6530_v25, %v4981_v41 }
 0x369   :  { %v6550_v45 = vpop.f32.mrb[16].mxu1 }
 0x36a   :  { %v6551_v48 = vpop.f32.mrb[17].mxu1 }
 0x36b   :  { %v6552_v51 = vadd.f32 %v6551_v48, %v6550_v45  ;;  %v6553_v12 = vpop.f32.mrb[18].mxu1 }
 0x36c   :  { %v6554_v22 = vpop.f32.mrb[19].mxu1 }
 0x36d   :  { %v5061_v32 = vadd.f32 %v6552_v51, %v5021_v34 }
 0x36f   :  { %v5101_v52 = vadd.f32 %v6574_v13, %v5061_v32 }
 0x39d   :  { %v5140_v53 = vpop.f32.mrb[20].mxu1 }
 0x39e   :  { %v5141_v14 = vadd.f32 %v5140_v53, %v5101_v52  ;;  %v5142_v54 = vpop.f32.mrb[21].mxu1 }
 0x39f   :  { %v5143_v55 = vpop.f32.mrb[22].mxu1 }
 0x3a0   :  { %v5150_v57 = vpack.c.bf16 %v5141_v14, %v5141_v14  ;;  %v5144_v59 = vpop.f32.mrb[23].mxu1 }
 0x3a2   :  { %6423 = vmatmul.mubr.msk.bf16.vlgmr.msra.gmra.mrb[20].mxu0 %vm5571_vm1, %v5150_v57 }
 0x475   :  { %v5691_v2 = vpop.f32.mrb[20].mxu0 }
 0x476   :  { %v6584_v25 = vadd.f32 %v5691_v2, %v5224_v63  ;;  %v5693_v31 = vpop.f32.mrb[21].mxu0 }
 0x477   :  { %v6585_v3 = vadd.f32 %v5693_v31, %v5228_v1  ;;  %v5695_v4 = vpop.f32.mrb[22].mxu0 }
 0x478   :  { %v5696_v56 = vpop.f32.mrb[23].mxu0 }
 0x479   :  { %v5700_v60 = vcombine.low %v6584_v25, %v6585_v3 }
 0x47b   :  { %v5707_v6 = vrot.slane %v5700_v60, %v5706_v5 }
 0x47d   :  { %5712 = vst.msk [vmem:[#allocation2] sm:$0xf] %vm5711_vm4, %v5707_v6 }
 0x47e   :  { %7640 = shalt.err (!%p7637_p4)
}
 0x47f   :  { %s7641_s20 = scalar_lea.hbm %s9975_s5, 64 }
 0x480   :  { %p7642_p5 = scmp.ne.s32.totalorder %s9975_s5, %s7641_s20  ;;  %p7645_p6 = scmp.lt.u32.totalorder %s7641_s20, %s9975_s5 }
 0x482   :  { %p7647_p7 = pnand %p7645_p6, %p7642_p5 }
 0x484   :  { %7650 = shalt.err (!%p7647_p7)
}
 0x485   :  { %5722 = dma.vmem_to_hbm [thread:$0]  %s5720_s17, 64, %s9975_s5, [#allocation3]  }
 0x486   :  { %7651 = dma.done.wait [#allocation3], 64  }
 0x487   :  { %7652 = vsyncadd [#allocation3], 4294967232 }
 0x488   :  { %5726 = vsyncpa [#allocation3], 1 }

</bundles_post_ra>
